<compile_context>
chip_gen: v6e
topology: v6e:2x2x1
jax: 0.10.0
libtpu: 0.0.40
codegen_flags: <defaults>
</compile_context>

<pallas_src>
import functools
import math

import jax
import jax.numpy as jnp
from jax.experimental import pallas as pl
from jax.experimental.pallas import tpu as pltpu


SCALE = 1.0e6     # channel_matrix * 1e6 inside the module (folded into conv w)
NEG = 1.0e7       # mask penalty used by the module
GP = 128          # lane pitch separating the hh block from the fused extra block


def _round_up(x, m):
    return ((x + m - 1) // m) * m


# ----------------------------------------------------------------------------
# Config mirroring the args the Actor expects.
# ----------------------------------------------------------------------------
class Args:
    cuda = False
    total_obs_matrix_number = 4      # input channels of channel_matrix
    obs_dim1 = 16                    # conv output channels == pointer sequence len
    obs_dim2 = 16                    # feature dim (input width)
    actor_kernel_size = 3
    actor_stride = 1
    actor_maxpool_kernel_size = 2
    rnn_hidden = 32
    rnn_input_dim = 32
    weight_dim = 16
    max_stream = 4
    drop_out = 0.0                   # inference: dropout == identity
    Training = False


# ----------------------------------------------------------------------------
# Parameter construction (deterministic init mirroring the nn.Module shapes).
# ----------------------------------------------------------------------------
def _uniform(key, shape, bound):
    return jax.random.uniform(key, shape, jnp.float32, -bound, bound)


def init_actor_params(args, input_shape, key):
    n, cin, h, w = input_shape
    k = args.actor_kernel_size
    pk = args.actor_maxpool_kernel_size
    keys = iter(jax.random.split(key, 32))
    p = {}

    # nn.Embedding(3, rnn_input_dim)
    p["emb"] = jax.random.normal(next(keys), (3, args.rnn_input_dim), jnp.float32)

    # nn.Conv2d(cin, obs_dim1, k, stride)
    fan = cin * k * k
    p["conv_w"] = _uniform(next(keys), (args.obs_dim1, cin, k, k), 1.0 / math.sqrt(fan))
    p["conv_b"] = _uniform(next(keys), (args.obs_dim1,), 1.0 / math.sqrt(fan))

    # flatten dim after conv (valid, stride 1) + maxpool (k=pk, stride 1)
    hp = (h - k + 1) - pk + 1
    wp = (w - k + 1) - pk + 1
    flat_dim = hp * wp

    # nn.Linear(flat_dim, rnn_input_dim)
    p["aff_w"] = _uniform(next(keys), (args.rnn_input_dim, flat_dim), 1.0 / math.sqrt(flat_dim))
    p["aff_b"] = _uniform(next(keys), (args.rnn_input_dim,), 1.0 / math.sqrt(flat_dim))

    # Encoder / Decoder GRUs (PyTorch layout: weight_ih (3H, in), weight_hh (3H, H))
    hb = 1.0 / math.sqrt(args.rnn_hidden)
    for name in ("enc", "dec"):
        p[f"{name}_w_ih"] = _uniform(next(keys), (3 * args.rnn_hidden, args.rnn_input_dim), hb)
        p[f"{name}_w_hh"] = _uniform(next(keys), (3 * args.rnn_hidden, args.rnn_hidden), hb)
        p[f"{name}_b_ih"] = _uniform(next(keys), (3 * args.rnn_hidden,), hb)
        p[f"{name}_b_hh"] = _uniform(next(keys), (3 * args.rnn_hidden,), hb)

    # Raw Parameters
    p["enc_init"] = jax.random.normal(next(keys), (1, 1, args.rnn_hidden), jnp.float32)
    p["W_k"] = jax.random.normal(next(keys), (1, args.weight_dim, args.rnn_hidden), jnp.float32)
    p["W_q"] = jax.random.normal(next(keys), (1, args.weight_dim, args.rnn_hidden), jnp.float32)
    p["W_v"] = jax.random.normal(next(keys), (1, args.weight_dim, 1), jnp.float32)
    return p


def prepare_kernel_params(params, args, input_shape):
    """One-time layout prep: transposes, padding, weight fusion, 1e6 conv fold."""
    n, cin, h, w = input_shape
    k = args.actor_kernel_size
    pk = args.actor_maxpool_kernel_size
    hp = (h - k + 1) - pk + 1
    wp = (w - k + 1) - pk + 1
    P = hp * wp
    P_pad = _round_up(P, 128)
    seq = args.obs_dim1
    T = seq + 1
    H = args.rnn_hidden
    Wd = args.weight_dim
    cout = args.obs_dim1

    kp = {}
    kp["wc"] = params["conv_w"].reshape(cout, -1).astype(jnp.float32) * SCALE   # (16, 36)
    kp["bc"] = params["conv_b"].reshape(cout, 1).astype(jnp.float32)            # (16, 1)
    waff_t = params["aff_w"].T.astype(jnp.float32)                              # (P, R)
    kp["w_aff_pad"] = jnp.pad(waff_t, ((0, P_pad - P), (0, 0)))                 # (P_pad, R)
    kp["b_aff"] = params["aff_b"].reshape(1, -1).astype(jnp.float32)            # (1, R)
    kp["emb"] = params["emb"].astype(jnp.float32)                               # (3, R)
    kp["enc_init"] = params["enc_init"].reshape(1, -1).astype(jnp.float32)      # (1, H)

    for name in ("enc", "dec"):
        kp[f"{name}_w_ih_t"] = params[f"{name}_w_ih"].T.astype(jnp.float32)     # (R, 3H)
        kp[f"{name}_b_ih"] = params[f"{name}_b_ih"].reshape(1, -1).astype(jnp.float32)
        kp[f"{name}_b_hh"] = params[f"{name}_b_hh"].reshape(1, -1).astype(jnp.float32)

    wkt = params["W_k"].reshape(Wd, H).T.astype(jnp.float32)                    # (H, Wd)
    wqt = params["W_q"].reshape(Wd, H).T.astype(jnp.float32)                    # (H, Wd)
    wv_col = params["W_v"].reshape(Wd, 1).astype(jnp.float32)                   # (Wd, 1)

    enc_whh_t = params["enc_w_hh"].T.astype(jnp.float32)                        # (H, 3H)
    dec_whh_t = params["dec_w_hh"].T.astype(jnp.float32)                        # (H, 3H)

    # Fused recurrent weights; hh block padded to GP lanes so both output slices
    # of the fused matmul start on lane-tile boundaries inside the kernel.
    assert 3 * H <= GP
    pad_hh = jnp.zeros((H, GP - 3 * H), jnp.float32)
    kp["enc_w_fused"] = jnp.concatenate([enc_whh_t, pad_hh, wkt], axis=1)       # (H, GP+Wd)
    kp["dec_w_fused"] = jnp.concatenate(
        [dec_whh_t, pad_hh, jnp.tile(wqt, (1, T))], axis=1)                     # (H, GP+T*Wd)
    # Score-reduction matrix: sel_v[t*Wd + w, t] = W_v[w]
    kp["sel_v"] = jnp.kron(jnp.eye(T, dtype=jnp.float32), wv_col)               # (T*Wd, T)
    return kp


# ----------------------------------------------------------------------------
# Input layout prep (outside the kernel, pure slicing on the raw input):
# im2col expanded over the 4 maxpool offsets, with each (offset, batch) column
# block zero-padded to a multiple of 128 lanes so every in-kernel slice is
# lane-tile aligned.
# ----------------------------------------------------------------------------
def build_pool_expanded_im2col(x, k, pool_k, p_pad):
    """x (N,C,H,W) -> (C*k*k, pool_k^2 * N * p_pad), columns (offset, batch, pos)."""
    n, c, h, w = x.shape
    ho, wo = h - k + 1, w - k + 1
    hp, wp = ho - pool_k + 1, wo - pool_k + 1
    p = hp * wp
    feats = []
    for ci in range(c):
        for di in range(k):
            for dj in range(k):
                feats.append(x[:, ci, di:di + ho, dj:dj + wo])   # (N, Ho, Wo)
    col_full = jnp.stack(feats, axis=0)                          # (Kf, N, Ho, Wo)
    blocks = []
    for a in range(pool_k):
        for d in range(pool_k):
            blk = col_full[:, :, a:a + hp, d:d + wp].reshape(c * k * k, n, p)
            blk = jnp.pad(blk, ((0, 0), (0, 0), (0, p_pad - p)))
            blocks.append(blk.reshape(c * k * k, n * p_pad))
    return jnp.concatenate(blocks, axis=1)                       # (Kf, n_off*N*p_pad)


# ----------------------------------------------------------------------------
# The fused Actor kernel (single invocation, everything in VMEM / vregs).
# ----------------------------------------------------------------------------
def _sigmoid(x):
    # single EUP tanh instead of a divide on the recurrent chain
    return 0.5 * jnp.tanh(0.5 * x) + 0.5


def _actor_kernel(colT_ref, wc_ref, bc_ref, waff_ref, baff_ref, emb_ref, enc_init_ref,
                  we_iht_ref, we_fus_ref, be_ih_ref, be_hh_ref,
                  wd_iht_ref, wd_fus_ref, bd_ih_ref, bd_hh_ref,
                  selv_ref, gumbel_ref,
                  sched_ref, logp_ref, selmask_ref, mask_ref,
                  *, batch, hidden, n_steps, total_len, p_pad, n_off, seq, wdim):
    f32 = jnp.float32
    B, H, T = batch, hidden, total_len
    H3 = 3 * H

    # ---- Conv2d (1e6 scale folded into wc) fused with MaxPool2d ------------
    conv = jnp.dot(wc_ref[...], colT_ref[...],
                   preferred_element_type=f32) + bc_ref[...]       # (seq, n_off*B*p_pad)
    ncols = B * p_pad
    pooled = conv[:, 0:ncols]
    for o in range(1, n_off):
        pooled = jnp.maximum(pooled, conv[:, o * ncols:(o + 1) * ncols])
    # pooled[c, b*p_pad + s] == MaxPool2d(Conv2d(1e6 * x))[b, c, s]

    bos = emb_ref[0:1, :]            # encoder begin-of-sequence embedding (token 0)
    eos = emb_ref[1:2, :]            # decoder first input embedding (token 1)

    # ---- Per-sample encoder features + all input projections (off-chain) ---
    gi_enc = []       # (seq, 3H) per sample: encoder input projections
    dec_tables = []   # (T, 3H) per sample: decoder input projections of [bos, enc_feat]
    for b in range(B):
        pb = pooled[:, b * p_pad:(b + 1) * p_pad]                  # (seq, p_pad), aligned
        ef = jnp.maximum(
            jnp.dot(pb, waff_ref[...], preferred_element_type=f32) + baff_ref[...], 0.0)
        gi_enc.append(jnp.dot(ef, we_iht_ref[...], preferred_element_type=f32)
                      + be_ih_ref[...])
        inp_enc = jnp.concatenate([bos, ef], axis=0)               # (T, R)
        dec_tables.append(jnp.dot(inp_enc, wd_iht_ref[...], preferred_element_type=f32)
                          + bd_ih_ref[...])
    gi_bos = jnp.dot(bos, we_iht_ref[...], preferred_element_type=f32) + be_ih_ref[...]

    # Time-major batched encoder input projections: gi_steps[t] is (B, 3H).
    gi_steps = [jnp.broadcast_to(gi_bos, (B, H3))]
    for t in range(seq):
        gi_steps.append(jnp.concatenate([gi_enc[b][t:t + 1, :] for b in range(B)], axis=0))

    def gru_elem(gi, gh, h):
        r = _sigmoid(gi[:, 0:H] + gh[:, 0:H])
        z = _sigmoid(gi[:, H:2 * H] + gh[:, H:2 * H])
        n = jnp.tanh(gi[:, 2 * H:3 * H] + r * gh[:, 2 * H:3 * H])
        return (1.0 - z) * n + z * h

    # ---- Batched GRU encoder (serial over T, batched over B) ---------------
    # Fused weight: one h-dependent matmul per step gives next-step gh AND the
    # attention key of the fresh hidden state.
    h = jnp.broadcast_to(enc_init_ref[...], (B, H))
    fus = jnp.dot(h, we_fus_ref[...], preferred_element_type=f32)   # (B, GP+Wd)
    key_pieces = []
    for t in range(T):
        gh = fus[:, 0:H3] + be_hh_ref[...]
        h = gru_elem(gi_steps[t], gh, h)
        fus = jnp.dot(h, we_fus_ref[...], preferred_element_type=f32)
        key_pieces.append(fus[:, GP:GP + wdim])                     # W_k @ h_t, (B, Wd)
    key_flat = jnp.concatenate(key_pieces, axis=1)                  # (B, T*Wd)

    # ---- Batched pointer decoder --------------------------------------------
    lane_t = jax.lax.broadcasted_iota(jnp.int32, (1, T), 1).astype(f32)

    h_dec = h                                    # decoder hidden init = encoder final hidden
    fus_d = jnp.dot(h_dec, wd_fus_ref[...], preferred_element_type=f32)   # (B, GP+T*Wd)
    gi = jnp.broadcast_to(
        jnp.dot(eos, wd_iht_ref[...], preferred_element_type=f32) + bd_ih_ref[...],
        (B, H3))
    mask = jnp.zeros((B, T), f32)
    prev_is_zero = jnp.zeros((B, 1), f32)
    sched_cols, logp_cols, selm_cols = [], [], []

    for i in range(n_steps):
        # Decoder GRU step (dropout == identity at inference).
        gh = fus_d[:, 0:H3] + bd_hh_ref[...]
        h_dec = gru_elem(gi, gh, h_dec)
        # One fused matmul: gh for the next step + query tiled over T.
        fus_d = jnp.dot(h_dec, wd_fus_ref[...], preferred_element_type=f32)
        q_tiled = fus_d[:, GP:GP + T * wdim]                        # (B, T*Wd), aligned

        # Additive attention, lane-dense in T: score[b,t] = relu(sum_w wv[w]*tanh(k+q)).
        sim = jnp.tanh(key_flat + q_tiled)                          # (B, T*Wd)
        scores = jnp.maximum(
            jnp.dot(sim, selv_ref[...], preferred_element_type=f32), 0.0)   # (B, T)
        logits = scores - NEG * mask

        # Gumbel-max trick == Categorical(softmax(logits)).sample(), per row.
        g = gumbel_ref[i * B:(i + 1) * B, :]                        # (B, T)
        zval = logits + g
        zmax = jnp.max(zval, axis=1, keepdims=True)
        cand = jnp.where(zval >= zmax, lane_t, 2.0 * T)
        chosen = jnp.min(cand, axis=1, keepdims=True)               # (B, 1)

        # Forced termination: after a 0 every later action is 0; last step forced to 0.
        if i == n_steps - 1:
            chosen = jnp.zeros((B, 1), f32)
        else:
            chosen = jnp.where(prev_is_zero > 0.5, jnp.zeros((B, 1), f32), chosen)
        onehot = (lane_t == chosen).astype(f32)                     # (B, T)

        # log-prob of the (possibly forced) action under the pre-update distribution.
        m = jnp.max(logits, axis=1, keepdims=True)
        lse = m + jnp.log(jnp.sum(jnp.exp(logits - m), axis=1, keepdims=True))
        logp = jnp.sum(logits * onehot, axis=1, keepdims=True) - lse

        sched_cols.append(chosen)
        logp_cols.append(logp)
        selm_cols.append(1.0 - prev_is_zero)

        # State updates for the next step.
        mask = jnp.maximum(mask, onehot)
        prev_is_zero = (chosen == 0.0).astype(f32)
        if i < n_steps - 1:
            # Next decoder input projection: one-hot row x precomputed (T, 3H) table.
            gi = jnp.concatenate(
                [jnp.dot(onehot[b:b + 1, :], dec_tables[b], preferred_element_type=f32)
                 for b in range(B)], axis=0)                        # (B, 3H)

    # Single store per output (no per-row partial stores).
    sched_ref[...] = jnp.concatenate(sched_cols, axis=1).astype(jnp.int32)
    logp_ref[...] = jnp.concatenate(logp_cols, axis=1)
    selmask_ref[...] = jnp.concatenate(selm_cols, axis=1)
    mask_ref[...] = mask


# ----------------------------------------------------------------------------
# Wrapper: single fused pallas_call.
# ----------------------------------------------------------------------------
def make_actor_forward(args, input_shape):
    n, cin, h, w = input_shape
    k = args.actor_kernel_size
    pk = args.actor_maxpool_kernel_size
    assert args.actor_stride == 1, "kernel assumes stride 1 for conv and maxpool"
    assert h == args.obs_dim1, "pointer length requires conv-out channels == input height"
    assert 3 * args.rnn_hidden <= GP

    hp = (h - k + 1) - pk + 1
    wp = (w - k + 1) - pk + 1
    P = hp * wp
    P_pad = _round_up(P, 128)
    seq = args.obs_dim1
    T = seq + 1
    n_off = pk * pk
    n_steps = args.max_stream + 1
    R = args.rnn_input_dim
    H = args.rnn_hidden
    Wd = args.weight_dim
    Kf = cin * k * k

    kernel = functools.partial(
        _actor_kernel, batch=n, hidden=H, n_steps=n_steps,
        total_len=T, p_pad=P_pad, n_off=n_off, seq=seq, wdim=Wd)

    def _spec(shape):
        zeros = (0,) * len(shape)
        return pl.BlockSpec(shape, lambda i, _z=zeros: _z)

    in_shapes = [
        (Kf, n_off * n * P_pad),                               # colT (lane-aligned blocks)
        (seq, Kf), (seq, 1),                                   # wc (1e6 folded), bc
        (P_pad, R), (1, R),                                    # w_aff (zero-padded rows), b_aff
        (3, R), (1, H),                                        # embedding table, enc_init
        (R, 3 * H), (H, GP + Wd), (1, 3 * H), (1, 3 * H),      # encoder GRU (+fused W_k)
        (R, 3 * H), (H, GP + T * Wd), (1, 3 * H), (1, 3 * H),  # decoder GRU (+fused tiled W_q)
        (T * Wd, T),                                           # sel_v (W_v folded)
        (n_steps * n, T),                                      # gumbel noise, rows i*B+b
    ]
    out_shapes = (
        jax.ShapeDtypeStruct((n, n_steps), jnp.int32),   # scheduling result
        jax.ShapeDtypeStruct((n, n_steps), jnp.float32), # log-probs
        jax.ShapeDtypeStruct((n, n_steps), jnp.float32), # selected_mask
        jax.ShapeDtypeStruct((n, T), jnp.float32),       # mask
    )

    call = pl.pallas_call(
        kernel,
        out_shape=out_shapes,
        grid=(1,),
        in_specs=[_spec(s) for s in in_shapes],
        out_specs=tuple(_spec(tuple(o.shape)) for o in out_shapes),
        compiler_params=pltpu.CompilerParams(dimension_semantics=("arbitrary",)),
    )

    def forward(kp, channel, gumbel):
        colT = build_pool_expanded_im2col(channel.astype(jnp.float32), k, pk, P_pad)
        return call(colT,
                    kp["wc"], kp["bc"], kp["w_aff_pad"], kp["b_aff"],
                    kp["emb"], kp["enc_init"],
                    kp["enc_w_ih_t"], kp["enc_w_fused"], kp["enc_b_ih"], kp["enc_b_hh"],
                    kp["dec_w_ih_t"], kp["dec_w_fused"], kp["dec_b_ih"], kp["dec_b_hh"],
                    kp["sel_v"], gumbel)

    return forward


# ----------------------------------------------------------------------------
if __name__ == "__main__":
    args = Args()
    input_shape = (2, args.total_obs_matrix_number, args.obs_dim1, args.obs_dim2)  # (B,C,H,W)

    key = jax.random.PRNGKey(0)
    k_param, k_input, k_gumbel = jax.random.split(key, 3)

    params = init_actor_params(args, input_shape, k_param)
    kp = prepare_kernel_params(params, args, input_shape)

    # Channel gains are tiny in the original setting (hence the 1e6 rescale
    # inside the module); generate the example input at that scale.
    channel = jax.random.uniform(k_input, input_shape, jnp.float32) * 1.0e-6

    B = input_shape[0]
    total_len = args.obs_dim1 + 1
    n_steps = args.max_stream + 1
    gumbel = jax.random.gumbel(
        k_gumbel, (n_steps, B, total_len), jnp.float32).reshape(n_steps * B, total_len)

    forward = jax.jit(make_actor_forward(args, input_shape))
    sched, logp, selected_mask, mask = forward(kp, channel, gumbel)
    jax.block_until_ready((sched, logp, selected_mask, mask))

    # Sanity checks on the pointer-network outputs.
    assert sched.shape == (B, n_steps), sched.shape
    assert logp.shape == (B, n_steps), logp.shape
    assert selected_mask.shape == (B, n_steps), selected_mask.shape
    assert mask.shape == (B, total_len), mask.shape
    assert bool(jnp.all(jnp.isfinite(logp)))
    assert bool(jnp.all(jnp.isfinite(mask)))
    assert bool(jnp.all((sched >= 0) & (sched < total_len)))
    assert bool(jnp.all(sched[:, -1] == 0))          # last step always forced to 0
    assert bool(jnp.all((mask == 0.0) | (mask == 1.0)))
    assert bool(jnp.all((selected_mask == 0.0) | (selected_mask == 1.0)))
    assert bool(jnp.all(selected_mask[:, 0] == 1.0))
    assert bool(jnp.all(logp <= 1e-3))
    print("KERNEL_OK")
</pallas_src>

<mosaic_0001>
module attributes {stable_mosaic.version = 11 : i64} {
  func.func @_actor_kernel(%arg0: i32, %arg1: memref<36x2048xf32, #tpu.memory_space<vmem>>, %arg2: memref<16x36xf32, #tpu.memory_space<vmem>>, %arg3: memref<16x1xf32, #tpu.memory_space<vmem>>, %arg4: memref<256x32xf32, #tpu.memory_space<vmem>>, %arg5: memref<1x32xf32, #tpu.memory_space<vmem>>, %arg6: memref<3x32xf32, #tpu.memory_space<vmem>>, %arg7: memref<1x32xf32, #tpu.memory_space<vmem>>, %arg8: memref<32x96xf32, #tpu.memory_space<vmem>>, %arg9: memref<32x144xf32, #tpu.memory_space<vmem>>, %arg10: memref<1x96xf32, #tpu.memory_space<vmem>>, %arg11: memref<1x96xf32, #tpu.memory_space<vmem>>, %arg12: memref<32x96xf32, #tpu.memory_space<vmem>>, %arg13: memref<32x400xf32, #tpu.memory_space<vmem>>, %arg14: memref<1x96xf32, #tpu.memory_space<vmem>>, %arg15: memref<1x96xf32, #tpu.memory_space<vmem>>, %arg16: memref<272x17xf32, #tpu.memory_space<vmem>>, %arg17: memref<10x17xf32, #tpu.memory_space<vmem>>, %arg18: memref<2x5xi32, #tpu.memory_space<vmem>>, %arg19: memref<2x5xf32, #tpu.memory_space<vmem>>, %arg20: memref<2x5xf32, #tpu.memory_space<vmem>>, %arg21: memref<2x17xf32, #tpu.memory_space<vmem>>) attributes {dimension_semantics = [#tpu.dimension_semantics<arbitrary>], iteration_bounds = array<i64: 1>, scalar_prefetch = 0 : i64, scratch_operands = 0 : i64, tpu.core_type = #tpu.core_type<tc>, window_params = [{pipeline_mode = #tpu.pipeline_mode<synchronous>, transform_indices = @transform_0, window_bounds = array<i64: 36, 2048>}, {pipeline_mode = #tpu.pipeline_mode<synchronous>, transform_indices = @transform_1, window_bounds = array<i64: 16, 36>}, {pipeline_mode = #tpu.pipeline_mode<synchronous>, transform_indices = @transform_2, window_bounds = array<i64: 16, 1>}, {pipeline_mode = #tpu.pipeline_mode<synchronous>, transform_indices = @transform_3, window_bounds = array<i64: 256, 32>}, {pipeline_mode = #tpu.pipeline_mode<synchronous>, transform_indices = @transform_4, window_bounds = array<i64: 1, 32>}, {pipeline_mode = #tpu.pipeline_mode<synchronous>, transform_indices = @transform_5, window_bounds = array<i64: 3, 32>}, {pipeline_mode = #tpu.pipeline_mode<synchronous>, transform_indices = @transform_6, window_bounds = array<i64: 1, 32>}, {pipeline_mode = #tpu.pipeline_mode<synchronous>, transform_indices = @transform_7, window_bounds = array<i64: 32, 96>}, {pipeline_mode = #tpu.pipeline_mode<synchronous>, transform_indices = @transform_8, window_bounds = array<i64: 32, 144>}, {pipeline_mode = #tpu.pipeline_mode<synchronous>, transform_indices = @transform_9, window_bounds = array<i64: 1, 96>}, {pipeline_mode = #tpu.pipeline_mode<synchronous>, transform_indices = @transform_10, window_bounds = array<i64: 1, 96>}, {pipeline_mode = #tpu.pipeline_mode<synchronous>, transform_indices = @transform_11, window_bounds = array<i64: 32, 96>}, {pipeline_mode = #tpu.pipeline_mode<synchronous>, transform_indices = @transform_12, window_bounds = array<i64: 32, 400>}, {pipeline_mode = #tpu.pipeline_mode<synchronous>, transform_indices = @transform_13, window_bounds = array<i64: 1, 96>}, {pipeline_mode = #tpu.pipeline_mode<synchronous>, transform_indices = @transform_14, window_bounds = array<i64: 1, 96>}, {pipeline_mode = #tpu.pipeline_mode<synchronous>, transform_indices = @transform_15, window_bounds = array<i64: 272, 17>}, {pipeline_mode = #tpu.pipeline_mode<synchronous>, transform_indices = @transform_16, window_bounds = array<i64: 10, 17>}, {pipeline_mode = #tpu.pipeline_mode<synchronous>, transform_indices = @transform_17, window_bounds = array<i64: 2, 5>}, {pipeline_mode = #tpu.pipeline_mode<synchronous>, transform_indices = @transform_18, window_bounds = array<i64: 2, 5>}, {pipeline_mode = #tpu.pipeline_mode<synchronous>, transform_indices = @transform_19, window_bounds = array<i64: 2, 5>}, {pipeline_mode = #tpu.pipeline_mode<synchronous>, transform_indices = @transform_20, window_bounds = array<i64: 2, 17>}]} {
    %c0 = arith.constant 0 : index
    %c0_0 = arith.constant 0 : index
    %0 = vector.load %arg2[%c0, %c0_0] : memref<16x36xf32, #tpu.memory_space<vmem>>, vector<16x36xf32>
    %c0_1 = arith.constant 0 : index
    %c0_2 = arith.constant 0 : index
    %1 = vector.load %arg1[%c0_1, %c0_2] : memref<36x2048xf32, #tpu.memory_space<vmem>>, vector<36x2048xf32>
    %cst = arith.constant dense<0.000000e+00> : vector<16x2048xf32>
    %2 = tpu.matmul %0, %1, %cst {dimension_numbers = #tpu.dot_dimension_numbers<[1], [0], [0], [1], [0, 0, 1, 1], [], []>} : vector<16x36xf32>, vector<36x2048xf32>, vector<16x2048xf32> -> vector<16x2048xf32>
    %c0_3 = arith.constant 0 : index
    %c0_4 = arith.constant 0 : index
    %3 = vector.load %arg3[%c0_3, %c0_4] : memref<16x1xf32, #tpu.memory_space<vmem>>, vector<16x1xf32>
    %4 = vector.broadcast %3 : vector<16x1xf32> to vector<16x2048xf32>
    %5 = arith.addf %2, %4 : vector<16x2048xf32>
    %6 = vector.extract_strided_slice %5 {offsets = [0, 0], sizes = [16, 512], strides = [1, 1]} : vector<16x2048xf32> to vector<16x512xf32>
    %7 = vector.extract_strided_slice %5 {offsets = [0, 512], sizes = [16, 512], strides = [1, 1]} : vector<16x2048xf32> to vector<16x512xf32>
    %8 = arith.maximumf %6, %7 : vector<16x512xf32>
    %9 = vector.extract_strided_slice %5 {offsets = [0, 1024], sizes = [16, 512], strides = [1, 1]} : vector<16x2048xf32> to vector<16x512xf32>
    %10 = arith.maximumf %8, %9 : vector<16x512xf32>
    %11 = vector.extract_strided_slice %5 {offsets = [0, 1536], sizes = [16, 512], strides = [1, 1]} : vector<16x2048xf32> to vector<16x512xf32>
    %12 = arith.maximumf %10, %11 : vector<16x512xf32>
    %c0_5 = arith.constant 0 : index
    %c0_6 = arith.constant 0 : index
    %13 = vector.load %arg6[%c0_5, %c0_6] : memref<3x32xf32, #tpu.memory_space<vmem>>, vector<1x32xf32>
    %c1 = arith.constant 1 : index
    %c0_7 = arith.constant 0 : index
    %14 = vector.load %arg6[%c1, %c0_7] : memref<3x32xf32, #tpu.memory_space<vmem>>, vector<1x32xf32>
    %15 = vector.extract_strided_slice %12 {offsets = [0, 0], sizes = [16, 256], strides = [1, 1]} : vector<16x512xf32> to vector<16x256xf32>
    %c0_8 = arith.constant 0 : index
    %c0_9 = arith.constant 0 : index
    %16 = vector.load %arg4[%c0_8, %c0_9] : memref<256x32xf32, #tpu.memory_space<vmem>>, vector<256x32xf32>
    %cst_10 = arith.constant dense<0.000000e+00> : vector<16x32xf32>
    %17 = tpu.matmul %15, %16, %cst_10 {dimension_numbers = #tpu.dot_dimension_numbers<[1], [0], [0], [1], [0, 0, 1, 1], [], []>} : vector<16x256xf32>, vector<256x32xf32>, vector<16x32xf32> -> vector<16x32xf32>
    %c0_11 = arith.constant 0 : index
    %c0_12 = arith.constant 0 : index
    %18 = vector.load %arg5[%c0_11, %c0_12] : memref<1x32xf32, #tpu.memory_space<vmem>>, vector<1x32xf32>
    %19 = vector.broadcast %18 : vector<1x32xf32> to vector<16x32xf32>
    %20 = arith.addf %17, %19 : vector<16x32xf32>
    %cst_13 = arith.constant 0.000000e+00 : f32
    %21 = vector.broadcast %cst_13 : f32 to vector<16x32xf32>
    %22 = arith.maximumf %20, %21 : vector<16x32xf32>
    %c0_14 = arith.constant 0 : index
    %c0_15 = arith.constant 0 : index
    %23 = vector.load %arg8[%c0_14, %c0_15] : memref<32x96xf32, #tpu.memory_space<vmem>>, vector<32x96xf32>
    %cst_16 = arith.constant dense<0.000000e+00> : vector<16x96xf32>
    %24 = tpu.matmul %22, %23, %cst_16 {dimension_numbers = #tpu.dot_dimension_numbers<[1], [0], [0], [1], [0, 0, 1, 1], [], []>} : vector<16x32xf32>, vector<32x96xf32>, vector<16x96xf32> -> vector<16x96xf32>
    %c0_17 = arith.constant 0 : index
    %c0_18 = arith.constant 0 : index
    %25 = vector.load %arg10[%c0_17, %c0_18] : memref<1x96xf32, #tpu.memory_space<vmem>>, vector<1x96xf32>
    %26 = vector.broadcast %25 : vector<1x96xf32> to vector<16x96xf32>
    %27 = arith.addf %24, %26 : vector<16x96xf32>
    %28 = tpu.concatenate %13, %22 in 0 : vector<1x32xf32>, vector<16x32xf32> -> vector<17x32xf32>
    %c0_19 = arith.constant 0 : index
    %c0_20 = arith.constant 0 : index
    %29 = vector.load %arg12[%c0_19, %c0_20] : memref<32x96xf32, #tpu.memory_space<vmem>>, vector<32x96xf32>
    %cst_21 = arith.constant dense<0.000000e+00> : vector<17x96xf32>
    %30 = tpu.matmul %28, %29, %cst_21 {dimension_numbers = #tpu.dot_dimension_numbers<[1], [0], [0], [1], [0, 0, 1, 1], [], []>} : vector<17x32xf32>, vector<32x96xf32>, vector<17x96xf32> -> vector<17x96xf32>
    %c0_22 = arith.constant 0 : index
    %c0_23 = arith.constant 0 : index
    %31 = vector.load %arg14[%c0_22, %c0_23] : memref<1x96xf32, #tpu.memory_space<vmem>>, vector<1x96xf32>
    %32 = vector.broadcast %31 : vector<1x96xf32> to vector<17x96xf32>
    %33 = arith.addf %30, %32 : vector<17x96xf32>
    %34 = vector.extract_strided_slice %12 {offsets = [0, 256], sizes = [16, 256], strides = [1, 1]} : vector<16x512xf32> to vector<16x256xf32>
    %c0_24 = arith.constant 0 : index
    %c0_25 = arith.constant 0 : index
    %35 = vector.load %arg4[%c0_24, %c0_25] : memref<256x32xf32, #tpu.memory_space<vmem>>, vector<256x32xf32>
    %cst_26 = arith.constant dense<0.000000e+00> : vector<16x32xf32>
    %36 = tpu.matmul %34, %35, %cst_26 {dimension_numbers = #tpu.dot_dimension_numbers<[1], [0], [0], [1], [0, 0, 1, 1], [], []>} : vector<16x256xf32>, vector<256x32xf32>, vector<16x32xf32> -> vector<16x32xf32>
    %c0_27 = arith.constant 0 : index
    %c0_28 = arith.constant 0 : index
    %37 = vector.load %arg5[%c0_27, %c0_28] : memref<1x32xf32, #tpu.memory_space<vmem>>, vector<1x32xf32>
    %38 = vector.broadcast %37 : vector<1x32xf32> to vector<16x32xf32>
    %39 = arith.addf %36, %38 : vector<16x32xf32>
    %cst_29 = arith.constant 0.000000e+00 : f32
    %40 = vector.broadcast %cst_29 : f32 to vector<16x32xf32>
    %41 = arith.maximumf %39, %40 : vector<16x32xf32>
    %c0_30 = arith.constant 0 : index
    %c0_31 = arith.constant 0 : index
    %42 = vector.load %arg8[%c0_30, %c0_31] : memref<32x96xf32, #tpu.memory_space<vmem>>, vector<32x96xf32>
    %cst_32 = arith.constant dense<0.000000e+00> : vector<16x96xf32>
    %43 = tpu.matmul %41, %42, %cst_32 {dimension_numbers = #tpu.dot_dimension_numbers<[1], [0], [0], [1], [0, 0, 1, 1], [], []>} : vector<16x32xf32>, vector<32x96xf32>, vector<16x96xf32> -> vector<16x96xf32>
    %c0_33 = arith.constant 0 : index
    %c0_34 = arith.constant 0 : index
    %44 = vector.load %arg10[%c0_33, %c0_34] : memref<1x96xf32, #tpu.memory_space<vmem>>, vector<1x96xf32>
    %45 = vector.broadcast %44 : vector<1x96xf32> to vector<16x96xf32>
    %46 = arith.addf %43, %45 : vector<16x96xf32>
    %47 = tpu.concatenate %13, %41 in 0 : vector<1x32xf32>, vector<16x32xf32> -> vector<17x32xf32>
    %c0_35 = arith.constant 0 : index
    %c0_36 = arith.constant 0 : index
    %48 = vector.load %arg12[%c0_35, %c0_36] : memref<32x96xf32, #tpu.memory_space<vmem>>, vector<32x96xf32>
    %cst_37 = arith.constant dense<0.000000e+00> : vector<17x96xf32>
    %49 = tpu.matmul %47, %48, %cst_37 {dimension_numbers = #tpu.dot_dimension_numbers<[1], [0], [0], [1], [0, 0, 1, 1], [], []>} : vector<17x32xf32>, vector<32x96xf32>, vector<17x96xf32> -> vector<17x96xf32>
    %c0_38 = arith.constant 0 : index
    %c0_39 = arith.constant 0 : index
    %50 = vector.load %arg14[%c0_38, %c0_39] : memref<1x96xf32, #tpu.memory_space<vmem>>, vector<1x96xf32>
    %51 = vector.broadcast %50 : vector<1x96xf32> to vector<17x96xf32>
    %52 = arith.addf %49, %51 : vector<17x96xf32>
    %c0_40 = arith.constant 0 : index
    %c0_41 = arith.constant 0 : index
    %53 = vector.load %arg8[%c0_40, %c0_41] : memref<32x96xf32, #tpu.memory_space<vmem>>, vector<32x96xf32>
    %cst_42 = arith.constant dense<0.000000e+00> : vector<1x96xf32>
    %54 = tpu.matmul %13, %53, %cst_42 {dimension_numbers = #tpu.dot_dimension_numbers<[1], [0], [0], [1], [0, 0, 1, 1], [], []>} : vector<1x32xf32>, vector<32x96xf32>, vector<1x96xf32> -> vector<1x96xf32>
    %c0_43 = arith.constant 0 : index
    %c0_44 = arith.constant 0 : index
    %55 = vector.load %arg10[%c0_43, %c0_44] : memref<1x96xf32, #tpu.memory_space<vmem>>, vector<1x96xf32>
    %56 = arith.addf %54, %55 : vector<1x96xf32>
    %57 = vector.shape_cast %56 : vector<1x96xf32> to vector<1x96xf32>
    %58 = vector.broadcast %57 : vector<1x96xf32> to vector<2x96xf32>
    %59 = vector.extract_strided_slice %27 {offsets = [0, 0], sizes = [1, 96], strides = [1, 1]} : vector<16x96xf32> to vector<1x96xf32>
    %60 = vector.extract_strided_slice %46 {offsets = [0, 0], sizes = [1, 96], strides = [1, 1]} : vector<16x96xf32> to vector<1x96xf32>
    %61 = tpu.concatenate %59, %60 in 0 : vector<1x96xf32>, vector<1x96xf32> -> vector<2x96xf32>
    %62 = vector.extract_strided_slice %27 {offsets = [1, 0], sizes = [1, 96], strides = [1, 1]} : vector<16x96xf32> to vector<1x96xf32>
    %63 = vector.extract_strided_slice %46 {offsets = [1, 0], sizes = [1, 96], strides = [1, 1]} : vector<16x96xf32> to vector<1x96xf32>
    %64 = tpu.concatenate %62, %63 in 0 : vector<1x96xf32>, vector<1x96xf32> -> vector<2x96xf32>
    %65 = vector.extract_strided_slice %27 {offsets = [2, 0], sizes = [1, 96], strides = [1, 1]} : vector<16x96xf32> to vector<1x96xf32>
    %66 = vector.extract_strided_slice %46 {offsets = [2, 0], sizes = [1, 96], strides = [1, 1]} : vector<16x96xf32> to vector<1x96xf32>
    %67 = tpu.concatenate %65, %66 in 0 : vector<1x96xf32>, vector<1x96xf32> -> vector<2x96xf32>
    %68 = vector.extract_strided_slice %27 {offsets = [3, 0], sizes = [1, 96], strides = [1, 1]} : vector<16x96xf32> to vector<1x96xf32>
    %69 = vector.extract_strided_slice %46 {offsets = [3, 0], sizes = [1, 96], strides = [1, 1]} : vector<16x96xf32> to vector<1x96xf32>
    %70 = tpu.concatenate %68, %69 in 0 : vector<1x96xf32>, vector<1x96xf32> -> vector<2x96xf32>
    %71 = vector.extract_strided_slice %27 {offsets = [4, 0], sizes = [1, 96], strides = [1, 1]} : vector<16x96xf32> to vector<1x96xf32>
    %72 = vector.extract_strided_slice %46 {offsets = [4, 0], sizes = [1, 96], strides = [1, 1]} : vector<16x96xf32> to vector<1x96xf32>
    %73 = tpu.concatenate %71, %72 in 0 : vector<1x96xf32>, vector<1x96xf32> -> vector<2x96xf32>
    %74 = vector.extract_strided_slice %27 {offsets = [5, 0], sizes = [1, 96], strides = [1, 1]} : vector<16x96xf32> to vector<1x96xf32>
    %75 = vector.extract_strided_slice %46 {offsets = [5, 0], sizes = [1, 96], strides = [1, 1]} : vector<16x96xf32> to vector<1x96xf32>
    %76 = tpu.concatenate %74, %75 in 0 : vector<1x96xf32>, vector<1x96xf32> -> vector<2x96xf32>
    %77 = vector.extract_strided_slice %27 {offsets = [6, 0], sizes = [1, 96], strides = [1, 1]} : vector<16x96xf32> to vector<1x96xf32>
    %78 = vector.extract_strided_slice %46 {offsets = [6, 0], sizes = [1, 96], strides = [1, 1]} : vector<16x96xf32> to vector<1x96xf32>
    %79 = tpu.concatenate %77, %78 in 0 : vector<1x96xf32>, vector<1x96xf32> -> vector<2x96xf32>
    %80 = vector.extract_strided_slice %27 {offsets = [7, 0], sizes = [1, 96], strides = [1, 1]} : vector<16x96xf32> to vector<1x96xf32>
    %81 = vector.extract_strided_slice %46 {offsets = [7, 0], sizes = [1, 96], strides = [1, 1]} : vector<16x96xf32> to vector<1x96xf32>
    %82 = tpu.concatenate %80, %81 in 0 : vector<1x96xf32>, vector<1x96xf32> -> vector<2x96xf32>
    %83 = vector.extract_strided_slice %27 {offsets = [8, 0], sizes = [1, 96], strides = [1, 1]} : vector<16x96xf32> to vector<1x96xf32>
    %84 = vector.extract_strided_slice %46 {offsets = [8, 0], sizes = [1, 96], strides = [1, 1]} : vector<16x96xf32> to vector<1x96xf32>
    %85 = tpu.concatenate %83, %84 in 0 : vector<1x96xf32>, vector<1x96xf32> -> vector<2x96xf32>
    %86 = vector.extract_strided_slice %27 {offsets = [9, 0], sizes = [1, 96], strides = [1, 1]} : vector<16x96xf32> to vector<1x96xf32>
    %87 = vector.extract_strided_slice %46 {offsets = [9, 0], sizes = [1, 96], strides = [1, 1]} : vector<16x96xf32> to vector<1x96xf32>
    %88 = tpu.concatenate %86, %87 in 0 : vector<1x96xf32>, vector<1x96xf32> -> vector<2x96xf32>
    %89 = vector.extract_strided_slice %27 {offsets = [10, 0], sizes = [1, 96], strides = [1, 1]} : vector<16x96xf32> to vector<1x96xf32>
    %90 = vector.extract_strided_slice %46 {offsets = [10, 0], sizes = [1, 96], strides = [1, 1]} : vector<16x96xf32> to vector<1x96xf32>
    %91 = tpu.concatenate %89, %90 in 0 : vector<1x96xf32>, vector<1x96xf32> -> vector<2x96xf32>
    %92 = vector.extract_strided_slice %27 {offsets = [11, 0], sizes = [1, 96], strides = [1, 1]} : vector<16x96xf32> to vector<1x96xf32>
    %93 = vector.extract_strided_slice %46 {offsets = [11, 0], sizes = [1, 96], strides = [1, 1]} : vector<16x96xf32> to vector<1x96xf32>
    %94 = tpu.concatenate %92, %93 in 0 : vector<1x96xf32>, vector<1x96xf32> -> vector<2x96xf32>
    %95 = vector.extract_strided_slice %27 {offsets = [12, 0], sizes = [1, 96], strides = [1, 1]} : vector<16x96xf32> to vector<1x96xf32>
    %96 = vector.extract_strided_slice %46 {offsets = [12, 0], sizes = [1, 96], strides = [1, 1]} : vector<16x96xf32> to vector<1x96xf32>
    %97 = tpu.concatenate %95, %96 in 0 : vector<1x96xf32>, vector<1x96xf32> -> vector<2x96xf32>
    %98 = vector.extract_strided_slice %27 {offsets = [13, 0], sizes = [1, 96], strides = [1, 1]} : vector<16x96xf32> to vector<1x96xf32>
    %99 = vector.extract_strided_slice %46 {offsets = [13, 0], sizes = [1, 96], strides = [1, 1]} : vector<16x96xf32> to vector<1x96xf32>
    %100 = tpu.concatenate %98, %99 in 0 : vector<1x96xf32>, vector<1x96xf32> -> vector<2x96xf32>
    %101 = vector.extract_strided_slice %27 {offsets = [14, 0], sizes = [1, 96], strides = [1, 1]} : vector<16x96xf32> to vector<1x96xf32>
    %102 = vector.extract_strided_slice %46 {offsets = [14, 0], sizes = [1, 96], strides = [1, 1]} : vector<16x96xf32> to vector<1x96xf32>
    %103 = tpu.concatenate %101, %102 in 0 : vector<1x96xf32>, vector<1x96xf32> -> vector<2x96xf32>
    %104 = vector.extract_strided_slice %27 {offsets = [15, 0], sizes = [1, 96], strides = [1, 1]} : vector<16x96xf32> to vector<1x96xf32>
    %105 = vector.extract_strided_slice %46 {offsets = [15, 0], sizes = [1, 96], strides = [1, 1]} : vector<16x96xf32> to vector<1x96xf32>
    %106 = tpu.concatenate %104, %105 in 0 : vector<1x96xf32>, vector<1x96xf32> -> vector<2x96xf32>
    %c0_45 = arith.constant 0 : index
    %c0_46 = arith.constant 0 : index
    %107 = vector.load %arg7[%c0_45, %c0_46] : memref<1x32xf32, #tpu.memory_space<vmem>>, vector<1x32xf32>
    %108 = vector.shape_cast %107 : vector<1x32xf32> to vector<1x32xf32>
    %109 = vector.broadcast %108 : vector<1x32xf32> to vector<2x32xf32>
    %c0_47 = arith.constant 0 : index
    %c0_48 = arith.constant 0 : index
    %110 = vector.load %arg9[%c0_47, %c0_48] : memref<32x144xf32, #tpu.memory_space<vmem>>, vector<32x144xf32>
    %cst_49 = arith.constant dense<0.000000e+00> : vector<2x144xf32>
    %111 = tpu.matmul %109, %110, %cst_49 {dimension_numbers = #tpu.dot_dimension_numbers<[1], [0], [0], [1], [0, 0, 1, 1], [], []>} : vector<2x32xf32>, vector<32x144xf32>, vector<2x144xf32> -> vector<2x144xf32>
    %112 = vector.extract_strided_slice %111 {offsets = [0, 0], sizes = [2, 96], strides = [1, 1]} : vector<2x144xf32> to vector<2x96xf32>
    %c0_50 = arith.constant 0 : index
    %c0_51 = arith.constant 0 : index
    %113 = vector.load %arg11[%c0_50, %c0_51] : memref<1x96xf32, #tpu.memory_space<vmem>>, vector<1x96xf32>
    %114 = vector.broadcast %113 : vector<1x96xf32> to vector<2x96xf32>
    %115 = arith.addf %112, %114 : vector<2x96xf32>
    %116 = vector.extract_strided_slice %58 {offsets = [0, 0], sizes = [2, 32], strides = [1, 1]} : vector<2x96xf32> to vector<2x32xf32>
    %117 = vector.extract_strided_slice %115 {offsets = [0, 0], sizes = [2, 32], strides = [1, 1]} : vector<2x96xf32> to vector<2x32xf32>
    %118 = arith.addf %116, %117 : vector<2x32xf32>
    %cst_52 = arith.constant 5.000000e-01 : f32
    %119 = vector.broadcast %cst_52 : f32 to vector<2x32xf32>
    %120 = arith.mulf %119, %118 : vector<2x32xf32>
    %121 = math.tanh %120 : vector<2x32xf32>
    %cst_53 = arith.constant 5.000000e-01 : f32
    %122 = vector.broadcast %cst_53 : f32 to vector<2x32xf32>
    %123 = arith.mulf %122, %121 : vector<2x32xf32>
    %cst_54 = arith.constant 5.000000e-01 : f32
    %124 = vector.broadcast %cst_54 : f32 to vector<2x32xf32>
    %125 = arith.addf %123, %124 : vector<2x32xf32>
    %126 = vector.extract_strided_slice %58 {offsets = [0, 32], sizes = [2, 32], strides = [1, 1]} : vector<2x96xf32> to vector<2x32xf32>
    %127 = vector.extract_strided_slice %115 {offsets = [0, 32], sizes = [2, 32], strides = [1, 1]} : vector<2x96xf32> to vector<2x32xf32>
    %128 = arith.addf %126, %127 : vector<2x32xf32>
    %cst_55 = arith.constant 5.000000e-01 : f32
    %129 = vector.broadcast %cst_55 : f32 to vector<2x32xf32>
    %130 = arith.mulf %129, %128 : vector<2x32xf32>
    %131 = math.tanh %130 : vector<2x32xf32>
    %cst_56 = arith.constant 5.000000e-01 : f32
    %132 = vector.broadcast %cst_56 : f32 to vector<2x32xf32>
    %133 = arith.mulf %132, %131 : vector<2x32xf32>
    %cst_57 = arith.constant 5.000000e-01 : f32
    %134 = vector.broadcast %cst_57 : f32 to vector<2x32xf32>
    %135 = arith.addf %133, %134 : vector<2x32xf32>
    %136 = vector.extract_strided_slice %58 {offsets = [0, 64], sizes = [2, 32], strides = [1, 1]} : vector<2x96xf32> to vector<2x32xf32>
    %137 = vector.extract_strided_slice %115 {offsets = [0, 64], sizes = [2, 32], strides = [1, 1]} : vector<2x96xf32> to vector<2x32xf32>
    %138 = arith.mulf %125, %137 : vector<2x32xf32>
    %139 = arith.addf %136, %138 : vector<2x32xf32>
    %140 = math.tanh %139 : vector<2x32xf32>
    %cst_58 = arith.constant 1.000000e+00 : f32
    %141 = vector.broadcast %cst_58 : f32 to vector<2x32xf32>
    %142 = arith.subf %141, %135 : vector<2x32xf32>
    %143 = arith.mulf %142, %140 : vector<2x32xf32>
    %144 = arith.mulf %135, %109 : vector<2x32xf32>
    %145 = arith.addf %143, %144 : vector<2x32xf32>
    %c0_59 = arith.constant 0 : index
    %c0_60 = arith.constant 0 : index
    %146 = vector.load %arg9[%c0_59, %c0_60] : memref<32x144xf32, #tpu.memory_space<vmem>>, vector<32x144xf32>
    %cst_61 = arith.constant dense<0.000000e+00> : vector<2x144xf32>
    %147 = tpu.matmul %145, %146, %cst_61 {dimension_numbers = #tpu.dot_dimension_numbers<[1], [0], [0], [1], [0, 0, 1, 1], [], []>} : vector<2x32xf32>, vector<32x144xf32>, vector<2x144xf32> -> vector<2x144xf32>
    %148 = vector.extract_strided_slice %147 {offsets = [0, 128], sizes = [2, 16], strides = [1, 1]} : vector<2x144xf32> to vector<2x16xf32>
    %149 = vector.extract_strided_slice %147 {offsets = [0, 0], sizes = [2, 96], strides = [1, 1]} : vector<2x144xf32> to vector<2x96xf32>
    %c0_62 = arith.constant 0 : index
    %c0_63 = arith.constant 0 : index
    %150 = vector.load %arg11[%c0_62, %c0_63] : memref<1x96xf32, #tpu.memory_space<vmem>>, vector<1x96xf32>
    %151 = vector.broadcast %150 : vector<1x96xf32> to vector<2x96xf32>
    %152 = arith.addf %149, %151 : vector<2x96xf32>
    %153 = vector.extract_strided_slice %61 {offsets = [0, 0], sizes = [2, 32], strides = [1, 1]} : vector<2x96xf32> to vector<2x32xf32>
    %154 = vector.extract_strided_slice %152 {offsets = [0, 0], sizes = [2, 32], strides = [1, 1]} : vector<2x96xf32> to vector<2x32xf32>
    %155 = arith.addf %153, %154 : vector<2x32xf32>
    %cst_64 = arith.constant 5.000000e-01 : f32
    %156 = vector.broadcast %cst_64 : f32 to vector<2x32xf32>
    %157 = arith.mulf %156, %155 : vector<2x32xf32>
    %158 = math.tanh %157 : vector<2x32xf32>
    %cst_65 = arith.constant 5.000000e-01 : f32
    %159 = vector.broadcast %cst_65 : f32 to vector<2x32xf32>
    %160 = arith.mulf %159, %158 : vector<2x32xf32>
    %cst_66 = arith.constant 5.000000e-01 : f32
    %161 = vector.broadcast %cst_66 : f32 to vector<2x32xf32>
    %162 = arith.addf %160, %161 : vector<2x32xf32>
    %163 = vector.extract_strided_slice %61 {offsets = [0, 32], sizes = [2, 32], strides = [1, 1]} : vector<2x96xf32> to vector<2x32xf32>
    %164 = vector.extract_strided_slice %152 {offsets = [0, 32], sizes = [2, 32], strides = [1, 1]} : vector<2x96xf32> to vector<2x32xf32>
    %165 = arith.addf %163, %164 : vector<2x32xf32>
    %cst_67 = arith.constant 5.000000e-01 : f32
    %166 = vector.broadcast %cst_67 : f32 to vector<2x32xf32>
    %167 = arith.mulf %166, %165 : vector<2x32xf32>
    %168 = math.tanh %167 : vector<2x32xf32>
    %cst_68 = arith.constant 5.000000e-01 : f32
    %169 = vector.broadcast %cst_68 : f32 to vector<2x32xf32>
    %170 = arith.mulf %169, %168 : vector<2x32xf32>
    %cst_69 = arith.constant 5.000000e-01 : f32
    %171 = vector.broadcast %cst_69 : f32 to vector<2x32xf32>
    %172 = arith.addf %170, %171 : vector<2x32xf32>
    %173 = vector.extract_strided_slice %61 {offsets = [0, 64], sizes = [2, 32], strides = [1, 1]} : vector<2x96xf32> to vector<2x32xf32>
    %174 = vector.extract_strided_slice %152 {offsets = [0, 64], sizes = [2, 32], strides = [1, 1]} : vector<2x96xf32> to vector<2x32xf32>
    %175 = arith.mulf %162, %174 : vector<2x32xf32>
    %176 = arith.addf %173, %175 : vector<2x32xf32>
    %177 = math.tanh %176 : vector<2x32xf32>
    %cst_70 = arith.constant 1.000000e+00 : f32
    %178 = vector.broadcast %cst_70 : f32 to vector<2x32xf32>
    %179 = arith.subf %178, %172 : vector<2x32xf32>
    %180 = arith.mulf %179, %177 : vector<2x32xf32>
    %181 = arith.mulf %172, %145 : vector<2x32xf32>
    %182 = arith.addf %180, %181 : vector<2x32xf32>
    %c0_71 = arith.constant 0 : index
    %c0_72 = arith.constant 0 : index
    %183 = vector.load %arg9[%c0_71, %c0_72] : memref<32x144xf32, #tpu.memory_space<vmem>>, vector<32x144xf32>
    %cst_73 = arith.constant dense<0.000000e+00> : vector<2x144xf32>
    %184 = tpu.matmul %182, %183, %cst_73 {dimension_numbers = #tpu.dot_dimension_numbers<[1], [0], [0], [1], [0, 0, 1, 1], [], []>} : vector<2x32xf32>, vector<32x144xf32>, vector<2x144xf32> -> vector<2x144xf32>
    %185 = vector.extract_strided_slice %184 {offsets = [0, 128], sizes = [2, 16], strides = [1, 1]} : vector<2x144xf32> to vector<2x16xf32>
    %186 = vector.extract_strided_slice %184 {offsets = [0, 0], sizes = [2, 96], strides = [1, 1]} : vector<2x144xf32> to vector<2x96xf32>
    %c0_74 = arith.constant 0 : index
    %c0_75 = arith.constant 0 : index
    %187 = vector.load %arg11[%c0_74, %c0_75] : memref<1x96xf32, #tpu.memory_space<vmem>>, vector<1x96xf32>
    %188 = vector.broadcast %187 : vector<1x96xf32> to vector<2x96xf32>
    %189 = arith.addf %186, %188 : vector<2x96xf32>
    %190 = vector.extract_strided_slice %64 {offsets = [0, 0], sizes = [2, 32], strides = [1, 1]} : vector<2x96xf32> to vector<2x32xf32>
    %191 = vector.extract_strided_slice %189 {offsets = [0, 0], sizes = [2, 32], strides = [1, 1]} : vector<2x96xf32> to vector<2x32xf32>
    %192 = arith.addf %190, %191 : vector<2x32xf32>
    %cst_76 = arith.constant 5.000000e-01 : f32
    %193 = vector.broadcast %cst_76 : f32 to vector<2x32xf32>
    %194 = arith.mulf %193, %192 : vector<2x32xf32>
    %195 = math.tanh %194 : vector<2x32xf32>
    %cst_77 = arith.constant 5.000000e-01 : f32
    %196 = vector.broadcast %cst_77 : f32 to vector<2x32xf32>
    %197 = arith.mulf %196, %195 : vector<2x32xf32>
    %cst_78 = arith.constant 5.000000e-01 : f32
    %198 = vector.broadcast %cst_78 : f32 to vector<2x32xf32>
    %199 = arith.addf %197, %198 : vector<2x32xf32>
    %200 = vector.extract_strided_slice %64 {offsets = [0, 32], sizes = [2, 32], strides = [1, 1]} : vector<2x96xf32> to vector<2x32xf32>
    %201 = vector.extract_strided_slice %189 {offsets = [0, 32], sizes = [2, 32], strides = [1, 1]} : vector<2x96xf32> to vector<2x32xf32>
    %202 = arith.addf %200, %201 : vector<2x32xf32>
    %cst_79 = arith.constant 5.000000e-01 : f32
    %203 = vector.broadcast %cst_79 : f32 to vector<2x32xf32>
    %204 = arith.mulf %203, %202 : vector<2x32xf32>
    %205 = math.tanh %204 : vector<2x32xf32>
    %cst_80 = arith.constant 5.000000e-01 : f32
    %206 = vector.broadcast %cst_80 : f32 to vector<2x32xf32>
    %207 = arith.mulf %206, %205 : vector<2x32xf32>
    %cst_81 = arith.constant 5.000000e-01 : f32
    %208 = vector.broadcast %cst_81 : f32 to vector<2x32xf32>
    %209 = arith.addf %207, %208 : vector<2x32xf32>
    %210 = vector.extract_strided_slice %64 {offsets = [0, 64], sizes = [2, 32], strides = [1, 1]} : vector<2x96xf32> to vector<2x32xf32>
    %211 = vector.extract_strided_slice %189 {offsets = [0, 64], sizes = [2, 32], strides = [1, 1]} : vector<2x96xf32> to vector<2x32xf32>
    %212 = arith.mulf %199, %211 : vector<2x32xf32>
    %213 = arith.addf %210, %212 : vector<2x32xf32>
    %214 = math.tanh %213 : vector<2x32xf32>
    %cst_82 = arith.constant 1.000000e+00 : f32
    %215 = vector.broadcast %cst_82 : f32 to vector<2x32xf32>
    %216 = arith.subf %215, %209 : vector<2x32xf32>
    %217 = arith.mulf %216, %214 : vector<2x32xf32>
    %218 = arith.mulf %209, %182 : vector<2x32xf32>
    %219 = arith.addf %217, %218 : vector<2x32xf32>
    %c0_83 = arith.constant 0 : index
    %c0_84 = arith.constant 0 : index
    %220 = vector.load %arg9[%c0_83, %c0_84] : memref<32x144xf32, #tpu.memory_space<vmem>>, vector<32x144xf32>
    %cst_85 = arith.constant dense<0.000000e+00> : vector<2x144xf32>
    %221 = tpu.matmul %219, %220, %cst_85 {dimension_numbers = #tpu.dot_dimension_numbers<[1], [0], [0], [1], [0, 0, 1, 1], [], []>} : vector<2x32xf32>, vector<32x144xf32>, vector<2x144xf32> -> vector<2x144xf32>
    %222 = vector.extract_strided_slice %221 {offsets = [0, 128], sizes = [2, 16], strides = [1, 1]} : vector<2x144xf32> to vector<2x16xf32>
    %223 = vector.extract_strided_slice %221 {offsets = [0, 0], sizes = [2, 96], strides = [1, 1]} : vector<2x144xf32> to vector<2x96xf32>
    %c0_86 = arith.constant 0 : index
    %c0_87 = arith.constant 0 : index
    %224 = vector.load %arg11[%c0_86, %c0_87] : memref<1x96xf32, #tpu.memory_space<vmem>>, vector<1x96xf32>
    %225 = vector.broadcast %224 : vector<1x96xf32> to vector<2x96xf32>
    %226 = arith.addf %223, %225 : vector<2x96xf32>
    %227 = vector.extract_strided_slice %67 {offsets = [0, 0], sizes = [2, 32], strides = [1, 1]} : vector<2x96xf32> to vector<2x32xf32>
    %228 = vector.extract_strided_slice %226 {offsets = [0, 0], sizes = [2, 32], strides = [1, 1]} : vector<2x96xf32> to vector<2x32xf32>
    %229 = arith.addf %227, %228 : vector<2x32xf32>
    %cst_88 = arith.constant 5.000000e-01 : f32
    %230 = vector.broadcast %cst_88 : f32 to vector<2x32xf32>
    %231 = arith.mulf %230, %229 : vector<2x32xf32>
    %232 = math.tanh %231 : vector<2x32xf32>
    %cst_89 = arith.constant 5.000000e-01 : f32
    %233 = vector.broadcast %cst_89 : f32 to vector<2x32xf32>
    %234 = arith.mulf %233, %232 : vector<2x32xf32>
    %cst_90 = arith.constant 5.000000e-01 : f32
    %235 = vector.broadcast %cst_90 : f32 to vector<2x32xf32>
    %236 = arith.addf %234, %235 : vector<2x32xf32>
    %237 = vector.extract_strided_slice %67 {offsets = [0, 32], sizes = [2, 32], strides = [1, 1]} : vector<2x96xf32> to vector<2x32xf32>
    %238 = vector.extract_strided_slice %226 {offsets = [0, 32], sizes = [2, 32], strides = [1, 1]} : vector<2x96xf32> to vector<2x32xf32>
    %239 = arith.addf %237, %238 : vector<2x32xf32>
    %cst_91 = arith.constant 5.000000e-01 : f32
    %240 = vector.broadcast %cst_91 : f32 to vector<2x32xf32>
    %241 = arith.mulf %240, %239 : vector<2x32xf32>
    %242 = math.tanh %241 : vector<2x32xf32>
    %cst_92 = arith.constant 5.000000e-01 : f32
    %243 = vector.broadcast %cst_92 : f32 to vector<2x32xf32>
    %244 = arith.mulf %243, %242 : vector<2x32xf32>
    %cst_93 = arith.constant 5.000000e-01 : f32
    %245 = vector.broadcast %cst_93 : f32 to vector<2x32xf32>
    %246 = arith.addf %244, %245 : vector<2x32xf32>
    %247 = vector.extract_strided_slice %67 {offsets = [0, 64], sizes = [2, 32], strides = [1, 1]} : vector<2x96xf32> to vector<2x32xf32>
    %248 = vector.extract_strided_slice %226 {offsets = [0, 64], sizes = [2, 32], strides = [1, 1]} : vector<2x96xf32> to vector<2x32xf32>
    %249 = arith.mulf %236, %248 : vector<2x32xf32>
    %250 = arith.addf %247, %249 : vector<2x32xf32>
    %251 = math.tanh %250 : vector<2x32xf32>
    %cst_94 = arith.constant 1.000000e+00 : f32
    %252 = vector.broadcast %cst_94 : f32 to vector<2x32xf32>
    %253 = arith.subf %252, %246 : vector<2x32xf32>
    %254 = arith.mulf %253, %251 : vector<2x32xf32>
    %255 = arith.mulf %246, %219 : vector<2x32xf32>
    %256 = arith.addf %254, %255 : vector<2x32xf32>
    %c0_95 = arith.constant 0 : index
    %c0_96 = arith.constant 0 : index
    %257 = vector.load %arg9[%c0_95, %c0_96] : memref<32x144xf32, #tpu.memory_space<vmem>>, vector<32x144xf32>
    %cst_97 = arith.constant dense<0.000000e+00> : vector<2x144xf32>
    %258 = tpu.matmul %256, %257, %cst_97 {dimension_numbers = #tpu.dot_dimension_numbers<[1], [0], [0], [1], [0, 0, 1, 1], [], []>} : vector<2x32xf32>, vector<32x144xf32>, vector<2x144xf32> -> vector<2x144xf32>
    %259 = vector.extract_strided_slice %258 {offsets = [0, 128], sizes = [2, 16], strides = [1, 1]} : vector<2x144xf32> to vector<2x16xf32>
    %260 = vector.extract_strided_slice %258 {offsets = [0, 0], sizes = [2, 96], strides = [1, 1]} : vector<2x144xf32> to vector<2x96xf32>
    %c0_98 = arith.constant 0 : index
    %c0_99 = arith.constant 0 : index
    %261 = vector.load %arg11[%c0_98, %c0_99] : memref<1x96xf32, #tpu.memory_space<vmem>>, vector<1x96xf32>
    %262 = vector.broadcast %261 : vector<1x96xf32> to vector<2x96xf32>
    %263 = arith.addf %260, %262 : vector<2x96xf32>
    %264 = vector.extract_strided_slice %70 {offsets = [0, 0], sizes = [2, 32], strides = [1, 1]} : vector<2x96xf32> to vector<2x32xf32>
    %265 = vector.extract_strided_slice %263 {offsets = [0, 0], sizes = [2, 32], strides = [1, 1]} : vector<2x96xf32> to vector<2x32xf32>
    %266 = arith.addf %264, %265 : vector<2x32xf32>
    %cst_100 = arith.constant 5.000000e-01 : f32
    %267 = vector.broadcast %cst_100 : f32 to vector<2x32xf32>
    %268 = arith.mulf %267, %266 : vector<2x32xf32>
    %269 = math.tanh %268 : vector<2x32xf32>
    %cst_101 = arith.constant 5.000000e-01 : f32
    %270 = vector.broadcast %cst_101 : f32 to vector<2x32xf32>
    %271 = arith.mulf %270, %269 : vector<2x32xf32>
    %cst_102 = arith.constant 5.000000e-01 : f32
    %272 = vector.broadcast %cst_102 : f32 to vector<2x32xf32>
    %273 = arith.addf %271, %272 : vector<2x32xf32>
    %274 = vector.extract_strided_slice %70 {offsets = [0, 32], sizes = [2, 32], strides = [1, 1]} : vector<2x96xf32> to vector<2x32xf32>
    %275 = vector.extract_strided_slice %263 {offsets = [0, 32], sizes = [2, 32], strides = [1, 1]} : vector<2x96xf32> to vector<2x32xf32>
    %276 = arith.addf %274, %275 : vector<2x32xf32>
    %cst_103 = arith.constant 5.000000e-01 : f32
    %277 = vector.broadcast %cst_103 : f32 to vector<2x32xf32>
    %278 = arith.mulf %277, %276 : vector<2x32xf32>
    %279 = math.tanh %278 : vector<2x32xf32>
    %cst_104 = arith.constant 5.000000e-01 : f32
    %280 = vector.broadcast %cst_104 : f32 to vector<2x32xf32>
    %281 = arith.mulf %280, %279 : vector<2x32xf32>
    %cst_105 = arith.constant 5.000000e-01 : f32
    %282 = vector.broadcast %cst_105 : f32 to vector<2x32xf32>
    %283 = arith.addf %281, %282 : vector<2x32xf32>
    %284 = vector.extract_strided_slice %70 {offsets = [0, 64], sizes = [2, 32], strides = [1, 1]} : vector<2x96xf32> to vector<2x32xf32>
    %285 = vector.extract_strided_slice %263 {offsets = [0, 64], sizes = [2, 32], strides = [1, 1]} : vector<2x96xf32> to vector<2x32xf32>
    %286 = arith.mulf %273, %285 : vector<2x32xf32>
    %287 = arith.addf %284, %286 : vector<2x32xf32>
    %288 = math.tanh %287 : vector<2x32xf32>
    %cst_106 = arith.constant 1.000000e+00 : f32
    %289 = vector.broadcast %cst_106 : f32 to vector<2x32xf32>
    %290 = arith.subf %289, %283 : vector<2x32xf32>
    %291 = arith.mulf %290, %288 : vector<2x32xf32>
    %292 = arith.mulf %283, %256 : vector<2x32xf32>
    %293 = arith.addf %291, %292 : vector<2x32xf32>
    %c0_107 = arith.constant 0 : index
    %c0_108 = arith.constant 0 : index
    %294 = vector.load %arg9[%c0_107, %c0_108] : memref<32x144xf32, #tpu.memory_space<vmem>>, vector<32x144xf32>
    %cst_109 = arith.constant dense<0.000000e+00> : vector<2x144xf32>
    %295 = tpu.matmul %293, %294, %cst_109 {dimension_numbers = #tpu.dot_dimension_numbers<[1], [0], [0], [1], [0, 0, 1, 1], [], []>} : vector<2x32xf32>, vector<32x144xf32>, vector<2x144xf32> -> vector<2x144xf32>
    %296 = vector.extract_strided_slice %295 {offsets = [0, 128], sizes = [2, 16], strides = [1, 1]} : vector<2x144xf32> to vector<2x16xf32>
    %297 = vector.extract_strided_slice %295 {offsets = [0, 0], sizes = [2, 96], strides = [1, 1]} : vector<2x144xf32> to vector<2x96xf32>
    %c0_110 = arith.constant 0 : index
    %c0_111 = arith.constant 0 : index
    %298 = vector.load %arg11[%c0_110, %c0_111] : memref<1x96xf32, #tpu.memory_space<vmem>>, vector<1x96xf32>
    %299 = vector.broadcast %298 : vector<1x96xf32> to vector<2x96xf32>
    %300 = arith.addf %297, %299 : vector<2x96xf32>
    %301 = vector.extract_strided_slice %73 {offsets = [0, 0], sizes = [2, 32], strides = [1, 1]} : vector<2x96xf32> to vector<2x32xf32>
    %302 = vector.extract_strided_slice %300 {offsets = [0, 0], sizes = [2, 32], strides = [1, 1]} : vector<2x96xf32> to vector<2x32xf32>
    %303 = arith.addf %301, %302 : vector<2x32xf32>
    %cst_112 = arith.constant 5.000000e-01 : f32
    %304 = vector.broadcast %cst_112 : f32 to vector<2x32xf32>
    %305 = arith.mulf %304, %303 : vector<2x32xf32>
    %306 = math.tanh %305 : vector<2x32xf32>
    %cst_113 = arith.constant 5.000000e-01 : f32
    %307 = vector.broadcast %cst_113 : f32 to vector<2x32xf32>
    %308 = arith.mulf %307, %306 : vector<2x32xf32>
    %cst_114 = arith.constant 5.000000e-01 : f32
    %309 = vector.broadcast %cst_114 : f32 to vector<2x32xf32>
    %310 = arith.addf %308, %309 : vector<2x32xf32>
    %311 = vector.extract_strided_slice %73 {offsets = [0, 32], sizes = [2, 32], strides = [1, 1]} : vector<2x96xf32> to vector<2x32xf32>
    %312 = vector.extract_strided_slice %300 {offsets = [0, 32], sizes = [2, 32], strides = [1, 1]} : vector<2x96xf32> to vector<2x32xf32>
    %313 = arith.addf %311, %312 : vector<2x32xf32>
    %cst_115 = arith.constant 5.000000e-01 : f32
    %314 = vector.broadcast %cst_115 : f32 to vector<2x32xf32>
    %315 = arith.mulf %314, %313 : vector<2x32xf32>
    %316 = math.tanh %315 : vector<2x32xf32>
    %cst_116 = arith.constant 5.000000e-01 : f32
    %317 = vector.broadcast %cst_116 : f32 to vector<2x32xf32>
    %318 = arith.mulf %317, %316 : vector<2x32xf32>
    %cst_117 = arith.constant 5.000000e-01 : f32
    %319 = vector.broadcast %cst_117 : f32 to vector<2x32xf32>
    %320 = arith.addf %318, %319 : vector<2x32xf32>
    %321 = vector.extract_strided_slice %73 {offsets = [0, 64], sizes = [2, 32], strides = [1, 1]} : vector<2x96xf32> to vector<2x32xf32>
    %322 = vector.extract_strided_slice %300 {offsets = [0, 64], sizes = [2, 32], strides = [1, 1]} : vector<2x96xf32> to vector<2x32xf32>
    %323 = arith.mulf %310, %322 : vector<2x32xf32>
    %324 = arith.addf %321, %323 : vector<2x32xf32>
    %325 = math.tanh %324 : vector<2x32xf32>
    %cst_118 = arith.constant 1.000000e+00 : f32
    %326 = vector.broadcast %cst_118 : f32 to vector<2x32xf32>
    %327 = arith.subf %326, %320 : vector<2x32xf32>
    %328 = arith.mulf %327, %325 : vector<2x32xf32>
    %329 = arith.mulf %320, %293 : vector<2x32xf32>
    %330 = arith.addf %328, %329 : vector<2x32xf32>
    %c0_119 = arith.constant 0 : index
    %c0_120 = arith.constant 0 : index
    %331 = vector.load %arg9[%c0_119, %c0_120] : memref<32x144xf32, #tpu.memory_space<vmem>>, vector<32x144xf32>
    %cst_121 = arith.constant dense<0.000000e+00> : vector<2x144xf32>
    %332 = tpu.matmul %330, %331, %cst_121 {dimension_numbers = #tpu.dot_dimension_numbers<[1], [0], [0], [1], [0, 0, 1, 1], [], []>} : vector<2x32xf32>, vector<32x144xf32>, vector<2x144xf32> -> vector<2x144xf32>
    %333 = vector.extract_strided_slice %332 {offsets = [0, 128], sizes = [2, 16], strides = [1, 1]} : vector<2x144xf32> to vector<2x16xf32>
    %334 = vector.extract_strided_slice %332 {offsets = [0, 0], sizes = [2, 96], strides = [1, 1]} : vector<2x144xf32> to vector<2x96xf32>
    %c0_122 = arith.constant 0 : index
    %c0_123 = arith.constant 0 : index
    %335 = vector.load %arg11[%c0_122, %c0_123] : memref<1x96xf32, #tpu.memory_space<vmem>>, vector<1x96xf32>
    %336 = vector.broadcast %335 : vector<1x96xf32> to vector<2x96xf32>
    %337 = arith.addf %334, %336 : vector<2x96xf32>
    %338 = vector.extract_strided_slice %76 {offsets = [0, 0], sizes = [2, 32], strides = [1, 1]} : vector<2x96xf32> to vector<2x32xf32>
    %339 = vector.extract_strided_slice %337 {offsets = [0, 0], sizes = [2, 32], strides = [1, 1]} : vector<2x96xf32> to vector<2x32xf32>
    %340 = arith.addf %338, %339 : vector<2x32xf32>
    %cst_124 = arith.constant 5.000000e-01 : f32
    %341 = vector.broadcast %cst_124 : f32 to vector<2x32xf32>
    %342 = arith.mulf %341, %340 : vector<2x32xf32>
    %343 = math.tanh %342 : vector<2x32xf32>
    %cst_125 = arith.constant 5.000000e-01 : f32
    %344 = vector.broadcast %cst_125 : f32 to vector<2x32xf32>
    %345 = arith.mulf %344, %343 : vector<2x32xf32>
    %cst_126 = arith.constant 5.000000e-01 : f32
    %346 = vector.broadcast %cst_126 : f32 to vector<2x32xf32>
    %347 = arith.addf %345, %346 : vector<2x32xf32>
    %348 = vector.extract_strided_slice %76 {offsets = [0, 32], sizes = [2, 32], strides = [1, 1]} : vector<2x96xf32> to vector<2x32xf32>
    %349 = vector.extract_strided_slice %337 {offsets = [0, 32], sizes = [2, 32], strides = [1, 1]} : vector<2x96xf32> to vector<2x32xf32>
    %350 = arith.addf %348, %349 : vector<2x32xf32>
    %cst_127 = arith.constant 5.000000e-01 : f32
    %351 = vector.broadcast %cst_127 : f32 to vector<2x32xf32>
    %352 = arith.mulf %351, %350 : vector<2x32xf32>
    %353 = math.tanh %352 : vector<2x32xf32>
    %cst_128 = arith.constant 5.000000e-01 : f32
    %354 = vector.broadcast %cst_128 : f32 to vector<2x32xf32>
    %355 = arith.mulf %354, %353 : vector<2x32xf32>
    %cst_129 = arith.constant 5.000000e-01 : f32
    %356 = vector.broadcast %cst_129 : f32 to vector<2x32xf32>
    %357 = arith.addf %355, %356 : vector<2x32xf32>
    %358 = vector.extract_strided_slice %76 {offsets = [0, 64], sizes = [2, 32], strides = [1, 1]} : vector<2x96xf32> to vector<2x32xf32>
    %359 = vector.extract_strided_slice %337 {offsets = [0, 64], sizes = [2, 32], strides = [1, 1]} : vector<2x96xf32> to vector<2x32xf32>
    %360 = arith.mulf %347, %359 : vector<2x32xf32>
    %361 = arith.addf %358, %360 : vector<2x32xf32>
    %362 = math.tanh %361 : vector<2x32xf32>
    %cst_130 = arith.constant 1.000000e+00 : f32
    %363 = vector.broadcast %cst_130 : f32 to vector<2x32xf32>
    %364 = arith.subf %363, %357 : vector<2x32xf32>
    %365 = arith.mulf %364, %362 : vector<2x32xf32>
    %366 = arith.mulf %357, %330 : vector<2x32xf32>
    %367 = arith.addf %365, %366 : vector<2x32xf32>
    %c0_131 = arith.constant 0 : index
    %c0_132 = arith.constant 0 : index
    %368 = vector.load %arg9[%c0_131, %c0_132] : memref<32x144xf32, #tpu.memory_space<vmem>>, vector<32x144xf32>
    %cst_133 = arith.constant dense<0.000000e+00> : vector<2x144xf32>
    %369 = tpu.matmul %367, %368, %cst_133 {dimension_numbers = #tpu.dot_dimension_numbers<[1], [0], [0], [1], [0, 0, 1, 1], [], []>} : vector<2x32xf32>, vector<32x144xf32>, vector<2x144xf32> -> vector<2x144xf32>
    %370 = vector.extract_strided_slice %369 {offsets = [0, 128], sizes = [2, 16], strides = [1, 1]} : vector<2x144xf32> to vector<2x16xf32>
    %371 = vector.extract_strided_slice %369 {offsets = [0, 0], sizes = [2, 96], strides = [1, 1]} : vector<2x144xf32> to vector<2x96xf32>
    %c0_134 = arith.constant 0 : index
    %c0_135 = arith.constant 0 : index
    %372 = vector.load %arg11[%c0_134, %c0_135] : memref<1x96xf32, #tpu.memory_space<vmem>>, vector<1x96xf32>
    %373 = vector.broadcast %372 : vector<1x96xf32> to vector<2x96xf32>
    %374 = arith.addf %371, %373 : vector<2x96xf32>
    %375 = vector.extract_strided_slice %79 {offsets = [0, 0], sizes = [2, 32], strides = [1, 1]} : vector<2x96xf32> to vector<2x32xf32>
    %376 = vector.extract_strided_slice %374 {offsets = [0, 0], sizes = [2, 32], strides = [1, 1]} : vector<2x96xf32> to vector<2x32xf32>
    %377 = arith.addf %375, %376 : vector<2x32xf32>
    %cst_136 = arith.constant 5.000000e-01 : f32
    %378 = vector.broadcast %cst_136 : f32 to vector<2x32xf32>
    %379 = arith.mulf %378, %377 : vector<2x32xf32>
    %380 = math.tanh %379 : vector<2x32xf32>
    %cst_137 = arith.constant 5.000000e-01 : f32
    %381 = vector.broadcast %cst_137 : f32 to vector<2x32xf32>
    %382 = arith.mulf %381, %380 : vector<2x32xf32>
    %cst_138 = arith.constant 5.000000e-01 : f32
    %383 = vector.broadcast %cst_138 : f32 to vector<2x32xf32>
    %384 = arith.addf %382, %383 : vector<2x32xf32>
    %385 = vector.extract_strided_slice %79 {offsets = [0, 32], sizes = [2, 32], strides = [1, 1]} : vector<2x96xf32> to vector<2x32xf32>
    %386 = vector.extract_strided_slice %374 {offsets = [0, 32], sizes = [2, 32], strides = [1, 1]} : vector<2x96xf32> to vector<2x32xf32>
    %387 = arith.addf %385, %386 : vector<2x32xf32>
    %cst_139 = arith.constant 5.000000e-01 : f32
    %388 = vector.broadcast %cst_139 : f32 to vector<2x32xf32>
    %389 = arith.mulf %388, %387 : vector<2x32xf32>
    %390 = math.tanh %389 : vector<2x32xf32>
    %cst_140 = arith.constant 5.000000e-01 : f32
    %391 = vector.broadcast %cst_140 : f32 to vector<2x32xf32>
    %392 = arith.mulf %391, %390 : vector<2x32xf32>
    %cst_141 = arith.constant 5.000000e-01 : f32
    %393 = vector.broadcast %cst_141 : f32 to vector<2x32xf32>
    %394 = arith.addf %392, %393 : vector<2x32xf32>
    %395 = vector.extract_strided_slice %79 {offsets = [0, 64], sizes = [2, 32], strides = [1, 1]} : vector<2x96xf32> to vector<2x32xf32>
    %396 = vector.extract_strided_slice %374 {offsets = [0, 64], sizes = [2, 32], strides = [1, 1]} : vector<2x96xf32> to vector<2x32xf32>
    %397 = arith.mulf %384, %396 : vector<2x32xf32>
    %398 = arith.addf %395, %397 : vector<2x32xf32>
    %399 = math.tanh %398 : vector<2x32xf32>
    %cst_142 = arith.constant 1.000000e+00 : f32
    %400 = vector.broadcast %cst_142 : f32 to vector<2x32xf32>
    %401 = arith.subf %400, %394 : vector<2x32xf32>
    %402 = arith.mulf %401, %399 : vector<2x32xf32>
    %403 = arith.mulf %394, %367 : vector<2x32xf32>
    %404 = arith.addf %402, %403 : vector<2x32xf32>
    %c0_143 = arith.constant 0 : index
    %c0_144 = arith.constant 0 : index
    %405 = vector.load %arg9[%c0_143, %c0_144] : memref<32x144xf32, #tpu.memory_space<vmem>>, vector<32x144xf32>
    %cst_145 = arith.constant dense<0.000000e+00> : vector<2x144xf32>
    %406 = tpu.matmul %404, %405, %cst_145 {dimension_numbers = #tpu.dot_dimension_numbers<[1], [0], [0], [1], [0, 0, 1, 1], [], []>} : vector<2x32xf32>, vector<32x144xf32>, vector<2x144xf32> -> vector<2x144xf32>
    %407 = vector.extract_strided_slice %406 {offsets = [0, 128], sizes = [2, 16], strides = [1, 1]} : vector<2x144xf32> to vector<2x16xf32>
    %408 = vector.extract_strided_slice %406 {offsets = [0, 0], sizes = [2, 96], strides = [1, 1]} : vector<2x144xf32> to vector<2x96xf32>
    %c0_146 = arith.constant 0 : index
    %c0_147 = arith.constant 0 : index
    %409 = vector.load %arg11[%c0_146, %c0_147] : memref<1x96xf32, #tpu.memory_space<vmem>>, vector<1x96xf32>
    %410 = vector.broadcast %409 : vector<1x96xf32> to vector<2x96xf32>
    %411 = arith.addf %408, %410 : vector<2x96xf32>
    %412 = vector.extract_strided_slice %82 {offsets = [0, 0], sizes = [2, 32], strides = [1, 1]} : vector<2x96xf32> to vector<2x32xf32>
    %413 = vector.extract_strided_slice %411 {offsets = [0, 0], sizes = [2, 32], strides = [1, 1]} : vector<2x96xf32> to vector<2x32xf32>
    %414 = arith.addf %412, %413 : vector<2x32xf32>
    %cst_148 = arith.constant 5.000000e-01 : f32
    %415 = vector.broadcast %cst_148 : f32 to vector<2x32xf32>
    %416 = arith.mulf %415, %414 : vector<2x32xf32>
    %417 = math.tanh %416 : vector<2x32xf32>
    %cst_149 = arith.constant 5.000000e-01 : f32
    %418 = vector.broadcast %cst_149 : f32 to vector<2x32xf32>
    %419 = arith.mulf %418, %417 : vector<2x32xf32>
    %cst_150 = arith.constant 5.000000e-01 : f32
    %420 = vector.broadcast %cst_150 : f32 to vector<2x32xf32>
    %421 = arith.addf %419, %420 : vector<2x32xf32>
    %422 = vector.extract_strided_slice %82 {offsets = [0, 32], sizes = [2, 32], strides = [1, 1]} : vector<2x96xf32> to vector<2x32xf32>
    %423 = vector.extract_strided_slice %411 {offsets = [0, 32], sizes = [2, 32], strides = [1, 1]} : vector<2x96xf32> to vector<2x32xf32>
    %424 = arith.addf %422, %423 : vector<2x32xf32>
    %cst_151 = arith.constant 5.000000e-01 : f32
    %425 = vector.broadcast %cst_151 : f32 to vector<2x32xf32>
    %426 = arith.mulf %425, %424 : vector<2x32xf32>
    %427 = math.tanh %426 : vector<2x32xf32>
    %cst_152 = arith.constant 5.000000e-01 : f32
    %428 = vector.broadcast %cst_152 : f32 to vector<2x32xf32>
    %429 = arith.mulf %428, %427 : vector<2x32xf32>
    %cst_153 = arith.constant 5.000000e-01 : f32
    %430 = vector.broadcast %cst_153 : f32 to vector<2x32xf32>
    %431 = arith.addf %429, %430 : vector<2x32xf32>
    %432 = vector.extract_strided_slice %82 {offsets = [0, 64], sizes = [2, 32], strides = [1, 1]} : vector<2x96xf32> to vector<2x32xf32>
    %433 = vector.extract_strided_slice %411 {offsets = [0, 64], sizes = [2, 32], strides = [1, 1]} : vector<2x96xf32> to vector<2x32xf32>
    %434 = arith.mulf %421, %433 : vector<2x32xf32>
    %435 = arith.addf %432, %434 : vector<2x32xf32>
    %436 = math.tanh %435 : vector<2x32xf32>
    %cst_154 = arith.constant 1.000000e+00 : f32
    %437 = vector.broadcast %cst_154 : f32 to vector<2x32xf32>
    %438 = arith.subf %437, %431 : vector<2x32xf32>
    %439 = arith.mulf %438, %436 : vector<2x32xf32>
    %440 = arith.mulf %431, %404 : vector<2x32xf32>
    %441 = arith.addf %439, %440 : vector<2x32xf32>
    %c0_155 = arith.constant 0 : index
    %c0_156 = arith.constant 0 : index
    %442 = vector.load %arg9[%c0_155, %c0_156] : memref<32x144xf32, #tpu.memory_space<vmem>>, vector<32x144xf32>
    %cst_157 = arith.constant dense<0.000000e+00> : vector<2x144xf32>
    %443 = tpu.matmul %441, %442, %cst_157 {dimension_numbers = #tpu.dot_dimension_numbers<[1], [0], [0], [1], [0, 0, 1, 1], [], []>} : vector<2x32xf32>, vector<32x144xf32>, vector<2x144xf32> -> vector<2x144xf32>
    %444 = vector.extract_strided_slice %443 {offsets = [0, 128], sizes = [2, 16], strides = [1, 1]} : vector<2x144xf32> to vector<2x16xf32>
    %445 = vector.extract_strided_slice %443 {offsets = [0, 0], sizes = [2, 96], strides = [1, 1]} : vector<2x144xf32> to vector<2x96xf32>
    %c0_158 = arith.constant 0 : index
    %c0_159 = arith.constant 0 : index
    %446 = vector.load %arg11[%c0_158, %c0_159] : memref<1x96xf32, #tpu.memory_space<vmem>>, vector<1x96xf32>
    %447 = vector.broadcast %446 : vector<1x96xf32> to vector<2x96xf32>
    %448 = arith.addf %445, %447 : vector<2x96xf32>
    %449 = vector.extract_strided_slice %85 {offsets = [0, 0], sizes = [2, 32], strides = [1, 1]} : vector<2x96xf32> to vector<2x32xf32>
    %450 = vector.extract_strided_slice %448 {offsets = [0, 0], sizes = [2, 32], strides = [1, 1]} : vector<2x96xf32> to vector<2x32xf32>
    %451 = arith.addf %449, %450 : vector<2x32xf32>
    %cst_160 = arith.constant 5.000000e-01 : f32
    %452 = vector.broadcast %cst_160 : f32 to vector<2x32xf32>
    %453 = arith.mulf %452, %451 : vector<2x32xf32>
    %454 = math.tanh %453 : vector<2x32xf32>
    %cst_161 = arith.constant 5.000000e-01 : f32
    %455 = vector.broadcast %cst_161 : f32 to vector<2x32xf32>
    %456 = arith.mulf %455, %454 : vector<2x32xf32>
    %cst_162 = arith.constant 5.000000e-01 : f32
    %457 = vector.broadcast %cst_162 : f32 to vector<2x32xf32>
    %458 = arith.addf %456, %457 : vector<2x32xf32>
    %459 = vector.extract_strided_slice %85 {offsets = [0, 32], sizes = [2, 32], strides = [1, 1]} : vector<2x96xf32> to vector<2x32xf32>
    %460 = vector.extract_strided_slice %448 {offsets = [0, 32], sizes = [2, 32], strides = [1, 1]} : vector<2x96xf32> to vector<2x32xf32>
    %461 = arith.addf %459, %460 : vector<2x32xf32>
    %cst_163 = arith.constant 5.000000e-01 : f32
    %462 = vector.broadcast %cst_163 : f32 to vector<2x32xf32>
    %463 = arith.mulf %462, %461 : vector<2x32xf32>
    %464 = math.tanh %463 : vector<2x32xf32>
    %cst_164 = arith.constant 5.000000e-01 : f32
    %465 = vector.broadcast %cst_164 : f32 to vector<2x32xf32>
    %466 = arith.mulf %465, %464 : vector<2x32xf32>
    %cst_165 = arith.constant 5.000000e-01 : f32
    %467 = vector.broadcast %cst_165 : f32 to vector<2x32xf32>
    %468 = arith.addf %466, %467 : vector<2x32xf32>
    %469 = vector.extract_strided_slice %85 {offsets = [0, 64], sizes = [2, 32], strides = [1, 1]} : vector<2x96xf32> to vector<2x32xf32>
    %470 = vector.extract_strided_slice %448 {offsets = [0, 64], sizes = [2, 32], strides = [1, 1]} : vector<2x96xf32> to vector<2x32xf32>
    %471 = arith.mulf %458, %470 : vector<2x32xf32>
    %472 = arith.addf %469, %471 : vector<2x32xf32>
    %473 = math.tanh %472 : vector<2x32xf32>
    %cst_166 = arith.constant 1.000000e+00 : f32
    %474 = vector.broadcast %cst_166 : f32 to vector<2x32xf32>
    %475 = arith.subf %474, %468 : vector<2x32xf32>
    %476 = arith.mulf %475, %473 : vector<2x32xf32>
    %477 = arith.mulf %468, %441 : vector<2x32xf32>
    %478 = arith.addf %476, %477 : vector<2x32xf32>
    %c0_167 = arith.constant 0 : index
    %c0_168 = arith.constant 0 : index
    %479 = vector.load %arg9[%c0_167, %c0_168] : memref<32x144xf32, #tpu.memory_space<vmem>>, vector<32x144xf32>
    %cst_169 = arith.constant dense<0.000000e+00> : vector<2x144xf32>
    %480 = tpu.matmul %478, %479, %cst_169 {dimension_numbers = #tpu.dot_dimension_numbers<[1], [0], [0], [1], [0, 0, 1, 1], [], []>} : vector<2x32xf32>, vector<32x144xf32>, vector<2x144xf32> -> vector<2x144xf32>
    %481 = vector.extract_strided_slice %480 {offsets = [0, 128], sizes = [2, 16], strides = [1, 1]} : vector<2x144xf32> to vector<2x16xf32>
    %482 = vector.extract_strided_slice %480 {offsets = [0, 0], sizes = [2, 96], strides = [1, 1]} : vector<2x144xf32> to vector<2x96xf32>
    %c0_170 = arith.constant 0 : index
    %c0_171 = arith.constant 0 : index
    %483 = vector.load %arg11[%c0_170, %c0_171] : memref<1x96xf32, #tpu.memory_space<vmem>>, vector<1x96xf32>
    %484 = vector.broadcast %483 : vector<1x96xf32> to vector<2x96xf32>
    %485 = arith.addf %482, %484 : vector<2x96xf32>
    %486 = vector.extract_strided_slice %88 {offsets = [0, 0], sizes = [2, 32], strides = [1, 1]} : vector<2x96xf32> to vector<2x32xf32>
    %487 = vector.extract_strided_slice %485 {offsets = [0, 0], sizes = [2, 32], strides = [1, 1]} : vector<2x96xf32> to vector<2x32xf32>
    %488 = arith.addf %486, %487 : vector<2x32xf32>
    %cst_172 = arith.constant 5.000000e-01 : f32
    %489 = vector.broadcast %cst_172 : f32 to vector<2x32xf32>
    %490 = arith.mulf %489, %488 : vector<2x32xf32>
    %491 = math.tanh %490 : vector<2x32xf32>
    %cst_173 = arith.constant 5.000000e-01 : f32
    %492 = vector.broadcast %cst_173 : f32 to vector<2x32xf32>
    %493 = arith.mulf %492, %491 : vector<2x32xf32>
    %cst_174 = arith.constant 5.000000e-01 : f32
    %494 = vector.broadcast %cst_174 : f32 to vector<2x32xf32>
    %495 = arith.addf %493, %494 : vector<2x32xf32>
    %496 = vector.extract_strided_slice %88 {offsets = [0, 32], sizes = [2, 32], strides = [1, 1]} : vector<2x96xf32> to vector<2x32xf32>
    %497 = vector.extract_strided_slice %485 {offsets = [0, 32], sizes = [2, 32], strides = [1, 1]} : vector<2x96xf32> to vector<2x32xf32>
    %498 = arith.addf %496, %497 : vector<2x32xf32>
    %cst_175 = arith.constant 5.000000e-01 : f32
    %499 = vector.broadcast %cst_175 : f32 to vector<2x32xf32>
    %500 = arith.mulf %499, %498 : vector<2x32xf32>
    %501 = math.tanh %500 : vector<2x32xf32>
    %cst_176 = arith.constant 5.000000e-01 : f32
    %502 = vector.broadcast %cst_176 : f32 to vector<2x32xf32>
    %503 = arith.mulf %502, %501 : vector<2x32xf32>
    %cst_177 = arith.constant 5.000000e-01 : f32
    %504 = vector.broadcast %cst_177 : f32 to vector<2x32xf32>
    %505 = arith.addf %503, %504 : vector<2x32xf32>
    %506 = vector.extract_strided_slice %88 {offsets = [0, 64], sizes = [2, 32], strides = [1, 1]} : vector<2x96xf32> to vector<2x32xf32>
    %507 = vector.extract_strided_slice %485 {offsets = [0, 64], sizes = [2, 32], strides = [1, 1]} : vector<2x96xf32> to vector<2x32xf32>
    %508 = arith.mulf %495, %507 : vector<2x32xf32>
    %509 = arith.addf %506, %508 : vector<2x32xf32>
    %510 = math.tanh %509 : vector<2x32xf32>
    %cst_178 = arith.constant 1.000000e+00 : f32
    %511 = vector.broadcast %cst_178 : f32 to vector<2x32xf32>
    %512 = arith.subf %511, %505 : vector<2x32xf32>
    %513 = arith.mulf %512, %510 : vector<2x32xf32>
    %514 = arith.mulf %505, %478 : vector<2x32xf32>
    %515 = arith.addf %513, %514 : vector<2x32xf32>
    %c0_179 = arith.constant 0 : index
    %c0_180 = arith.constant 0 : index
    %516 = vector.load %arg9[%c0_179, %c0_180] : memref<32x144xf32, #tpu.memory_space<vmem>>, vector<32x144xf32>
    %cst_181 = arith.constant dense<0.000000e+00> : vector<2x144xf32>
    %517 = tpu.matmul %515, %516, %cst_181 {dimension_numbers = #tpu.dot_dimension_numbers<[1], [0], [0], [1], [0, 0, 1, 1], [], []>} : vector<2x32xf32>, vector<32x144xf32>, vector<2x144xf32> -> vector<2x144xf32>
    %518 = vector.extract_strided_slice %517 {offsets = [0, 128], sizes = [2, 16], strides = [1, 1]} : vector<2x144xf32> to vector<2x16xf32>
    %519 = vector.extract_strided_slice %517 {offsets = [0, 0], sizes = [2, 96], strides = [1, 1]} : vector<2x144xf32> to vector<2x96xf32>
    %c0_182 = arith.constant 0 : index
    %c0_183 = arith.constant 0 : index
    %520 = vector.load %arg11[%c0_182, %c0_183] : memref<1x96xf32, #tpu.memory_space<vmem>>, vector<1x96xf32>
    %521 = vector.broadcast %520 : vector<1x96xf32> to vector<2x96xf32>
    %522 = arith.addf %519, %521 : vector<2x96xf32>
    %523 = vector.extract_strided_slice %91 {offsets = [0, 0], sizes = [2, 32], strides = [1, 1]} : vector<2x96xf32> to vector<2x32xf32>
    %524 = vector.extract_strided_slice %522 {offsets = [0, 0], sizes = [2, 32], strides = [1, 1]} : vector<2x96xf32> to vector<2x32xf32>
    %525 = arith.addf %523, %524 : vector<2x32xf32>
    %cst_184 = arith.constant 5.000000e-01 : f32
    %526 = vector.broadcast %cst_184 : f32 to vector<2x32xf32>
    %527 = arith.mulf %526, %525 : vector<2x32xf32>
    %528 = math.tanh %527 : vector<2x32xf32>
    %cst_185 = arith.constant 5.000000e-01 : f32
    %529 = vector.broadcast %cst_185 : f32 to vector<2x32xf32>
    %530 = arith.mulf %529, %528 : vector<2x32xf32>
    %cst_186 = arith.constant 5.000000e-01 : f32
    %531 = vector.broadcast %cst_186 : f32 to vector<2x32xf32>
    %532 = arith.addf %530, %531 : vector<2x32xf32>
    %533 = vector.extract_strided_slice %91 {offsets = [0, 32], sizes = [2, 32], strides = [1, 1]} : vector<2x96xf32> to vector<2x32xf32>
    %534 = vector.extract_strided_slice %522 {offsets = [0, 32], sizes = [2, 32], strides = [1, 1]} : vector<2x96xf32> to vector<2x32xf32>
    %535 = arith.addf %533, %534 : vector<2x32xf32>
    %cst_187 = arith.constant 5.000000e-01 : f32
    %536 = vector.broadcast %cst_187 : f32 to vector<2x32xf32>
    %537 = arith.mulf %536, %535 : vector<2x32xf32>
    %538 = math.tanh %537 : vector<2x32xf32>
    %cst_188 = arith.constant 5.000000e-01 : f32
    %539 = vector.broadcast %cst_188 : f32 to vector<2x32xf32>
    %540 = arith.mulf %539, %538 : vector<2x32xf32>
    %cst_189 = arith.constant 5.000000e-01 : f32
    %541 = vector.broadcast %cst_189 : f32 to vector<2x32xf32>
    %542 = arith.addf %540, %541 : vector<2x32xf32>
    %543 = vector.extract_strided_slice %91 {offsets = [0, 64], sizes = [2, 32], strides = [1, 1]} : vector<2x96xf32> to vector<2x32xf32>
    %544 = vector.extract_strided_slice %522 {offsets = [0, 64], sizes = [2, 32], strides = [1, 1]} : vector<2x96xf32> to vector<2x32xf32>
    %545 = arith.mulf %532, %544 : vector<2x32xf32>
    %546 = arith.addf %543, %545 : vector<2x32xf32>
    %547 = math.tanh %546 : vector<2x32xf32>
    %cst_190 = arith.constant 1.000000e+00 : f32
    %548 = vector.broadcast %cst_190 : f32 to vector<2x32xf32>
    %549 = arith.subf %548, %542 : vector<2x32xf32>
    %550 = arith.mulf %549, %547 : vector<2x32xf32>
    %551 = arith.mulf %542, %515 : vector<2x32xf32>
    %552 = arith.addf %550, %551 : vector<2x32xf32>
    %c0_191 = arith.constant 0 : index
    %c0_192 = arith.constant 0 : index
    %553 = vector.load %arg9[%c0_191, %c0_192] : memref<32x144xf32, #tpu.memory_space<vmem>>, vector<32x144xf32>
    %cst_193 = arith.constant dense<0.000000e+00> : vector<2x144xf32>
    %554 = tpu.matmul %552, %553, %cst_193 {dimension_numbers = #tpu.dot_dimension_numbers<[1], [0], [0], [1], [0, 0, 1, 1], [], []>} : vector<2x32xf32>, vector<32x144xf32>, vector<2x144xf32> -> vector<2x144xf32>
    %555 = vector.extract_strided_slice %554 {offsets = [0, 128], sizes = [2, 16], strides = [1, 1]} : vector<2x144xf32> to vector<2x16xf32>
    %556 = vector.extract_strided_slice %554 {offsets = [0, 0], sizes = [2, 96], strides = [1, 1]} : vector<2x144xf32> to vector<2x96xf32>
    %c0_194 = arith.constant 0 : index
    %c0_195 = arith.constant 0 : index
    %557 = vector.load %arg11[%c0_194, %c0_195] : memref<1x96xf32, #tpu.memory_space<vmem>>, vector<1x96xf32>
    %558 = vector.broadcast %557 : vector<1x96xf32> to vector<2x96xf32>
    %559 = arith.addf %556, %558 : vector<2x96xf32>
    %560 = vector.extract_strided_slice %94 {offsets = [0, 0], sizes = [2, 32], strides = [1, 1]} : vector<2x96xf32> to vector<2x32xf32>
    %561 = vector.extract_strided_slice %559 {offsets = [0, 0], sizes = [2, 32], strides = [1, 1]} : vector<2x96xf32> to vector<2x32xf32>
    %562 = arith.addf %560, %561 : vector<2x32xf32>
    %cst_196 = arith.constant 5.000000e-01 : f32
    %563 = vector.broadcast %cst_196 : f32 to vector<2x32xf32>
    %564 = arith.mulf %563, %562 : vector<2x32xf32>
    %565 = math.tanh %564 : vector<2x32xf32>
    %cst_197 = arith.constant 5.000000e-01 : f32
    %566 = vector.broadcast %cst_197 : f32 to vector<2x32xf32>
    %567 = arith.mulf %566, %565 : vector<2x32xf32>
    %cst_198 = arith.constant 5.000000e-01 : f32
    %568 = vector.broadcast %cst_198 : f32 to vector<2x32xf32>
    %569 = arith.addf %567, %568 : vector<2x32xf32>
    %570 = vector.extract_strided_slice %94 {offsets = [0, 32], sizes = [2, 32], strides = [1, 1]} : vector<2x96xf32> to vector<2x32xf32>
    %571 = vector.extract_strided_slice %559 {offsets = [0, 32], sizes = [2, 32], strides = [1, 1]} : vector<2x96xf32> to vector<2x32xf32>
    %572 = arith.addf %570, %571 : vector<2x32xf32>
    %cst_199 = arith.constant 5.000000e-01 : f32
    %573 = vector.broadcast %cst_199 : f32 to vector<2x32xf32>
    %574 = arith.mulf %573, %572 : vector<2x32xf32>
    %575 = math.tanh %574 : vector<2x32xf32>
    %cst_200 = arith.constant 5.000000e-01 : f32
    %576 = vector.broadcast %cst_200 : f32 to vector<2x32xf32>
    %577 = arith.mulf %576, %575 : vector<2x32xf32>
    %cst_201 = arith.constant 5.000000e-01 : f32
    %578 = vector.broadcast %cst_201 : f32 to vector<2x32xf32>
    %579 = arith.addf %577, %578 : vector<2x32xf32>
    %580 = vector.extract_strided_slice %94 {offsets = [0, 64], sizes = [2, 32], strides = [1, 1]} : vector<2x96xf32> to vector<2x32xf32>
    %581 = vector.extract_strided_slice %559 {offsets = [0, 64], sizes = [2, 32], strides = [1, 1]} : vector<2x96xf32> to vector<2x32xf32>
    %582 = arith.mulf %569, %581 : vector<2x32xf32>
    %583 = arith.addf %580, %582 : vector<2x32xf32>
    %584 = math.tanh %583 : vector<2x32xf32>
    %cst_202 = arith.constant 1.000000e+00 : f32
    %585 = vector.broadcast %cst_202 : f32 to vector<2x32xf32>
    %586 = arith.subf %585, %579 : vector<2x32xf32>
    %587 = arith.mulf %586, %584 : vector<2x32xf32>
    %588 = arith.mulf %579, %552 : vector<2x32xf32>
    %589 = arith.addf %587, %588 : vector<2x32xf32>
    %c0_203 = arith.constant 0 : index
    %c0_204 = arith.constant 0 : index
    %590 = vector.load %arg9[%c0_203, %c0_204] : memref<32x144xf32, #tpu.memory_space<vmem>>, vector<32x144xf32>
    %cst_205 = arith.constant dense<0.000000e+00> : vector<2x144xf32>
    %591 = tpu.matmul %589, %590, %cst_205 {dimension_numbers = #tpu.dot_dimension_numbers<[1], [0], [0], [1], [0, 0, 1, 1], [], []>} : vector<2x32xf32>, vector<32x144xf32>, vector<2x144xf32> -> vector<2x144xf32>
    %592 = vector.extract_strided_slice %591 {offsets = [0, 128], sizes = [2, 16], strides = [1, 1]} : vector<2x144xf32> to vector<2x16xf32>
    %593 = vector.extract_strided_slice %591 {offsets = [0, 0], sizes = [2, 96], strides = [1, 1]} : vector<2x144xf32> to vector<2x96xf32>
    %c0_206 = arith.constant 0 : index
    %c0_207 = arith.constant 0 : index
    %594 = vector.load %arg11[%c0_206, %c0_207] : memref<1x96xf32, #tpu.memory_space<vmem>>, vector<1x96xf32>
    %595 = vector.broadcast %594 : vector<1x96xf32> to vector<2x96xf32>
    %596 = arith.addf %593, %595 : vector<2x96xf32>
    %597 = vector.extract_strided_slice %97 {offsets = [0, 0], sizes = [2, 32], strides = [1, 1]} : vector<2x96xf32> to vector<2x32xf32>
    %598 = vector.extract_strided_slice %596 {offsets = [0, 0], sizes = [2, 32], strides = [1, 1]} : vector<2x96xf32> to vector<2x32xf32>
    %599 = arith.addf %597, %598 : vector<2x32xf32>
    %cst_208 = arith.constant 5.000000e-01 : f32
    %600 = vector.broadcast %cst_208 : f32 to vector<2x32xf32>
    %601 = arith.mulf %600, %599 : vector<2x32xf32>
    %602 = math.tanh %601 : vector<2x32xf32>
    %cst_209 = arith.constant 5.000000e-01 : f32
    %603 = vector.broadcast %cst_209 : f32 to vector<2x32xf32>
    %604 = arith.mulf %603, %602 : vector<2x32xf32>
    %cst_210 = arith.constant 5.000000e-01 : f32
    %605 = vector.broadcast %cst_210 : f32 to vector<2x32xf32>
    %606 = arith.addf %604, %605 : vector<2x32xf32>
    %607 = vector.extract_strided_slice %97 {offsets = [0, 32], sizes = [2, 32], strides = [1, 1]} : vector<2x96xf32> to vector<2x32xf32>
    %608 = vector.extract_strided_slice %596 {offsets = [0, 32], sizes = [2, 32], strides = [1, 1]} : vector<2x96xf32> to vector<2x32xf32>
    %609 = arith.addf %607, %608 : vector<2x32xf32>
    %cst_211 = arith.constant 5.000000e-01 : f32
    %610 = vector.broadcast %cst_211 : f32 to vector<2x32xf32>
    %611 = arith.mulf %610, %609 : vector<2x32xf32>
    %612 = math.tanh %611 : vector<2x32xf32>
    %cst_212 = arith.constant 5.000000e-01 : f32
    %613 = vector.broadcast %cst_212 : f32 to vector<2x32xf32>
    %614 = arith.mulf %613, %612 : vector<2x32xf32>
    %cst_213 = arith.constant 5.000000e-01 : f32
    %615 = vector.broadcast %cst_213 : f32 to vector<2x32xf32>
    %616 = arith.addf %614, %615 : vector<2x32xf32>
    %617 = vector.extract_strided_slice %97 {offsets = [0, 64], sizes = [2, 32], strides = [1, 1]} : vector<2x96xf32> to vector<2x32xf32>
    %618 = vector.extract_strided_slice %596 {offsets = [0, 64], sizes = [2, 32], strides = [1, 1]} : vector<2x96xf32> to vector<2x32xf32>
    %619 = arith.mulf %606, %618 : vector<2x32xf32>
    %620 = arith.addf %617, %619 : vector<2x32xf32>
    %621 = math.tanh %620 : vector<2x32xf32>
    %cst_214 = arith.constant 1.000000e+00 : f32
    %622 = vector.broadcast %cst_214 : f32 to vector<2x32xf32>
    %623 = arith.subf %622, %616 : vector<2x32xf32>
    %624 = arith.mulf %623, %621 : vector<2x32xf32>
    %625 = arith.mulf %616, %589 : vector<2x32xf32>
    %626 = arith.addf %624, %625 : vector<2x32xf32>
    %c0_215 = arith.constant 0 : index
    %c0_216 = arith.constant 0 : index
    %627 = vector.load %arg9[%c0_215, %c0_216] : memref<32x144xf32, #tpu.memory_space<vmem>>, vector<32x144xf32>
    %cst_217 = arith.constant dense<0.000000e+00> : vector<2x144xf32>
    %628 = tpu.matmul %626, %627, %cst_217 {dimension_numbers = #tpu.dot_dimension_numbers<[1], [0], [0], [1], [0, 0, 1, 1], [], []>} : vector<2x32xf32>, vector<32x144xf32>, vector<2x144xf32> -> vector<2x144xf32>
    %629 = vector.extract_strided_slice %628 {offsets = [0, 128], sizes = [2, 16], strides = [1, 1]} : vector<2x144xf32> to vector<2x16xf32>
    %630 = vector.extract_strided_slice %628 {offsets = [0, 0], sizes = [2, 96], strides = [1, 1]} : vector<2x144xf32> to vector<2x96xf32>
    %c0_218 = arith.constant 0 : index
    %c0_219 = arith.constant 0 : index
    %631 = vector.load %arg11[%c0_218, %c0_219] : memref<1x96xf32, #tpu.memory_space<vmem>>, vector<1x96xf32>
    %632 = vector.broadcast %631 : vector<1x96xf32> to vector<2x96xf32>
    %633 = arith.addf %630, %632 : vector<2x96xf32>
    %634 = vector.extract_strided_slice %100 {offsets = [0, 0], sizes = [2, 32], strides = [1, 1]} : vector<2x96xf32> to vector<2x32xf32>
    %635 = vector.extract_strided_slice %633 {offsets = [0, 0], sizes = [2, 32], strides = [1, 1]} : vector<2x96xf32> to vector<2x32xf32>
    %636 = arith.addf %634, %635 : vector<2x32xf32>
    %cst_220 = arith.constant 5.000000e-01 : f32
    %637 = vector.broadcast %cst_220 : f32 to vector<2x32xf32>
    %638 = arith.mulf %637, %636 : vector<2x32xf32>
    %639 = math.tanh %638 : vector<2x32xf32>
    %cst_221 = arith.constant 5.000000e-01 : f32
    %640 = vector.broadcast %cst_221 : f32 to vector<2x32xf32>
    %641 = arith.mulf %640, %639 : vector<2x32xf32>
    %cst_222 = arith.constant 5.000000e-01 : f32
    %642 = vector.broadcast %cst_222 : f32 to vector<2x32xf32>
    %643 = arith.addf %641, %642 : vector<2x32xf32>
    %644 = vector.extract_strided_slice %100 {offsets = [0, 32], sizes = [2, 32], strides = [1, 1]} : vector<2x96xf32> to vector<2x32xf32>
    %645 = vector.extract_strided_slice %633 {offsets = [0, 32], sizes = [2, 32], strides = [1, 1]} : vector<2x96xf32> to vector<2x32xf32>
    %646 = arith.addf %644, %645 : vector<2x32xf32>
    %cst_223 = arith.constant 5.000000e-01 : f32
    %647 = vector.broadcast %cst_223 : f32 to vector<2x32xf32>
    %648 = arith.mulf %647, %646 : vector<2x32xf32>
    %649 = math.tanh %648 : vector<2x32xf32>
    %cst_224 = arith.constant 5.000000e-01 : f32
    %650 = vector.broadcast %cst_224 : f32 to vector<2x32xf32>
    %651 = arith.mulf %650, %649 : vector<2x32xf32>
    %cst_225 = arith.constant 5.000000e-01 : f32
    %652 = vector.broadcast %cst_225 : f32 to vector<2x32xf32>
    %653 = arith.addf %651, %652 : vector<2x32xf32>
    %654 = vector.extract_strided_slice %100 {offsets = [0, 64], sizes = [2, 32], strides = [1, 1]} : vector<2x96xf32> to vector<2x32xf32>
    %655 = vector.extract_strided_slice %633 {offsets = [0, 64], sizes = [2, 32], strides = [1, 1]} : vector<2x96xf32> to vector<2x32xf32>
    %656 = arith.mulf %643, %655 : vector<2x32xf32>
    %657 = arith.addf %654, %656 : vector<2x32xf32>
    %658 = math.tanh %657 : vector<2x32xf32>
    %cst_226 = arith.constant 1.000000e+00 : f32
    %659 = vector.broadcast %cst_226 : f32 to vector<2x32xf32>
    %660 = arith.subf %659, %653 : vector<2x32xf32>
    %661 = arith.mulf %660, %658 : vector<2x32xf32>
    %662 = arith.mulf %653, %626 : vector<2x32xf32>
    %663 = arith.addf %661, %662 : vector<2x32xf32>
    %c0_227 = arith.constant 0 : index
    %c0_228 = arith.constant 0 : index
    %664 = vector.load %arg9[%c0_227, %c0_228] : memref<32x144xf32, #tpu.memory_space<vmem>>, vector<32x144xf32>
    %cst_229 = arith.constant dense<0.000000e+00> : vector<2x144xf32>
    %665 = tpu.matmul %663, %664, %cst_229 {dimension_numbers = #tpu.dot_dimension_numbers<[1], [0], [0], [1], [0, 0, 1, 1], [], []>} : vector<2x32xf32>, vector<32x144xf32>, vector<2x144xf32> -> vector<2x144xf32>
    %666 = vector.extract_strided_slice %665 {offsets = [0, 128], sizes = [2, 16], strides = [1, 1]} : vector<2x144xf32> to vector<2x16xf32>
    %667 = vector.extract_strided_slice %665 {offsets = [0, 0], sizes = [2, 96], strides = [1, 1]} : vector<2x144xf32> to vector<2x96xf32>
    %c0_230 = arith.constant 0 : index
    %c0_231 = arith.constant 0 : index
    %668 = vector.load %arg11[%c0_230, %c0_231] : memref<1x96xf32, #tpu.memory_space<vmem>>, vector<1x96xf32>
    %669 = vector.broadcast %668 : vector<1x96xf32> to vector<2x96xf32>
    %670 = arith.addf %667, %669 : vector<2x96xf32>
    %671 = vector.extract_strided_slice %103 {offsets = [0, 0], sizes = [2, 32], strides = [1, 1]} : vector<2x96xf32> to vector<2x32xf32>
    %672 = vector.extract_strided_slice %670 {offsets = [0, 0], sizes = [2, 32], strides = [1, 1]} : vector<2x96xf32> to vector<2x32xf32>
    %673 = arith.addf %671, %672 : vector<2x32xf32>
    %cst_232 = arith.constant 5.000000e-01 : f32
    %674 = vector.broadcast %cst_232 : f32 to vector<2x32xf32>
    %675 = arith.mulf %674, %673 : vector<2x32xf32>
    %676 = math.tanh %675 : vector<2x32xf32>
    %cst_233 = arith.constant 5.000000e-01 : f32
    %677 = vector.broadcast %cst_233 : f32 to vector<2x32xf32>
    %678 = arith.mulf %677, %676 : vector<2x32xf32>
    %cst_234 = arith.constant 5.000000e-01 : f32
    %679 = vector.broadcast %cst_234 : f32 to vector<2x32xf32>
    %680 = arith.addf %678, %679 : vector<2x32xf32>
    %681 = vector.extract_strided_slice %103 {offsets = [0, 32], sizes = [2, 32], strides = [1, 1]} : vector<2x96xf32> to vector<2x32xf32>
    %682 = vector.extract_strided_slice %670 {offsets = [0, 32], sizes = [2, 32], strides = [1, 1]} : vector<2x96xf32> to vector<2x32xf32>
    %683 = arith.addf %681, %682 : vector<2x32xf32>
    %cst_235 = arith.constant 5.000000e-01 : f32
    %684 = vector.broadcast %cst_235 : f32 to vector<2x32xf32>
    %685 = arith.mulf %684, %683 : vector<2x32xf32>
    %686 = math.tanh %685 : vector<2x32xf32>
    %cst_236 = arith.constant 5.000000e-01 : f32
    %687 = vector.broadcast %cst_236 : f32 to vector<2x32xf32>
    %688 = arith.mulf %687, %686 : vector<2x32xf32>
    %cst_237 = arith.constant 5.000000e-01 : f32
    %689 = vector.broadcast %cst_237 : f32 to vector<2x32xf32>
    %690 = arith.addf %688, %689 : vector<2x32xf32>
    %691 = vector.extract_strided_slice %103 {offsets = [0, 64], sizes = [2, 32], strides = [1, 1]} : vector<2x96xf32> to vector<2x32xf32>
    %692 = vector.extract_strided_slice %670 {offsets = [0, 64], sizes = [2, 32], strides = [1, 1]} : vector<2x96xf32> to vector<2x32xf32>
    %693 = arith.mulf %680, %692 : vector<2x32xf32>
    %694 = arith.addf %691, %693 : vector<2x32xf32>
    %695 = math.tanh %694 : vector<2x32xf32>
    %cst_238 = arith.constant 1.000000e+00 : f32
    %696 = vector.broadcast %cst_238 : f32 to vector<2x32xf32>
    %697 = arith.subf %696, %690 : vector<2x32xf32>
    %698 = arith.mulf %697, %695 : vector<2x32xf32>
    %699 = arith.mulf %690, %663 : vector<2x32xf32>
    %700 = arith.addf %698, %699 : vector<2x32xf32>
    %c0_239 = arith.constant 0 : index
    %c0_240 = arith.constant 0 : index
    %701 = vector.load %arg9[%c0_239, %c0_240] : memref<32x144xf32, #tpu.memory_space<vmem>>, vector<32x144xf32>
    %cst_241 = arith.constant dense<0.000000e+00> : vector<2x144xf32>
    %702 = tpu.matmul %700, %701, %cst_241 {dimension_numbers = #tpu.dot_dimension_numbers<[1], [0], [0], [1], [0, 0, 1, 1], [], []>} : vector<2x32xf32>, vector<32x144xf32>, vector<2x144xf32> -> vector<2x144xf32>
    %703 = vector.extract_strided_slice %702 {offsets = [0, 128], sizes = [2, 16], strides = [1, 1]} : vector<2x144xf32> to vector<2x16xf32>
    %704 = vector.extract_strided_slice %702 {offsets = [0, 0], sizes = [2, 96], strides = [1, 1]} : vector<2x144xf32> to vector<2x96xf32>
    %c0_242 = arith.constant 0 : index
    %c0_243 = arith.constant 0 : index
    %705 = vector.load %arg11[%c0_242, %c0_243] : memref<1x96xf32, #tpu.memory_space<vmem>>, vector<1x96xf32>
    %706 = vector.broadcast %705 : vector<1x96xf32> to vector<2x96xf32>
    %707 = arith.addf %704, %706 : vector<2x96xf32>
    %708 = vector.extract_strided_slice %106 {offsets = [0, 0], sizes = [2, 32], strides = [1, 1]} : vector<2x96xf32> to vector<2x32xf32>
    %709 = vector.extract_strided_slice %707 {offsets = [0, 0], sizes = [2, 32], strides = [1, 1]} : vector<2x96xf32> to vector<2x32xf32>
    %710 = arith.addf %708, %709 : vector<2x32xf32>
    %cst_244 = arith.constant 5.000000e-01 : f32
    %711 = vector.broadcast %cst_244 : f32 to vector<2x32xf32>
    %712 = arith.mulf %711, %710 : vector<2x32xf32>
    %713 = math.tanh %712 : vector<2x32xf32>
    %cst_245 = arith.constant 5.000000e-01 : f32
    %714 = vector.broadcast %cst_245 : f32 to vector<2x32xf32>
    %715 = arith.mulf %714, %713 : vector<2x32xf32>
    %cst_246 = arith.constant 5.000000e-01 : f32
    %716 = vector.broadcast %cst_246 : f32 to vector<2x32xf32>
    %717 = arith.addf %715, %716 : vector<2x32xf32>
    %718 = vector.extract_strided_slice %106 {offsets = [0, 32], sizes = [2, 32], strides = [1, 1]} : vector<2x96xf32> to vector<2x32xf32>
    %719 = vector.extract_strided_slice %707 {offsets = [0, 32], sizes = [2, 32], strides = [1, 1]} : vector<2x96xf32> to vector<2x32xf32>
    %720 = arith.addf %718, %719 : vector<2x32xf32>
    %cst_247 = arith.constant 5.000000e-01 : f32
    %721 = vector.broadcast %cst_247 : f32 to vector<2x32xf32>
    %722 = arith.mulf %721, %720 : vector<2x32xf32>
    %723 = math.tanh %722 : vector<2x32xf32>
    %cst_248 = arith.constant 5.000000e-01 : f32
    %724 = vector.broadcast %cst_248 : f32 to vector<2x32xf32>
    %725 = arith.mulf %724, %723 : vector<2x32xf32>
    %cst_249 = arith.constant 5.000000e-01 : f32
    %726 = vector.broadcast %cst_249 : f32 to vector<2x32xf32>
    %727 = arith.addf %725, %726 : vector<2x32xf32>
    %728 = vector.extract_strided_slice %106 {offsets = [0, 64], sizes = [2, 32], strides = [1, 1]} : vector<2x96xf32> to vector<2x32xf32>
    %729 = vector.extract_strided_slice %707 {offsets = [0, 64], sizes = [2, 32], strides = [1, 1]} : vector<2x96xf32> to vector<2x32xf32>
    %730 = arith.mulf %717, %729 : vector<2x32xf32>
    %731 = arith.addf %728, %730 : vector<2x32xf32>
    %732 = math.tanh %731 : vector<2x32xf32>
    %cst_250 = arith.constant 1.000000e+00 : f32
    %733 = vector.broadcast %cst_250 : f32 to vector<2x32xf32>
    %734 = arith.subf %733, %727 : vector<2x32xf32>
    %735 = arith.mulf %734, %732 : vector<2x32xf32>
    %736 = arith.mulf %727, %700 : vector<2x32xf32>
    %737 = arith.addf %735, %736 : vector<2x32xf32>
    %c0_251 = arith.constant 0 : index
    %c0_252 = arith.constant 0 : index
    %738 = vector.load %arg9[%c0_251, %c0_252] : memref<32x144xf32, #tpu.memory_space<vmem>>, vector<32x144xf32>
    %cst_253 = arith.constant dense<0.000000e+00> : vector<2x144xf32>
    %739 = tpu.matmul %737, %738, %cst_253 {dimension_numbers = #tpu.dot_dimension_numbers<[1], [0], [0], [1], [0, 0, 1, 1], [], []>} : vector<2x32xf32>, vector<32x144xf32>, vector<2x144xf32> -> vector<2x144xf32>
    %740 = vector.extract_strided_slice %739 {offsets = [0, 128], sizes = [2, 16], strides = [1, 1]} : vector<2x144xf32> to vector<2x16xf32>
    %741 = tpu.concatenate %148, %185, %222, %259, %296, %333, %370, %407, %444, %481, %518, %555, %592, %629, %666, %703 in 1 : vector<2x16xf32>, vector<2x16xf32>, vector<2x16xf32>, vector<2x16xf32>, vector<2x16xf32>, vector<2x16xf32>, vector<2x16xf32>, vector<2x16xf32>, vector<2x16xf32>, vector<2x16xf32>, vector<2x16xf32>, vector<2x16xf32>, vector<2x16xf32>, vector<2x16xf32>, vector<2x16xf32>, vector<2x16xf32> -> vector<2x256xf32>
    %742 = tpu.concatenate %741, %740 in 1 : vector<2x256xf32>, vector<2x16xf32> -> vector<2x272xf32>
    %743 = tpu.iota {dimensions = array<i32: 1>} : vector<1x17xi32>
    %744 = arith.sitofp %743 : vector<1x17xi32> to vector<1x17xf32>
    %c0_254 = arith.constant 0 : index
    %c0_255 = arith.constant 0 : index
    %745 = vector.load %arg13[%c0_254, %c0_255] : memref<32x400xf32, #tpu.memory_space<vmem>>, vector<32x400xf32>
    %cst_256 = arith.constant dense<0.000000e+00> : vector<2x400xf32>
    %746 = tpu.matmul %737, %745, %cst_256 {dimension_numbers = #tpu.dot_dimension_numbers<[1], [0], [0], [1], [0, 0, 1, 1], [], []>} : vector<2x32xf32>, vector<32x400xf32>, vector<2x400xf32> -> vector<2x400xf32>
    %c0_257 = arith.constant 0 : index
    %c0_258 = arith.constant 0 : index
    %747 = vector.load %arg12[%c0_257, %c0_258] : memref<32x96xf32, #tpu.memory_space<vmem>>, vector<32x96xf32>
    %cst_259 = arith.constant dense<0.000000e+00> : vector<1x96xf32>
    %748 = tpu.matmul %14, %747, %cst_259 {dimension_numbers = #tpu.dot_dimension_numbers<[1], [0], [0], [1], [0, 0, 1, 1], [], []>} : vector<1x32xf32>, vector<32x96xf32>, vector<1x96xf32> -> vector<1x96xf32>
    %c0_260 = arith.constant 0 : index
    %c0_261 = arith.constant 0 : index
    %749 = vector.load %arg14[%c0_260, %c0_261] : memref<1x96xf32, #tpu.memory_space<vmem>>, vector<1x96xf32>
    %750 = arith.addf %748, %749 : vector<1x96xf32>
    %751 = vector.shape_cast %750 : vector<1x96xf32> to vector<1x96xf32>
    %752 = vector.broadcast %751 : vector<1x96xf32> to vector<2x96xf32>
    %cst_262 = arith.constant 0.000000e+00 : f32
    %753 = vector.broadcast %cst_262 : f32 to vector<2x17xf32>
    %cst_263 = arith.constant 0.000000e+00 : f32
    %754 = vector.broadcast %cst_263 : f32 to vector<2x1xf32>
    %755 = vector.extract_strided_slice %746 {offsets = [0, 0], sizes = [2, 96], strides = [1, 1]} : vector<2x400xf32> to vector<2x96xf32>
    %c0_264 = arith.constant 0 : index
    %c0_265 = arith.constant 0 : index
    %756 = vector.load %arg15[%c0_264, %c0_265] : memref<1x96xf32, #tpu.memory_space<vmem>>, vector<1x96xf32>
    %757 = vector.broadcast %756 : vector<1x96xf32> to vector<2x96xf32>
    %758 = arith.addf %755, %757 : vector<2x96xf32>
    %759 = vector.extract_strided_slice %752 {offsets = [0, 0], sizes = [2, 32], strides = [1, 1]} : vector<2x96xf32> to vector<2x32xf32>
    %760 = vector.extract_strided_slice %758 {offsets = [0, 0], sizes = [2, 32], strides = [1, 1]} : vector<2x96xf32> to vector<2x32xf32>
    %761 = arith.addf %759, %760 : vector<2x32xf32>
    %cst_266 = arith.constant 5.000000e-01 : f32
    %762 = vector.broadcast %cst_266 : f32 to vector<2x32xf32>
    %763 = arith.mulf %762, %761 : vector<2x32xf32>
    %764 = math.tanh %763 : vector<2x32xf32>
    %cst_267 = arith.constant 5.000000e-01 : f32
    %765 = vector.broadcast %cst_267 : f32 to vector<2x32xf32>
    %766 = arith.mulf %765, %764 : vector<2x32xf32>
    %cst_268 = arith.constant 5.000000e-01 : f32
    %767 = vector.broadcast %cst_268 : f32 to vector<2x32xf32>
    %768 = arith.addf %766, %767 : vector<2x32xf32>
    %769 = vector.extract_strided_slice %752 {offsets = [0, 32], sizes = [2, 32], strides = [1, 1]} : vector<2x96xf32> to vector<2x32xf32>
    %770 = vector.extract_strided_slice %758 {offsets = [0, 32], sizes = [2, 32], strides = [1, 1]} : vector<2x96xf32> to vector<2x32xf32>
    %771 = arith.addf %769, %770 : vector<2x32xf32>
    %cst_269 = arith.constant 5.000000e-01 : f32
    %772 = vector.broadcast %cst_269 : f32 to vector<2x32xf32>
    %773 = arith.mulf %772, %771 : vector<2x32xf32>
    %774 = math.tanh %773 : vector<2x32xf32>
    %cst_270 = arith.constant 5.000000e-01 : f32
    %775 = vector.broadcast %cst_270 : f32 to vector<2x32xf32>
    %776 = arith.mulf %775, %774 : vector<2x32xf32>
    %cst_271 = arith.constant 5.000000e-01 : f32
    %777 = vector.broadcast %cst_271 : f32 to vector<2x32xf32>
    %778 = arith.addf %776, %777 : vector<2x32xf32>
    %779 = vector.extract_strided_slice %752 {offsets = [0, 64], sizes = [2, 32], strides = [1, 1]} : vector<2x96xf32> to vector<2x32xf32>
    %780 = vector.extract_strided_slice %758 {offsets = [0, 64], sizes = [2, 32], strides = [1, 1]} : vector<2x96xf32> to vector<2x32xf32>
    %781 = arith.mulf %768, %780 : vector<2x32xf32>
    %782 = arith.addf %779, %781 : vector<2x32xf32>
    %783 = math.tanh %782 : vector<2x32xf32>
    %cst_272 = arith.constant 1.000000e+00 : f32
    %784 = vector.broadcast %cst_272 : f32 to vector<2x32xf32>
    %785 = arith.subf %784, %778 : vector<2x32xf32>
    %786 = arith.mulf %785, %783 : vector<2x32xf32>
    %787 = arith.mulf %778, %737 : vector<2x32xf32>
    %788 = arith.addf %786, %787 : vector<2x32xf32>
    %c0_273 = arith.constant 0 : index
    %c0_274 = arith.constant 0 : index
    %789 = vector.load %arg13[%c0_273, %c0_274] : memref<32x400xf32, #tpu.memory_space<vmem>>, vector<32x400xf32>
    %cst_275 = arith.constant dense<0.000000e+00> : vector<2x400xf32>
    %790 = tpu.matmul %788, %789, %cst_275 {dimension_numbers = #tpu.dot_dimension_numbers<[1], [0], [0], [1], [0, 0, 1, 1], [], []>} : vector<2x32xf32>, vector<32x400xf32>, vector<2x400xf32> -> vector<2x400xf32>
    %791 = vector.extract_strided_slice %790 {offsets = [0, 128], sizes = [2, 272], strides = [1, 1]} : vector<2x400xf32> to vector<2x272xf32>
    %792 = arith.addf %742, %791 : vector<2x272xf32>
    %793 = math.tanh %792 : vector<2x272xf32>
    %c0_276 = arith.constant 0 : index
    %c0_277 = arith.constant 0 : index
    %794 = vector.load %arg16[%c0_276, %c0_277] : memref<272x17xf32, #tpu.memory_space<vmem>>, vector<272x17xf32>
    %cst_278 = arith.constant dense<0.000000e+00> : vector<2x17xf32>
    %795 = tpu.matmul %793, %794, %cst_278 {dimension_numbers = #tpu.dot_dimension_numbers<[1], [0], [0], [1], [0, 0, 1, 1], [], []>} : vector<2x272xf32>, vector<272x17xf32>, vector<2x17xf32> -> vector<2x17xf32>
    %cst_279 = arith.constant 0.000000e+00 : f32
    %796 = vector.broadcast %cst_279 : f32 to vector<2x17xf32>
    %797 = arith.maximumf %795, %796 : vector<2x17xf32>
    %cst_280 = arith.constant 1.000000e+07 : f32
    %798 = vector.broadcast %cst_280 : f32 to vector<2x17xf32>
    %799 = arith.mulf %798, %753 : vector<2x17xf32>
    %800 = arith.subf %797, %799 : vector<2x17xf32>
    %c0_281 = arith.constant 0 : index
    %c0_282 = arith.constant 0 : index
    %801 = vector.load %arg17[%c0_281, %c0_282] : memref<10x17xf32, #tpu.memory_space<vmem>>, vector<2x17xf32>
    %802 = arith.addf %800, %801 : vector<2x17xf32>
    %cst_283 = arith.constant dense<0xFF800000> : vector<2xf32>
    %803 = vector.multi_reduction <maximumf>, %802, %cst_283 [1] : vector<2x17xf32> to vector<2xf32>
    %804 = vector.shape_cast %803 : vector<2xf32> to vector<2x1xf32>
    %805 = vector.broadcast %804 : vector<2x1xf32> to vector<2x17xf32>
    %806 = arith.cmpf oge, %802, %805 : vector<2x17xf32>
    %cst_284 = arith.constant 3.400000e+01 : f32
    %807 = vector.shape_cast %744 : vector<1x17xf32> to vector<1x17xf32>
    %808 = vector.broadcast %807 : vector<1x17xf32> to vector<2x17xf32>
    %809 = vector.broadcast %cst_284 : f32 to vector<2x17xf32>
    %810 = arith.select %806, %808, %809 : vector<2x17xi1>, vector<2x17xf32>
    %cst_285 = arith.constant dense<0x7F800000> : vector<2xf32>
    %811 = vector.multi_reduction <minimumf>, %810, %cst_285 [1] : vector<2x17xf32> to vector<2xf32>
    %812 = vector.shape_cast %811 : vector<2xf32> to vector<2x1xf32>
    %cst_286 = arith.constant 5.000000e-01 : f32
    %813 = vector.broadcast %cst_286 : f32 to vector<2x1xf32>
    %814 = arith.cmpf ogt, %754, %813 : vector<2x1xf32>
    %cst_287 = arith.constant 0.000000e+00 : f32
    %815 = vector.broadcast %cst_287 : f32 to vector<2x1xf32>
    %816 = arith.select %814, %815, %812 : vector<2x1xi1>, vector<2x1xf32>
    %817 = vector.broadcast %744 : vector<1x17xf32> to vector<2x17xf32>
    %818 = vector.broadcast %816 : vector<2x1xf32> to vector<2x17xf32>
    %819 = arith.cmpf oeq, %817, %818 : vector<2x17xf32>
    %820 = arith.extui %819 : vector<2x17xi1> to vector<2x17xi32>
    %821 = arith.sitofp %820 : vector<2x17xi32> to vector<2x17xf32>
    %cst_288 = arith.constant dense<0xFF800000> : vector<2xf32>
    %822 = vector.multi_reduction <maximumf>, %800, %cst_288 [1] : vector<2x17xf32> to vector<2xf32>
    %823 = vector.shape_cast %822 : vector<2xf32> to vector<2x1xf32>
    %824 = vector.broadcast %823 : vector<2x1xf32> to vector<2x17xf32>
    %825 = arith.subf %800, %824 : vector<2x17xf32>
    %826 = math.exp %825 : vector<2x17xf32>
    %cst_289 = arith.constant dense<0.000000e+00> : vector<2xf32>
    %827 = vector.multi_reduction <add>, %826, %cst_289 [1] : vector<2x17xf32> to vector<2xf32>
    %828 = vector.shape_cast %827 : vector<2xf32> to vector<2x1xf32>
    %829 = math.log %828 : vector<2x1xf32>
    %830 = arith.addf %823, %829 : vector<2x1xf32>
    %831 = arith.mulf %800, %821 : vector<2x17xf32>
    %cst_290 = arith.constant dense<0.000000e+00> : vector<2xf32>
    %832 = vector.multi_reduction <add>, %831, %cst_290 [1] : vector<2x17xf32> to vector<2xf32>
    %833 = vector.shape_cast %832 : vector<2xf32> to vector<2x1xf32>
    %834 = arith.subf %833, %830 : vector<2x1xf32>
    %cst_291 = arith.constant 1.000000e+00 : f32
    %835 = vector.broadcast %cst_291 : f32 to vector<2x1xf32>
    %836 = arith.subf %835, %754 : vector<2x1xf32>
    %837 = arith.maximumf %753, %821 : vector<2x17xf32>
    %cst_292 = arith.constant 0.000000e+00 : f32
    %838 = vector.broadcast %cst_292 : f32 to vector<2x1xf32>
    %839 = arith.cmpf oeq, %816, %838 : vector<2x1xf32>
    %840 = arith.extui %839 : vector<2x1xi1> to vector<2x1xi32>
    %841 = arith.sitofp %840 : vector<2x1xi32> to vector<2x1xf32>
    %842 = vector.extract_strided_slice %821 {offsets = [0, 0], sizes = [1, 17], strides = [1, 1]} : vector<2x17xf32> to vector<1x17xf32>
    %cst_293 = arith.constant dense<0.000000e+00> : vector<1x96xf32>
    %843 = tpu.matmul %842, %33, %cst_293 {dimension_numbers = #tpu.dot_dimension_numbers<[1], [0], [0], [1], [0, 0, 1, 1], [], []>} : vector<1x17xf32>, vector<17x96xf32>, vector<1x96xf32> -> vector<1x96xf32>
    %844 = vector.extract_strided_slice %821 {offsets = [1, 0], sizes = [1, 17], strides = [1, 1]} : vector<2x17xf32> to vector<1x17xf32>
    %cst_294 = arith.constant dense<0.000000e+00> : vector<1x96xf32>
    %845 = tpu.matmul %844, %52, %cst_294 {dimension_numbers = #tpu.dot_dimension_numbers<[1], [0], [0], [1], [0, 0, 1, 1], [], []>} : vector<1x17xf32>, vector<17x96xf32>, vector<1x96xf32> -> vector<1x96xf32>
    %846 = tpu.concatenate %843, %845 in 0 : vector<1x96xf32>, vector<1x96xf32> -> vector<2x96xf32>
    %847 = vector.extract_strided_slice %790 {offsets = [0, 0], sizes = [2, 96], strides = [1, 1]} : vector<2x400xf32> to vector<2x96xf32>
    %c0_295 = arith.constant 0 : index
    %c0_296 = arith.constant 0 : index
    %848 = vector.load %arg15[%c0_295, %c0_296] : memref<1x96xf32, #tpu.memory_space<vmem>>, vector<1x96xf32>
    %849 = vector.broadcast %848 : vector<1x96xf32> to vector<2x96xf32>
    %850 = arith.addf %847, %849 : vector<2x96xf32>
    %851 = vector.extract_strided_slice %846 {offsets = [0, 0], sizes = [2, 32], strides = [1, 1]} : vector<2x96xf32> to vector<2x32xf32>
    %852 = vector.extract_strided_slice %850 {offsets = [0, 0], sizes = [2, 32], strides = [1, 1]} : vector<2x96xf32> to vector<2x32xf32>
    %853 = arith.addf %851, %852 : vector<2x32xf32>
    %cst_297 = arith.constant 5.000000e-01 : f32
    %854 = vector.broadcast %cst_297 : f32 to vector<2x32xf32>
    %855 = arith.mulf %854, %853 : vector<2x32xf32>
    %856 = math.tanh %855 : vector<2x32xf32>
    %cst_298 = arith.constant 5.000000e-01 : f32
    %857 = vector.broadcast %cst_298 : f32 to vector<2x32xf32>
    %858 = arith.mulf %857, %856 : vector<2x32xf32>
    %cst_299 = arith.constant 5.000000e-01 : f32
    %859 = vector.broadcast %cst_299 : f32 to vector<2x32xf32>
    %860 = arith.addf %858, %859 : vector<2x32xf32>
    %861 = vector.extract_strided_slice %846 {offsets = [0, 32], sizes = [2, 32], strides = [1, 1]} : vector<2x96xf32> to vector<2x32xf32>
    %862 = vector.extract_strided_slice %850 {offsets = [0, 32], sizes = [2, 32], strides = [1, 1]} : vector<2x96xf32> to vector<2x32xf32>
    %863 = arith.addf %861, %862 : vector<2x32xf32>
    %cst_300 = arith.constant 5.000000e-01 : f32
    %864 = vector.broadcast %cst_300 : f32 to vector<2x32xf32>
    %865 = arith.mulf %864, %863 : vector<2x32xf32>
    %866 = math.tanh %865 : vector<2x32xf32>
    %cst_301 = arith.constant 5.000000e-01 : f32
    %867 = vector.broadcast %cst_301 : f32 to vector<2x32xf32>
    %868 = arith.mulf %867, %866 : vector<2x32xf32>
    %cst_302 = arith.constant 5.000000e-01 : f32
    %869 = vector.broadcast %cst_302 : f32 to vector<2x32xf32>
    %870 = arith.addf %868, %869 : vector<2x32xf32>
    %871 = vector.extract_strided_slice %846 {offsets = [0, 64], sizes = [2, 32], strides = [1, 1]} : vector<2x96xf32> to vector<2x32xf32>
    %872 = vector.extract_strided_slice %850 {offsets = [0, 64], sizes = [2, 32], strides = [1, 1]} : vector<2x96xf32> to vector<2x32xf32>
    %873 = arith.mulf %860, %872 : vector<2x32xf32>
    %874 = arith.addf %871, %873 : vector<2x32xf32>
    %875 = math.tanh %874 : vector<2x32xf32>
    %cst_303 = arith.constant 1.000000e+00 : f32
    %876 = vector.broadcast %cst_303 : f32 to vector<2x32xf32>
    %877 = arith.subf %876, %870 : vector<2x32xf32>
    %878 = arith.mulf %877, %875 : vector<2x32xf32>
    %879 = arith.mulf %870, %788 : vector<2x32xf32>
    %880 = arith.addf %878, %879 : vector<2x32xf32>
    %c0_304 = arith.constant 0 : index
    %c0_305 = arith.constant 0 : index
    %881 = vector.load %arg13[%c0_304, %c0_305] : memref<32x400xf32, #tpu.memory_space<vmem>>, vector<32x400xf32>
    %cst_306 = arith.constant dense<0.000000e+00> : vector<2x400xf32>
    %882 = tpu.matmul %880, %881, %cst_306 {dimension_numbers = #tpu.dot_dimension_numbers<[1], [0], [0], [1], [0, 0, 1, 1], [], []>} : vector<2x32xf32>, vector<32x400xf32>, vector<2x400xf32> -> vector<2x400xf32>
    %883 = vector.extract_strided_slice %882 {offsets = [0, 128], sizes = [2, 272], strides = [1, 1]} : vector<2x400xf32> to vector<2x272xf32>
    %884 = arith.addf %742, %883 : vector<2x272xf32>
    %885 = math.tanh %884 : vector<2x272xf32>
    %c0_307 = arith.constant 0 : index
    %c0_308 = arith.constant 0 : index
    %886 = vector.load %arg16[%c0_307, %c0_308] : memref<272x17xf32, #tpu.memory_space<vmem>>, vector<272x17xf32>
    %cst_309 = arith.constant dense<0.000000e+00> : vector<2x17xf32>
    %887 = tpu.matmul %885, %886, %cst_309 {dimension_numbers = #tpu.dot_dimension_numbers<[1], [0], [0], [1], [0, 0, 1, 1], [], []>} : vector<2x272xf32>, vector<272x17xf32>, vector<2x17xf32> -> vector<2x17xf32>
    %cst_310 = arith.constant 0.000000e+00 : f32
    %888 = vector.broadcast %cst_310 : f32 to vector<2x17xf32>
    %889 = arith.maximumf %887, %888 : vector<2x17xf32>
    %cst_311 = arith.constant 1.000000e+07 : f32
    %890 = vector.broadcast %cst_311 : f32 to vector<2x17xf32>
    %891 = arith.mulf %890, %837 : vector<2x17xf32>
    %892 = arith.subf %889, %891 : vector<2x17xf32>
    %c2 = arith.constant 2 : index
    %c0_312 = arith.constant 0 : index
    %893 = vector.load %arg17[%c2, %c0_312] : memref<10x17xf32, #tpu.memory_space<vmem>>, vector<2x17xf32>
    %894 = arith.addf %892, %893 : vector<2x17xf32>
    %cst_313 = arith.constant dense<0xFF800000> : vector<2xf32>
    %895 = vector.multi_reduction <maximumf>, %894, %cst_313 [1] : vector<2x17xf32> to vector<2xf32>
    %896 = vector.shape_cast %895 : vector<2xf32> to vector<2x1xf32>
    %897 = vector.broadcast %896 : vector<2x1xf32> to vector<2x17xf32>
    %898 = arith.cmpf oge, %894, %897 : vector<2x17xf32>
    %cst_314 = arith.constant 3.400000e+01 : f32
    %899 = vector.shape_cast %744 : vector<1x17xf32> to vector<1x17xf32>
    %900 = vector.broadcast %899 : vector<1x17xf32> to vector<2x17xf32>
    %901 = vector.broadcast %cst_314 : f32 to vector<2x17xf32>
    %902 = arith.select %898, %900, %901 : vector<2x17xi1>, vector<2x17xf32>
    %cst_315 = arith.constant dense<0x7F800000> : vector<2xf32>
    %903 = vector.multi_reduction <minimumf>, %902, %cst_315 [1] : vector<2x17xf32> to vector<2xf32>
    %904 = vector.shape_cast %903 : vector<2xf32> to vector<2x1xf32>
    %cst_316 = arith.constant 5.000000e-01 : f32
    %905 = vector.broadcast %cst_316 : f32 to vector<2x1xf32>
    %906 = arith.cmpf ogt, %841, %905 : vector<2x1xf32>
    %cst_317 = arith.constant 0.000000e+00 : f32
    %907 = vector.broadcast %cst_317 : f32 to vector<2x1xf32>
    %908 = arith.select %906, %907, %904 : vector<2x1xi1>, vector<2x1xf32>
    %909 = vector.broadcast %744 : vector<1x17xf32> to vector<2x17xf32>
    %910 = vector.broadcast %908 : vector<2x1xf32> to vector<2x17xf32>
    %911 = arith.cmpf oeq, %909, %910 : vector<2x17xf32>
    %912 = arith.extui %911 : vector<2x17xi1> to vector<2x17xi32>
    %913 = arith.sitofp %912 : vector<2x17xi32> to vector<2x17xf32>
    %cst_318 = arith.constant dense<0xFF800000> : vector<2xf32>
    %914 = vector.multi_reduction <maximumf>, %892, %cst_318 [1] : vector<2x17xf32> to vector<2xf32>
    %915 = vector.shape_cast %914 : vector<2xf32> to vector<2x1xf32>
    %916 = vector.broadcast %915 : vector<2x1xf32> to vector<2x17xf32>
    %917 = arith.subf %892, %916 : vector<2x17xf32>
    %918 = math.exp %917 : vector<2x17xf32>
    %cst_319 = arith.constant dense<0.000000e+00> : vector<2xf32>
    %919 = vector.multi_reduction <add>, %918, %cst_319 [1] : vector<2x17xf32> to vector<2xf32>
    %920 = vector.shape_cast %919 : vector<2xf32> to vector<2x1xf32>
    %921 = math.log %920 : vector<2x1xf32>
    %922 = arith.addf %915, %921 : vector<2x1xf32>
    %923 = arith.mulf %892, %913 : vector<2x17xf32>
    %cst_320 = arith.constant dense<0.000000e+00> : vector<2xf32>
    %924 = vector.multi_reduction <add>, %923, %cst_320 [1] : vector<2x17xf32> to vector<2xf32>
    %925 = vector.shape_cast %924 : vector<2xf32> to vector<2x1xf32>
    %926 = arith.subf %925, %922 : vector<2x1xf32>
    %cst_321 = arith.constant 1.000000e+00 : f32
    %927 = vector.broadcast %cst_321 : f32 to vector<2x1xf32>
    %928 = arith.subf %927, %841 : vector<2x1xf32>
    %929 = arith.maximumf %837, %913 : vector<2x17xf32>
    %cst_322 = arith.constant 0.000000e+00 : f32
    %930 = vector.broadcast %cst_322 : f32 to vector<2x1xf32>
    %931 = arith.cmpf oeq, %908, %930 : vector<2x1xf32>
    %932 = arith.extui %931 : vector<2x1xi1> to vector<2x1xi32>
    %933 = arith.sitofp %932 : vector<2x1xi32> to vector<2x1xf32>
    %934 = vector.extract_strided_slice %913 {offsets = [0, 0], sizes = [1, 17], strides = [1, 1]} : vector<2x17xf32> to vector<1x17xf32>
    %cst_323 = arith.constant dense<0.000000e+00> : vector<1x96xf32>
    %935 = tpu.matmul %934, %33, %cst_323 {dimension_numbers = #tpu.dot_dimension_numbers<[1], [0], [0], [1], [0, 0, 1, 1], [], []>} : vector<1x17xf32>, vector<17x96xf32>, vector<1x96xf32> -> vector<1x96xf32>
    %936 = vector.extract_strided_slice %913 {offsets = [1, 0], sizes = [1, 17], strides = [1, 1]} : vector<2x17xf32> to vector<1x17xf32>
    %cst_324 = arith.constant dense<0.000000e+00> : vector<1x96xf32>
    %937 = tpu.matmul %936, %52, %cst_324 {dimension_numbers = #tpu.dot_dimension_numbers<[1], [0], [0], [1], [0, 0, 1, 1], [], []>} : vector<1x17xf32>, vector<17x96xf32>, vector<1x96xf32> -> vector<1x96xf32>
    %938 = tpu.concatenate %935, %937 in 0 : vector<1x96xf32>, vector<1x96xf32> -> vector<2x96xf32>
    %939 = vector.extract_strided_slice %882 {offsets = [0, 0], sizes = [2, 96], strides = [1, 1]} : vector<2x400xf32> to vector<2x96xf32>
    %c0_325 = arith.constant 0 : index
    %c0_326 = arith.constant 0 : index
    %940 = vector.load %arg15[%c0_325, %c0_326] : memref<1x96xf32, #tpu.memory_space<vmem>>, vector<1x96xf32>
    %941 = vector.broadcast %940 : vector<1x96xf32> to vector<2x96xf32>
    %942 = arith.addf %939, %941 : vector<2x96xf32>
    %943 = vector.extract_strided_slice %938 {offsets = [0, 0], sizes = [2, 32], strides = [1, 1]} : vector<2x96xf32> to vector<2x32xf32>
    %944 = vector.extract_strided_slice %942 {offsets = [0, 0], sizes = [2, 32], strides = [1, 1]} : vector<2x96xf32> to vector<2x32xf32>
    %945 = arith.addf %943, %944 : vector<2x32xf32>
    %cst_327 = arith.constant 5.000000e-01 : f32
    %946 = vector.broadcast %cst_327 : f32 to vector<2x32xf32>
    %947 = arith.mulf %946, %945 : vector<2x32xf32>
    %948 = math.tanh %947 : vector<2x32xf32>
    %cst_328 = arith.constant 5.000000e-01 : f32
    %949 = vector.broadcast %cst_328 : f32 to vector<2x32xf32>
    %950 = arith.mulf %949, %948 : vector<2x32xf32>
    %cst_329 = arith.constant 5.000000e-01 : f32
    %951 = vector.broadcast %cst_329 : f32 to vector<2x32xf32>
    %952 = arith.addf %950, %951 : vector<2x32xf32>
    %953 = vector.extract_strided_slice %938 {offsets = [0, 32], sizes = [2, 32], strides = [1, 1]} : vector<2x96xf32> to vector<2x32xf32>
    %954 = vector.extract_strided_slice %942 {offsets = [0, 32], sizes = [2, 32], strides = [1, 1]} : vector<2x96xf32> to vector<2x32xf32>
    %955 = arith.addf %953, %954 : vector<2x32xf32>
    %cst_330 = arith.constant 5.000000e-01 : f32
    %956 = vector.broadcast %cst_330 : f32 to vector<2x32xf32>
    %957 = arith.mulf %956, %955 : vector<2x32xf32>
    %958 = math.tanh %957 : vector<2x32xf32>
    %cst_331 = arith.constant 5.000000e-01 : f32
    %959 = vector.broadcast %cst_331 : f32 to vector<2x32xf32>
    %960 = arith.mulf %959, %958 : vector<2x32xf32>
    %cst_332 = arith.constant 5.000000e-01 : f32
    %961 = vector.broadcast %cst_332 : f32 to vector<2x32xf32>
    %962 = arith.addf %960, %961 : vector<2x32xf32>
    %963 = vector.extract_strided_slice %938 {offsets = [0, 64], sizes = [2, 32], strides = [1, 1]} : vector<2x96xf32> to vector<2x32xf32>
    %964 = vector.extract_strided_slice %942 {offsets = [0, 64], sizes = [2, 32], strides = [1, 1]} : vector<2x96xf32> to vector<2x32xf32>
    %965 = arith.mulf %952, %964 : vector<2x32xf32>
    %966 = arith.addf %963, %965 : vector<2x32xf32>
    %967 = math.tanh %966 : vector<2x32xf32>
    %cst_333 = arith.constant 1.000000e+00 : f32
    %968 = vector.broadcast %cst_333 : f32 to vector<2x32xf32>
    %969 = arith.subf %968, %962 : vector<2x32xf32>
    %970 = arith.mulf %969, %967 : vector<2x32xf32>
    %971 = arith.mulf %962, %880 : vector<2x32xf32>
    %972 = arith.addf %970, %971 : vector<2x32xf32>
    %c0_334 = arith.constant 0 : index
    %c0_335 = arith.constant 0 : index
    %973 = vector.load %arg13[%c0_334, %c0_335] : memref<32x400xf32, #tpu.memory_space<vmem>>, vector<32x400xf32>
    %cst_336 = arith.constant dense<0.000000e+00> : vector<2x400xf32>
    %974 = tpu.matmul %972, %973, %cst_336 {dimension_numbers = #tpu.dot_dimension_numbers<[1], [0], [0], [1], [0, 0, 1, 1], [], []>} : vector<2x32xf32>, vector<32x400xf32>, vector<2x400xf32> -> vector<2x400xf32>
    %975 = vector.extract_strided_slice %974 {offsets = [0, 128], sizes = [2, 272], strides = [1, 1]} : vector<2x400xf32> to vector<2x272xf32>
    %976 = arith.addf %742, %975 : vector<2x272xf32>
    %977 = math.tanh %976 : vector<2x272xf32>
    %c0_337 = arith.constant 0 : index
    %c0_338 = arith.constant 0 : index
    %978 = vector.load %arg16[%c0_337, %c0_338] : memref<272x17xf32, #tpu.memory_space<vmem>>, vector<272x17xf32>
    %cst_339 = arith.constant dense<0.000000e+00> : vector<2x17xf32>
    %979 = tpu.matmul %977, %978, %cst_339 {dimension_numbers = #tpu.dot_dimension_numbers<[1], [0], [0], [1], [0, 0, 1, 1], [], []>} : vector<2x272xf32>, vector<272x17xf32>, vector<2x17xf32> -> vector<2x17xf32>
    %cst_340 = arith.constant 0.000000e+00 : f32
    %980 = vector.broadcast %cst_340 : f32 to vector<2x17xf32>
    %981 = arith.maximumf %979, %980 : vector<2x17xf32>
    %cst_341 = arith.constant 1.000000e+07 : f32
    %982 = vector.broadcast %cst_341 : f32 to vector<2x17xf32>
    %983 = arith.mulf %982, %929 : vector<2x17xf32>
    %984 = arith.subf %981, %983 : vector<2x17xf32>
    %c4 = arith.constant 4 : index
    %c0_342 = arith.constant 0 : index
    %985 = vector.load %arg17[%c4, %c0_342] : memref<10x17xf32, #tpu.memory_space<vmem>>, vector<2x17xf32>
    %986 = arith.addf %984, %985 : vector<2x17xf32>
    %cst_343 = arith.constant dense<0xFF800000> : vector<2xf32>
    %987 = vector.multi_reduction <maximumf>, %986, %cst_343 [1] : vector<2x17xf32> to vector<2xf32>
    %988 = vector.shape_cast %987 : vector<2xf32> to vector<2x1xf32>
    %989 = vector.broadcast %988 : vector<2x1xf32> to vector<2x17xf32>
    %990 = arith.cmpf oge, %986, %989 : vector<2x17xf32>
    %cst_344 = arith.constant 3.400000e+01 : f32
    %991 = vector.shape_cast %744 : vector<1x17xf32> to vector<1x17xf32>
    %992 = vector.broadcast %991 : vector<1x17xf32> to vector<2x17xf32>
    %993 = vector.broadcast %cst_344 : f32 to vector<2x17xf32>
    %994 = arith.select %990, %992, %993 : vector<2x17xi1>, vector<2x17xf32>
    %cst_345 = arith.constant dense<0x7F800000> : vector<2xf32>
    %995 = vector.multi_reduction <minimumf>, %994, %cst_345 [1] : vector<2x17xf32> to vector<2xf32>
    %996 = vector.shape_cast %995 : vector<2xf32> to vector<2x1xf32>
    %cst_346 = arith.constant 5.000000e-01 : f32
    %997 = vector.broadcast %cst_346 : f32 to vector<2x1xf32>
    %998 = arith.cmpf ogt, %933, %997 : vector<2x1xf32>
    %cst_347 = arith.constant 0.000000e+00 : f32
    %999 = vector.broadcast %cst_347 : f32 to vector<2x1xf32>
    %1000 = arith.select %998, %999, %996 : vector<2x1xi1>, vector<2x1xf32>
    %1001 = vector.broadcast %744 : vector<1x17xf32> to vector<2x17xf32>
    %1002 = vector.broadcast %1000 : vector<2x1xf32> to vector<2x17xf32>
    %1003 = arith.cmpf oeq, %1001, %1002 : vector<2x17xf32>
    %1004 = arith.extui %1003 : vector<2x17xi1> to vector<2x17xi32>
    %1005 = arith.sitofp %1004 : vector<2x17xi32> to vector<2x17xf32>
    %cst_348 = arith.constant dense<0xFF800000> : vector<2xf32>
    %1006 = vector.multi_reduction <maximumf>, %984, %cst_348 [1] : vector<2x17xf32> to vector<2xf32>
    %1007 = vector.shape_cast %1006 : vector<2xf32> to vector<2x1xf32>
    %1008 = vector.broadcast %1007 : vector<2x1xf32> to vector<2x17xf32>
    %1009 = arith.subf %984, %1008 : vector<2x17xf32>
    %1010 = math.exp %1009 : vector<2x17xf32>
    %cst_349 = arith.constant dense<0.000000e+00> : vector<2xf32>
    %1011 = vector.multi_reduction <add>, %1010, %cst_349 [1] : vector<2x17xf32> to vector<2xf32>
    %1012 = vector.shape_cast %1011 : vector<2xf32> to vector<2x1xf32>
    %1013 = math.log %1012 : vector<2x1xf32>
    %1014 = arith.addf %1007, %1013 : vector<2x1xf32>
    %1015 = arith.mulf %984, %1005 : vector<2x17xf32>
    %cst_350 = arith.constant dense<0.000000e+00> : vector<2xf32>
    %1016 = vector.multi_reduction <add>, %1015, %cst_350 [1] : vector<2x17xf32> to vector<2xf32>
    %1017 = vector.shape_cast %1016 : vector<2xf32> to vector<2x1xf32>
    %1018 = arith.subf %1017, %1014 : vector<2x1xf32>
    %cst_351 = arith.constant 1.000000e+00 : f32
    %1019 = vector.broadcast %cst_351 : f32 to vector<2x1xf32>
    %1020 = arith.subf %1019, %933 : vector<2x1xf32>
    %1021 = arith.maximumf %929, %1005 : vector<2x17xf32>
    %cst_352 = arith.constant 0.000000e+00 : f32
    %1022 = vector.broadcast %cst_352 : f32 to vector<2x1xf32>
    %1023 = arith.cmpf oeq, %1000, %1022 : vector<2x1xf32>
    %1024 = arith.extui %1023 : vector<2x1xi1> to vector<2x1xi32>
    %1025 = arith.sitofp %1024 : vector<2x1xi32> to vector<2x1xf32>
    %1026 = vector.extract_strided_slice %1005 {offsets = [0, 0], sizes = [1, 17], strides = [1, 1]} : vector<2x17xf32> to vector<1x17xf32>
    %cst_353 = arith.constant dense<0.000000e+00> : vector<1x96xf32>
    %1027 = tpu.matmul %1026, %33, %cst_353 {dimension_numbers = #tpu.dot_dimension_numbers<[1], [0], [0], [1], [0, 0, 1, 1], [], []>} : vector<1x17xf32>, vector<17x96xf32>, vector<1x96xf32> -> vector<1x96xf32>
    %1028 = vector.extract_strided_slice %1005 {offsets = [1, 0], sizes = [1, 17], strides = [1, 1]} : vector<2x17xf32> to vector<1x17xf32>
    %cst_354 = arith.constant dense<0.000000e+00> : vector<1x96xf32>
    %1029 = tpu.matmul %1028, %52, %cst_354 {dimension_numbers = #tpu.dot_dimension_numbers<[1], [0], [0], [1], [0, 0, 1, 1], [], []>} : vector<1x17xf32>, vector<17x96xf32>, vector<1x96xf32> -> vector<1x96xf32>
    %1030 = tpu.concatenate %1027, %1029 in 0 : vector<1x96xf32>, vector<1x96xf32> -> vector<2x96xf32>
    %1031 = vector.extract_strided_slice %974 {offsets = [0, 0], sizes = [2, 96], strides = [1, 1]} : vector<2x400xf32> to vector<2x96xf32>
    %c0_355 = arith.constant 0 : index
    %c0_356 = arith.constant 0 : index
    %1032 = vector.load %arg15[%c0_355, %c0_356] : memref<1x96xf32, #tpu.memory_space<vmem>>, vector<1x96xf32>
    %1033 = vector.broadcast %1032 : vector<1x96xf32> to vector<2x96xf32>
    %1034 = arith.addf %1031, %1033 : vector<2x96xf32>
    %1035 = vector.extract_strided_slice %1030 {offsets = [0, 0], sizes = [2, 32], strides = [1, 1]} : vector<2x96xf32> to vector<2x32xf32>
    %1036 = vector.extract_strided_slice %1034 {offsets = [0, 0], sizes = [2, 32], strides = [1, 1]} : vector<2x96xf32> to vector<2x32xf32>
    %1037 = arith.addf %1035, %1036 : vector<2x32xf32>
    %cst_357 = arith.constant 5.000000e-01 : f32
    %1038 = vector.broadcast %cst_357 : f32 to vector<2x32xf32>
    %1039 = arith.mulf %1038, %1037 : vector<2x32xf32>
    %1040 = math.tanh %1039 : vector<2x32xf32>
    %cst_358 = arith.constant 5.000000e-01 : f32
    %1041 = vector.broadcast %cst_358 : f32 to vector<2x32xf32>
    %1042 = arith.mulf %1041, %1040 : vector<2x32xf32>
    %cst_359 = arith.constant 5.000000e-01 : f32
    %1043 = vector.broadcast %cst_359 : f32 to vector<2x32xf32>
    %1044 = arith.addf %1042, %1043 : vector<2x32xf32>
    %1045 = vector.extract_strided_slice %1030 {offsets = [0, 32], sizes = [2, 32], strides = [1, 1]} : vector<2x96xf32> to vector<2x32xf32>
    %1046 = vector.extract_strided_slice %1034 {offsets = [0, 32], sizes = [2, 32], strides = [1, 1]} : vector<2x96xf32> to vector<2x32xf32>
    %1047 = arith.addf %1045, %1046 : vector<2x32xf32>
    %cst_360 = arith.constant 5.000000e-01 : f32
    %1048 = vector.broadcast %cst_360 : f32 to vector<2x32xf32>
    %1049 = arith.mulf %1048, %1047 : vector<2x32xf32>
    %1050 = math.tanh %1049 : vector<2x32xf32>
    %cst_361 = arith.constant 5.000000e-01 : f32
    %1051 = vector.broadcast %cst_361 : f32 to vector<2x32xf32>
    %1052 = arith.mulf %1051, %1050 : vector<2x32xf32>
    %cst_362 = arith.constant 5.000000e-01 : f32
    %1053 = vector.broadcast %cst_362 : f32 to vector<2x32xf32>
    %1054 = arith.addf %1052, %1053 : vector<2x32xf32>
    %1055 = vector.extract_strided_slice %1030 {offsets = [0, 64], sizes = [2, 32], strides = [1, 1]} : vector<2x96xf32> to vector<2x32xf32>
    %1056 = vector.extract_strided_slice %1034 {offsets = [0, 64], sizes = [2, 32], strides = [1, 1]} : vector<2x96xf32> to vector<2x32xf32>
    %1057 = arith.mulf %1044, %1056 : vector<2x32xf32>
    %1058 = arith.addf %1055, %1057 : vector<2x32xf32>
    %1059 = math.tanh %1058 : vector<2x32xf32>
    %cst_363 = arith.constant 1.000000e+00 : f32
    %1060 = vector.broadcast %cst_363 : f32 to vector<2x32xf32>
    %1061 = arith.subf %1060, %1054 : vector<2x32xf32>
    %1062 = arith.mulf %1061, %1059 : vector<2x32xf32>
    %1063 = arith.mulf %1054, %972 : vector<2x32xf32>
    %1064 = arith.addf %1062, %1063 : vector<2x32xf32>
    %c0_364 = arith.constant 0 : index
    %c0_365 = arith.constant 0 : index
    %1065 = vector.load %arg13[%c0_364, %c0_365] : memref<32x400xf32, #tpu.memory_space<vmem>>, vector<32x400xf32>
    %cst_366 = arith.constant dense<0.000000e+00> : vector<2x400xf32>
    %1066 = tpu.matmul %1064, %1065, %cst_366 {dimension_numbers = #tpu.dot_dimension_numbers<[1], [0], [0], [1], [0, 0, 1, 1], [], []>} : vector<2x32xf32>, vector<32x400xf32>, vector<2x400xf32> -> vector<2x400xf32>
    %1067 = vector.extract_strided_slice %1066 {offsets = [0, 128], sizes = [2, 272], strides = [1, 1]} : vector<2x400xf32> to vector<2x272xf32>
    %1068 = arith.addf %742, %1067 : vector<2x272xf32>
    %1069 = math.tanh %1068 : vector<2x272xf32>
    %c0_367 = arith.constant 0 : index
    %c0_368 = arith.constant 0 : index
    %1070 = vector.load %arg16[%c0_367, %c0_368] : memref<272x17xf32, #tpu.memory_space<vmem>>, vector<272x17xf32>
    %cst_369 = arith.constant dense<0.000000e+00> : vector<2x17xf32>
    %1071 = tpu.matmul %1069, %1070, %cst_369 {dimension_numbers = #tpu.dot_dimension_numbers<[1], [0], [0], [1], [0, 0, 1, 1], [], []>} : vector<2x272xf32>, vector<272x17xf32>, vector<2x17xf32> -> vector<2x17xf32>
    %cst_370 = arith.constant 0.000000e+00 : f32
    %1072 = vector.broadcast %cst_370 : f32 to vector<2x17xf32>
    %1073 = arith.maximumf %1071, %1072 : vector<2x17xf32>
    %cst_371 = arith.constant 1.000000e+07 : f32
    %1074 = vector.broadcast %cst_371 : f32 to vector<2x17xf32>
    %1075 = arith.mulf %1074, %1021 : vector<2x17xf32>
    %1076 = arith.subf %1073, %1075 : vector<2x17xf32>
    %c6 = arith.constant 6 : index
    %c0_372 = arith.constant 0 : index
    %1077 = vector.load %arg17[%c6, %c0_372] : memref<10x17xf32, #tpu.memory_space<vmem>>, vector<2x17xf32>
    %1078 = arith.addf %1076, %1077 : vector<2x17xf32>
    %cst_373 = arith.constant dense<0xFF800000> : vector<2xf32>
    %1079 = vector.multi_reduction <maximumf>, %1078, %cst_373 [1] : vector<2x17xf32> to vector<2xf32>
    %1080 = vector.shape_cast %1079 : vector<2xf32> to vector<2x1xf32>
    %1081 = vector.broadcast %1080 : vector<2x1xf32> to vector<2x17xf32>
    %1082 = arith.cmpf oge, %1078, %1081 : vector<2x17xf32>
    %cst_374 = arith.constant 3.400000e+01 : f32
    %1083 = vector.shape_cast %744 : vector<1x17xf32> to vector<1x17xf32>
    %1084 = vector.broadcast %1083 : vector<1x17xf32> to vector<2x17xf32>
    %1085 = vector.broadcast %cst_374 : f32 to vector<2x17xf32>
    %1086 = arith.select %1082, %1084, %1085 : vector<2x17xi1>, vector<2x17xf32>
    %cst_375 = arith.constant dense<0x7F800000> : vector<2xf32>
    %1087 = vector.multi_reduction <minimumf>, %1086, %cst_375 [1] : vector<2x17xf32> to vector<2xf32>
    %1088 = vector.shape_cast %1087 : vector<2xf32> to vector<2x1xf32>
    %cst_376 = arith.constant 5.000000e-01 : f32
    %1089 = vector.broadcast %cst_376 : f32 to vector<2x1xf32>
    %1090 = arith.cmpf ogt, %1025, %1089 : vector<2x1xf32>
    %cst_377 = arith.constant 0.000000e+00 : f32
    %1091 = vector.broadcast %cst_377 : f32 to vector<2x1xf32>
    %1092 = arith.select %1090, %1091, %1088 : vector<2x1xi1>, vector<2x1xf32>
    %1093 = vector.broadcast %744 : vector<1x17xf32> to vector<2x17xf32>
    %1094 = vector.broadcast %1092 : vector<2x1xf32> to vector<2x17xf32>
    %1095 = arith.cmpf oeq, %1093, %1094 : vector<2x17xf32>
    %1096 = arith.extui %1095 : vector<2x17xi1> to vector<2x17xi32>
    %1097 = arith.sitofp %1096 : vector<2x17xi32> to vector<2x17xf32>
    %cst_378 = arith.constant dense<0xFF800000> : vector<2xf32>
    %1098 = vector.multi_reduction <maximumf>, %1076, %cst_378 [1] : vector<2x17xf32> to vector<2xf32>
    %1099 = vector.shape_cast %1098 : vector<2xf32> to vector<2x1xf32>
    %1100 = vector.broadcast %1099 : vector<2x1xf32> to vector<2x17xf32>
    %1101 = arith.subf %1076, %1100 : vector<2x17xf32>
    %1102 = math.exp %1101 : vector<2x17xf32>
    %cst_379 = arith.constant dense<0.000000e+00> : vector<2xf32>
    %1103 = vector.multi_reduction <add>, %1102, %cst_379 [1] : vector<2x17xf32> to vector<2xf32>
    %1104 = vector.shape_cast %1103 : vector<2xf32> to vector<2x1xf32>
    %1105 = math.log %1104 : vector<2x1xf32>
    %1106 = arith.addf %1099, %1105 : vector<2x1xf32>
    %1107 = arith.mulf %1076, %1097 : vector<2x17xf32>
    %cst_380 = arith.constant dense<0.000000e+00> : vector<2xf32>
    %1108 = vector.multi_reduction <add>, %1107, %cst_380 [1] : vector<2x17xf32> to vector<2xf32>
    %1109 = vector.shape_cast %1108 : vector<2xf32> to vector<2x1xf32>
    %1110 = arith.subf %1109, %1106 : vector<2x1xf32>
    %cst_381 = arith.constant 1.000000e+00 : f32
    %1111 = vector.broadcast %cst_381 : f32 to vector<2x1xf32>
    %1112 = arith.subf %1111, %1025 : vector<2x1xf32>
    %1113 = arith.maximumf %1021, %1097 : vector<2x17xf32>
    %cst_382 = arith.constant 0.000000e+00 : f32
    %1114 = vector.broadcast %cst_382 : f32 to vector<2x1xf32>
    %1115 = arith.cmpf oeq, %1092, %1114 : vector<2x1xf32>
    %1116 = arith.extui %1115 : vector<2x1xi1> to vector<2x1xi32>
    %1117 = arith.sitofp %1116 : vector<2x1xi32> to vector<2x1xf32>
    %1118 = vector.extract_strided_slice %1097 {offsets = [0, 0], sizes = [1, 17], strides = [1, 1]} : vector<2x17xf32> to vector<1x17xf32>
    %cst_383 = arith.constant dense<0.000000e+00> : vector<1x96xf32>
    %1119 = tpu.matmul %1118, %33, %cst_383 {dimension_numbers = #tpu.dot_dimension_numbers<[1], [0], [0], [1], [0, 0, 1, 1], [], []>} : vector<1x17xf32>, vector<17x96xf32>, vector<1x96xf32> -> vector<1x96xf32>
    %1120 = vector.extract_strided_slice %1097 {offsets = [1, 0], sizes = [1, 17], strides = [1, 1]} : vector<2x17xf32> to vector<1x17xf32>
    %cst_384 = arith.constant dense<0.000000e+00> : vector<1x96xf32>
    %1121 = tpu.matmul %1120, %52, %cst_384 {dimension_numbers = #tpu.dot_dimension_numbers<[1], [0], [0], [1], [0, 0, 1, 1], [], []>} : vector<1x17xf32>, vector<17x96xf32>, vector<1x96xf32> -> vector<1x96xf32>
    %1122 = tpu.concatenate %1119, %1121 in 0 : vector<1x96xf32>, vector<1x96xf32> -> vector<2x96xf32>
    %1123 = vector.extract_strided_slice %1066 {offsets = [0, 0], sizes = [2, 96], strides = [1, 1]} : vector<2x400xf32> to vector<2x96xf32>
    %c0_385 = arith.constant 0 : index
    %c0_386 = arith.constant 0 : index
    %1124 = vector.load %arg15[%c0_385, %c0_386] : memref<1x96xf32, #tpu.memory_space<vmem>>, vector<1x96xf32>
    %1125 = vector.broadcast %1124 : vector<1x96xf32> to vector<2x96xf32>
    %1126 = arith.addf %1123, %1125 : vector<2x96xf32>
    %1127 = vector.extract_strided_slice %1122 {offsets = [0, 0], sizes = [2, 32], strides = [1, 1]} : vector<2x96xf32> to vector<2x32xf32>
    %1128 = vector.extract_strided_slice %1126 {offsets = [0, 0], sizes = [2, 32], strides = [1, 1]} : vector<2x96xf32> to vector<2x32xf32>
    %1129 = arith.addf %1127, %1128 : vector<2x32xf32>
    %cst_387 = arith.constant 5.000000e-01 : f32
    %1130 = vector.broadcast %cst_387 : f32 to vector<2x32xf32>
    %1131 = arith.mulf %1130, %1129 : vector<2x32xf32>
    %1132 = math.tanh %1131 : vector<2x32xf32>
    %cst_388 = arith.constant 5.000000e-01 : f32
    %1133 = vector.broadcast %cst_388 : f32 to vector<2x32xf32>
    %1134 = arith.mulf %1133, %1132 : vector<2x32xf32>
    %cst_389 = arith.constant 5.000000e-01 : f32
    %1135 = vector.broadcast %cst_389 : f32 to vector<2x32xf32>
    %1136 = arith.addf %1134, %1135 : vector<2x32xf32>
    %1137 = vector.extract_strided_slice %1122 {offsets = [0, 32], sizes = [2, 32], strides = [1, 1]} : vector<2x96xf32> to vector<2x32xf32>
    %1138 = vector.extract_strided_slice %1126 {offsets = [0, 32], sizes = [2, 32], strides = [1, 1]} : vector<2x96xf32> to vector<2x32xf32>
    %1139 = arith.addf %1137, %1138 : vector<2x32xf32>
    %cst_390 = arith.constant 5.000000e-01 : f32
    %1140 = vector.broadcast %cst_390 : f32 to vector<2x32xf32>
    %1141 = arith.mulf %1140, %1139 : vector<2x32xf32>
    %1142 = math.tanh %1141 : vector<2x32xf32>
    %cst_391 = arith.constant 5.000000e-01 : f32
    %1143 = vector.broadcast %cst_391 : f32 to vector<2x32xf32>
    %1144 = arith.mulf %1143, %1142 : vector<2x32xf32>
    %cst_392 = arith.constant 5.000000e-01 : f32
    %1145 = vector.broadcast %cst_392 : f32 to vector<2x32xf32>
    %1146 = arith.addf %1144, %1145 : vector<2x32xf32>
    %1147 = vector.extract_strided_slice %1122 {offsets = [0, 64], sizes = [2, 32], strides = [1, 1]} : vector<2x96xf32> to vector<2x32xf32>
    %1148 = vector.extract_strided_slice %1126 {offsets = [0, 64], sizes = [2, 32], strides = [1, 1]} : vector<2x96xf32> to vector<2x32xf32>
    %1149 = arith.mulf %1136, %1148 : vector<2x32xf32>
    %1150 = arith.addf %1147, %1149 : vector<2x32xf32>
    %1151 = math.tanh %1150 : vector<2x32xf32>
    %cst_393 = arith.constant 1.000000e+00 : f32
    %1152 = vector.broadcast %cst_393 : f32 to vector<2x32xf32>
    %1153 = arith.subf %1152, %1146 : vector<2x32xf32>
    %1154 = arith.mulf %1153, %1151 : vector<2x32xf32>
    %1155 = arith.mulf %1146, %1064 : vector<2x32xf32>
    %1156 = arith.addf %1154, %1155 : vector<2x32xf32>
    %c0_394 = arith.constant 0 : index
    %c0_395 = arith.constant 0 : index
    %1157 = vector.load %arg13[%c0_394, %c0_395] : memref<32x400xf32, #tpu.memory_space<vmem>>, vector<32x400xf32>
    %cst_396 = arith.constant dense<0.000000e+00> : vector<2x400xf32>
    %1158 = tpu.matmul %1156, %1157, %cst_396 {dimension_numbers = #tpu.dot_dimension_numbers<[1], [0], [0], [1], [0, 0, 1, 1], [], []>} : vector<2x32xf32>, vector<32x400xf32>, vector<2x400xf32> -> vector<2x400xf32>
    %1159 = vector.extract_strided_slice %1158 {offsets = [0, 128], sizes = [2, 272], strides = [1, 1]} : vector<2x400xf32> to vector<2x272xf32>
    %1160 = arith.addf %742, %1159 : vector<2x272xf32>
    %1161 = math.tanh %1160 : vector<2x272xf32>
    %c0_397 = arith.constant 0 : index
    %c0_398 = arith.constant 0 : index
    %1162 = vector.load %arg16[%c0_397, %c0_398] : memref<272x17xf32, #tpu.memory_space<vmem>>, vector<272x17xf32>
    %cst_399 = arith.constant dense<0.000000e+00> : vector<2x17xf32>
    %1163 = tpu.matmul %1161, %1162, %cst_399 {dimension_numbers = #tpu.dot_dimension_numbers<[1], [0], [0], [1], [0, 0, 1, 1], [], []>} : vector<2x272xf32>, vector<272x17xf32>, vector<2x17xf32> -> vector<2x17xf32>
    %cst_400 = arith.constant 0.000000e+00 : f32
    %1164 = vector.broadcast %cst_400 : f32 to vector<2x17xf32>
    %1165 = arith.maximumf %1163, %1164 : vector<2x17xf32>
    %cst_401 = arith.constant 1.000000e+07 : f32
    %1166 = vector.broadcast %cst_401 : f32 to vector<2x17xf32>
    %1167 = arith.mulf %1166, %1113 : vector<2x17xf32>
    %1168 = arith.subf %1165, %1167 : vector<2x17xf32>
    %cst_402 = arith.constant 0.000000e+00 : f32
    %1169 = vector.broadcast %cst_402 : f32 to vector<2x1xf32>
    %1170 = vector.broadcast %744 : vector<1x17xf32> to vector<2x17xf32>
    %1171 = vector.broadcast %1169 : vector<2x1xf32> to vector<2x17xf32>
    %1172 = arith.cmpf oeq, %1170, %1171 : vector<2x17xf32>
    %1173 = arith.extui %1172 : vector<2x17xi1> to vector<2x17xi32>
    %1174 = arith.sitofp %1173 : vector<2x17xi32> to vector<2x17xf32>
    %cst_403 = arith.constant dense<0xFF800000> : vector<2xf32>
    %1175 = vector.multi_reduction <maximumf>, %1168, %cst_403 [1] : vector<2x17xf32> to vector<2xf32>
    %1176 = vector.shape_cast %1175 : vector<2xf32> to vector<2x1xf32>
    %1177 = vector.broadcast %1176 : vector<2x1xf32> to vector<2x17xf32>
    %1178 = arith.subf %1168, %1177 : vector<2x17xf32>
    %1179 = math.exp %1178 : vector<2x17xf32>
    %cst_404 = arith.constant dense<0.000000e+00> : vector<2xf32>
    %1180 = vector.multi_reduction <add>, %1179, %cst_404 [1] : vector<2x17xf32> to vector<2xf32>
    %1181 = vector.shape_cast %1180 : vector<2xf32> to vector<2x1xf32>
    %1182 = math.log %1181 : vector<2x1xf32>
    %1183 = arith.addf %1176, %1182 : vector<2x1xf32>
    %1184 = arith.mulf %1168, %1174 : vector<2x17xf32>
    %cst_405 = arith.constant dense<0.000000e+00> : vector<2xf32>
    %1185 = vector.multi_reduction <add>, %1184, %cst_405 [1] : vector<2x17xf32> to vector<2xf32>
    %1186 = vector.shape_cast %1185 : vector<2xf32> to vector<2x1xf32>
    %1187 = arith.subf %1186, %1183 : vector<2x1xf32>
    %cst_406 = arith.constant 1.000000e+00 : f32
    %1188 = vector.broadcast %cst_406 : f32 to vector<2x1xf32>
    %1189 = arith.subf %1188, %1117 : vector<2x1xf32>
    %1190 = arith.maximumf %1113, %1174 : vector<2x17xf32>
    %1191 = tpu.concatenate %816, %908, %1000, %1092, %1169 in 1 : vector<2x1xf32>, vector<2x1xf32>, vector<2x1xf32>, vector<2x1xf32>, vector<2x1xf32> -> vector<2x5xf32>
    %1192 = arith.fptosi %1191 : vector<2x5xf32> to vector<2x5xi32>
    %c0_407 = arith.constant 0 : index
    %c0_408 = arith.constant 0 : index
    %1193 = vector.load %arg18[%c0_407, %c0_408] : memref<2x5xi32, #tpu.memory_space<vmem>>, vector<2x5xi32>
    tpu.vector_store %arg18[%c0_407, %c0_408], %1192 {strides = array<i32>} : memref<2x5xi32, #tpu.memory_space<vmem>>, vector<2x5xi32>,
    %1194 = tpu.concatenate %834, %926, %1018, %1110, %1187 in 1 : vector<2x1xf32>, vector<2x1xf32>, vector<2x1xf32>, vector<2x1xf32>, vector<2x1xf32> -> vector<2x5xf32>
    %c0_409 = arith.constant 0 : index
    %c0_410 = arith.constant 0 : index
    %1195 = vector.load %arg19[%c0_409, %c0_410] : memref<2x5xf32, #tpu.memory_space<vmem>>, vector<2x5xf32>
    tpu.vector_store %arg19[%c0_409, %c0_410], %1194 {strides = array<i32>} : memref<2x5xf32, #tpu.memory_space<vmem>>, vector<2x5xf32>,
    %1196 = tpu.concatenate %836, %928, %1020, %1112, %1189 in 1 : vector<2x1xf32>, vector<2x1xf32>, vector<2x1xf32>, vector<2x1xf32>, vector<2x1xf32> -> vector<2x5xf32>
    %c0_411 = arith.constant 0 : index
    %c0_412 = arith.constant 0 : index
    %1197 = vector.load %arg20[%c0_411, %c0_412] : memref<2x5xf32, #tpu.memory_space<vmem>>, vector<2x5xf32>
    tpu.vector_store %arg20[%c0_411, %c0_412], %1196 {strides = array<i32>} : memref<2x5xf32, #tpu.memory_space<vmem>>, vector<2x5xf32>,
    %c0_413 = arith.constant 0 : index
    %c0_414 = arith.constant 0 : index
    %1198 = vector.load %arg21[%c0_413, %c0_414] : memref<2x17xf32, #tpu.memory_space<vmem>>, vector<2x17xf32>
    tpu.vector_store %arg21[%c0_413, %c0_414], %1190 {strides = array<i32>} : memref<2x17xf32, #tpu.memory_space<vmem>>, vector<2x17xf32>,
    return
  }
  func.func @transform_0(%arg0: i32) -> (i32, i32) {
    %c0_i32 = arith.constant 0 : i32
    %c0_i32_0 = arith.constant 0 : i32
    %c0_i32_1 = arith.constant 0 : i32
    return %c0_i32, %c0_i32_0 : i32, i32
  }
  func.func @transform_1(%arg0: i32) -> (i32, i32) {
    %c0_i32 = arith.constant 0 : i32
    %c0_i32_0 = arith.constant 0 : i32
    %c0_i32_1 = arith.constant 0 : i32
    return %c0_i32, %c0_i32_0 : i32, i32
  }
  func.func @transform_2(%arg0: i32) -> (i32, i32) {
    %c0_i32 = arith.constant 0 : i32
    %c0_i32_0 = arith.constant 0 : i32
    %c0_i32_1 = arith.constant 0 : i32
    return %c0_i32, %c0_i32_0 : i32, i32
  }
  func.func @transform_3(%arg0: i32) -> (i32, i32) {
    %c0_i32 = arith.constant 0 : i32
    %c0_i32_0 = arith.constant 0 : i32
    %c0_i32_1 = arith.constant 0 : i32
    return %c0_i32, %c0_i32_0 : i32, i32
  }
  func.func @transform_4(%arg0: i32) -> (i32, i32) {
    %c0_i32 = arith.constant 0 : i32
    %c0_i32_0 = arith.constant 0 : i32
    %c0_i32_1 = arith.constant 0 : i32
    return %c0_i32, %c0_i32_0 : i32, i32
  }
  func.func @transform_5(%arg0: i32) -> (i32, i32) {
    %c0_i32 = arith.constant 0 : i32
    %c0_i32_0 = arith.constant 0 : i32
    %c0_i32_1 = arith.constant 0 : i32
    return %c0_i32, %c0_i32_0 : i32, i32
  }
  func.func @transform_6(%arg0: i32) -> (i32, i32) {
    %c0_i32 = arith.constant 0 : i32
    %c0_i32_0 = arith.constant 0 : i32
    %c0_i32_1 = arith.constant 0 : i32
    return %c0_i32, %c0_i32_0 : i32, i32
  }
  func.func @transform_7(%arg0: i32) -> (i32, i32) {
    %c0_i32 = arith.constant 0 : i32
    %c0_i32_0 = arith.constant 0 : i32
    %c0_i32_1 = arith.constant 0 : i32
    return %c0_i32, %c0_i32_0 : i32, i32
  }
  func.func @transform_8(%arg0: i32) -> (i32, i32) {
    %c0_i32 = arith.constant 0 : i32
    %c0_i32_0 = arith.constant 0 : i32
    %c0_i32_1 = arith.constant 0 : i32
    return %c0_i32, %c0_i32_0 : i32, i32
  }
  func.func @transform_9(%arg0: i32) -> (i32, i32) {
    %c0_i32 = arith.constant 0 : i32
    %c0_i32_0 = arith.constant 0 : i32
    %c0_i32_1 = arith.constant 0 : i32
    return %c0_i32, %c0_i32_0 : i32, i32
  }
  func.func @transform_10(%arg0: i32) -> (i32, i32) {
    %c0_i32 = arith.constant 0 : i32
    %c0_i32_0 = arith.constant 0 : i32
    %c0_i32_1 = arith.constant 0 : i32
    return %c0_i32, %c0_i32_0 : i32, i32
  }
  func.func @transform_11(%arg0: i32) -> (i32, i32) {
    %c0_i32 = arith.constant 0 : i32
    %c0_i32_0 = arith.constant 0 : i32
    %c0_i32_1 = arith.constant 0 : i32
    return %c0_i32, %c0_i32_0 : i32, i32
  }
  func.func @transform_12(%arg0: i32) -> (i32, i32) {
    %c0_i32 = arith.constant 0 : i32
    %c0_i32_0 = arith.constant 0 : i32
    %c0_i32_1 = arith.constant 0 : i32
    return %c0_i32, %c0_i32_0 : i32, i32
  }
  func.func @transform_13(%arg0: i32) -> (i32, i32) {
    %c0_i32 = arith.constant 0 : i32
    %c0_i32_0 = arith.constant 0 : i32
    %c0_i32_1 = arith.constant 0 : i32
    return %c0_i32, %c0_i32_0 : i32, i32
  }
  func.func @transform_14(%arg0: i32) -> (i32, i32) {
    %c0_i32 = arith.constant 0 : i32
    %c0_i32_0 = arith.constant 0 : i32
    %c0_i32_1 = arith.constant 0 : i32
    return %c0_i32, %c0_i32_0 : i32, i32
  }
  func.func @transform_15(%arg0: i32) -> (i32, i32) {
    %c0_i32 = arith.constant 0 : i32
    %c0_i32_0 = arith.constant 0 : i32
    %c0_i32_1 = arith.constant 0 : i32
    return %c0_i32, %c0_i32_0 : i32, i32
  }
  func.func @transform_16(%arg0: i32) -> (i32, i32) {
    %c0_i32 = arith.constant 0 : i32
    %c0_i32_0 = arith.constant 0 : i32
    %c0_i32_1 = arith.constant 0 : i32
    return %c0_i32, %c0_i32_0 : i32, i32
  }
  func.func @transform_17(%arg0: i32) -> (i32, i32) {
    %c0_i32 = arith.constant 0 : i32
    %c0_i32_0 = arith.constant 0 : i32
    %c0_i32_1 = arith.constant 0 : i32
    return %c0_i32, %c0_i32_0 : i32, i32
  }
  func.func @transform_18(%arg0: i32) -> (i32, i32) {
    %c0_i32 = arith.constant 0 : i32
    %c0_i32_0 = arith.constant 0 : i32
    %c0_i32_1 = arith.constant 0 : i32
    return %c0_i32, %c0_i32_0 : i32, i32
  }
  func.func @transform_19(%arg0: i32) -> (i32, i32) {
    %c0_i32 = arith.constant 0 : i32
    %c0_i32_0 = arith.constant 0 : i32
    %c0_i32_1 = arith.constant 0 : i32
    return %c0_i32, %c0_i32_0 : i32, i32
  }
  func.func @transform_20(%arg0: i32) -> (i32, i32) {
    %c0_i32 = arith.constant 0 : i32
    %c0_i32_0 = arith.constant 0 : i32
    %c0_i32_1 = arith.constant 0 : i32
    return %c0_i32, %c0_i32_0 : i32, i32
  }
}

</mosaic_0001>

<bundles_post_ra>
// kernel: forward.1
= control target key start
LH: loop header
LB: loop body
LE: loop exit
PB: predicated region body
PF: predicated region fallthrough
CT: control target
= control target key end

     0   :  { %s9559_s0 = inlined_call_operand.vmem [shape: f32[36,2048], index: 0, kind: input, shape index: {}]   ;;  %s9560_s1 = inlined_call_operand.vmem [shape: f32[16,36], index: 1, kind: input, shape index: {}]   ;;  %s9561_s2 = inlined_call_operand.vmem [shape: f32[16,1], index: 2, kind: input, shape index: {}]   ;;  %s9562_s3 = inlined_call_operand.vmem [shape: f32[256,32], index: 3, kind: input, shape index: {}]   ;;  %s9563_s4 = inlined_call_operand.vmem [shape: f32[1,32], index: 4, kind: input, shape index: {}]   ;;  %s9564_s5 = inlined_call_operand.vmem [shape: f32[3,32], index: 5, kind: input, shape index: {}]   ;;  %s9565_s6 = inlined_call_operand.vmem [shape: f32[1,32], index: 6, kind: input, shape index: {}]   ;;  %s9566_s7 = inlined_call_operand.vmem [shape: f32[32,96], index: 7, kind: input, shape index: {}]   ;;  %s9567_s8 = inlined_call_operand.vmem [shape: f32[32,144], index: 8, kind: input, shape index: {}]   ;;  %s9568_s9 = inlined_call_operand.vmem [shape: f32[1,96], index: 9, kind: input, shape index: {}]   ;;  %s9569_s10 = inlined_call_operand.vmem [shape: f32[1,96], index: 10, kind: input, shape index: {}]   ;;  %s9570_s11 = inlined_call_operand.vmem [shape: f32[32,96], index: 11, kind: input, shape index: {}]   ;;  %s9571_s12 = inlined_call_operand.vmem [shape: f32[32,400], index: 12, kind: input, shape index: {}]   ;;  %s9572_s13 = inlined_call_operand.vmem [shape: f32[1,96], index: 13, kind: input, shape index: {}]   ;;  %s9573_s14 = inlined_call_operand.vmem [shape: f32[1,96], index: 14, kind: input, shape index: {}]   ;;  %s9574_s15 = inlined_call_operand.vmem [shape: f32[272,17], index: 15, kind: input, shape index: {}]   ;;  %s9575_s16 = inlined_call_operand.vmem [shape: f32[10,17], index: 16, kind: input, shape index: {}]   ;;  %s9576_s17 = inlined_call_operand.hbm [shape: s32[2,5], index: 17, kind: output, shape index: {0}]   ;;  %s9577_s18 = inlined_call_operand.hbm [shape: f32[2,5], index: 18, kind: output, shape index: {1}]   ;;  %s9578_s19 = inlined_call_operand.hbm [shape: f32[2,5], index: 19, kind: output, shape index: {2}]   ;;  %s9579_s20 = inlined_call_operand.hbm [shape: f32[2,17], index: 20, kind: output, shape index: {3}]  }
   0x1   :  { %9644 = sst [smem:[#allocation41_spill]] %s9559_s0 }
   0x2   :  { %9645 = sst [smem:[#allocation42_spill]] %s9560_s1 }
   0x3   :  { %9646 = sst [smem:[#allocation43_spill]] %s9561_s2 }
   0x4   :  { %9647 = sst [smem:[#allocation44_spill]] %s9562_s3 }
   0x5   :  { %9648 = sst [smem:[#allocation45_spill]] %s9563_s4 }
   0x6   :  { %26 = vsyncpa [#allocation3], 0 }
   0x7   :  { %27 = vsyncpa [#allocation5], 0  ;;  %s9649_s23 = sld [smem:[#allocation41_spill]]  ;;  %vm164_vm0 = vcmask 1043456   ;;  %vm157_vm1 = vcmask 293888   ;;  %v9595_v22 = vmov 0.0  }
   0x8   :  { %s9650_s1 = sld [smem:[#allocation42_spill]]  ;;  %277 = vmatprep.mubr.f32.mxu0 %v9595_v22  ;;  %354 = vmatprep.mubr.f32.mxu1 %v9595_v22 }
   0xd   :  { %v130_v0 = vld [vmem:[%s9649_s23 + $0x208] sm:$0xf]  ;;  %v132_v1 = vld [vmem:[%s9649_s23 + $0x218] sm:$0xf]  ;;  %v129_v3 = vld [vmem:[%s9649_s23 + $0x200] sm:$0xf] }
   0xe   :  { %v114_v2 = vld [vmem:[%s9649_s23 + $0x188] sm:$0xff]  ;;  %6137 = vmatprep.subr.msk.mxu0 %vm164_vm0, %v130_v0  ;;  %6141 = vmatprep.subr.msk.mxu1 %vm164_vm0, %v132_v1  ;;  %v131_v4 = vld [vmem:[%s9649_s23 + $0x210] sm:$0xf]  ;;  %v116_v5 = vld [vmem:[%s9649_s23 + $0x198] sm:$0xff] }
   0xf   :  { %6138 = vmatpush1.msk.msra.mxu0 %vm164_vm0, %v129_v3  ;;  %6142 = vmatpush1.msk.msra.mxu1 %vm164_vm0, %v131_v4  ;;  %v113_v6 = vld [vmem:[%s9649_s23 + $0x180] sm:$0xff]  ;;  %v115_v7 = vld [vmem:[%s9649_s23 + $0x190] sm:$0xff]  ;;  %v98_v8 = vld [vmem:[%s9649_s23 + $0x108] sm:$0xff] }
  0x10   :  { %237 = vmatprep.subr.mxu0 %v114_v2  ;;  %314 = vmatprep.subr.mxu1 %v116_v5  ;;  %v100_v9 = vld [vmem:[%s9649_s23 + $0x118] sm:$0xff]  ;;  %v97_v10 = vld [vmem:[%s9649_s23 + $0x100] sm:$0xff]  ;;  %v99_v11 = vld [vmem:[%s9649_s23 + $0x110] sm:$0xff] }
  0x11   :  { %238 = vmatpush1.msra.mxu0 %v113_v6  ;;  %315 = vmatpush1.msra.mxu1 %v115_v7  ;;  %v82_v12 = vld [vmem:[%s9649_s23 + $0x88] sm:$0xff]  ;;  %v84_v13 = vld [vmem:[%s9649_s23 + $0x98] sm:$0xff]  ;;  %v81_v14 = vld [vmem:[%s9649_s23 + $0x80] sm:$0xff] }
  0x12   :  { %239 = vmatprep.subr.mxu0 %v98_v8  ;;  %316 = vmatprep.subr.mxu1 %v100_v9  ;;  %v83_v15 = vld [vmem:[%s9649_s23 + $0x90] sm:$0xff]  ;;  %v66_v16 = vld [vmem:[%s9649_s23 + $0x8] sm:$0xff]  ;;  %v68_v17 = vld [vmem:[%s9649_s23 + $0x18] sm:$0xff] }
  0x13   :  { %240 = vmatpush1.msra.mxu0 %v97_v10  ;;  %317 = vmatpush1.msra.mxu1 %v99_v11  ;;  %v65_v18 = vld [vmem:[%s9649_s23] sm:$0xff]  ;;  %v67_v19 = vld [vmem:[%s9649_s23 + $0x10] sm:$0xff]  ;;  %v134_v21 = vld [vmem:[%s9649_s23 + $0x228] sm:$0xf] }
  0x14   :  { %241 = vmatprep.subr.mxu0 %v82_v12  ;;  %318 = vmatprep.subr.mxu1 %v84_v13  ;;  %v7253_v20 = vld [vmem:[%s9650_s1] sm:$0xff]  ;;  %v136_v23 = vld [vmem:[%s9649_s23 + $0x238] sm:$0xf]  ;;  %v135_v25 = vld [vmem:[%s9649_s23 + $0x230] sm:$0xf] }
  0x15   :  { %242 = vmatpush1.msra.mxu0 %v81_v14  ;;  %319 = vmatpush1.msra.mxu1 %v83_v15  ;;  %v133_v24 = vld [vmem:[%s9649_s23 + $0x220] sm:$0xf]  ;;  %v118_v26 = vld [vmem:[%s9649_s23 + $0x1a8] sm:$0xff]  ;;  %v120_v27 = vld [vmem:[%s9649_s23 + $0x1b8] sm:$0xff] }
  0x16   :  { %243 = vmatprep.subr.mxu0 %v66_v16  ;;  %320 = vmatprep.subr.mxu1 %v68_v17  ;;  %v117_v28 = vld [vmem:[%s9649_s23 + $0x1a0] sm:$0xff]  ;;  %v119_v29 = vld [vmem:[%s9649_s23 + $0x1b0] sm:$0xff]  ;;  %v102_v30 = vld [vmem:[%s9649_s23 + $0x128] sm:$0xff] }
  0x17   :  { %244 = vmatpush1.msra.mxu0 %v65_v18  ;;  %321 = vmatpush1.msra.mxu1 %v67_v19  ;;  %v104_v31 = vld [vmem:[%s9649_s23 + $0x138] sm:$0xff]  ;;  %v7298_v32 = vld [vmem:[%s9650_s1 + $0x8] sm:$0xff]  ;;  %v101_v33 = vld [vmem:[%s9649_s23 + $0x120] sm:$0xff] }
  0x18   :  { %6139 = vmatmul.mubr.msk.f32.vlgmr.msra.gmra.mxu0 %vm157_vm1, %v7253_v20  ;;  %6145 = vmatprep.subr.msk.mxu0 %vm164_vm0, %v134_v21  ;;  %v103_v34 = vld [vmem:[%s9649_s23 + $0x130] sm:$0xff]  ;;  %v86_v35 = vld [vmem:[%s9649_s23 + $0xa8] sm:$0xff]  ;;  %v88_v36 = vld [vmem:[%s9649_s23 + $0xb8] sm:$0xff] }
  0x19   :  { %6149 = vmatprep.subr.msk.mxu1 %vm164_vm0, %v136_v23  ;;  %6143 = vmatmul.mubr.msk.f32.vlgmr.msra.gmra.mxu1 %vm157_vm1, %v7253_v20  ;;  %v85_v37 = vld [vmem:[%s9649_s23 + $0xa0] sm:$0xff]  ;;  %v87_v38 = vld [vmem:[%s9649_s23 + $0xb0] sm:$0xff]  ;;  %v70_v39 = vld [vmem:[%s9649_s23 + $0x28] sm:$0xff] }
  0x1a   :  { %6146 = vmatpush1.msk.msra.mxu0 %vm164_vm0, %v133_v24  ;;  %6150 = vmatpush1.msk.msra.mxu1 %vm164_vm0, %v135_v25  ;;  %v72_v40 = vld [vmem:[%s9649_s23 + $0x38] sm:$0xff]  ;;  %v69_v41 = vld [vmem:[%s9649_s23 + $0x20] sm:$0xff]  ;;  %v71_v42 = vld [vmem:[%s9649_s23 + $0x30] sm:$0xff] }
  0x1b   :  { %391 = vmatprep.subr.mxu0 %v118_v26  ;;  %468 = vmatprep.subr.mxu1 %v120_v27  ;;  %v138_v43 = vld [vmem:[%s9649_s23 + $0x248] sm:$0xf]  ;;  %v140_v44 = vld [vmem:[%s9649_s23 + $0x258] sm:$0xf]  ;;  %v137_v45 = vld [vmem:[%s9649_s23 + $0x240] sm:$0xf] }
  0x1c   :  { %392 = vmatpush1.msra.mxu0 %v117_v28  ;;  %469 = vmatpush1.msra.mxu1 %v119_v29  ;;  %v139_v46 = vld [vmem:[%s9649_s23 + $0x250] sm:$0xf]  ;;  %v122_v47 = vld [vmem:[%s9649_s23 + $0x1c8] sm:$0xff]  ;;  %v124_v48 = vld [vmem:[%s9649_s23 + $0x1d8] sm:$0xff] }
  0x1d   :  { %283 = vmatprep.mubr.f32.mxu0 %v9595_v22  ;;  %393 = vmatprep.subr.mxu0 %v102_v30  ;;  %v121_v49 = vld [vmem:[%s9649_s23 + $0x1c0] sm:$0xff]  ;;  %v123_v50 = vld [vmem:[%s9649_s23 + $0x1d0] sm:$0xff] }
  0x1e   :  { %470 = vmatprep.subr.mxu1 %v104_v31  ;;  %6140 = vmatmul.mubr.msk.f32.gmra.mxu0 %vm157_vm1, %v7298_v32 }
  0x1f   :  { %394 = vmatpush1.msra.mxu0 %v101_v33  ;;  %471 = vmatpush1.msra.mxu1 %v103_v34 }
  0x20   :  { %360 = vmatprep.mubr.f32.mxu1 %v9595_v22  ;;  %395 = vmatprep.subr.mxu0 %v86_v35 }
  0x21   :  { %472 = vmatprep.subr.mxu1 %v88_v36  ;;  %6144 = vmatmul.mubr.msk.f32.gmra.mxu1 %vm157_vm1, %v7298_v32 }
  0x22   :  { %396 = vmatpush1.msra.mxu0 %v85_v37  ;;  %473 = vmatpush1.msra.mxu1 %v87_v38 }
  0x23   :  { %397 = vmatprep.subr.mxu0 %v70_v39  ;;  %474 = vmatprep.subr.mxu1 %v72_v40 }
  0x24   :  { %398 = vmatpush1.msra.mxu0 %v69_v41  ;;  %431 = vmatprep.mubr.f32.mxu0 %v9595_v22 }
  0x25   :  { %475 = vmatpush1.msra.mxu1 %v71_v42  ;;  %6147 = vmatmul.mubr.msk.f32.vlgmr.msra.gmra.mxu0 %vm157_vm1, %v7253_v20 }
  0x26   :  { %508 = vmatprep.mubr.f32.mxu1 %v9595_v22  ;;  %6153 = vmatprep.subr.msk.mxu0 %vm164_vm0, %v138_v43 }
  0x27   :  { %6157 = vmatprep.subr.msk.mxu1 %vm164_vm0, %v140_v44  ;;  %6151 = vmatmul.mubr.msk.f32.vlgmr.msra.gmra.mxu1 %vm157_vm1, %v7253_v20 }
  0x28   :  { %6154 = vmatpush1.msk.msra.mxu0 %vm164_vm0, %v137_v45  ;;  %6158 = vmatpush1.msk.msra.mxu1 %vm164_vm0, %v139_v46 }
  0x29   :  { %28 = vsyncpa [#allocation8], 0  ;;  %545 = vmatprep.subr.mxu0 %v122_v47  ;;  %622 = vmatprep.subr.mxu1 %v124_v48  ;;  %v106_v51 = vld [vmem:[%s9649_s23 + $0x148] sm:$0xff]  ;;  %v108_v52 = vld [vmem:[%s9649_s23 + $0x158] sm:$0xff]  ;;  %s9651_s22 = sld [smem:[#allocation43_spill]]  ;;  %v7068_v21 = vmov 0  }
  0x2a   :  { %437 = vmatprep.mubr.f32.mxu0 %v9595_v22  ;;  %546 = vmatpush1.msra.mxu0 %v121_v49  ;;  %v105_v53 = vld [vmem:[%s9649_s23 + $0x140] sm:$0xff]  ;;  %v107_v54 = vld [vmem:[%s9649_s23 + $0x150] sm:$0xff]  ;;  %v90_v55 = vld [vmem:[%s9649_s23 + $0xc8] sm:$0xff]  ;;  %s9652_s25 = sld [smem:[#allocation44_spill]]  ;;  %vm982_vm2 = vcmask 261120   ;;  %vm7069_vm3 = vmmov 0  }
  0x2b   :  { %623 = vmatpush1.msra.mxu1 %v123_v50  ;;  %6148 = vmatmul.mubr.msk.f32.gmra.mxu0 %vm157_vm1, %v7298_v32  ;;  %v92_v56 = vld [vmem:[%s9649_s23 + $0xd8] sm:$0xff]  ;;  %v89_v57 = vld [vmem:[%s9649_s23 + $0xc0] sm:$0xff]  ;;  %v91_v58 = vld [vmem:[%s9649_s23 + $0xd0] sm:$0xff]  ;;  %s9655_s3 = sld [smem:[#allocation45_spill]]  ;;  %vm1064_vm4 = vcmask 1040384   ;;  %s7071_s26 = smov 32  }
  0x2c   :  { %547 = vmatprep.subr.mxu0 %v106_v51  ;;  %624 = vmatprep.subr.mxu1 %v108_v52  ;;  %v74_v59 = vld [vmem:[%s9649_s23 + $0x48] sm:$0xff]  ;;  %v76_v60 = vld [vmem:[%s9649_s23 + $0x58] sm:$0xff]  ;;  %v73_v61 = vld [vmem:[%s9649_s23 + $0x40] sm:$0xff]  ;;  %s7074_s1 = smov 48   ;;  %s7075_s4 = smov 80   ;;  %vm3439_vm5 = vcmask 130048  }
  0x2d   :  { %548 = vmatpush1.msra.mxu0 %v105_v53  ;;  %625 = vmatpush1.msra.mxu1 %v107_v54  ;;  %v75_v62 = vld [vmem:[%s9649_s23 + $0x50] sm:$0xff]  ;;  %v142_v63 = vld [vmem:[%s9649_s23 + $0x268] sm:$0xf]  ;;  %v144_v0 = vld [vmem:[%s9649_s23 + $0x278] sm:$0xf]  ;;  %vm3442_vm6 = vcmask 392192  }
  0x2e   :  { %514 = vmatprep.mubr.f32.mxu1 %v9595_v22  ;;  %549 = vmatprep.subr.mxu0 %v90_v55  ;;  %v141_v1 = vld [vmem:[%s9649_s23 + $0x260] sm:$0xf]  ;;  %v143_v2 = vld [vmem:[%s9649_s23 + $0x270] sm:$0xf]  ;;  %v126_v3 = vld [vmem:[%s9649_s23 + $0x1e8] sm:$0xff]  ;;  %vm3444_vm7 = vcmask 523264  }
  0x2f   :  { %626 = vmatprep.subr.mxu1 %v92_v56  ;;  %6152 = vmatmul.mubr.msk.f32.gmra.mxu1 %vm157_vm1, %v7298_v32  ;;  %v128_v4 = vld [vmem:[%s9649_s23 + $0x1f8] sm:$0xff]  ;;  %v125_v5 = vld [vmem:[%s9649_s23 + $0x1e0] sm:$0xff]  ;;  %v127_v6 = vld [vmem:[%s9649_s23 + $0x1f0] sm:$0xff]  ;;  %vm3446_vm8 = vcmask 654336   ;;  %vm3448_vm9 = vcmask 785408   ;;  %vm3450_vm10 = vcmask 916480  }
  0x30   :  { %550 = vmatpush1.msra.mxu0 %v89_v57  ;;  %627 = vmatpush1.msra.mxu1 %v91_v58  ;;  %v110_v7 = vld [vmem:[%s9649_s23 + $0x168] sm:$0xff]  ;;  %v112_v8 = vld [vmem:[%s9649_s23 + $0x178] sm:$0xff]  ;;  %v109_v9 = vld [vmem:[%s9649_s23 + $0x160] sm:$0xff]  ;;  %vm3990_vm11 = vcmask 132096   ;;  %vm4025_vm13 = vcmask 138240  }
  0x31   :  { %551 = vmatprep.subr.mxu0 %v74_v59  ;;  %628 = vmatprep.subr.mxu1 %v76_v60  ;;  %v111_v10 = vld [vmem:[%s9649_s23 + $0x170] sm:$0xff]  ;;  %v94_v11 = vld [vmem:[%s9649_s23 + $0xe8] sm:$0xff]  ;;  %v96_v12 = vld [vmem:[%s9649_s23 + $0xf8] sm:$0xff] }
  0x32   :  { %552 = vmatpush1.msra.mxu0 %v73_v61  ;;  %585 = vmatprep.mubr.f32.mxu0 %v9595_v22  ;;  %v93_v13 = vld [vmem:[%s9649_s23 + $0xe0] sm:$0xff]  ;;  %v95_v14 = vld [vmem:[%s9649_s23 + $0xf0] sm:$0xff]  ;;  %v78_v15 = vld [vmem:[%s9649_s23 + $0x68] sm:$0xff] }
  0x33   :  { %629 = vmatpush1.msra.mxu1 %v75_v62  ;;  %6155 = vmatmul.mubr.msk.f32.vlgmr.msra.gmra.mxu0 %vm157_vm1, %v7253_v20  ;;  %v80_v16 = vld [vmem:[%s9649_s23 + $0x78] sm:$0xff]  ;;  %v77_v17 = vld [vmem:[%s9649_s23 + $0x60] sm:$0xff]  ;;  %v79_v18 = vld [vmem:[%s9649_s23 + $0x70] sm:$0xff] }
  0x34   :  { %662 = vmatprep.mubr.f32.mxu1 %v9595_v22  ;;  %6161 = vmatprep.subr.msk.mxu0 %vm164_vm0, %v142_v63  ;;  %v145_v19 = vld [vmem:[%s9651_s22] sm:$0xff]  ;;  %v7509_v23 = vld [vmem:[%s9652_s25 + $0xf8] sm:$0xff]  ;;  %v7520_v25 = vld [vmem:[%s9652_s25 + $0xf0] sm:$0xff] }
  0x35   :  { %6165 = vmatprep.subr.msk.mxu1 %vm164_vm0, %v144_v0  ;;  %6159 = vmatmul.mubr.msk.f32.vlgmr.msra.gmra.mxu1 %vm157_vm1, %v7253_v20  ;;  %v7515_v24 = vld [vmem:[%s9652_s25 + $0x78] sm:$0xff]  ;;  %v7525_v26 = vld [vmem:[%s9652_s25 + $0x70] sm:$0xff]  ;;  %v7533_v27 = vld [vmem:[%s9652_s25 + $0xe8] sm:$0xff] }
  0x36   :  { %6162 = vmatpush1.msk.msra.mxu0 %vm164_vm0, %v141_v1  ;;  %6166 = vmatpush1.msk.msra.mxu1 %vm164_vm0, %v143_v2  ;;  %v7538_v28 = vld [vmem:[%s9652_s25 + $0x68] sm:$0xff]  ;;  %v7545_v29 = vld [vmem:[%s9652_s25 + $0xe0] sm:$0xff]  ;;  %v7557_v31 = vld [vmem:[%s9652_s25 + $0xd8] sm:$0xff] }
  0x37   :  { %699 = vmatprep.subr.mxu0 %v126_v3  ;;  %776 = vmatprep.subr.mxu1 %v128_v4  ;;  %v7550_v30 = vld [vmem:[%s9652_s25 + $0x60] sm:$0xff]  ;;  %v7569_v33 = vld [vmem:[%s9652_s25 + $0xd0] sm:$0xff]  ;;  %v7581_v35 = vld [vmem:[%s9652_s25 + $0xc8] sm:$0xff] }
  0x38   :  { %591 = vmatprep.mubr.f32.mxu0 %v9595_v22  ;;  %700 = vmatpush1.msra.mxu0 %v125_v5  ;;  %v7574_v34 = vld [vmem:[%s9652_s25 + $0x50] sm:$0xff]  ;;  %v7586_v36 = vld [vmem:[%s9652_s25 + $0x48] sm:$0xff]  ;;  %v7593_v37 = vld [vmem:[%s9652_s25 + $0xc0] sm:$0xff] }
  0x39   :  { %777 = vmatpush1.msra.mxu1 %v127_v6  ;;  %6156 = vmatmul.mubr.msk.f32.gmra.mxu0 %vm157_vm1, %v7298_v32  ;;  %v7598_v38 = vld [vmem:[%s9652_s25 + $0x40] sm:$0xff]  ;;  %v7605_v39 = vld [vmem:[%s9652_s25 + $0xb8] sm:$0xff]  ;;  %v7617_v41 = vld [vmem:[%s9652_s25 + $0xb0] sm:$0xff] }
  0x3a   :  { %701 = vmatprep.subr.mxu0 %v110_v7  ;;  %778 = vmatprep.subr.mxu1 %v112_v8  ;;  %v7610_v40 = vld [vmem:[%s9652_s25 + $0x38] sm:$0xff]  ;;  %v7623_v42 = vld [vmem:[%s9652_s25 + $0x30] sm:$0xff]  ;;  %v7629_v43 = vld [vmem:[%s9652_s25 + $0xa8] sm:$0xff] }
  0x3b   :  { %668 = vmatprep.mubr.f32.mxu1 %v9595_v22  ;;  %702 = vmatpush1.msra.mxu0 %v109_v9  ;;  %v7635_v44 = vld [vmem:[%s9652_s25 + $0x28] sm:$0xff]  ;;  %v7641_v45 = vld [vmem:[%s9652_s25 + $0xa0] sm:$0xff]  ;;  %v7653_v47 = vld [vmem:[%s9652_s25 + $0x98] sm:$0xff] }
  0x3c   :  { %779 = vmatpush1.msra.mxu1 %v111_v10  ;;  %703 = vmatprep.subr.mxu0 %v94_v11  ;;  %v7647_v46 = vld [vmem:[%s9652_s25 + $0x20] sm:$0xff]  ;;  %v7659_v48 = vld [vmem:[%s9652_s25 + $0x18] sm:$0xff]  ;;  %v7665_v49 = vld [vmem:[%s9652_s25 + $0x90] sm:$0xff] }
  0x3d   :  { %6160 = vmatmul.mubr.msk.f32.gmra.mxu1 %vm157_vm1, %v7298_v32  ;;  %780 = vmatprep.subr.mxu1 %v96_v12  ;;  %v7671_v50 = vld [vmem:[%s9652_s25 + $0x10] sm:$0xff]  ;;  %v7677_v51 = vld [vmem:[%s9652_s25 + $0x88] sm:$0xff]  ;;  %v7689_v53 = vld [vmem:[%s9652_s25 + $0x80] sm:$0xff] }
  0x3e   :  { %704 = vmatpush1.msra.mxu0 %v93_v13  ;;  %781 = vmatpush1.msra.mxu1 %v95_v14  ;;  %v7683_v52 = vld [vmem:[%s9652_s25 + $0x8] sm:$0xff]  ;;  %v7695_v54 = vld [vmem:[%s9652_s25] sm:$0xff] }
  0x3f   :  { %705 = vmatprep.subr.mxu0 %v78_v15  ;;  %782 = vmatprep.subr.mxu1 %v80_v16 }
  0x40   :  { %706 = vmatpush1.msra.mxu0 %v77_v17  ;;  %739 = vmatprep.mubr.f32.mxu0 %v9595_v22 }
  0x41   :  { %783 = vmatpush1.msra.mxu1 %v79_v18  ;;  %816 = vmatprep.mubr.f32.mxu1 %v9595_v22 }
  0x42   :  { %6163 = vmatmul.mubr.msk.f32.vlgmr.msra.gmra.mxu0 %vm157_vm1, %v7253_v20  ;;  %6167 = vmatmul.mubr.msk.f32.vlgmr.msra.gmra.mxu1 %vm157_vm1, %v7253_v20  ;;  %v146_v20 = vld [vmem:[%s9651_s22 + $0x8] sm:$0xff] }
  0x43   :  { %745 = vmatprep.mubr.f32.mxu0 %v9595_v22  ;;  %822 = vmatprep.mubr.f32.mxu1 %v9595_v22 }
  0x44   :  { %6779 = vset.pattern.permute.xlu0 %v7068_v21  ;;  %6244 = vmatprep.subr.mxu0 %v7509_v23 }
  0x45   :  { %149 = vperm.xlu0 %6779, %v145_v19   ;;  %6245 = vmatpush3.msra.mxu0 %v7515_v24 }
  0x46   :  { %6164 = vmatmul.mubr.msk.f32.gmra.mxu0 %vm157_vm1, %v7298_v32  ;;  %6168 = vmatmul.mubr.msk.f32.gmra.mxu1 %vm157_vm1, %v7298_v32  ;;  %v7562_v32 = vld [vmem:[%s9652_s25 + $0x58] sm:$0xff] }
  0x47   :  { %6246 = vmatprep.subr.mxu0 %v7520_v25 }
  0x48   :  { %6247 = vmatpush3.msra.mxu0 %v7525_v26 }
  0x49   :  { %154 = vperm.xlu0 %6779, %v146_v20   ;;  %6248 = vmatprep.subr.mxu0 %v7533_v27 }
  0x4a   :  { %6249 = vmatpush3.msra.mxu0 %v7538_v28 }
  0x4b   :  { %6250 = vmatprep.subr.mxu0 %v7545_v29 }
  0x4c   :  { %6251 = vmatpush3.msra.mxu0 %v7550_v30 }
  0x4d   :  { %6252 = vmatprep.subr.mxu0 %v7557_v31 }
  0x4e   :  { %6253 = vmatpush3.msra.mxu0 %v7562_v32 }
  0x4f   :  { %6254 = vmatprep.subr.mxu0 %v7569_v33 }
  0x50   :  { %6255 = vmatpush3.msra.mxu0 %v7574_v34 }
  0x51   :  { %6256 = vmatprep.subr.mxu0 %v7581_v35 }
  0x52   :  { %6257 = vmatpush3.msra.mxu0 %v7586_v36 }
  0x53   :  { %6258 = vmatprep.subr.mxu0 %v7593_v37 }
  0x54   :  { %6259 = vmatpush3.msra.mxu0 %v7598_v38 }
  0x55   :  { %6260 = vmatprep.subr.mxu0 %v7605_v39 }
  0x56   :  { %6261 = vmatpush3.msra.mxu0 %v7610_v40 }
  0x57   :  { %6262 = vmatprep.subr.mxu0 %v7617_v41 }
  0x58   :  { %6263 = vmatpush3.msra.mxu0 %v7623_v42 }
  0x59   :  { %6264 = vmatprep.subr.mxu0 %v7629_v43 }
  0x5a   :  { %6265 = vmatpush3.msra.mxu0 %v7635_v44 }
  0x5b   :  { %6266 = vmatprep.subr.mxu0 %v7641_v45 }
  0x5c   :  { %6267 = vmatpush3.msra.mxu0 %v7647_v46 }
  0x5d   :  { %6268 = vmatprep.subr.mxu0 %v7653_v47 }
  0x5e   :  { %6269 = vmatpush3.msra.mxu0 %v7659_v48 }
  0x5f   :  { %6270 = vmatprep.subr.mxu0 %v7665_v49 }
  0x60   :  { %6271 = vmatpush3.msra.mxu0 %v7671_v50 }
  0x61   :  { %6272 = vmatprep.subr.mxu0 %v7677_v51 }
  0x62   :  { %6273 = vmatpush3.msra.mxu0 %v7683_v52 }
  0x63   :  { %6274 = vmatprep.subr.mxu0 %v7689_v53 }
  0x64   :  { %6275 = vmatpush3.msra.mxu0 %v7695_v54 }
  0xc0   :  { %v7698_v2 = vpop.permute.xlu0 %149 }
  0xc4   :  { %v7704_v8 = vpop.permute.xlu0 %154 }
  0xd8   :  { %v279_v55 = vpop.f32.mrf.mxu0 }
  0xd9   :  { %v280_v9 = vadd.f32 %v279_v55, %v7698_v2 }
  0xda   :  { %v281_v56 = vpop.f32.mrf.mxu0 }
  0xdb   :  { %v282_v6 = vadd.f32 %v281_v56, %v7698_v2 }
  0xde   :  { %v285_v57 = vpop.f32.mrf.mxu0 }
  0xdf   :  { %v286_v55 = vadd.f32 %v285_v57, %v7704_v8  ;;  %v7721_v57 = vld [vmem:[%s9566_s7 + $0x18] sm:$0xff] }
  0xe0   :  { %v287_v58 = vpop.f32.mrf.mxu0  ;;  %6578 = vmatprep.subr.mxu1 %v7721_v57  ;;  %6606 = vmatprep.subr.mxu0 %v7721_v57 }
  0xe1   :  { %v288_v18 = vadd.f32 %v287_v58, %v7704_v8  ;;  %6579 = vmatpush3.msra.mxu1 %v7721_v57 }
  0xe5   :  { %v433_v59 = vpop.f32.mrf.mxu0 }
  0xe6   :  { %v434_v4 = vadd.f32 %v433_v59, %v7698_v2 }
  0xe7   :  { %v435_v60 = vpop.f32.mrf.mxu0 }
  0xe8   :  { %v436_v3 = vadd.f32 %v435_v60, %v7698_v2  ;;  %v829_v14 = vmax.f32 %v280_v9, %v434_v4 }
  0xea   :  { %v830_v12 = vmax.f32 %v282_v6, %v436_v3 }
  0xeb   :  { %v439_v61 = vpop.f32.mrf.mxu0 }
  0xec   :  { %v440_v15 = vadd.f32 %v439_v61, %v7704_v8 }
  0xed   :  { %v441_v62 = vpop.f32.mrf.mxu0 }
  0xee   :  { %v442_v13 = vadd.f32 %v441_v62, %v7704_v8 }
  0xf0   :  { %v834_v62 = vmax.f32 %v288_v18, %v442_v13 }
  0xf3   :  { %v587_v63 = vpop.f32.mrf.mxu0 }
  0xf4   :  { %v588_v10 = vadd.f32 %v587_v63, %v7698_v2 }
  0xf5   :  { %v589_v0 = vpop.f32.mrf.mxu0 }
  0xf6   :  { %v590_v7 = vadd.f32 %v589_v0, %v7698_v2  ;;  %v837_v56 = vmax.f32 %v829_v14, %v588_v10  ;;  %v833_v0 = vmax.f32 %v286_v55, %v440_v15  ;;  %v7738_v10 = vld [vmem:[%s9566_s7 + $0x8] sm:$0xff]  ;;  %v7772_v55 = vld [vmem:[%s9655_s3] ss:$0 sm:$0xff] }
  0xf7   :  { %9653 = vst [vmem:[#allocation12_spill] sm:$0xff] %v7738_v10 }
  0xf8   :  { %v838_v19 = vmax.f32 %v830_v12, %v590_v7  ;;  %v7755_v12 = vpop.f32.mrf.mxu1 }
  0xf9   :  { %v593_v1 = vpop.f32.mrf.mxu0 }
  0xfa   :  { %v594_v59 = vadd.f32 %v593_v1, %v7704_v8  ;;  %v7729_v1 = vld [vmem:[%s9566_s7 + $0x10] sm:$0xff]  ;;  %v358_v13 = vpop.f32.mrf.mxu1 }
  0xfb   :  { %v595_v5 = vpop.f32.mrf.mxu0  ;;  %6580 = vmatprep.subr.mxu1 %v7729_v1 }
  0xfc   :  { %v596_v21 = vadd.f32 %v595_v5, %v7704_v8  ;;  %v841_v5 = vmax.f32 %v833_v0, %v594_v59  ;;  %6581 = vmatpush3.msra.mxu1 %v7729_v1  ;;  %v7757_v14 = vpop.f32.mrf.mxu1 }
  0xfd   :  { %6582 = vmatprep.subr.mxu1 %v7738_v10 }
  0xfe   :  { %v842_v6 = vmax.f32 %v834_v62, %v596_v21  ;;  %6583 = vmatpush3.msra.mxu1 %v7738_v10  ;;  %v7759_v15 = vpop.f32.mrf.mxu1 }
 0x102   :  { %v741_v11 = vpop.f32.mrf.mxu0 }
 0x103   :  { %v742_v16 = vadd.f32 %v741_v11, %v7698_v2  ;;  %v7747_v11 = vld [vmem:[%s9566_s7] sm:$0xff]  ;;  %s7070_s7 = smov 64  }
 0x104   :  { %v743_v17 = vpop.f32.mrf.mxu0  ;;  %9654 = vst [vmem:[#allocation13_spill] sm:$0xff] %v7747_v11  ;;  %6584 = vmatprep.subr.mxu1 %v7747_v11 }
 0x105   :  { %v744_v20 = vadd.f32 %v743_v17, %v7698_v2  ;;  %v845_v61 = vmax.f32 %v837_v56, %v742_v16  ;;  %6585 = vmatpush3.msra.mxu1 %v7747_v11  ;;  %v7761_v16 = vpop.f32.mrf.mxu1 }
 0x106   :  { %v747_v60 = vpop.f32.mrf.mxu0  ;;  %6589 = vmatprep.subr.mxu1 %v9595_v22 }
 0x107   :  { %v846_v63 = vmax.f32 %v838_v19, %v744_v20  ;;  %v748_v3 = vadd.f32 %v747_v60, %v7704_v8  ;;  %v512_v17 = vpop.f32.mrf.mxu1 }
 0x108   :  { %v749_v4 = vpop.f32.mrf.mxu0 }
 0x109   :  { %v750_v58 = vadd.f32 %v749_v4, %v7704_v8  ;;  %958 = vmatprep.mubr.f32.mxu0 %v846_v63  ;;  %v849_v9 = vmax.f32 %v841_v5, %v748_v3  ;;  %v7763_v18 = vpop.f32.mrf.mxu1  ;;  %v7782_v5 = vld [vmem:[%s9570_s11 + $0x18] sm:$0xff] }
 0x10a   :  { %959 = vmatmul.mubr.f32.vlgmr.msra.gmra.mxu0 %v845_v61 }
 0x10b   :  { %v850_v7 = vmax.f32 %v842_v6, %v750_v58  ;;  %6607 = vmatpush3.msra.mxu0 %v7721_v57  ;;  %v7765_v19 = vpop.f32.mrf.mxu1 }
 0x10c   :  { %6608 = vmatprep.subr.mxu0 %v7729_v1 }
 0x10d   :  { %963 = vmatprep.mubr.f32.mxu0 %v850_v7  ;;  %6609 = vmatpush3.msra.mxu0 %v7729_v1  ;;  %v7767_v20 = vpop.f32.mrf.mxu1 }
 0x10e   :  { %964 = vmatmul.mubr.f32.gmra.mxu0 %v849_v9  ;;  %6610 = vmatprep.subr.mxu0 %v7738_v10  ;;  %v7790_v9 = vld [vmem:[%s9570_s11 + $0x10] sm:$0xff] }
 0x10f   :  { %6611 = vmatpush3.msra.mxu0 %v7738_v10  ;;  %v666_v62 = vpop.f32.mrf.mxu1 }
 0x110   :  { %6612 = vmatprep.subr.mxu0 %v7747_v11 }
 0x111   :  { %6613 = vmatpush3.msra.mxu0 %v7747_v11  ;;  %v7775_v4 = vpop.f32.mrf.mxu1 }
 0x113   :  { %v7784_v7 = vpop.f32.mrf.mxu1 }
 0x1ca   :  { %v6276_v21 = vpop.f32.mrf.mxu0 }
 0x1cc   :  { %v6277_v56 = vpop.f32.mrf.mxu0 }
 0x1cd   :  { %v6278_v59 = vadd.f32 %v6277_v56, %v6276_v21  ;;  %v7799_v21 = vld [vmem:[%s9570_s11 + $0x8] sm:$0xff] }
 0x1ce   :  { %v6279_v60 = vpop.f32.mrf.mxu0 }
 0x1cf   :  { %v961_v63 = vadd.f32 %v6278_v59, %v7772_v55  ;;  %v7802_v59 = vpop.f32.mrf.mxu1 }
 0x1d0   :  { %v6280_v0 = vpop.f32.mrf.mxu0 }
 0x1d1   :  { %v969_v61 = vmax.f32 %v961_v63, 0.0  ;;  %v6281_v3 = vadd.f32 %v6280_v0, %v6279_v60  ;;  %v7808_v60 = vld [vmem:[%s9570_s11] sm:$0xff]  ;;  %v359_v0 = vadd.f32 %v358_v13, %v7698_v2  ;;  %v820_v11 = vpop.f32.mrf.mxu1  ;;  %v667_v13 = vadd.f32 %v666_v62, %v7698_v2 }
 0x1d2   :  { %v7813_v63 = vld [vmem:[%s9564_s5] sm:$0x1] }
 0x1d3   :  { %v966_v6 = vadd.f32 %v6281_v3, %v7772_v55  ;;  %6586 = vmatprep.mubr.msk.f32.mxu1 %vm982_vm2, %v969_v61  ;;  %v1065_v56 = vrot.slane %v969_v61, 7  ;;  %v513_v61 = vadd.f32 %v512_v17, %v7698_v2  ;;  %v821_v17 = vadd.f32 %v820_v11, %v7698_v2 }
 0x1d5   :  { %v970_v58 = vmax.f32 %v966_v6, 0.0  ;;  %v1069_v6 = vsel %vm1064_vm4, %v7813_v63, %v1065_v56  ;;  %v832_v10 = vmax.f32 %v359_v0, %v513_v61  ;;  %v7957_v0 = vld [vmem:[%s9567_s8 + $0x8] sm:$0xff]  ;;  %v7972_v61 = vld [vmem:[%s9565_s6] ss:$0 sm:$0xff]  ;;  %s7076_s6 = smov 112  }
 0x1d7   :  { %6587 = vmatmul.mubr.msk.f32.vlgmr.msra.gmra.mxu1 %vm982_vm2, %v970_v58  ;;  %v1066_v3 = vrot.slane %v970_v58, 7 }
 0x1d8   :  { %6590 = vmatpush3.msra.mxu1 %v7782_v5  ;;  %6597 = vmatprep.mubr.msk.f32.mxu1 %vm7069_vm3, %v9595_v22 }
 0x1d9   :  { %6591 = vmatprep.subr.mxu1 %v9595_v22  ;;  %v1067_v58 = vsel %vm1064_vm4, %v1065_v56, %v1066_v3  ;;  %v7941_v56 = vld [vmem:[%s9567_s8 + $0x18] sm:$0xff] }
 0x1da   :  { %6592 = vmatpush3.msra.mxu1 %v7790_v9 }
 0x1db   :  { %6593 = vmatprep.subr.mxu1 %v9595_v22 }
 0x1dc   :  { %6594 = vmatpush3.msra.mxu1 %v7799_v21 }
 0x1dd   :  { %6595 = vmatprep.subr.mxu1 %v9595_v22 }
 0x1de   :  { %6596 = vmatpush3.msra.mxu1 %v7808_v60 }
 0x1df   :  { %6598 = vmatmul.mubr.msk.f32.vlgmr.msra.gmra.mxu1 %vm982_vm2, %v1069_v6  ;;  %6295 = vmatprep.subr.mxu1 %v7509_v23  ;;  %v840_v23 = vmax.f32 %v832_v10, %v667_v13 }
 0x1e0   :  { %6296 = vmatpush3.msra.mxu1 %v7515_v24  ;;  %6600 = vmatprep.mubr.msk.f32.mxu1 %vm7069_vm3, %v9595_v22 }
 0x1e1   :  { %6297 = vmatprep.subr.mxu1 %v7520_v25  ;;  %v848_v24 = vmax.f32 %v840_v23, %v821_v17  ;;  %v357_v25 = vadd.f32 %v7755_v12, %v7698_v2 }
 0x1e2   :  { %6298 = vmatpush3.msra.mxu1 %v7525_v26  ;;  %v511_v26 = vadd.f32 %v7761_v16, %v7698_v2 }
 0x1e3   :  { %6601 = vmatmul.mubr.msk.f32.gmra.mxu1 %vm982_vm2, %v1067_v58  ;;  %6299 = vmatprep.subr.mxu1 %v7533_v27  ;;  %v824_v27 = vpop.f32.mrf.mxu1 }
 0x1e4   :  { %6300 = vmatpush3.msra.mxu1 %v7538_v28  ;;  %6603 = vmatprep.mubr.msk.f32.mxu1 %vm7069_vm3, %v9595_v22  ;;  %v365_v28 = vadd.f32 %v7759_v15, %v7704_v8 }
 0x1e5   :  { %6301 = vmatprep.subr.mxu1 %v7545_v29  ;;  %v519_v29 = vadd.f32 %v7765_v19, %v7704_v8 }
 0x1e6   :  { %6302 = vmatpush3.msra.mxu1 %v7550_v30  ;;  %v831_v30 = vmax.f32 %v357_v25, %v511_v26 }
 0x1e7   :  { %6604 = vmatmul.mubr.msk.f32.gmra.mxu1 %vm982_vm2, %v1066_v3  ;;  %6303 = vmatprep.subr.mxu1 %v7557_v31  ;;  %v665_v31 = vadd.f32 %v7767_v20, %v7698_v2  ;;  %v9656_v3 = vld [vmem:[#allocation12_spill] sm:$0xff] }
 0x1e8   :  { %6304 = vmatpush3.msra.mxu1 %v7562_v32  ;;  %1232 = vmatprep.mubr.f32.mxu1 %v848_v24  ;;  %v363_v32 = vadd.f32 %v7757_v14, %v7704_v8  ;;  %v8017_v24 = vld [vmem:[%s9569_s10] ss:$0 sm:$0xff] }
 0x1e9   :  { %6305 = vmatprep.subr.mxu1 %v7569_v33  ;;  %v517_v33 = vadd.f32 %v7763_v18, %v7704_v8 }
 0x1ea   :  { %6306 = vmatpush3.msra.mxu1 %v7574_v34  ;;  %v826_v34 = vpop.f32.mrf.mxu1 }
 0x1eb   :  { %6307 = vmatprep.subr.mxu1 %v7581_v35  ;;  %v836_v35 = vmax.f32 %v365_v28, %v519_v29 }
 0x1ec   :  { %6308 = vmatpush3.msra.mxu1 %v7586_v36  ;;  %v673_v36 = vadd.f32 %v7784_v7, %v7704_v8  ;;  %v7921_v7 = vld [vmem:[%s9567_s8 + $0x30] sm:$0xff] }
 0x1ed   :  { %6309 = vmatprep.subr.mxu1 %v7593_v37  ;;  %v839_v37 = vmax.f32 %v831_v30, %v665_v31 }
 0x1ee   :  { %6310 = vmatpush3.msra.mxu1 %v7598_v38  ;;  %v819_v38 = vadd.f32 %v7802_v59, %v7698_v2 }
 0x1ef   :  { %6311 = vmatprep.subr.mxu1 %v7605_v39  ;;  %v827_v39 = vadd.f32 %v826_v34, %v7704_v8  ;;  %v975_v34 = vld [vmem:[%s9568_s9] sm:$0x1]  ;;  %s7072_s9 = smov 96  }
 0x1f0   :  { %6312 = vmatpush3.msra.mxu1 %v7610_v40  ;;  %v835_v40 = vmax.f32 %v363_v32, %v517_v33  ;;  %v9586_v32 = vlaneseq }
 0x1f1   :  { %6313 = vmatprep.subr.mxu1 %v7617_v41  ;;  %v671_v41 = vadd.f32 %v7775_v4, %v7704_v8 }
 0x1f2   :  { %6314 = vmatpush3.msra.mxu1 %v7623_v42  ;;  %v844_v42 = vmax.f32 %v836_v35, %v673_v36  ;;  %v978_v33 = vshrl.u32 %v9586_v32, 7  ;;  %v8790_v32 = vld [vmem:[%s9574_s15] sm:$0xff] }
 0x1f3   :  { %6315 = vmatprep.subr.mxu1 %v7629_v43  ;;  %v847_v43 = vmax.f32 %v839_v37, %v819_v38  ;;  %9685 = vst [vmem:[#allocation39_spill] sm:$0xff] %v8790_v32 }
 0x1f4   :  { %6316 = vmatpush3.msra.mxu1 %v7635_v44  ;;  %v825_v44 = vadd.f32 %v824_v27, %v7704_v8  ;;  %v8027_v36 = vsub.s32 0, %v978_v33 }
 0x1f5   :  { %6317 = vmatprep.subr.mxu1 %v7641_v45  ;;  %v852_v45 = vmax.f32 %v844_v42, %v827_v39 }
 0x1f6   :  { %6318 = vmatpush3.msra.mxu1 %v7647_v46  ;;  %v843_v46 = vmax.f32 %v835_v40, %v671_v41 }
 0x1f7   :  { %6319 = vmatprep.subr.mxu1 %v7653_v47 }
 0x1f8   :  { %6320 = vmatpush3.msra.mxu1 %v7659_v48  ;;  %v851_v47 = vmax.f32 %v843_v46, %v825_v44  ;;  %v7900_v48 = vld [vmem:[%s9567_s8 + $0x38] sm:$0xff] }
 0x1f9   :  { %6321 = vmatprep.subr.mxu1 %v7665_v49  ;;  %1607 = vmatprep.subr.mxu0 %v7900_v48 }
 0x1fa   :  { %6322 = vmatpush3.msra.mxu1 %v7671_v50 }
 0x1fb   :  { %6323 = vmatprep.subr.mxu1 %v7677_v51 }
 0x1fc   :  { %6324 = vmatpush3.msra.mxu1 %v7683_v52 }
 0x1fd   :  { %6325 = vmatprep.subr.mxu1 %v7689_v53 }
 0x1fe   :  { %6326 = vmatpush3.msra.mxu1 %v7695_v54 }
 0x1ff   :  { %1233 = vmatmul.mubr.f32.vlgmr.msra.gmra.mxu1 %v847_v43  ;;  %6617 = vmatprep.subr.mxu1 %v9595_v22 }
 0x200   :  { %1237 = vmatprep.mubr.f32.mxu1 %v852_v45  ;;  %6618 = vmatpush3.msra.mxu1 %v7782_v5 }
 0x201   :  { %6619 = vmatprep.subr.mxu1 %v9595_v22 }
 0x202   :  { %6620 = vmatpush3.msra.mxu1 %v7790_v9  ;;  %v7927_v9 = vld [vmem:[%s9567_s8 + $0x28] sm:$0xff] }
 0x203   :  { %1238 = vmatmul.mubr.f32.gmra.mxu1 %v851_v47  ;;  %6621 = vmatprep.subr.mxu1 %v9595_v22 }
 0x204   :  { %6622 = vmatpush3.msra.mxu1 %v7799_v21  ;;  %6625 = vmatprep.mubr.msk.f32.mxu1 %vm7069_vm3, %v9595_v22 }
 0x205   :  { %6623 = vmatprep.subr.mxu1 %v9595_v22 }
 0x206   :  { %6624 = vmatpush3.msra.mxu1 %v7808_v60  ;;  %v7949_v60 = vld [vmem:[%s9567_s8 + $0x10] sm:$0xff] }
 0x207   :  { %6634 = vmatprep.subr.mxu1 %v9595_v22 }
 0x297   :  { %v7903_v49 = vpop.f32.mrf.mxu1 }
 0x299   :  { %v7905_v50 = vpop.f32.mrf.mxu1 }
 0x29f   :  { %v7907_v51 = vpop.f32.mrf.mxu1 }
 0x2a1   :  { %v6599_v52 = vpop.f32.mrf.mxu1 }
 0x2a3   :  { %v7909_v53 = vpop.f32.mrf.mxu1 }
 0x2a5   :  { %v6602_v54 = vpop.f32.mrf.mxu1 }
 0x2a7   :  { %v7911_v2 = vpop.f32.mrf.mxu1 }
 0x2a9   :  { %v6605_v8 = vpop.f32.mrf.mxu1 }
 0x2bf   :  { %v6327_v10 = vpop.f32.mrf.mxu1 }
 0x2c1   :  { %v6328_v11 = vpop.f32.mrf.mxu1 }
 0x2c2   :  { %v6329_v12 = vadd.f32 %v6328_v11, %v6327_v10 }
 0x2c3   :  { %v6330_v14 = vpop.f32.mrf.mxu1 }
 0x2c4   :  { %v1235_v15 = vadd.f32 %v6329_v12, %v7772_v55 }
 0x2c5   :  { %v6331_v16 = vpop.f32.mrf.mxu1 }
 0x2c6   :  { %v1243_v18 = vmax.f32 %v1235_v15, 0.0  ;;  %v6332_v19 = vadd.f32 %v6331_v16, %v6330_v14 }
 0x2c8   :  { %v1326_v20 = vrot.slane %v1243_v18, 7  ;;  %v1240_v62 = vadd.f32 %v6332_v19, %v7772_v55  ;;  %6614 = vmatprep.mubr.msk.f32.mxu0 %vm982_vm2, %v1243_v18  ;;  %v7935_v55 = vld [vmem:[%s9567_s8 + $0x20] sm:$0xff]  ;;  %v8048_v18 = vrot.slane %v975_v34, %v8027_v36 }
 0x2ca   :  { %v1244_v4 = vmax.f32 %v1240_v62, 0.0  ;;  %v1330_v5 = vsel %vm1064_vm4, %v7813_v63, %v1326_v20  ;;  %v8056_v62 = vadd.f32 %v7905_v50, %v8048_v18 }
 0x2cb   :  { %6626 = vmatmul.mubr.msk.f32.vlgmr.msra.gmra.mxu1 %vm982_vm2, %v1330_v5 }
 0x2cc   :  { %v1327_v21 = vrot.slane %v1244_v4, 7  ;;  %6615 = vmatmul.mubr.msk.f32.vlgmr.msra.gmra.mxu0 %vm982_vm2, %v1244_v4  ;;  %6628 = vmatprep.mubr.msk.f32.mxu1 %vm7069_vm3, %v9595_v22 }
 0x2cd   :  { %1608 = vmatpush1.msra.mxu0 %v7921_v7  ;;  %6635 = vmatpush3.msra.mxu1 %v7721_v57  ;;  %v7965_v57 = vld [vmem:[%s9567_s8] sm:$0xff] }
 0x2ce   :  { %1609 = vmatprep.subr.mxu0 %v7927_v9  ;;  %v1328_v59 = vsel %vm1064_vm4, %v1326_v20, %v1327_v21  ;;  %6636 = vmatprep.subr.mxu1 %v9595_v22 }
 0x2cf   :  { %1610 = vmatpush1.msra.mxu0 %v7935_v55  ;;  %6629 = vmatmul.mubr.msk.f32.gmra.mxu1 %vm982_vm2, %v1328_v59 }
 0x2d0   :  { %1611 = vmatprep.subr.mxu0 %v7941_v56  ;;  %6631 = vmatprep.mubr.msk.f32.mxu1 %vm7069_vm3, %v9595_v22 }
 0x2d1   :  { %1612 = vmatpush1.msra.mxu0 %v7949_v60  ;;  %6637 = vmatpush3.msra.mxu1 %v7729_v1  ;;  %v9657_v1 = vld [vmem:[#allocation13_spill] sm:$0xff] }
 0x2d2   :  { %1613 = vmatprep.subr.mxu0 %v7957_v0  ;;  %1647 = vmatprep.mubr.f32.mxu0 %v9595_v22 }
 0x2d3   :  { %1614 = vmatpush1.msra.mxu0 %v7965_v57  ;;  %6632 = vmatmul.mubr.msk.f32.gmra.mxu1 %vm982_vm2, %v1327_v21 }
 0x2d4   :  { %6638 = vmatprep.subr.mxu1 %v9595_v22  ;;  %6182 = vmatmul.mubr.msk.f32.vlgmr.msra.gmra.mxu0 %vm982_vm2, %v7972_v61 }
 0x2d5   :  { %6639 = vmatpush3.msra.mxu1 %v9656_v3  ;;  %6642 = vmatprep.mubr.msk.f32.mxu1 %vm7069_vm3, %v9595_v22 }
 0x2d6   :  { %6640 = vmatprep.subr.mxu1 %v9595_v22  ;;  %1822 = vmatprep.subr.mxu0 %v7900_v48 }
 0x2d7   :  { %6641 = vmatpush3.msra.mxu1 %v9657_v1  ;;  %1823 = vmatpush1.msra.mxu0 %v7921_v7 }
 0x2d8   :  { %6643 = vmatmul.mubr.msk.f32.vlgmr.msra.gmra.mxu1 %vm982_vm2, %v7813_v63  ;;  %1721 = vmatprep.subr.mxu1 %v7900_v48 }
 0x2d9   :  { %1722 = vmatpush1.msra.mxu1 %v7921_v7  ;;  %1761 = vmatprep.mubr.f32.mxu1 %v9595_v22 }
 0x2da   :  { %1723 = vmatprep.subr.mxu1 %v7927_v9  ;;  %1824 = vmatprep.subr.mxu0 %v7927_v9 }
 0x2db   :  { %1724 = vmatpush1.msra.mxu1 %v7935_v55  ;;  %1825 = vmatpush1.msra.mxu0 %v7935_v55 }
 0x2dc   :  { %1725 = vmatprep.subr.mxu1 %v7941_v56  ;;  %1826 = vmatprep.subr.mxu0 %v7941_v56 }
 0x2dd   :  { %1726 = vmatpush1.msra.mxu1 %v7949_v60  ;;  %1827 = vmatpush1.msra.mxu0 %v7949_v60 }
 0x2de   :  { %1727 = vmatprep.subr.mxu1 %v7957_v0  ;;  %1828 = vmatprep.subr.mxu0 %v7957_v0 }
 0x2df   :  { %1728 = vmatpush1.msra.mxu1 %v7965_v57  ;;  %1829 = vmatpush1.msra.mxu0 %v7965_v57 }
 0x2e0   :  { %1862 = vmatprep.mubr.f32.mxu0 %v9595_v22  ;;  %1923 = vmatprep.subr.mxu1 %v7900_v48 }
 0x2e1   :  { %2024 = vmatprep.subr.mxu0 %v7900_v48 }
 0x38b   :  { %v8008_v63 = vpop.f32.mrf.mxu1 }
 0x38c   :  { %9658 = vst [vmem:[#allocation12_spill] sm:$0xff] %v8008_v63  ;;  %v8010_v13 = vpop.f32.mrf.mxu0 }
 0x38d   :  { %v6627_v6 = vpop.f32.mrf.mxu1 }
 0x38e   :  { %v1317_v23 = vpop.f32.mrf.mxu0 }
 0x38f   :  { %v8012_v17 = vpop.f32.mrf.mxu1  ;;  %v8051_v19 = vadd.f32 %v1317_v23, %v8048_v18 }
 0x390   :  { %9659 = vst [vmem:[#allocation13_spill] sm:$0xff] %v8012_v17 }
 0x391   :  { %v6630_v58 = vpop.f32.mrf.mxu1  ;;  %v1492_v20 = vrot.slane %v8051_v19, 7 }
 0x393   :  { %v8019_v25 = vpop.f32.mrf.mxu1  ;;  %v1494_v4 = vsel %vm1064_vm4, %v8056_v62, %v1492_v20  ;;  %v1501_v20 = vrot.slane %v8051_v19, 1 }
 0x394   :  { %9660 = vst [vmem:[#allocation14_spill] sm:$0xff] %v8019_v25  ;;  %v1649_v26 = vpop.f32.mrf.mxu0 }
 0x395   :  { %v1660_v27 = vadd.f32 %v8017_v24, %v1649_v26  ;;  %v6633_v28 = vpop.f32.mrf.mxu1 }
 0x396   :  { %v1651_v29 = vpop.f32.mrf.mxu0 }
 0x397   :  { %1671 = vrot.lane.b32.xlu1 %v1660_v27, %s7070_s7 }
 0x398   :  { %v1487_v30 = vpop.f32.mrf.mxu1 }
 0x399   :  { %v1488_v35 = vadd.f32 %v1487_v30, %v975_v34 }
 0x39a   :  { %v6644_v31 = vpop.f32.mrf.mxu1 }
 0x39b   :  { %v1664_v37 = vrot.slane %v1488_v35, %v8027_v36  ;;  %v1496_v35 = vrot.slane %v8056_v62, 1 }
 0x39d   :  { %v1665_v38 = vadd.f32 %v1664_v37, %v1660_v27 }
 0x39f   :  { %v1666_v39 = vmul.f32 0.5, %v1665_v38 }
 0x3a1   :  { %6780 = vtanh.f32 %v1666_v39 }
 0x3ae   :  { %v6781_v40 = vpop.eup %6780 }
 0x3af   :  { %v1668_v41 = vmul.f32 0.5, %v6781_v40 }
 0x3b1   :  { %v1669_v42 = vadd.f32 0.5, %v1668_v41 }
 0x3b3   :  { %v1681_v54 = vsub.f32 1.0, %v1669_v42 }
 0x409   :  { %v1672_v43 = vpop.permute.xlu1 %1671 }
 0x40a   :  { %v1674_v44 = vmul.f32 %v1672_v43, %v1669_v42 }
 0x40c   :  { %1676 = vrot.lane.b32.xlu1 %v1674_v44, %s7070_s7 }
 0x410   :  { %1687 = vrot.lane.b32.xlu1 %v7972_v61, %s7071_s26 }
 0x47e   :  { %v1677_v45 = vpop.permute.xlu1 %1676 }
 0x47f   :  { %v1679_v46 = vadd.f32 %v1677_v45, %v1664_v37  ;;  %v1498_v37 = vsel %vm1064_vm4, %v1496_v35, %v8051_v19 }
 0x481   :  { %6782 = vtanh.f32 %v1679_v46 }
 0x482   :  { %v1688_v52 = vpop.permute.xlu1 %1687 }
 0x483   :  { %v1690_v10 = vmul.f32 %v1688_v52, %v1669_v42 }
 0x48e   :  { %v6783_v47 = vpop.eup %6782 }
 0x48f   :  { %1683 = vrot.lane.b32.xlu0 %v6783_v47, %s7072_s9 }
 0x501   :  { %v1684_v8 = vpop.permute.xlu0 %1683 }
 0x502   :  { %v1686_v11 = vmul.f32 %v1684_v8, %v1681_v54 }
 0x504   :  { %v1691_v12 = vadd.f32 %v1690_v10, %v1686_v11 }
 0x506   :  { %1693 = vrot.lane.b32.xlu0 %v1691_v12, %s7072_s9 }
 0x578   :  { %v1694_v14 = vpop.permute.xlu0 %1693 }
 0x579   :  { %6184 = vmatmul.mubr.msk.f32.vlgmr.msra.gmra.mxu1 %vm982_vm2, %v1694_v14 }
 0x57a   :  { %1924 = vmatpush1.msra.mxu1 %v7921_v7  ;;  %1963 = vmatprep.mubr.f32.mxu1 %v9595_v22 }
 0x57b   :  { %1925 = vmatprep.subr.mxu1 %v7927_v9 }
 0x57c   :  { %1926 = vmatpush1.msra.mxu1 %v7935_v55 }
 0x57d   :  { %1927 = vmatprep.subr.mxu1 %v7941_v56 }
 0x57e   :  { %1928 = vmatpush1.msra.mxu1 %v7949_v60 }
 0x57f   :  { %1929 = vmatprep.subr.mxu1 %v7957_v0 }
 0x580   :  { %1930 = vmatpush1.msra.mxu1 %v7965_v57 }
 0x581   :  { %2125 = vmatprep.subr.mxu1 %v7900_v48 }
 0x639   :  { %v1763_v15 = vpop.f32.mrf.mxu1 }
 0x63a   :  { %v1768_v16 = vadd.f32 %v8017_v24, %v1763_v15 }
 0x63b   :  { %v8091_v14 = vpop.f32.mrf.mxu1 }
 0x63c   :  { %1775 = vrot.lane.b32.xlu1 %v1768_v16, %s7070_s7  ;;  %v1769_v5 = vadd.f32 %v1768_v16, %v1494_v4 }
 0x63e   :  { %v1770_v21 = vmul.f32 0.5, %v1769_v5 }
 0x640   :  { %6784 = vtanh.f32 %v1770_v21 }
 0x64d   :  { %v6785_v59 = vpop.eup %6784 }
 0x64e   :  { %v1772_v61 = vmul.f32 0.5, %v6785_v59 }
 0x650   :  { %v1773_v3 = vadd.f32 0.5, %v1772_v61 }
 0x652   :  { %v1785_v50 = vsub.f32 1.0, %v1773_v3  ;;  %v1791_v28 = vmul.f32 %v1773_v3, %v1691_v12 }
 0x6ae   :  { %v1776_v1 = vpop.permute.xlu1 %1775 }
 0x6af   :  { %v1778_v6 = vmul.f32 %v1776_v1, %v1773_v3 }
 0x6b1   :  { %1780 = vrot.lane.b32.xlu0 %v1778_v6, %s7070_s7 }
 0x723   :  { %v1781_v58 = vpop.permute.xlu0 %1780 }
 0x724   :  { %v1783_v23 = vadd.f32 %v1781_v58, %v1494_v4  ;;  %v1499_v4 = vrot.slane %v8056_v62, 2 }
 0x726   :  { %6786 = vtanh.f32 %v1783_v23  ;;  %v1503_v5 = vsel %vm1064_vm4, %v1499_v4, %v1501_v20 }
 0x733   :  { %v6787_v26 = vpop.eup %6786 }
 0x734   :  { %1787 = vrot.lane.b32.xlu1 %v6787_v26, %s7072_s9 }
 0x7a6   :  { %v1788_v27 = vpop.permute.xlu1 %1787 }
 0x7a7   :  { %v1790_v29 = vmul.f32 %v1788_v27, %v1785_v50 }
 0x7a9   :  { %v1792_v30 = vadd.f32 %v1791_v28, %v1790_v29 }
 0x7ab   :  { %1794 = vrot.lane.b32.xlu0 %v1792_v30, %s7072_s9 }
 0x81d   :  { %v1795_v31 = vpop.permute.xlu0 %1794 }
 0x81e   :  { %6185 = vmatmul.mubr.msk.f32.vlgmr.msra.gmra.mxu0 %vm982_vm2, %v1795_v31 }
 0x81f   :  { %2025 = vmatpush1.msra.mxu0 %v7921_v7  ;;  %2064 = vmatprep.mubr.f32.mxu0 %v9595_v22 }
 0x820   :  { %2026 = vmatprep.subr.mxu0 %v7927_v9 }
 0x821   :  { %2027 = vmatpush1.msra.mxu0 %v7935_v55 }
 0x822   :  { %2028 = vmatprep.subr.mxu0 %v7941_v56 }
 0x823   :  { %2029 = vmatpush1.msra.mxu0 %v7949_v60 }
 0x824   :  { %2030 = vmatprep.subr.mxu0 %v7957_v0 }
 0x825   :  { %2031 = vmatpush1.msra.mxu0 %v7965_v57 }
 0x826   :  { %2226 = vmatprep.subr.mxu0 %v7900_v48 }
 0x8de   :  { %v1864_v33 = vpop.f32.mrf.mxu0 }
 0x8df   :  { %v1869_v34 = vadd.f32 %v8017_v24, %v1864_v33 }
 0x8e1   :  { %1876 = vrot.lane.b32.xlu1 %v1869_v34, %s7070_s7  ;;  %v1870_v38 = vadd.f32 %v1869_v34, %v1498_v37  ;;  %v8111_v34 = vpop.f32.mrf.mxu0 }
 0x8e3   :  { %v1871_v39 = vmul.f32 0.5, %v1870_v38  ;;  %v1506_v38 = vrot.slane %v8051_v19, 2 }
 0x8e5   :  { %6788 = vtanh.f32 %v1871_v39  ;;  %v1504_v39 = vrot.slane %v8056_v62, 3 }
 0x8f2   :  { %v6789_v40 = vpop.eup %6788 }
 0x8f3   :  { %v1873_v41 = vmul.f32 0.5, %v6789_v40  ;;  %v1508_v40 = vsel %vm1064_vm4, %v1504_v39, %v1506_v38 }
 0x8f5   :  { %v1874_v42 = vadd.f32 0.5, %v1873_v41 }
 0x8f7   :  { %v1886_v52 = vsub.f32 1.0, %v1874_v42  ;;  %v1892_v8 = vmul.f32 %v1874_v42, %v1792_v30 }
 0x953   :  { %v1877_v43 = vpop.permute.xlu1 %1876 }
 0x954   :  { %v1879_v44 = vmul.f32 %v1877_v43, %v1874_v42 }
 0x956   :  { %1881 = vrot.lane.b32.xlu0 %v1879_v44, %s7070_s7 }
 0x9c8   :  { %v1882_v45 = vpop.permute.xlu0 %1881 }
 0x9c9   :  { %v1884_v46 = vadd.f32 %v1882_v45, %v1498_v37 }
 0x9cb   :  { %6790 = vtanh.f32 %v1884_v46 }
 0x9d8   :  { %v6791_v47 = vpop.eup %6790 }
 0x9d9   :  { %1888 = vrot.lane.b32.xlu1 %v6791_v47, %s7072_s9 }
 0xa4b   :  { %v1889_v54 = vpop.permute.xlu1 %1888 }
 0xa4c   :  { %v1891_v10 = vmul.f32 %v1889_v54, %v1886_v52 }
 0xa4e   :  { %v1893_v11 = vadd.f32 %v1892_v8, %v1891_v10 }
 0xa50   :  { %1895 = vrot.lane.b32.xlu0 %v1893_v11, %s7072_s9 }
 0xac2   :  { %v1896_v12 = vpop.permute.xlu0 %1895 }
 0xac3   :  { %6186 = vmatmul.mubr.msk.f32.vlgmr.msra.gmra.mxu1 %vm982_vm2, %v1896_v12 }
 0xac4   :  { %2126 = vmatpush1.msra.mxu1 %v7921_v7  ;;  %2165 = vmatprep.mubr.f32.mxu1 %v9595_v22 }
 0xac5   :  { %2127 = vmatprep.subr.mxu1 %v7927_v9 }
 0xac6   :  { %2128 = vmatpush1.msra.mxu1 %v7935_v55 }
 0xac7   :  { %2129 = vmatprep.subr.mxu1 %v7941_v56 }
 0xac8   :  { %2130 = vmatpush1.msra.mxu1 %v7949_v60 }
 0xac9   :  { %2131 = vmatprep.subr.mxu1 %v7957_v0 }
 0xaca   :  { %2132 = vmatpush1.msra.mxu1 %v7965_v57 }
 0xacb   :  { %2327 = vmatprep.subr.mxu1 %v7900_v48 }
 0xb83   :  { %v1965_v15 = vpop.f32.mrf.mxu1 }
 0xb84   :  { %v1970_v16 = vadd.f32 %v8017_v24, %v1965_v15 }
 0xb85   :  { %v8131_v4 = vpop.f32.mrf.mxu1 }
 0xb86   :  { %1977 = vrot.lane.b32.xlu1 %v1970_v16, %s7070_s7  ;;  %v1971_v21 = vadd.f32 %v1970_v16, %v1503_v5 }
 0xb88   :  { %v1972_v59 = vmul.f32 0.5, %v1971_v21 }
 0xb8a   :  { %6792 = vtanh.f32 %v1972_v59  ;;  %v1511_v59 = vrot.slane %v8051_v19, 3 }
 0xb97   :  { %v6793_v61 = vpop.eup %6792 }
 0xb98   :  { %v1974_v3 = vmul.f32 0.5, %v6793_v61  ;;  %v1509_v61 = vrot.slane %v8056_v62, 4 }
 0xb9a   :  { %v1975_v1 = vadd.f32 0.5, %v1974_v3  ;;  %v1513_v3 = vsel %vm1064_vm4, %v1509_v61, %v1511_v59 }
 0xb9c   :  { %v1987_v27 = vsub.f32 1.0, %v1975_v1  ;;  %v1993_v29 = vmul.f32 %v1975_v1, %v1893_v11 }
 0xbf8   :  { %v1978_v6 = vpop.permute.xlu1 %1977 }
 0xbf9   :  { %v1980_v58 = vmul.f32 %v1978_v6, %v1975_v1 }
 0xbfb   :  { %1982 = vrot.lane.b32.xlu0 %v1980_v58, %s7070_s7 }
 0xc6d   :  { %v1983_v23 = vpop.permute.xlu0 %1982 }
 0xc6e   :  { %v1985_v26 = vadd.f32 %v1983_v23, %v1503_v5 }
 0xc70   :  { %6794 = vtanh.f32 %v1985_v26 }
 0xc7d   :  { %v6795_v50 = vpop.eup %6794 }
 0xc7e   :  { %1989 = vrot.lane.b32.xlu1 %v6795_v50, %s7072_s9 }
 0xcf0   :  { %v1990_v28 = vpop.permute.xlu1 %1989 }
 0xcf1   :  { %v1992_v30 = vmul.f32 %v1990_v28, %v1987_v27 }
 0xcf3   :  { %v1994_v31 = vadd.f32 %v1993_v29, %v1992_v30 }
 0xcf5   :  { %1996 = vrot.lane.b32.xlu0 %v1994_v31, %s7072_s9 }
 0xd67   :  { %v1997_v33 = vpop.permute.xlu0 %1996 }
 0xd68   :  { %6187 = vmatmul.mubr.msk.f32.vlgmr.msra.gmra.mxu0 %vm982_vm2, %v1997_v33 }
 0xd69   :  { %2227 = vmatpush1.msra.mxu0 %v7921_v7  ;;  %2266 = vmatprep.mubr.f32.mxu0 %v9595_v22 }
 0xd6a   :  { %2228 = vmatprep.subr.mxu0 %v7927_v9 }
 0xd6b   :  { %2229 = vmatpush1.msra.mxu0 %v7935_v55 }
 0xd6c   :  { %2230 = vmatprep.subr.mxu0 %v7941_v56 }
 0xd6d   :  { %2231 = vmatpush1.msra.mxu0 %v7949_v60 }
 0xd6e   :  { %2232 = vmatprep.subr.mxu0 %v7957_v0 }
 0xd6f   :  { %2233 = vmatpush1.msra.mxu0 %v7965_v57 }
 0xd70   :  { %2428 = vmatprep.subr.mxu0 %v7900_v48 }
 0xe28   :  { %v2066_v35 = vpop.f32.mrf.mxu0 }
 0xe29   :  { %v2071_v37 = vadd.f32 %v8017_v24, %v2066_v35 }
 0xe2b   :  { %2078 = vrot.lane.b32.xlu1 %v2071_v37, %s7070_s7  ;;  %v2072_v41 = vadd.f32 %v2071_v37, %v1508_v40 }
 0xe2d   :  { %v2073_v42 = vmul.f32 0.5, %v2072_v41 }
 0xe2f   :  { %6796 = vtanh.f32 %v2073_v42 }
 0xe3c   :  { %v6797_v43 = vpop.eup %6796 }
 0xe3d   :  { %v2075_v44 = vmul.f32 0.5, %v6797_v43  ;;  %v1516_v43 = vrot.slane %v8051_v19, 4 }
 0xe3f   :  { %v2076_v45 = vadd.f32 0.5, %v2075_v44  ;;  %v1514_v44 = vrot.slane %v8056_v62, 5 }
 0xe41   :  { %v2088_v10 = vsub.f32 1.0, %v2076_v45  ;;  %v2094_v12 = vmul.f32 %v2076_v45, %v1994_v31 }
 0xe9d   :  { %v2079_v46 = vpop.permute.xlu1 %2078 }
 0xe9e   :  { %v2081_v47 = vmul.f32 %v2079_v46, %v2076_v45  ;;  %v1518_v45 = vsel %vm1064_vm4, %v1514_v44, %v1516_v43 }
 0xea0   :  { %2083 = vrot.lane.b32.xlu0 %v2081_v47, %s7070_s7 }
 0xf12   :  { %v2084_v52 = vpop.permute.xlu0 %2083 }
 0xf13   :  { %v2086_v54 = vadd.f32 %v2084_v52, %v1508_v40  ;;  %v8151_v40 = vpop.f32.mrf.mxu0 }
 0xf15   :  { %6798 = vtanh.f32 %v2086_v54 }
 0xf22   :  { %v6799_v8 = vpop.eup %6798 }
 0xf23   :  { %2090 = vrot.lane.b32.xlu1 %v6799_v8, %s7072_s9 }
 0xf95   :  { %v2091_v11 = vpop.permute.xlu1 %2090 }
 0xf96   :  { %v2093_v15 = vmul.f32 %v2091_v11, %v2088_v10 }
 0xf98   :  { %v2095_v16 = vadd.f32 %v2094_v12, %v2093_v15 }
 0xf9a   :  { %2097 = vrot.lane.b32.xlu0 %v2095_v16, %s7072_s9 }
0x100c   :  { %v2098_v20 = vpop.permute.xlu0 %2097 }
0x100d   :  { %6188 = vmatmul.mubr.msk.f32.vlgmr.msra.gmra.mxu1 %vm982_vm2, %v2098_v20 }
0x100e   :  { %2328 = vmatpush1.msra.mxu1 %v7921_v7  ;;  %2367 = vmatprep.mubr.f32.mxu1 %v9595_v22 }
0x100f   :  { %2329 = vmatprep.subr.mxu1 %v7927_v9 }
0x1010   :  { %2330 = vmatpush1.msra.mxu1 %v7935_v55 }
0x1011   :  { %2331 = vmatprep.subr.mxu1 %v7941_v56 }
0x1012   :  { %2332 = vmatpush1.msra.mxu1 %v7949_v60 }
0x1013   :  { %2333 = vmatprep.subr.mxu1 %v7957_v0 }
0x1014   :  { %2334 = vmatpush1.msra.mxu1 %v7965_v57 }
0x1015   :  { %2529 = vmatprep.subr.mxu1 %v7900_v48 }
0x10cd   :  { %v2167_v5 = vpop.f32.mrf.mxu1 }
0x10ce   :  { %v2172_v21 = vadd.f32 %v8017_v24, %v2167_v5 }
0x10d0   :  { %2179 = vrot.lane.b32.xlu1 %v2172_v21, %s7070_s7  ;;  %v2173_v1 = vadd.f32 %v2172_v21, %v1513_v3 }
0x10d2   :  { %v2174_v6 = vmul.f32 0.5, %v2173_v1  ;;  %v8171_v1 = vpop.f32.mrf.mxu1 }
0x10d4   :  { %6800 = vtanh.f32 %v2174_v6 }
0x10e1   :  { %v6801_v58 = vpop.eup %6800 }
0x10e2   :  { %v2176_v23 = vmul.f32 0.5, %v6801_v58 }
0x10e4   :  { %v2177_v26 = vadd.f32 0.5, %v2176_v23  ;;  %v1521_v23 = vrot.slane %v8051_v19, 5 }
0x10e6   :  { %v2189_v31 = vsub.f32 1.0, %v2177_v26  ;;  %v2195_v35 = vmul.f32 %v2177_v26, %v2095_v16 }
0x1142   :  { %v2180_v50 = vpop.permute.xlu1 %2179 }
0x1143   :  { %v2182_v27 = vmul.f32 %v2180_v50, %v2177_v26  ;;  %v1519_v26 = vrot.slane %v8056_v62, 6 }
0x1145   :  { %2184 = vrot.lane.b32.xlu0 %v2182_v27, %s7070_s7  ;;  %v1523_v50 = vsel %vm1064_vm4, %v1519_v26, %v1521_v23 }
0x11b7   :  { %v2185_v28 = vpop.permute.xlu0 %2184 }
0x11b8   :  { %v2187_v29 = vadd.f32 %v2185_v28, %v1513_v3 }
0x11ba   :  { %6802 = vtanh.f32 %v2187_v29 }
0x11c7   :  { %v6803_v30 = vpop.eup %6802 }
0x11c8   :  { %2191 = vrot.lane.b32.xlu1 %v6803_v30, %s7072_s9 }
0x123a   :  { %v2192_v33 = vpop.permute.xlu1 %2191 }
0x123b   :  { %v2194_v37 = vmul.f32 %v2192_v33, %v2189_v31 }
0x123d   :  { %v2196_v38 = vadd.f32 %v2195_v35, %v2194_v37 }
0x123f   :  { %2198 = vrot.lane.b32.xlu0 %v2196_v38, %s7072_s9 }
0x12b1   :  { %v2199_v39 = vpop.permute.xlu0 %2198 }
0x12b2   :  { %6189 = vmatmul.mubr.msk.f32.vlgmr.msra.gmra.mxu0 %vm982_vm2, %v2199_v39 }
0x12b3   :  { %2429 = vmatpush1.msra.mxu0 %v7921_v7  ;;  %2468 = vmatprep.mubr.f32.mxu0 %v9595_v22 }
0x12b4   :  { %2430 = vmatprep.subr.mxu0 %v7927_v9 }
0x12b5   :  { %2431 = vmatpush1.msra.mxu0 %v7935_v55 }
0x12b6   :  { %2432 = vmatprep.subr.mxu0 %v7941_v56 }
0x12b7   :  { %2433 = vmatpush1.msra.mxu0 %v7949_v60 }
0x12b8   :  { %2434 = vmatprep.subr.mxu0 %v7957_v0 }
0x12b9   :  { %2435 = vmatpush1.msra.mxu0 %v7965_v57 }
0x12ba   :  { %2630 = vmatprep.subr.mxu0 %v7900_v48 }
0x1372   :  { %v2268_v41 = vpop.f32.mrf.mxu0 }
0x1373   :  { %v2273_v42 = vadd.f32 %v8017_v24, %v2268_v41 }
0x1375   :  { %2280 = vrot.lane.b32.xlu1 %v2273_v42, %s7070_s7  ;;  %v2274_v46 = vadd.f32 %v2273_v42, %v1518_v45 }
0x1377   :  { %v2275_v47 = vmul.f32 0.5, %v2274_v46 }
0x1379   :  { %6804 = vtanh.f32 %v2275_v47  ;;  %v8191_v47 = vpop.f32.mrf.mxu0 }
0x1386   :  { %v6805_v52 = vpop.eup %6804 }
0x1387   :  { %v2277_v54 = vmul.f32 0.5, %v6805_v52 }
0x1389   :  { %v2278_v8 = vadd.f32 0.5, %v2277_v54 }
0x138b   :  { %v2290_v20 = vsub.f32 1.0, %v2278_v8  ;;  %v2296_v21 = vmul.f32 %v2278_v8, %v2196_v38 }
0x13e7   :  { %v2281_v10 = vpop.permute.xlu1 %2280 }
0x13e8   :  { %v2283_v11 = vmul.f32 %v2281_v10, %v2278_v8  ;;  %v1526_v8 = vrot.slane %v8051_v19, 6  ;;  %v1524_v10 = vrot.slane %v8056_v62, 7 }
0x13ea   :  { %2285 = vrot.lane.b32.xlu0 %v2283_v11, %s7070_s7  ;;  %v1528_v11 = vsel %vm1064_vm4, %v1524_v10, %v1526_v8 }
0x145c   :  { %v2286_v12 = vpop.permute.xlu0 %2285 }
0x145d   :  { %v2288_v15 = vadd.f32 %v2286_v12, %v1518_v45 }
0x145f   :  { %6806 = vtanh.f32 %v2288_v15 }
0x146c   :  { %v6807_v16 = vpop.eup %6806 }
0x146d   :  { %2292 = vrot.lane.b32.xlu1 %v6807_v16, %s7072_s9 }
0x14df   :  { %v2293_v5 = vpop.permute.xlu1 %2292 }
0x14e0   :  { %v2295_v59 = vmul.f32 %v2293_v5, %v2290_v20 }
0x14e2   :  { %v2297_v61 = vadd.f32 %v2296_v21, %v2295_v59 }
0x14e4   :  { %2299 = vrot.lane.b32.xlu0 %v2297_v61, %s7072_s9 }
0x1556   :  { %v2300_v3 = vpop.permute.xlu0 %2299 }
0x1557   :  { %6190 = vmatmul.mubr.msk.f32.vlgmr.msra.gmra.mxu1 %vm982_vm2, %v2300_v3 }
0x1558   :  { %2530 = vmatpush1.msra.mxu1 %v7921_v7  ;;  %2569 = vmatprep.mubr.f32.mxu1 %v9595_v22 }
0x1559   :  { %2531 = vmatprep.subr.mxu1 %v7927_v9 }
0x155a   :  { %2532 = vmatpush1.msra.mxu1 %v7935_v55 }
0x155b   :  { %2533 = vmatprep.subr.mxu1 %v7941_v56 }
0x155c   :  { %2534 = vmatpush1.msra.mxu1 %v7949_v60 }
0x155d   :  { %2535 = vmatprep.subr.mxu1 %v7957_v0 }
0x155e   :  { %2536 = vmatpush1.msra.mxu1 %v7965_v57 }
0x155f   :  { %2731 = vmatprep.subr.mxu1 %v7900_v48 }
0x1617   :  { %v2369_v6 = vpop.f32.mrf.mxu1 }
0x1618   :  { %v2374_v58 = vadd.f32 %v8017_v24, %v2369_v6 }
0x161a   :  { %2381 = vrot.lane.b32.xlu1 %v2374_v58, %s7070_s7  ;;  %v2375_v27 = vadd.f32 %v2374_v58, %v1523_v50 }
0x161c   :  { %v2376_v28 = vmul.f32 0.5, %v2375_v27  ;;  %v8211_v27 = vpop.f32.mrf.mxu1 }
0x161e   :  { %6808 = vtanh.f32 %v2376_v28 }
0x162b   :  { %v6809_v29 = vpop.eup %6808 }
0x162c   :  { %v2378_v30 = vmul.f32 0.5, %v6809_v29 }
0x162e   :  { %v2379_v31 = vadd.f32 0.5, %v2378_v30  ;;  %v8217_v30 = vadd.f32 %v8010_v13, %v8048_v18 }
0x1630   :  { %v2391_v41 = vsub.f32 1.0, %v2379_v31  ;;  %v2397_v43 = vmul.f32 %v2379_v31, %v2297_v61 }
0x168c   :  { %v2382_v33 = vpop.permute.xlu1 %2381 }
0x168d   :  { %v2384_v35 = vmul.f32 %v2382_v33, %v2379_v31  ;;  %v1530_v31 = vrot.slane %v8217_v30, 7  ;;  %v8222_v33 = vadd.f32 %v7903_v49, %v8048_v18 }
0x168f   :  { %2386 = vrot.lane.b32.xlu0 %v2384_v35, %s7070_s7  ;;  %v1532_v35 = vsel %vm1064_vm4, %v8222_v33, %v1530_v31 }
0x1701   :  { %v2387_v37 = vpop.permute.xlu0 %2386 }
0x1702   :  { %v2389_v38 = vadd.f32 %v2387_v37, %v1523_v50 }
0x1704   :  { %6810 = vtanh.f32 %v2389_v38 }
0x1711   :  { %v6811_v39 = vpop.eup %6810 }
0x1712   :  { %2393 = vrot.lane.b32.xlu1 %v6811_v39, %s7072_s9 }
0x1784   :  { %v2394_v42 = vpop.permute.xlu1 %2393 }
0x1785   :  { %v2396_v44 = vmul.f32 %v2394_v42, %v2391_v41 }
0x1787   :  { %v2398_v45 = vadd.f32 %v2397_v43, %v2396_v44 }
0x1789   :  { %2400 = vrot.lane.b32.xlu0 %v2398_v45, %s7072_s9 }
0x17fb   :  { %v2401_v46 = vpop.permute.xlu0 %2400 }
0x17fc   :  { %6191 = vmatmul.mubr.msk.f32.vlgmr.msra.gmra.mxu0 %vm982_vm2, %v2401_v46 }
0x17fd   :  { %2631 = vmatpush1.msra.mxu0 %v7921_v7  ;;  %2670 = vmatprep.mubr.f32.mxu0 %v9595_v22 }
0x17fe   :  { %2632 = vmatprep.subr.mxu0 %v7927_v9 }
0x17ff   :  { %2633 = vmatpush1.msra.mxu0 %v7935_v55 }
0x1800   :  { %2634 = vmatprep.subr.mxu0 %v7941_v56 }
0x1801   :  { %2635 = vmatpush1.msra.mxu0 %v7949_v60 }
0x1802   :  { %2636 = vmatprep.subr.mxu0 %v7957_v0 }
0x1803   :  { %2637 = vmatpush1.msra.mxu0 %v7965_v57 }
0x1804   :  { %2832 = vmatprep.subr.mxu0 %v7900_v48 }
0x18bc   :  { %v2470_v52 = vpop.f32.mrf.mxu0 }
0x18bd   :  { %v2475_v54 = vadd.f32 %v8017_v24, %v2470_v52 }
0x18bf   :  { %2482 = vrot.lane.b32.xlu1 %v2475_v54, %s7070_s7  ;;  %v2476_v12 = vadd.f32 %v2475_v54, %v1528_v11 }
0x18c1   :  { %v2477_v15 = vmul.f32 0.5, %v2476_v12 }
0x18c3   :  { %6812 = vtanh.f32 %v2477_v15 }
0x18d0   :  { %v6813_v16 = vpop.eup %6812 }
0x18d1   :  { %v2479_v20 = vmul.f32 0.5, %v6813_v16  ;;  %v1534_v16 = vrot.slane %v8222_v33, 1 }
0x18d3   :  { %v2480_v5 = vadd.f32 0.5, %v2479_v20  ;;  %v1536_v20 = vsel %vm1064_vm4, %v1534_v16, %v8217_v30  ;;  %v8285_v16 = vld [vmem:[%s9567_s8 + $0x28] sm:$0xff] }
0x18d5   :  { %v2492_v19 = vsub.f32 1.0, %v2480_v5  ;;  %v2498_v58 = vmul.f32 %v2480_v5, %v2398_v45 }
0x1931   :  { %v2483_v21 = vpop.permute.xlu1 %2482 }
0x1932   :  { %v2485_v59 = vmul.f32 %v2483_v21, %v2480_v5 }
0x1934   :  { %2487 = vrot.lane.b32.xlu0 %v2485_v59, %s7070_s7 }
0x19a6   :  { %v2488_v61 = vpop.permute.xlu0 %2487 }
0x19a7   :  { %v2490_v3 = vadd.f32 %v2488_v61, %v1528_v11  ;;  %v8239_v11 = vpop.f32.mrf.mxu0 }
0x19a9   :  { %6814 = vtanh.f32 %v2490_v3 }
0x19b6   :  { %v6815_v6 = vpop.eup %6814 }
0x19b7   :  { %2494 = vrot.lane.b32.xlu1 %v6815_v6, %s7072_s9 }
0x1a29   :  { %v2495_v62 = vpop.permute.xlu1 %2494 }
0x1a2a   :  { %v2497_v23 = vmul.f32 %v2495_v62, %v2492_v19 }
0x1a2c   :  { %v2499_v26 = vadd.f32 %v2498_v58, %v2497_v23 }
0x1a2e   :  { %2501 = vrot.lane.b32.xlu0 %v2499_v26, %s7072_s9 }
0x1aa0   :  { %v2502_v50 = vpop.permute.xlu0 %2501 }
0x1aa1   :  { %6192 = vmatmul.mubr.msk.f32.vlgmr.msra.gmra.mxu1 %vm982_vm2, %v2502_v50 }
0x1aa2   :  { %2732 = vmatpush1.msra.mxu1 %v7921_v7  ;;  %2771 = vmatprep.mubr.f32.mxu1 %v9595_v22 }
0x1aa3   :  { %2733 = vmatprep.subr.mxu1 %v7927_v9 }
0x1aa4   :  { %2734 = vmatpush1.msra.mxu1 %v7935_v55 }
0x1aa5   :  { %2735 = vmatprep.subr.mxu1 %v7941_v56 }
0x1aa6   :  { %2736 = vmatpush1.msra.mxu1 %v7949_v60 }
0x1aa7   :  { %2737 = vmatprep.subr.mxu1 %v7957_v0 }
0x1aa8   :  { %2738 = vmatpush1.msra.mxu1 %v7965_v57 }
0x1aa9   :  { %2933 = vmatprep.subr.mxu1 %v7900_v48 }
0x1b61   :  { %v2571_v28 = vpop.f32.mrf.mxu1 }
0x1b62   :  { %v2576_v29 = vadd.f32 %v8017_v24, %v2571_v28 }
0x1b64   :  { %2583 = vrot.lane.b32.xlu1 %v2576_v29, %s7070_s7  ;;  %v2577_v37 = vadd.f32 %v2576_v29, %v1532_v35 }
0x1b66   :  { %v2578_v38 = vmul.f32 0.5, %v2577_v37 }
0x1b68   :  { %6816 = vtanh.f32 %v2578_v38 }
0x1b75   :  { %v6817_v39 = vpop.eup %6816 }
0x1b76   :  { %v2580_v41 = vmul.f32 0.5, %v6817_v39 }
0x1b78   :  { %v2581_v42 = vadd.f32 0.5, %v2580_v41 }
0x1b7a   :  { %v2593_v49 = vsub.f32 1.0, %v2581_v42  ;;  %v2599_v52 = vmul.f32 %v2581_v42, %v2499_v26 }
0x1bd6   :  { %v2584_v43 = vpop.permute.xlu1 %2583 }
0x1bd7   :  { %v2586_v44 = vmul.f32 %v2584_v43, %v2581_v42 }
0x1bd9   :  { %2588 = vrot.lane.b32.xlu0 %v2586_v44, %s7070_s7 }
0x1c4b   :  { %v2589_v13 = vpop.permute.xlu0 %2588 }
0x1c4c   :  { %v2591_v45 = vadd.f32 %v2589_v13, %v1532_v35  ;;  %v8261_v35 = vld [vmem:[%s9567_s8 + $0x38] sm:$0xff] }
0x1c4e   :  { %6818 = vtanh.f32 %v2591_v45 }
0x1c5b   :  { %v6819_v46 = vpop.eup %6818 }
0x1c5c   :  { %2595 = vrot.lane.b32.xlu1 %v6819_v46, %s7072_s9 }
0x1cce   :  { %v2596_v18 = vpop.permute.xlu1 %2595 }
0x1ccf   :  { %v2598_v54 = vmul.f32 %v2596_v18, %v2593_v49 }
0x1cd1   :  { %v2600_v8 = vadd.f32 %v2599_v52, %v2598_v54 }
0x1cd3   :  { %2602 = vrot.lane.b32.xlu0 %v2600_v8, %s7072_s9 }
0x1d45   :  { %v2603_v10 = vpop.permute.xlu0 %2602 }
0x1d46   :  { %6193 = vmatmul.mubr.msk.f32.vlgmr.msra.gmra.mxu0 %vm982_vm2, %v2603_v10 }
0x1d47   :  { %2833 = vmatpush1.msra.mxu0 %v7921_v7  ;;  %2872 = vmatprep.mubr.f32.mxu0 %v9595_v22 }
0x1d48   :  { %2834 = vmatprep.subr.mxu0 %v7927_v9 }
0x1d49   :  { %2835 = vmatpush1.msra.mxu0 %v7935_v55 }
0x1d4a   :  { %2836 = vmatprep.subr.mxu0 %v7941_v56 }
0x1d4b   :  { %2837 = vmatpush1.msra.mxu0 %v7949_v60 }
0x1d4c   :  { %2838 = vmatprep.subr.mxu0 %v7957_v0 }
0x1d4d   :  { %2839 = vmatpush1.msra.mxu0 %v7965_v57 }
0x1d4e   :  { %3034 = vmatprep.subr.mxu0 %v7900_v48 }
0x1e06   :  { %v2672_v12 = vpop.f32.mrf.mxu0 }
0x1e07   :  { %v2677_v15 = vadd.f32 %v8017_v24, %v2672_v12 }
0x1e09   :  { %2684 = vrot.lane.b32.xlu1 %v2677_v15, %s7070_s7  ;;  %v2678_v5 = vadd.f32 %v2677_v15, %v1536_v20  ;;  %v8278_v15 = vld [vmem:[%s9567_s8 + $0x30] sm:$0xff] }
0x1e0b   :  { %v2679_v21 = vmul.f32 0.5, %v2678_v5  ;;  %v8297_v5 = vld [vmem:[%s9567_s8 + $0x18] sm:$0xff] }
0x1e0d   :  { %6820 = vtanh.f32 %v2679_v21  ;;  %v8303_v21 = vld [vmem:[%s9567_s8 + $0x10] sm:$0xff] }
0x1e1a   :  { %v6821_v59 = vpop.eup %6820 }
0x1e1b   :  { %v2681_v61 = vmul.f32 0.5, %v6821_v59  ;;  %v8309_v59 = vpop.f32.mrf.mxu0 }
0x1e1d   :  { %v2682_v3 = vadd.f32 0.5, %v2681_v61 }
0x1e1f   :  { %v2694_v23 = vsub.f32 1.0, %v2682_v3  ;;  %v2700_v50 = vmul.f32 %v2682_v3, %v2600_v8 }
0x1e7b   :  { %v2685_v6 = vpop.permute.xlu1 %2684 }
0x1e7c   :  { %v2687_v48 = vmul.f32 %v2685_v6, %v2682_v3  ;;  %v1544_v6 = vrot.slane %v8217_v30, 2 }
0x1e7e   :  { %2689 = vrot.lane.b32.xlu0 %v2687_v48, %s7070_s7  ;;  %v1542_v48 = vrot.slane %v8222_v33, 3 }
0x1ef0   :  { %v2690_v19 = vpop.permute.xlu0 %2689 }
0x1ef1   :  { %v2692_v62 = vadd.f32 %v2690_v19, %v1536_v20  ;;  %v8291_v20 = vld [vmem:[%s9567_s8 + $0x20] sm:$0xff]  ;;  %v1546_v19 = vsel %vm1064_vm4, %v1542_v48, %v1544_v6 }
0x1ef3   :  { %6822 = vtanh.f32 %v2692_v62 }
0x1f00   :  { %v6823_v58 = vpop.eup %6822 }
0x1f01   :  { %2696 = vrot.lane.b32.xlu1 %v6823_v58, %s7072_s9 }
0x1f73   :  { %v2697_v26 = vpop.permute.xlu1 %2696 }
0x1f74   :  { %v2699_v28 = vmul.f32 %v2697_v26, %v2694_v23 }
0x1f76   :  { %v2701_v29 = vadd.f32 %v2700_v50, %v2699_v28 }
0x1f78   :  { %2703 = vrot.lane.b32.xlu0 %v2701_v29, %s7072_s9 }
0x1fea   :  { %v2704_v31 = vpop.permute.xlu0 %2703 }
0x1feb   :  { %6194 = vmatmul.mubr.msk.f32.vlgmr.msra.gmra.mxu1 %vm982_vm2, %v2704_v31 }
0x1fec   :  { %2934 = vmatpush1.msra.mxu1 %v7921_v7  ;;  %2973 = vmatprep.mubr.f32.mxu1 %v9595_v22  ;;  %v8264_v7 = vpop.f32.mrf.mxu1 }
0x1fed   :  { %2935 = vmatprep.subr.mxu1 %v7927_v9 }
0x1fee   :  { %2936 = vmatpush1.msra.mxu1 %v7935_v55 }
0x1fef   :  { %2937 = vmatprep.subr.mxu1 %v7941_v56  ;;  %v1539_v56 = vrot.slane %v8217_v30, 1 }
0x1ff0   :  { %2938 = vmatpush1.msra.mxu1 %v7949_v60  ;;  %v1537_v60 = vrot.slane %v8222_v33, 2 }
0x1ff1   :  { %2939 = vmatprep.subr.mxu1 %v7957_v0 }
0x1ff2   :  { %2940 = vmatpush1.msra.mxu1 %v7965_v57  ;;  %v1541_v37 = vsel %vm1064_vm4, %v1537_v60, %v1539_v56 }
0x1ff3   :  { %3135 = vmatprep.subr.mxu1 %v8261_v35 }
0x20ab   :  { %v2773_v9 = vpop.f32.mrf.mxu1 }
0x20ac   :  { %v2778_v55 = vadd.f32 %v8017_v24, %v2773_v9 }
0x20ae   :  { %2785 = vrot.lane.b32.xlu1 %v2778_v55, %s7070_s7  ;;  %v2779_v38 = vadd.f32 %v2778_v55, %v1541_v37 }
0x20b0   :  { %v2780_v39 = vmul.f32 0.5, %v2779_v38 }
0x20b2   :  { %6824 = vtanh.f32 %v2780_v39  ;;  %v8329_v39 = vld [vmem:[%s9567_s8 + $0x8] sm:$0xff] }
0x20bf   :  { %v6825_v41 = vpop.eup %6824 }
0x20c0   :  { %v2782_v42 = vmul.f32 0.5, %v6825_v41  ;;  %v8335_v41 = vld [vmem:[%s9567_s8] sm:$0xff] }
0x20c2   :  { %v2783_v43 = vadd.f32 0.5, %v2782_v42  ;;  %v8339_v42 = vpop.f32.mrf.mxu1 }
0x20c4   :  { %v2795_v18 = vsub.f32 1.0, %v2783_v43  ;;  %v2801_v54 = vmul.f32 %v2783_v43, %v2701_v29 }
0x2120   :  { %v2786_v44 = vpop.permute.xlu1 %2785 }
0x2121   :  { %v2788_v13 = vmul.f32 %v2786_v44, %v2783_v43 }
0x2123   :  { %2790 = vrot.lane.b32.xlu0 %v2788_v13, %s7070_s7  ;;  %v1549_v13 = vrot.slane %v8217_v30, 3 }
0x2195   :  { %v2791_v45 = vpop.permute.xlu0 %2790 }
0x2196   :  { %v2793_v46 = vadd.f32 %v2791_v45, %v1541_v37  ;;  %v1547_v45 = vrot.slane %v8222_v33, 4 }
0x2198   :  { %6826 = vtanh.f32 %v2793_v46  ;;  %v1551_v46 = vsel %vm1064_vm4, %v1547_v45, %v1549_v13 }
0x21a5   :  { %v6827_v49 = vpop.eup %6826 }
0x21a6   :  { %2797 = vrot.lane.b32.xlu1 %v6827_v49, %s7072_s9 }
0x2218   :  { %v2798_v52 = vpop.permute.xlu1 %2797 }
0x2219   :  { %v2800_v8 = vmul.f32 %v2798_v52, %v2795_v18 }
0x221b   :  { %v2802_v10 = vadd.f32 %v2801_v54, %v2800_v8 }
0x221d   :  { %2804 = vrot.lane.b32.xlu0 %v2802_v10, %s7072_s9 }
0x228f   :  { %v2805_v12 = vpop.permute.xlu0 %2804 }
0x2290   :  { %6195 = vmatmul.mubr.msk.f32.vlgmr.msra.gmra.mxu0 %vm982_vm2, %v2805_v12 }
0x2291   :  { %3035 = vmatpush1.msra.mxu0 %v8278_v15  ;;  %3074 = vmatprep.mubr.f32.mxu0 %v9595_v22 }
0x2292   :  { %3036 = vmatprep.subr.mxu0 %v8285_v16 }
0x2293   :  { %3037 = vmatpush1.msra.mxu0 %v8291_v20 }
0x2294   :  { %3038 = vmatprep.subr.mxu0 %v8297_v5 }
0x2295   :  { %3039 = vmatpush1.msra.mxu0 %v8303_v21 }
0x2296   :  { %3040 = vmatprep.subr.mxu0 %v7957_v0 }
0x2297   :  { %3041 = vmatpush1.msra.mxu0 %v7965_v57 }
0x2298   :  { %3236 = vmatprep.subr.mxu0 %v8261_v35 }
0x2350   :  { %v2874_v61 = vpop.f32.mrf.mxu0 }
0x2351   :  { %v2879_v3 = vadd.f32 %v8017_v24, %v2874_v61 }
0x2353   :  { %2886 = vrot.lane.b32.xlu1 %v2879_v3, %s7070_s7  ;;  %v2880_v62 = vadd.f32 %v2879_v3, %v1546_v19 }
0x2355   :  { %v2881_v58 = vmul.f32 0.5, %v2880_v62 }
0x2357   :  { %6828 = vtanh.f32 %v2881_v58 }
0x2364   :  { %v6829_v0 = vpop.eup %6828 }
0x2365   :  { %v2883_v57 = vmul.f32 0.5, %v6829_v0  ;;  %v8358_v0 = vpop.f32.mrf.mxu0 }
0x2367   :  { %v2884_v23 = vadd.f32 0.5, %v2883_v57 }
0x2369   :  { %v2896_v9 = vsub.f32 1.0, %v2884_v23  ;;  %v2902_v56 = vmul.f32 %v2884_v23, %v2802_v10 }
0x23c5   :  { %v2887_v26 = vpop.permute.xlu1 %2886 }
0x23c6   :  { %v2889_v50 = vmul.f32 %v2887_v26, %v2884_v23  ;;  %v8363_v23 = vld [vmem:[%s9569_s10] ss:$0 sm:$0xff] }
0x23c8   :  { %2891 = vrot.lane.b32.xlu0 %v2889_v50, %s7070_s7  ;;  %v1554_v50 = vrot.slane %v8217_v30, 4 }
0x243a   :  { %v2892_v28 = vpop.permute.xlu0 %2891 }
0x243b   :  { %v2894_v29 = vadd.f32 %v2892_v28, %v1546_v19  ;;  %v1552_v28 = vrot.slane %v8222_v33, 5 }
0x243d   :  { %6830 = vtanh.f32 %v2894_v29  ;;  %v1556_v29 = vsel %vm1064_vm4, %v1552_v28, %v1554_v50 }
0x244a   :  { %v6831_v31 = vpop.eup %6830 }
0x244b   :  { %2898 = vrot.lane.b32.xlu1 %v6831_v31, %s7072_s9 }
0x24bd   :  { %v2899_v55 = vpop.permute.xlu1 %2898 }
0x24be   :  { %v2901_v60 = vmul.f32 %v2899_v55, %v2896_v9 }
0x24c0   :  { %v2903_v37 = vadd.f32 %v2902_v56, %v2901_v60 }
0x24c2   :  { %2905 = vrot.lane.b32.xlu0 %v2903_v37, %s7072_s9 }
0x2534   :  { %v2906_v38 = vpop.permute.xlu0 %2905 }
0x2535   :  { %6196 = vmatmul.mubr.msk.f32.vlgmr.msra.gmra.mxu1 %vm982_vm2, %v2906_v38 }
0x2536   :  { %3136 = vmatpush1.msra.mxu1 %v8278_v15  ;;  %3175 = vmatprep.mubr.f32.mxu1 %v9595_v22 }
0x2537   :  { %3137 = vmatprep.subr.mxu1 %v8285_v16 }
0x2538   :  { %3138 = vmatpush1.msra.mxu1 %v8291_v20 }
0x2539   :  { %3139 = vmatprep.subr.mxu1 %v8297_v5 }
0x253a   :  { %3140 = vmatpush1.msra.mxu1 %v8303_v21 }
0x253b   :  { %3141 = vmatprep.subr.mxu1 %v8329_v39 }
0x253c   :  { %3142 = vmatpush1.msra.mxu1 %v8335_v41 }
0x253d   :  { %3337 = vmatprep.subr.mxu1 %v8261_v35 }
0x25f5   :  { %v2975_v43 = vpop.f32.mrf.mxu1 }
0x25f6   :  { %v2980_v44 = vadd.f32 %v8017_v24, %v2975_v43 }
0x25f8   :  { %2987 = vrot.lane.b32.xlu1 %v2980_v44, %s7070_s7  ;;  %v2981_v49 = vadd.f32 %v2980_v44, %v1551_v46 }
0x25fa   :  { %v2982_v18 = vmul.f32 0.5, %v2981_v49 }
0x25fc   :  { %6832 = vtanh.f32 %v2982_v18 }
0x2609   :  { %v6833_v52 = vpop.eup %6832 }
0x260a   :  { %v2984_v54 = vmul.f32 0.5, %v6833_v52 }
0x260c   :  { %v2985_v8 = vadd.f32 0.5, %v2984_v54 }
0x260e   :  { %v2997_v3 = vsub.f32 1.0, %v2985_v8  ;;  %v3003_v48 = vmul.f32 %v2985_v8, %v2903_v37 }
0x266a   :  { %v2988_v35 = vpop.permute.xlu1 %2987 }
0x266b   :  { %v2990_v10 = vmul.f32 %v2988_v35, %v2985_v8  ;;  %v8383_v8 = vpop.f32.mrf.mxu1 }
0x266d   :  { %2992 = vrot.lane.b32.xlu0 %v2990_v10, %s7070_s7 }
0x26df   :  { %v2993_v12 = vpop.permute.xlu0 %2992 }
0x26e0   :  { %v2995_v24 = vadd.f32 %v2993_v12, %v1551_v46 }
0x26e2   :  { %6834 = vtanh.f32 %v2995_v24 }
0x26ef   :  { %v6835_v61 = vpop.eup %6834 }
0x26f0   :  { %2999 = vrot.lane.b32.xlu1 %v6835_v61, %s7072_s9 }
0x2762   :  { %v3000_v6 = vpop.permute.xlu1 %2999 }
0x2763   :  { %v3002_v19 = vmul.f32 %v3000_v6, %v2997_v3 }
0x2765   :  { %v3004_v62 = vadd.f32 %v3003_v48, %v3002_v19 }
0x2767   :  { %3006 = vrot.lane.b32.xlu0 %v3004_v62, %s7072_s9 }
0x27d9   :  { %v3007_v58 = vpop.permute.xlu0 %3006 }
0x27da   :  { %6197 = vmatmul.mubr.msk.f32.vlgmr.msra.gmra.mxu0 %vm982_vm2, %v3007_v58 }
0x27db   :  { %3237 = vmatpush1.msra.mxu0 %v8278_v15  ;;  %3276 = vmatprep.mubr.f32.mxu0 %v9595_v22 }
0x27dc   :  { %3238 = vmatprep.subr.mxu0 %v8285_v16 }
0x27dd   :  { %3239 = vmatpush1.msra.mxu0 %v8291_v20 }
0x27de   :  { %3240 = vmatprep.subr.mxu0 %v8297_v5 }
0x27df   :  { %3241 = vmatpush1.msra.mxu0 %v8303_v21 }
0x27e0   :  { %3242 = vmatprep.subr.mxu0 %v8329_v39 }
0x27e1   :  { %3243 = vmatpush1.msra.mxu0 %v8335_v41 }
0x289a   :  { %v3076_v57 = vpop.f32.mrf.mxu0 }
0x289b   :  { %v3081_v26 = vadd.f32 %v8363_v23, %v3076_v57 }
0x289c   :  { %v8395_v28 = vpop.f32.mrf.mxu0 }
0x289d   :  { %3088 = vrot.lane.b32.xlu1 %v3081_v26, %s7070_s7  ;;  %v3082_v31 = vadd.f32 %v3081_v26, %v1556_v29 }
0x289f   :  { %v3083_v9 = vmul.f32 0.5, %v3082_v31 }
0x28a1   :  { %6836 = vtanh.f32 %v3083_v9  ;;  %v1564_v9 = vrot.slane %v8217_v30, 6 }
0x28ae   :  { %v6837_v55 = vpop.eup %6836 }
0x28af   :  { %v3085_v56 = vmul.f32 0.5, %v6837_v55  ;;  %v1562_v55 = vrot.slane %v8222_v33, 7 }
0x28b1   :  { %v3086_v60 = vadd.f32 0.5, %v3085_v56  ;;  %v1566_v56 = vsel %vm1064_vm4, %v1562_v55, %v1564_v9  ;;  %v8501_v55 = vld [vmem:[%s9572_s13] sm:$0x1]  ;;  %s7073_s13 = smov 16  }
0x28b3   :  { %v3098_v45 = vsub.f32 1.0, %v3086_v60  ;;  %v3104_v49 = vmul.f32 %v3086_v60, %v3004_v62 }
0x290f   :  { %v3089_v37 = vpop.permute.xlu1 %3088 }
0x2910   :  { %v3091_v38 = vmul.f32 %v3089_v37, %v3086_v60 }
0x2912   :  { %3093 = vrot.lane.b32.xlu0 %v3091_v38, %s7070_s7 }
0x2984   :  { %v3094_v43 = vpop.permute.xlu0 %3093 }
0x2985   :  { %v3096_v44 = vadd.f32 %v3094_v43, %v1556_v29 }
0x2987   :  { %6838 = vtanh.f32 %v3096_v44 }
0x2994   :  { %v6839_v13 = vpop.eup %6838 }
0x2995   :  { %3100 = vrot.lane.b32.xlu1 %v6839_v13, %s7072_s9 }
0x2a07   :  { %v3101_v46 = vpop.permute.xlu1 %3100 }
0x2a08   :  { %v3103_v18 = vmul.f32 %v3101_v46, %v3098_v45 }
0x2a0a   :  { %v3105_v52 = vadd.f32 %v3104_v49, %v3103_v18  ;;  %v8416_v49 = vld [vmem:[%s9571_s12 + $0x48] sm:$0xff]  ;;  %v8422_v18 = vld [vmem:[%s9571_s12 + $0x40] sm:$0xff] }
0x2a0b   :  { %9663 = vst [vmem:[#allocation17_spill] sm:$0xff] %v8416_v49  ;;  %9664 = vst [vmem:[#allocation18_spill] sm:$0xff] %v8422_v18 }
0x2a0c   :  { %3107 = vrot.lane.b32.xlu0 %v3105_v52, %s7072_s9 }
0x2a7e   :  { %v3108_v54 = vpop.permute.xlu0 %3107 }
0x2a7f   :  { %6198 = vmatmul.mubr.msk.f32.vlgmr.msra.gmra.mxu1 %vm982_vm2, %v3108_v54  ;;  %v8434_v54 = vld [vmem:[%s9571_s12 + $0x20] sm:$0xff] }
0x2a80   :  { %3338 = vmatpush1.msra.mxu1 %v8278_v15  ;;  %3377 = vmatprep.mubr.f32.mxu1 %v9595_v22  ;;  %9666 = vst [vmem:[#allocation20_spill] sm:$0xff] %v8434_v54 }
0x2a81   :  { %3339 = vmatprep.subr.mxu1 %v8285_v16  ;;  %v1559_v16 = vrot.slane %v8217_v30, 5  ;;  %v8406_v30 = vld [vmem:[%s9571_s12 + $0x68] sm:$0xff] }
0x2a82   :  { %3340 = vmatpush1.msra.mxu1 %v8291_v20  ;;  %v1557_v20 = vrot.slane %v8222_v33, 6  ;;  %9661 = vst [vmem:[#allocation15_spill] sm:$0xff] %v8406_v30  ;;  %v8411_v33 = vld [vmem:[%s9571_s12 + $0x60] sm:$0xff]  ;;  %3502 = vmatprep.subr.mxu0 %v8406_v30 }
0x2a83   :  { %3341 = vmatprep.subr.mxu1 %v8297_v5  ;;  %9662 = vst [vmem:[#allocation16_spill] sm:$0xff] %v8411_v33 }
0x2a84   :  { %3342 = vmatpush1.msra.mxu1 %v8303_v21  ;;  %v1561_v5 = vsel %vm1064_vm4, %v1557_v20, %v1559_v16 }
0x2a85   :  { %3343 = vmatprep.subr.mxu1 %v8329_v39 }
0x2a86   :  { %3344 = vmatpush1.msra.mxu1 %v8335_v41 }
0x2a87   :  { %6645 = vmatprep.subr.mxu1 %v9595_v22 }
0x2b3f   :  { %v3177_v35 = vpop.f32.mrf.mxu1 }
0x2b40   :  { %v3182_v15 = vadd.f32 %v8363_v23, %v3177_v35  ;;  %v8440_v35 = vld [vmem:[%s9571_s12 + $0x8] sm:$0xff] }
0x2b41   :  { %9667 = vst [vmem:[#allocation21_spill] sm:$0xff] %v8440_v35 }
0x2b42   :  { %3189 = vrot.lane.b32.xlu1 %v3182_v15, %s7070_s7  ;;  %v3183_v21 = vadd.f32 %v3182_v15, %v1561_v5  ;;  %v8446_v15 = vld [vmem:[%s9571_s12] sm:$0xff] }
0x2b43   :  { %9668 = vst [vmem:[#allocation22_spill] sm:$0xff] %v8446_v15 }
0x2b44   :  { %v3184_v10 = vmul.f32 0.5, %v3183_v21 }
0x2b46   :  { %6840 = vtanh.f32 %v3184_v10 }
0x2b53   :  { %v6841_v39 = vpop.eup %6840 }
0x2b54   :  { %v3186_v41 = vmul.f32 0.5, %v6841_v39 }
0x2b56   :  { %v3187_v12 = vadd.f32 0.5, %v3186_v41 }
0x2b58   :  { %v3199_v19 = vsub.f32 1.0, %v3187_v12  ;;  %v3205_v58 = vmul.f32 %v3187_v12, %v3105_v52  ;;  %v8428_v52 = vld [vmem:[%s9571_s12 + $0x28] sm:$0xff] }
0x2b59   :  { %9665 = vst [vmem:[#allocation19_spill] sm:$0xff] %v8428_v52 }
0x2bb4   :  { %v3190_v24 = vpop.permute.xlu1 %3189 }
0x2bb5   :  { %v3192_v61 = vmul.f32 %v3190_v24, %v3187_v12  ;;  %v6927_v12 = vld [vmem:[%s9570_s11 + $0x18] sm:$0xff]  ;;  %v6928_v24 = vld [vmem:[%s9570_s11 + $0x10] sm:$0xff] }
0x2bb7   :  { %3194 = vrot.lane.b32.xlu0 %v3192_v61, %s7070_s7  ;;  %v6929_v61 = vld [vmem:[%s9570_s11 + $0x8] sm:$0xff] }
0x2c29   :  { %v3195_v3 = vpop.permute.xlu0 %3194 }
0x2c2a   :  { %v3197_v6 = vadd.f32 %v3195_v3, %v1561_v5  ;;  %v854_v3 = vld [vmem:[%s9564_s5 + $0x1] sm:$0x1] }
0x2c2c   :  { %6842 = vtanh.f32 %v3197_v6  ;;  %v6930_v6 = vld [vmem:[%s9570_s11] sm:$0xff] }
0x2c39   :  { %v6843_v48 = vpop.eup %6842 }
0x2c3a   :  { %3201 = vrot.lane.b32.xlu1 %v6843_v48, %s7072_s9  ;;  %v3179_v48 = vpop.f32.mrf.mxu1 }
0x2cac   :  { %v3202_v62 = vpop.permute.xlu1 %3201 }
0x2cad   :  { %v3204_v57 = vmul.f32 %v3202_v62, %v3199_v19  ;;  %v8492_v62 = vld [vmem:[%s9573_s14] ss:$0 sm:$0xff] }
0x2cae   :  { %9669 = vst [vmem:[#allocation23_spill] sm:$0xff] %v8492_v62 }
0x2caf   :  { %v3206_v26 = vadd.f32 %v3205_v58, %v3204_v57 }
0x2cb1   :  { %3208 = vrot.lane.b32.xlu0 %v3206_v26, %s7072_s9 }
0x2d23   :  { %v3209_v50 = vpop.permute.xlu0 %3208 }
0x2d24   :  { %6199 = vmatmul.mubr.msk.f32.vlgmr.msra.gmra.mxu0 %vm982_vm2, %v3209_v50 }
0x2d25   :  { %3542 = vmatprep.mubr.f32.mxu0 %v9595_v22  ;;  %3503 = vmatpush1.msra.mxu0 %v8411_v33 }
0x2d26   :  { %3504 = vmatprep.subr.mxu0 %v8416_v49 }
0x2d27   :  { %3505 = vmatpush1.msra.mxu0 %v8422_v18 }
0x2d28   :  { %3506 = vmatprep.subr.mxu0 %v8428_v52 }
0x2d29   :  { %3507 = vmatpush1.msra.mxu0 %v8434_v54 }
0x2d2a   :  { %3508 = vmatprep.subr.mxu0 %v8440_v35 }
0x2d2b   :  { %3509 = vmatpush1.msra.mxu0 %v8446_v15 }
0x2d2c   :  { %3686 = vmatprep.subr.mxu0 %v8406_v30 }
0x2de4   :  { %v3278_v29 = vpop.f32.mrf.mxu0 }
0x2de5   :  { %v3283_v31 = vadd.f32 %v8363_v23, %v3278_v29 }
0x2de6   :  { %v3280_v19 = vpop.f32.mrf.mxu0 }
0x2de7   :  { %3290 = vrot.lane.b32.xlu1 %v3283_v31, %s7070_s7  ;;  %v3284_v60 = vadd.f32 %v3283_v31, %v1566_v56 }
0x2de9   :  { %v3285_v37 = vmul.f32 0.5, %v3284_v60 }
0x2deb   :  { %6844 = vtanh.f32 %v3285_v37 }
0x2df8   :  { %v6845_v38 = vpop.eup %6844 }
0x2df9   :  { %v3287_v43 = vmul.f32 0.5, %v6845_v38 }
0x2dfb   :  { %v3288_v44 = vadd.f32 0.5, %v3287_v43 }
0x2dfd   :  { %v3300_v20 = vsub.f32 1.0, %v3288_v44  ;;  %v3306_v21 = vmul.f32 %v3288_v44, %v3206_v26 }
0x2e59   :  { %v3291_v13 = vpop.permute.xlu1 %3290 }
0x2e5a   :  { %v3293_v45 = vmul.f32 %v3291_v13, %v3288_v44 }
0x2e5c   :  { %3295 = vrot.lane.b32.xlu0 %v3293_v45, %s7070_s7 }
0x2ece   :  { %v3296_v46 = vpop.permute.xlu0 %3295 }
0x2ecf   :  { %v3298_v23 = vadd.f32 %v3296_v46, %v1566_v56 }
0x2ed1   :  { %6846 = vtanh.f32 %v3298_v23 }
0x2ede   :  { %v6847_v16 = vpop.eup %6846 }
0x2edf   :  { %3302 = vrot.lane.b32.xlu1 %v6847_v16, %s7072_s9 }
0x2f51   :  { %v3303_v5 = vpop.permute.xlu1 %3302 }
0x2f52   :  { %v3305_v10 = vmul.f32 %v3303_v5, %v3300_v20  ;;  %v8518_v5 = vld [vmem:[%s9571_s12 + $0x78] sm:$0xff] }
0x2f53   :  { %9670 = vst [vmem:[#allocation24_spill] sm:$0xff] %v8518_v5 }
0x2f54   :  { %v8453_v39 = vadd.f32 %v3306_v21, %v3305_v10  ;;  %v8523_v21 = vld [vmem:[%s9571_s12 + $0x70] sm:$0xff] }
0x2f55   :  { %9671 = vst [vmem:[#allocation25_spill] sm:$0xff] %v8523_v21  ;;  %v8561_v10 = vld [vmem:[%s9571_s12 + $0x10] sm:$0xff] }
0x2f56   :  { %3309 = vrot.lane.b32.xlu0 %v8453_v39, %s7072_s9  ;;  %9677 = vst [vmem:[#allocation31_spill] sm:$0xff] %v8561_v10 }
0x2fc8   :  { %v3310_v41 = vpop.permute.xlu0 %3309 }
0x2fc9   :  { %6200 = vmatmul.mubr.msk.f32.vlgmr.msra.gmra.mxu1 %vm982_vm2, %v3310_v41  ;;  %6201 = vmatmul.mubr.msk.f32.vlgmr.msra.gmra.mxu0 %vm982_vm2, %v3310_v41 }
0x2fca   :  { %6646 = vmatpush3.msra.mxu1 %v6927_v12  ;;  %6653 = vmatprep.mubr.msk.f32.mxu1 %vm7069_vm3, %v9595_v22 }
0x2fcb   :  { %6647 = vmatprep.subr.mxu1 %v9595_v22  ;;  %3687 = vmatpush1.msra.mxu0 %v8411_v33 }
0x2fcc   :  { %6648 = vmatpush3.msra.mxu1 %v6928_v24  ;;  %3688 = vmatprep.subr.mxu0 %v8416_v49 }
0x2fcd   :  { %6649 = vmatprep.subr.mxu1 %v9595_v22  ;;  %3689 = vmatpush1.msra.mxu0 %v8422_v18 }
0x2fce   :  { %6650 = vmatpush3.msra.mxu1 %v6929_v61  ;;  %3690 = vmatprep.subr.mxu0 %v8428_v52 }
0x2fcf   :  { %6651 = vmatprep.subr.mxu1 %v9595_v22  ;;  %3691 = vmatpush1.msra.mxu0 %v8434_v54 }
0x2fd0   :  { %6652 = vmatpush3.msra.mxu1 %v6930_v6  ;;  %3692 = vmatprep.subr.mxu0 %v8440_v35  ;;  %v8581_v6 = vld [vmem:[%s9574_s15 + $0xf8] sm:$0xff] }
0x2fd1   :  { %6654 = vmatmul.mubr.msk.f32.vlgmr.msra.gmra.mxu1 %vm982_vm2, %v854_v3  ;;  %3693 = vmatpush1.msra.mxu0 %v8446_v15  ;;  %9679 = vst [vmem:[#allocation33_spill] sm:$0xff] %v8581_v6 }
0x2fd2   :  { %3726 = vmatprep.mubr.f32.mxu0 %v9595_v22  ;;  %3797 = vmatprep.mubr.f32.mxu1 %v9595_v22 }
0x2fd3   :  { %3757 = vmatprep.subr.mxu1 %v8518_v5  ;;  %6356 = vmatprep.subr.mxu0 %v8581_v6 }
0x2fd4   :  { %3758 = vmatpush1.msra.mxu1 %v8523_v21 }
0x3089   :  { %v3379_v58 = vpop.f32.mrf.mxu1  ;;  %v3544_v57 = vpop.f32.mrf.mxu0 }
0x308a   :  { %v3628_v26 = vadd.f32 %v8492_v62, %v3544_v57  ;;  %v8650_v58 = vld [vmem:[%s9574_s15 + $0xd0] sm:$0xff] }
0x308b   :  { %v3546_v50 = vpop.f32.mrf.mxu0  ;;  %v8496_v29 = vpop.f32.mrf.mxu1  ;;  %v8656_v57 = vld [vmem:[%s9574_s15 + $0x50] sm:$0xff] }
0x308c   :  { %3639 = vrot.lane.b32.xlu1 %v3628_v26, %s7070_s7  ;;  %v8670_v50 = vld [vmem:[%s9574_s15 + $0x48] sm:$0xff] }
0x3091   :  { %v3617_v31 = vpop.f32.mrf.mxu1 }
0x3092   :  { %v3618_v56 = vadd.f32 %v3617_v31, %v8501_v55  ;;  %v8675_v31 = vld [vmem:[%s9574_s15 + $0xc0] sm:$0xff] }
0x3093   :  { %v6655_v9 = vpop.f32.mrf.mxu1 }
0x3094   :  { %v3632_v60 = vrot.slane %v3618_v56, %v8027_v36  ;;  %v8682_v9 = vld [vmem:[%s9574_s15 + $0x40] sm:$0xff]  ;;  %v8687_v56 = vld [vmem:[%s9574_s15 + $0xb8] sm:$0xff] }
0x3096   :  { %v3633_v37 = vadd.f32 %v3632_v60, %v3628_v26  ;;  %v8662_v26 = vld [vmem:[%s9574_s15 + $0xc8] sm:$0xff] }
0x3098   :  { %v3634_v38 = vmul.f32 0.5, %v3633_v37  ;;  %v8698_v37 = vld [vmem:[%s9574_s15 + $0xb0] sm:$0xff] }
0x309a   :  { %6848 = vtanh.f32 %v3634_v38  ;;  %v8704_v38 = vld [vmem:[%s9574_s15 + $0x30] sm:$0xff] }
0x30a7   :  { %v6849_v43 = vpop.eup %6848 }
0x30a8   :  { %v3636_v44 = vmul.f32 0.5, %v6849_v43  ;;  %v8710_v43 = vld [vmem:[%s9574_s15 + $0xa8] sm:$0xff] }
0x30aa   :  { %v3637_v13 = vadd.f32 0.5, %v3636_v44  ;;  %v8716_v44 = vld [vmem:[%s9574_s15 + $0x28] sm:$0xff] }
0x30ac   :  { %v3649_v41 = vsub.f32 1.0, %v3637_v13  ;;  %v3655_v24 = vmul.f32 %v3637_v13, %v8453_v39  ;;  %v8632_v39 = vld [vmem:[%s9574_s15 + $0x60] sm:$0xff] }
0x30fe   :  { %v3640_v45 = vpop.permute.xlu1 %3639 }
0x30ff   :  { %v3642_v46 = vmul.f32 %v3640_v45, %v3637_v13  ;;  %v8721_v13 = vld [vmem:[%s9574_s15 + $0x108] sm:$0xff]  ;;  %v8727_v45 = vld [vmem:[%s9574_s15 + $0xa0] sm:$0xff] }
0x3100   :  { %9680 = vst [vmem:[#allocation34_spill] sm:$0xff] %v8721_v13 }
0x3101   :  { %3644 = vrot.lane.b32.xlu0 %v3642_v46, %s7070_s7  ;;  %v8734_v46 = vld [vmem:[%s9574_s15 + $0x20] sm:$0xff] }
0x3173   :  { %v3645_v23 = vpop.permute.xlu0 %3644 }
0x3174   :  { %v3647_v16 = vadd.f32 %v3645_v23, %v3632_v60  ;;  %v8692_v60 = vld [vmem:[%s9574_s15 + $0x38] sm:$0xff] }
0x3175   :  { %v8741_v23 = vld [vmem:[%s9574_s15 + $0x98] sm:$0xff] }
0x3176   :  { %6850 = vtanh.f32 %v3647_v16  ;;  %v8747_v16 = vld [vmem:[%s9574_s15 + $0x18] sm:$0xff] }
0x3183   :  { %v6851_v20 = vpop.eup %6850 }
0x3184   :  { %3651 = vrot.lane.b32.xlu1 %v6851_v20, %s7072_s9  ;;  %v8753_v20 = vld [vmem:[%s9574_s15 + $0x90] sm:$0xff] }
0x3188   :  { %3412 = vrot.lane.b32.xlu1 %v8309_v59, %s7073_s13  ;;  %v8528_v59 = vld [vmem:[%s9571_s12 + $0x58] sm:$0xff] }
0x3189   :  { %9672 = vst [vmem:[#allocation26_spill] sm:$0xff] %v8528_v59  ;;  %3759 = vmatprep.subr.mxu1 %v8528_v59 }
0x318c   :  { %3416 = vrot.lane.b32.xlu1 %v8339_v42, %s7071_s26  ;;  %v8536_v42 = vld [vmem:[%s9571_s12 + $0x50] sm:$0xff] }
0x318d   :  { %9673 = vst [vmem:[#allocation27_spill] sm:$0xff] %v8536_v42  ;;  %3760 = vmatpush1.msra.mxu1 %v8536_v42 }
0x3190   :  { %3420 = vrot.lane.b32.xlu1 %v8358_v0, %s7074_s1  ;;  %v8542_v0 = vld [vmem:[%s9571_s12 + $0x38] sm:$0xff] }
0x3191   :  { %9674 = vst [vmem:[#allocation28_spill] sm:$0xff] %v8542_v0  ;;  %3761 = vmatprep.subr.mxu1 %v8542_v0 }
0x3194   :  { %3424 = vrot.lane.b32.xlu1 %v8383_v8, %s7070_s7  ;;  %v8548_v8 = vld [vmem:[%s9571_s12 + $0x30] sm:$0xff] }
0x3195   :  { %9675 = vst [vmem:[#allocation29_spill] sm:$0xff] %v8548_v8  ;;  %3762 = vmatpush1.msra.mxu1 %v8548_v8 }
0x3198   :  { %3428 = vrot.lane.b32.xlu1 %v8395_v28, %s7075_s4  ;;  %v8554_v28 = vld [vmem:[%s9571_s12 + $0x18] sm:$0xff] }
0x3199   :  { %9676 = vst [vmem:[#allocation30_spill] sm:$0xff] %v8554_v28  ;;  %3763 = vmatprep.subr.mxu1 %v8554_v28 }
0x319a   :  { %3764 = vmatpush1.msra.mxu1 %v8561_v10 }
0x319b   :  { %6656 = vmatprep.subr.mxu1 %v9595_v22 }
0x319c   :  { %3432 = vrot.lane.b32.xlu1 %v3179_v48, %s7072_s9  ;;  %v8638_v48 = vld [vmem:[%s9574_s15 + $0xd8] sm:$0xff] }
0x31a0   :  { %3436 = vrot.lane.b32.xlu1 %v3280_v19, %s7076_s6  ;;  %v8644_v19 = vld [vmem:[%s9574_s15 + $0x58] sm:$0xff] }
0x31f6   :  { %v3652_v12 = vpop.permute.xlu1 %3651 }
0x31f7   :  { %v3654_v61 = vmul.f32 %v3652_v12, %v3649_v41  ;;  %v8759_v41 = vld [vmem:[%s9574_s15 + $0x10] sm:$0xff]  ;;  %v8765_v12 = vld [vmem:[%s9574_s15 + $0x88] sm:$0xff] }
0x31f8   :  { %9681 = vst [vmem:[#allocation35_spill] sm:$0xff] %v8765_v12 }
0x31f9   :  { %v8568_v3 = vadd.f32 %v3655_v24, %v3654_v61  ;;  %v8770_v24 = vld [vmem:[%s9574_s15 + $0x100] sm:$0xff]  ;;  %v8776_v61 = vld [vmem:[%s9574_s15 + $0x8] sm:$0xff] }
0x31fa   :  { %9682 = vst [vmem:[#allocation36_spill] sm:$0xff] %v8770_v24  ;;  %9683 = vst [vmem:[#allocation37_spill] sm:$0xff] %v8776_v61 }
0x31fb   :  { %9678 = vst [vmem:[#allocation32_spill] sm:$0xff] %v8568_v3  ;;  %3658 = vrot.lane.b32.xlu0 %v8568_v3, %s7072_s9 }
0x31ff   :  { %3384 = vrot.lane.b32.xlu0 %v8111_v34, %s7073_s13  ;;  %v8594_v34 = vld [vmem:[%s9574_s15 + $0x78] sm:$0xff] }
0x3203   :  { %3388 = vrot.lane.b32.xlu0 %v8131_v4, %s7071_s26 }
0x3207   :  { %3392 = vrot.lane.b32.xlu0 %v8151_v40, %s7074_s1  ;;  %v8599_v40 = vld [vmem:[%s9574_s15 + $0xf0] sm:$0xff] }
0x320b   :  { %3396 = vrot.lane.b32.xlu0 %v8171_v1, %s7070_s7  ;;  %v8606_v1 = vld [vmem:[%s9574_s15 + $0x70] sm:$0xff] }
0x320f   :  { %3400 = vrot.lane.b32.xlu0 %v8191_v47, %s7075_s4  ;;  %v8612_v47 = vld [vmem:[%s9574_s15 + $0xe8] sm:$0xff] }
0x3213   :  { %3404 = vrot.lane.b32.xlu0 %v8211_v27, %s7072_s9  ;;  %v8620_v27 = vld [vmem:[%s9574_s15 + $0x68] sm:$0xff] }
0x3217   :  { %3408 = vrot.lane.b32.xlu0 %v8239_v11, %s7076_s6  ;;  %v8626_v11 = vld [vmem:[%s9574_s15 + $0xe0] sm:$0xff] }
0x326d   :  { %v3659_v4 = vpop.permute.xlu0 %3658 }
0x326e   :  { %6204 = vmatmul.mubr.msk.f32.vlgmr.msra.gmra.mxu0 %vm982_vm2, %v3659_v4  ;;  %6205 = vmatmul.mubr.msk.f32.vlgmr.msra.gmra.mxu1 %vm982_vm2, %v3659_v4  ;;  %v8783_v4 = vld [vmem:[%s9574_s15 + $0x80] sm:$0xff] }
0x326f   :  { %6357 = vmatpush3.msra.mxu0 %v8594_v34  ;;  %6660 = vmatprep.mubr.msk.f32.mxu1 %vm7069_vm3, %v9595_v22  ;;  %9684 = vst [vmem:[#allocation38_spill] sm:$0xff] %v8783_v4 }
0x3270   :  { %6358 = vmatprep.subr.mxu0 %v8599_v40  ;;  %6657 = vmatpush3.msra.mxu1 %v8721_v13 }
0x3271   :  { %6359 = vmatpush3.msra.mxu0 %v8606_v1  ;;  %6658 = vmatprep.subr.mxu1 %v9595_v22  ;;  %v3385_v13 = vpop.permute.xlu0 %3384 }
0x3272   :  { %6360 = vmatprep.subr.mxu0 %v8612_v47  ;;  %6659 = vmatpush3.msra.mxu1 %v8770_v24  ;;  %v3413_v24 = vpop.permute.xlu1 %3412  ;;  %v3440_v52 = vsel %vm3439_vm5, %v8091_v14, %v3385_v13 }
0x3273   :  { %6361 = vmatpush3.msra.mxu0 %v8620_v27  ;;  %6663 = vmatprep.subr.mxu1 %v9595_v22  ;;  %v3452_v15 = vsel %vm3439_vm5, %v8264_v7, %v3413_v24 }
0x3274   :  { %6362 = vmatprep.subr.mxu0 %v8626_v11 }
0x3275   :  { %6363 = vmatpush3.msra.mxu0 %v8632_v39  ;;  %v3389_v28 = vpop.permute.xlu0 %3388 }
0x3276   :  { %6364 = vmatprep.subr.mxu0 %v8638_v48  ;;  %v3417_v10 = vpop.permute.xlu1 %3416  ;;  %v3441_v33 = vsel %vm982_vm2, %v3440_v52, %v3389_v28 }
0x3277   :  { %6365 = vmatpush3.msra.mxu0 %v8644_v19  ;;  %v3453_v35 = vsel %vm982_vm2, %v3452_v15, %v3417_v10 }
0x3278   :  { %6366 = vmatprep.subr.mxu0 %v8650_v58 }
0x3279   :  { %6367 = vmatpush3.msra.mxu0 %v8656_v57  ;;  %v3393_v8 = vpop.permute.xlu0 %3392 }
0x327a   :  { %6368 = vmatprep.subr.mxu0 %v8662_v26  ;;  %v3421_v22 = vpop.permute.xlu1 %3420  ;;  %v3443_v63 = vsel %vm3442_vm6, %v3441_v33, %v3393_v8 }
0x327b   :  { %6369 = vmatpush3.msra.mxu0 %v8670_v50  ;;  %v3454_v54 = vsel %vm3442_vm6, %v3453_v35, %v3421_v22  ;;  %vm6060_vm6 = vcmask 7168  }
0x327c   :  { %6370 = vmatprep.subr.mxu0 %v8675_v31 }
0x327d   :  { %6371 = vmatpush3.msra.mxu0 %v8682_v9  ;;  %v3397_v42 = vpop.permute.xlu0 %3396 }
0x327e   :  { %6372 = vmatprep.subr.mxu0 %v8687_v56  ;;  %v3425_v0 = vpop.permute.xlu1 %3424  ;;  %v3445_v25 = vsel %vm3444_vm7, %v3443_v63, %v3397_v42 }
0x327f   :  { %6373 = vmatpush3.msra.mxu0 %v8692_v60  ;;  %v3455_v18 = vsel %vm3444_vm7, %v3454_v54, %v3425_v0 }
0x3280   :  { %6374 = vmatprep.subr.mxu0 %v8698_v37 }
0x3281   :  { %6375 = vmatpush3.msra.mxu0 %v8704_v38  ;;  %v3401_v21 = vpop.permute.xlu0 %3400 }
0x3282   :  { %6376 = vmatprep.subr.mxu0 %v8710_v43  ;;  %v3429_v59 = vpop.permute.xlu1 %3428  ;;  %v3447_v24 = vsel %vm3446_vm8, %v3445_v25, %v3401_v21 }
0x3283   :  { %6377 = vmatpush3.msra.mxu0 %v8716_v44  ;;  %v3456_v30 = vsel %vm3446_vm8, %v3455_v18, %v3429_v59  ;;  %v3988_v59 = vld [vmem:[%s9575_s16] sm:$0x3] }
0x3284   :  { %6378 = vmatprep.subr.mxu0 %v8727_v45 }
0x3285   :  { %6379 = vmatpush3.msra.mxu0 %v8734_v46  ;;  %v3405_v5 = vpop.permute.xlu0 %3404 }
0x3286   :  { %6380 = vmatprep.subr.mxu0 %v8741_v23  ;;  %v3433_v3 = vpop.permute.xlu1 %3432  ;;  %v3449_v35 = vsel %vm3448_vm9, %v3447_v24, %v3405_v5 }
0x3287   :  { %6381 = vmatpush3.msra.mxu0 %v8747_v16  ;;  %v3457_v17 = vsel %vm3448_vm9, %v3456_v30, %v3433_v3  ;;  %v9688_v3 = vlaneseq  ;;  %vm6062_vm9 = vcmask 15360  }
0x3288   :  { %6382 = vmatprep.subr.mxu0 %v8753_v20 }
0x3289   :  { %6383 = vmatpush3.msra.mxu0 %v8759_v41  ;;  %v3409_v62 = vpop.permute.xlu0 %3408  ;;  %v3460_v13 = vand.u32 127, %v9688_v3  ;;  %v9703_v3 = vld [vmem:[#allocation22_spill] sm:$0xff] }
0x328a   :  { %6384 = vmatprep.subr.mxu0 %v8765_v12  ;;  %v3437_v49 = vpop.permute.xlu1 %3436  ;;  %v8807_v14 = vsel %vm3450_vm10, %v3449_v35, %v3409_v62 }
0x328b   :  { %6385 = vmatpush3.msra.mxu0 %v8776_v61  ;;  %v8802_v7 = vsel %vm3450_vm10, %v3457_v17, %v3437_v49  ;;  %v8813_v17 = vrot.slane %v8501_v55, %v8027_v36  ;;  %v9686_v36 = vmov 0.0   ;;  %v8877_v24 = vcvt.s32.f32 %v3460_v13  ;;  %v9704_v13 = vld [vmem:[#allocation24_spill] sm:$0xff] }
0x328c   :  { %6386 = vmatprep.subr.mxu0 %v8783_v4 }
0x328d   :  { %6387 = vmatpush3.msra.mxu0 %v8790_v32  ;;  %v8817_v49 = vadd.f32 %v7911_v2, %v8813_v17  ;;  %v8823_v52 = vadd.f32 %v7909_v53, %v8813_v17  ;;  %v8833_v2 = vadd.f32 %v7907_v51, %v8813_v17 }
0x328e   :  { %6402 = vmatprep.subr.mxu0 %v8581_v6 }
0x332e   :  { %v8804_v15 = vpop.f32.mrf.mxu0  ;;  %v3799_v22 = vpop.f32.mrf.mxu1 }
0x332f   :  { %v3805_v10 = vadd.f32 %v3799_v22, %v8802_v7 }
0x3330   :  { %v3730_v54 = vpop.f32.mrf.mxu0  ;;  %v3801_v0 = vpop.f32.mrf.mxu1 }
0x3331   :  { %6852 = vtanh.f32 %v3805_v10  ;;  %v3804_v18 = vadd.f32 %v3730_v54, %v8807_v14  ;;  %v3806_v30 = vadd.f32 %v3801_v0, %v8496_v29  ;;  %v9689_v54 = vld [vmem:[#allocation23_spill] sm:$0xff] }
0x3332   :  { %v4182_v0 = vadd.f32 %v9689_v54, %v8804_v15  ;;  %v9692_v15 = vld [vmem:[#allocation13_spill] sm:$0xff] }
0x3333   :  { %6854 = vtanh.f32 %v3804_v18 }
0x3334   :  { %6856 = vtanh.f32 %v3806_v30  ;;  %v9690_v30 = vld [vmem:[#allocation14_spill] sm:$0xff] }
0x333e   :  { %v6853_v63 = vpop.eup %6852 }
0x333f   :  { %3911 = vmatprep.mubr.f32.mxu0 %v6853_v63  ;;  %v8890_v63 = vadd.f32 %v9690_v30, %v8813_v17 }
0x3340   :  { %v6855_v25 = vpop.eup %6854 }
0x3341   :  { %v6857_v33 = vpop.eup %6856  ;;  %3912 = vmatmul.mubr.f32.vlgmr.msra.gmra.mxu0 %v6855_v25  ;;  %9691 = vst [vmem:[#allocation23_spill] sm:$0xff] %v8890_v63 }
0x3342   :  { %6661 = vmatmul.mubr.msk.f32.vlgmr.msra.gmra.mxu1 %vm3439_vm5, %v6857_v33  ;;  %6403 = vmatpush3.msra.mxu0 %v8594_v34  ;;  %v8899_v33 = vadd.f32 %v9692_v15, %v8813_v17 }
0x3343   :  { %6664 = vmatpush3.msk.msra.mxu1 %vm1064_vm4, %v8817_v49  ;;  %6669 = vmatprep.mubr.msk.f32.mxu1 %vm7069_vm3, %v9686_v36 }
0x3344   :  { %6665 = vmatprep.subr.mxu1 %v9686_v36  ;;  %6404 = vmatprep.subr.mxu0 %v8599_v40  ;;  %9693 = vst [vmem:[#allocation14_spill] sm:$0xff] %v8899_v33 }
0x3345   :  { %6666 = vmatpush3.msra.mxu1 %v8823_v52  ;;  %6405 = vmatpush3.msra.mxu0 %v8606_v1 }
0x3346   :  { %6667 = vmatprep.subr.mxu1 %v9686_v36  ;;  %6406 = vmatprep.subr.mxu0 %v8612_v47 }
0x3347   :  { %6668 = vmatpush3.msra.mxu1 %v8833_v2  ;;  %6407 = vmatpush3.msra.mxu0 %v8620_v27 }
0x3348   :  { %6672 = vmatprep.subr.mxu1 %v9686_v36  ;;  %6408 = vmatprep.subr.mxu0 %v8626_v11 }
0x3349   :  { %6409 = vmatpush3.msra.mxu0 %v8632_v39 }
0x334a   :  { %6410 = vmatprep.subr.mxu0 %v8638_v48 }
0x334b   :  { %6411 = vmatpush3.msra.mxu0 %v8644_v19 }
0x334c   :  { %6412 = vmatprep.subr.mxu0 %v8650_v58 }
0x334d   :  { %6413 = vmatpush3.msra.mxu0 %v8656_v57 }
0x334e   :  { %6414 = vmatprep.subr.mxu0 %v8662_v26 }
0x334f   :  { %6415 = vmatpush3.msra.mxu0 %v8670_v50 }
0x3350   :  { %6416 = vmatprep.subr.mxu0 %v8675_v31 }
0x3351   :  { %6417 = vmatpush3.msra.mxu0 %v8682_v9 }
0x3352   :  { %6418 = vmatprep.subr.mxu0 %v8687_v56 }
0x3353   :  { %6419 = vmatpush3.msra.mxu0 %v8692_v60 }
0x3354   :  { %6420 = vmatprep.subr.mxu0 %v8698_v37 }
0x3355   :  { %6421 = vmatpush3.msra.mxu0 %v8704_v38 }
0x3356   :  { %6422 = vmatprep.subr.mxu0 %v8710_v43 }
0x3357   :  { %6423 = vmatpush3.msra.mxu0 %v8716_v44 }
0x3358   :  { %6424 = vmatprep.subr.mxu0 %v8727_v45 }
0x3359   :  { %6425 = vmatpush3.msra.mxu0 %v8734_v46 }
0x335a   :  { %6426 = vmatprep.subr.mxu0 %v8741_v23 }
0x335b   :  { %6427 = vmatpush3.msra.mxu0 %v8747_v16 }
0x335c   :  { %6428 = vmatprep.subr.mxu0 %v8753_v20 }
0x335d   :  { %6429 = vmatpush3.msra.mxu0 %v8759_v41 }
0x335e   :  { %6430 = vmatprep.subr.mxu0 %v8765_v12 }
0x335f   :  { %6431 = vmatpush3.msra.mxu0 %v8776_v61 }
0x3360   :  { %6432 = vmatprep.subr.mxu0 %v8783_v4 }
0x3361   :  { %6433 = vmatpush3.msra.mxu0 %v8790_v32 }
0x3362   :  { %6448 = vmatprep.subr.mxu0 %v8581_v6 }
0x3401   :  { %v6388_v51 = vpop.f32.mrf.mxu0 }
0x3402   :  { %v3983_v53 = vpop.f32.mrf.mxu1 }
0x3403   :  { %v6389_v62 = vpop.f32.mrf.mxu0 }
0x3404   :  { %v6390_v55 = vadd.f32 %v6389_v62, %v6388_v51  ;;  %v6662_v5 = vpop.f32.mrf.mxu1  ;;  %v9694_v51 = vld [vmem:[#allocation12_spill] sm:$0xff] }
0x3405   :  { %v9697_v5 = vld [vmem:[#allocation16_spill] sm:$0xff] }
0x3406   :  { %v3984_v21 = vadd.f32 %v6390_v55, %v3983_v53  ;;  %v8908_v53 = vadd.f32 %v9694_v51, %v8813_v17  ;;  %v9696_v55 = vld [vmem:[#allocation15_spill] sm:$0xff]  ;;  %v9699_v17 = vld [vmem:[#allocation18_spill] sm:$0xff] }
0x3408   :  { %v8872_v42 = vmax.f32 %v3984_v21, 0.0  ;;  %9695 = vst [vmem:[#allocation13_spill] sm:$0xff] %v8908_v53  ;;  %v9698_v21 = vld [vmem:[#allocation17_spill] sm:$0xff] }
0x340a   :  { %9687 = vst [vmem:[#allocation40_spill] sm:$0xff] %v8872_v42  ;;  %v3989_v8 = vadd.f32 %v3988_v59, %v8872_v42  ;;  %v9700_v59 = vld [vmem:[#allocation19_spill] sm:$0xff] }
0x340c   :  { %v3991_v28 = vsel %vm3990_vm11, %v3989_v8, -inf }
0x340d   :  { %3992 = vmax.xlane.f32.xlu1 %v3991_v28  ;;  %v9702_v28 = vld [vmem:[#allocation21_spill] sm:$0xff] }
0x3496   :  { %v3993_v22 = vpop.xlane.xlu1 %3992 }
0x3497   :  { %vm3994_vm12 = vcmp.ge.f32.partialorder %v3989_v8, %v3993_v22  ;;  %v9701_v8 = vld [vmem:[#allocation20_spill] sm:$0xff] }
0x3498   :  { %v3995_v35 = vsel %vm3994_vm12, %v8877_v24, 34.0 }
0x3499   :  { %v3996_v10 = vsel %vm3990_vm11, %v3995_v35, inf }
0x349a   :  { %3997 = vmin.xlane.f32.xlu0 %v3996_v10 }
0x34b0   :  { %4189 = vrot.lane.b32.xlu0 %v4182_v0, %s7070_s7 }
0x3523   :  { %v8884_v18 = vpop.xlane.xlu0 %3997 }
0x3524   :  { %vm4001_vm14 = vcmp.eq.f32.partialorder %v8877_v24, %v8884_v18  ;;  %vm4022_vm0 = vcmp.eq.f32.partialorder %v8884_v18, 0.0 }
0x3525   :  { %v8893_v25 = vsel %vm4001_vm14, 1.0, %v9686_v36 }
0x3526   :  { %6670 = vmatmul.mubr.msk.f32.vlgmr.msra.gmra.mxu1 %vm4025_vm13, %v8893_v25  ;;  %v4102_v62 = vrot.slane %v8893_v25, 1 }
0x3527   :  { %6673 = vmatpush3.msk.msra.mxu1 %vm1064_vm4, %v8890_v63  ;;  %6678 = vmatprep.mubr.msk.f32.mxu1 %vm7069_vm3, %v9686_v36 }
0x3528   :  { %6674 = vmatprep.subr.mxu1 %v9686_v36 }
0x3529   :  { %6675 = vmatpush3.msra.mxu1 %v8899_v33 }
0x352a   :  { %6676 = vmatprep.subr.mxu1 %v9686_v36 }
0x352b   :  { %6677 = vmatpush3.msra.mxu1 %v8908_v53 }
0x352c   :  { %6679 = vmatmul.mubr.msk.f32.vlgmr.msra.gmra.mxu1 %vm4025_vm13, %v4102_v62  ;;  %4236 = vmatprep.subr.mxu1 %v9696_v55 }
0x352d   :  { %4237 = vmatpush1.msra.mxu1 %v9697_v5  ;;  %4276 = vmatprep.mubr.f32.mxu1 %v9686_v36 }
0x352e   :  { %4238 = vmatprep.subr.mxu1 %v9698_v21 }
0x352f   :  { %4239 = vmatpush1.msra.mxu1 %v9699_v17 }
0x3530   :  { %4240 = vmatprep.subr.mxu1 %v9700_v59 }
0x3531   :  { %4241 = vmatpush1.msra.mxu1 %v9701_v8  ;;  %v4190_v8 = vpop.permute.xlu0 %4189 }
0x3532   :  { %4242 = vmatprep.subr.mxu1 %v9702_v28 }
0x3533   :  { %4243 = vmatpush1.msra.mxu1 %v9703_v3 }
0x3534   :  { %4307 = vmatprep.subr.mxu1 %v9704_v13 }
0x35e6   :  { %v4098_v22 = vpop.f32.mrf.mxu1 }
0x35e8   :  { %v6671_v35 = vpop.f32.mrf.mxu1 }
0x35ec   :  { %v4174_v10 = vpop.f32.mrf.mxu1 }
0x35ed   :  { %v4179_v30 = vrot.slane %v4174_v10, 7 }
0x35ee   :  { %v6680_v15 = vpop.f32.mrf.mxu1 }
0x35ef   :  { %v4181_v51 = vsel %vm1064_vm4, %v4098_v22, %v4179_v30  ;;  %v9705_v15 = vld [vmem:[#allocation32_spill] sm:$0xff] }
0x35f0   :  { %v4183_v62 = vadd.f32 %v4182_v0, %v4181_v51 }
0x35f2   :  { %v4184_v42 = vmul.f32 0.5, %v4183_v62 }
0x35f4   :  { %6858 = vtanh.f32 %v4184_v42 }
0x3601   :  { %v6859_v17 = vpop.eup %6858 }
0x3602   :  { %v4186_v59 = vmul.f32 0.5, %v6859_v17  ;;  %v9707_v17 = vld [vmem:[#allocation26_spill] sm:$0xff] }
0x3604   :  { %v4187_v21 = vadd.f32 0.5, %v4186_v59  ;;  %v9708_v59 = vld [vmem:[#allocation27_spill] sm:$0xff] }
0x3606   :  { %v4192_v5 = vmul.f32 %v4190_v8, %v4187_v21  ;;  %v4199_v35 = vsub.f32 1.0, %v4187_v21  ;;  %v4205_v22 = vmul.f32 %v4187_v21, %v9705_v15  ;;  %v9709_v8 = vld [vmem:[#allocation28_spill] sm:$0xff]  ;;  %v9710_v21 = vld [vmem:[#allocation29_spill] sm:$0xff] }
0x3608   :  { %4194 = vrot.lane.b32.xlu1 %v4192_v5, %s7070_s7  ;;  %v9706_v5 = vld [vmem:[#allocation25_spill] sm:$0xff] }
0x367a   :  { %v4195_v3 = vpop.permute.xlu1 %4194 }
0x367b   :  { %v4197_v28 = vadd.f32 %v4195_v3, %v4181_v51  ;;  %v9712_v3 = vld [vmem:[#allocation31_spill] sm:$0xff]  ;;  %v9714_v51 = vld [vmem:[#allocation36_spill] sm:$0xff] }
0x367d   :  { %6860 = vtanh.f32 %v4197_v28  ;;  %v9711_v28 = vld [vmem:[#allocation30_spill] sm:$0xff] }
0x368a   :  { %v6861_v13 = vpop.eup %6860 }
0x368b   :  { %4201 = vrot.lane.b32.xlu1 %v6861_v13, %s7072_s9  ;;  %v9713_v13 = vld [vmem:[#allocation34_spill] sm:$0xff] }
0x36fd   :  { %v4202_v10 = vpop.permute.xlu1 %4201 }
0x36fe   :  { %v4204_v0 = vmul.f32 %v4202_v10, %v4199_v35 }
0x3700   :  { %v8929_v30 = vadd.f32 %v4205_v22, %v4204_v0 }
0x3702   :  { %4208 = vrot.lane.b32.xlu0 %v8929_v30, %s7072_s9 }
0x3774   :  { %v4209_v42 = vpop.permute.xlu0 %4208 }
0x3775   :  { %6213 = vmatmul.mubr.msk.f32.vlgmr.msra.gmra.mxu1 %vm982_vm2, %v4209_v42 }
0x3776   :  { %4308 = vmatpush1.msra.mxu1 %v9706_v5  ;;  %4347 = vmatprep.mubr.f32.mxu1 %v9686_v36 }
0x3777   :  { %4309 = vmatprep.subr.mxu1 %v9707_v17 }
0x3778   :  { %4310 = vmatpush1.msra.mxu1 %v9708_v59 }
0x3779   :  { %4311 = vmatprep.subr.mxu1 %v9709_v8 }
0x377a   :  { %4312 = vmatpush1.msra.mxu1 %v9710_v21 }
0x377b   :  { %4313 = vmatprep.subr.mxu1 %v9711_v28 }
0x377c   :  { %4314 = vmatpush1.msra.mxu1 %v9712_v3 }
0x377d   :  { %6214 = vmatmul.mubr.msk.f32.vlgmr.msra.gmra.mxu1 %vm982_vm2, %v4209_v42  ;;  %6681 = vmatprep.subr.mxu1 %v9686_v36 }
0x377e   :  { %6682 = vmatpush3.msra.mxu1 %v9713_v13  ;;  %6685 = vmatprep.mubr.msk.f32.mxu1 %vm7069_vm3, %v9686_v36 }
0x377f   :  { %6683 = vmatprep.subr.mxu1 %v9686_v36 }
0x3780   :  { %6684 = vmatpush3.msra.mxu1 %v9714_v51 }
0x3781   :  { %6688 = vmatprep.subr.mxu1 %v9686_v36 }
0x3835   :  { %v8950_v62 = vpop.f32.mrf.mxu1 }
0x3837   :  { %v4280_v35 = vpop.f32.mrf.mxu1 }
0x3838   :  { %v4354_v10 = vadd.f32 %v4280_v35, %v8807_v14  ;;  %v9635_v35 = vmax.f32 %v8893_v25, 0.0 }
0x383d   :  { %v4349_v15 = vpop.f32.mrf.mxu1 }
0x383e   :  { %v4355_v22 = vadd.f32 %v4349_v15, %v8802_v7 }
0x383f   :  { %v4351_v0 = vpop.f32.mrf.mxu1 }
0x3840   :  { %6862 = vtanh.f32 %v4355_v22  ;;  %v4356_v42 = vadd.f32 %v4351_v0, %v8496_v29 }
0x3841   :  { %6864 = vtanh.f32 %v4354_v10 }
0x3842   :  { %6866 = vtanh.f32 %v4356_v42  ;;  %v4504_v42 = vmul.f32 10000000.0, %v9635_v35 }
0x384d   :  { %v6863_v13 = vpop.eup %6862 }
0x384e   :  { %v6865_v3 = vpop.eup %6864  ;;  %4427 = vmatprep.mubr.f32.mxu0 %v6863_v13 }
0x384f   :  { %v6867_v51 = vpop.eup %6866  ;;  %4428 = vmatmul.mubr.f32.vlgmr.msra.gmra.mxu0 %v6865_v3 }
0x3850   :  { %6686 = vmatmul.mubr.msk.f32.vlgmr.msra.gmra.mxu1 %vm3439_vm5, %v6867_v51  ;;  %6449 = vmatpush3.msra.mxu0 %v8594_v34 }
0x3851   :  { %6689 = vmatpush3.msk.msra.mxu1 %vm1064_vm4, %v8817_v49  ;;  %6694 = vmatprep.mubr.msk.f32.mxu1 %vm7069_vm3, %v9686_v36 }
0x3852   :  { %6690 = vmatprep.subr.mxu1 %v9686_v36  ;;  %6450 = vmatprep.subr.mxu0 %v8599_v40 }
0x3853   :  { %6691 = vmatpush3.msra.mxu1 %v8823_v52  ;;  %6451 = vmatpush3.msra.mxu0 %v8606_v1 }
0x3854   :  { %6692 = vmatprep.subr.mxu1 %v9686_v36  ;;  %6452 = vmatprep.subr.mxu0 %v8612_v47 }
0x3855   :  { %6693 = vmatpush3.msra.mxu1 %v8833_v2  ;;  %6453 = vmatpush3.msra.mxu0 %v8620_v27 }
0x3856   :  { %6697 = vmatprep.subr.mxu1 %v9686_v36  ;;  %6454 = vmatprep.subr.mxu0 %v8626_v11 }
0x3857   :  { %6455 = vmatpush3.msra.mxu0 %v8632_v39 }
0x3858   :  { %6456 = vmatprep.subr.mxu0 %v8638_v48 }
0x3859   :  { %6457 = vmatpush3.msra.mxu0 %v8644_v19 }
0x385a   :  { %6458 = vmatprep.subr.mxu0 %v8650_v58 }
0x385b   :  { %6459 = vmatpush3.msra.mxu0 %v8656_v57 }
0x385c   :  { %6460 = vmatprep.subr.mxu0 %v8662_v26 }
0x385d   :  { %6461 = vmatpush3.msra.mxu0 %v8670_v50 }
0x385e   :  { %6462 = vmatprep.subr.mxu0 %v8675_v31 }
0x385f   :  { %6463 = vmatpush3.msra.mxu0 %v8682_v9 }
0x3860   :  { %6464 = vmatprep.subr.mxu0 %v8687_v56 }
0x3861   :  { %6465 = vmatpush3.msra.mxu0 %v8692_v60 }
0x3862   :  { %6466 = vmatprep.subr.mxu0 %v8698_v37 }
0x3863   :  { %6467 = vmatpush3.msra.mxu0 %v8704_v38 }
0x3864   :  { %6468 = vmatprep.subr.mxu0 %v8710_v43 }
0x3865   :  { %6469 = vmatpush3.msra.mxu0 %v8716_v44 }
0x3866   :  { %6470 = vmatprep.subr.mxu0 %v8727_v45 }
0x3867   :  { %6471 = vmatpush3.msra.mxu0 %v8734_v46 }
0x3868   :  { %6472 = vmatprep.subr.mxu0 %v8741_v23 }
0x3869   :  { %6473 = vmatpush3.msra.mxu0 %v8747_v16 }
0x386a   :  { %6474 = vmatprep.subr.mxu0 %v8753_v20 }
0x386b   :  { %6475 = vmatpush3.msra.mxu0 %v8759_v41 }
0x386c   :  { %6476 = vmatprep.subr.mxu0 %v8765_v12 }
0x386d   :  { %6477 = vmatpush3.msra.mxu0 %v8776_v61 }
0x386e   :  { %6478 = vmatprep.subr.mxu0 %v8783_v4  ;;  %v4506_v4 = vld [vmem:[%s9575_s16 + $0x2] sm:$0x3] }
0x386f   :  { %6479 = vmatpush3.msra.mxu0 %v8790_v32 }
0x3870   :  { %6494 = vmatprep.subr.mxu0 %v8581_v6 }
0x390f   :  { %v6434_v3 = vpop.f32.mrf.mxu0 }
0x3910   :  { %v4499_v13 = vpop.f32.mrf.mxu1 }
0x3911   :  { %v6435_v51 = vpop.f32.mrf.mxu0 }
0x3912   :  { %v6436_v10 = vadd.f32 %v6435_v51, %v6434_v3  ;;  %v6687_v15 = vpop.f32.mrf.mxu1  ;;  %v4693_v51 = vadd.f32 %v9689_v54, %v8950_v62 }
0x3914   :  { %v4500_v22 = vadd.f32 %v6436_v10, %v4499_v13  ;;  %v6208_v10 = vsel %vm4022_vm0, 1.0, %v9686_v36  ;;  %vm6064_vm0 = vcmask 23552  }
0x3915   :  { %vm4516_vm1 = vcmp.gt.f32.partialorder %v6208_v10, 0.5  ;;  %v4538_v15 = vsub.f32 1.0, %v6208_v10  ;;  %v9720_v10 = vld [vmem:[#allocation19_spill] sm:$0xff] }
0x3916   :  { %v4503_v0 = vmax.f32 %v4500_v22, 0.0 }
0x3917   :  { %v6076_v62 = vsel %vm6060_vm6, 1.0, %v4538_v15  ;;  %v9722_v15 = vld [vmem:[#allocation21_spill] sm:$0xff] }
0x3918   :  { %v9003_v61 = vsub.f32 %v4503_v0, %v4504_v42  ;;  %v9717_v42 = vld [vmem:[#allocation16_spill] sm:$0xff] }
0x391a   :  { %9715 = vst [vmem:[#allocation12_spill] sm:$0xff] %v9003_v61  ;;  %v4507_v6 = vadd.f32 %v4506_v4, %v9003_v61 }
0x391c   :  { %v4508_v32 = vsel %vm3990_vm11, %v4507_v6, -inf }
0x391d   :  { %4509 = vmax.xlane.f32.xlu1 %v4508_v32 }
0x39a6   :  { %v4510_v12 = vpop.xlane.xlu1 %4509 }
0x39a7   :  { %vm4511_vm15 = vcmp.ge.f32.partialorder %v4507_v6, %v4510_v12 }
0x39a8   :  { %v4512_v3 = vsel %vm4511_vm15, %v8877_v24, 34.0 }
0x39a9   :  { %v4513_v13 = vsel %vm3990_vm11, %v4512_v3, inf  ;;  %v9718_v3 = vld [vmem:[#allocation17_spill] sm:$0xff] }
0x39aa   :  { %4514 = vmin.xlane.f32.xlu0 %v4513_v13  ;;  %v9719_v13 = vld [vmem:[#allocation18_spill] sm:$0xff] }
0x39c0   :  { %4700 = vrot.lane.b32.xlu0 %v4693_v51, %s7070_s7 }
0x3a33   :  { %v4515_v4 = vpop.xlane.xlu0 %4514 }
0x3a34   :  { %v9014_v32 = vsel %vm4516_vm1, 0.0, %v4515_v4  ;;  %v9721_v4 = vld [vmem:[#allocation20_spill] sm:$0xff] }
0x3a35   :  { %vm4518_vm7 = vcmp.eq.f32.partialorder %v8877_v24, %v9014_v32  ;;  %vm4540_vm8 = vcmp.eq.f32.partialorder %v9014_v32, 0.0 }
0x3a36   :  { %v9020_v6 = vsel %vm4518_vm7, 1.0, %v9686_v36  ;;  %v9023_v12 = vsel %vm4540_vm8, 1.0, %v9686_v36  ;;  %vm6038_vm8 = vcmp.eq.f32.partialorder %v8877_v24, 0.0 }
0x3a37   :  { %6695 = vmatmul.mubr.msk.f32.vlgmr.msra.gmra.mxu1 %vm4025_vm13, %v9020_v6  ;;  %v5049_v54 = vsub.f32 1.0, %v9023_v12  ;;  %v4616_v0 = vrot.slane %v9020_v6, 1  ;;  %vm5027_vm12 = vcmp.gt.f32.partialorder %v9023_v12, 0.5 }
0x3a38   :  { %6698 = vmatpush3.msk.msra.mxu1 %vm1064_vm4, %v8890_v63  ;;  %6703 = vmatprep.mubr.msk.f32.mxu1 %vm7069_vm3, %v9686_v36 }
0x3a39   :  { %6699 = vmatprep.subr.mxu1 %v9686_v36  ;;  %v9035_v22 = vsel %vm6062_vm9, %v6076_v62, %v5049_v54  ;;  %v9723_v54 = vld [vmem:[#allocation22_spill] sm:$0xff]  ;;  %v9724_v62 = vld [vmem:[#allocation24_spill] sm:$0xff] }
0x3a3a   :  { %9716 = vst [vmem:[#allocation15_spill] sm:$0xff] %v9035_v22  ;;  %6700 = vmatpush3.msra.mxu1 %v8899_v33 }
0x3a3b   :  { %6701 = vmatprep.subr.mxu1 %v9686_v36 }
0x3a3c   :  { %6702 = vmatpush3.msra.mxu1 %v8908_v53 }
0x3a3d   :  { %6704 = vmatmul.mubr.msk.f32.vlgmr.msra.gmra.mxu1 %vm4025_vm13, %v4616_v0  ;;  %4747 = vmatprep.subr.mxu1 %v9696_v55 }
0x3a3e   :  { %4748 = vmatpush1.msra.mxu1 %v9717_v42  ;;  %4787 = vmatprep.mubr.f32.mxu1 %v9686_v36 }
0x3a3f   :  { %4749 = vmatprep.subr.mxu1 %v9718_v3 }
0x3a40   :  { %4750 = vmatpush1.msra.mxu1 %v9719_v13 }
0x3a41   :  { %4751 = vmatprep.subr.mxu1 %v9720_v10 }
0x3a42   :  { %4752 = vmatpush1.msra.mxu1 %v9721_v4  ;;  %v4701_v4 = vpop.permute.xlu0 %4700 }
0x3a43   :  { %4753 = vmatprep.subr.mxu1 %v9722_v15 }
0x3a44   :  { %4754 = vmatpush1.msra.mxu1 %v9723_v54 }
0x3a45   :  { %4818 = vmatprep.subr.mxu1 %v9724_v62 }
0x3af7   :  { %v4612_v0 = vpop.f32.mrf.mxu1 }
0x3af9   :  { %v6696_v55 = vpop.f32.mrf.mxu1 }
0x3afd   :  { %v4685_v35 = vpop.f32.mrf.mxu1 }
0x3afe   :  { %v4690_v42 = vrot.slane %v4685_v35, 7 }
0x3aff   :  { %v6705_v61 = vpop.f32.mrf.mxu1 }
0x3b00   :  { %v4692_v53 = vsel %vm1064_vm4, %v4612_v0, %v4690_v42 }
0x3b01   :  { %v4694_v3 = vadd.f32 %v4693_v51, %v4692_v53 }
0x3b03   :  { %v4695_v33 = vmul.f32 0.5, %v4694_v3 }
0x3b05   :  { %6868 = vtanh.f32 %v4695_v33 }
0x3b12   :  { %v6869_v13 = vpop.eup %6868 }
0x3b13   :  { %v4697_v10 = vmul.f32 0.5, %v6869_v13 }
0x3b15   :  { %v4698_v22 = vadd.f32 0.5, %v4697_v10 }
0x3b17   :  { %v4703_v63 = vmul.f32 %v4701_v4, %v4698_v22  ;;  %v4710_v35 = vsub.f32 1.0, %v4698_v22  ;;  %v4716_v0 = vmul.f32 %v4698_v22, %v8929_v30  ;;  %v9727_v30 = vld [vmem:[#allocation36_spill] sm:$0xff] }
0x3b19   :  { %4705 = vrot.lane.b32.xlu1 %v4703_v63, %s7070_s7  ;;  %v9725_v63 = vld [vmem:[#allocation31_spill] sm:$0xff] }
0x3b8b   :  { %v4706_v15 = vpop.permute.xlu1 %4705 }
0x3b8c   :  { %v4708_v54 = vadd.f32 %v4706_v15, %v4692_v53  ;;  %v9726_v53 = vld [vmem:[#allocation34_spill] sm:$0xff] }
0x3b8e   :  { %6870 = vtanh.f32 %v4708_v54 }
0x3b9b   :  { %v6871_v62 = vpop.eup %6870 }
0x3b9c   :  { %4712 = vrot.lane.b32.xlu1 %v6871_v62, %s7072_s9  ;;  %v9736_v62 = vld [vmem:[#allocation14_spill] sm:$0xff] }
0x3c0e   :  { %v4713_v61 = vpop.permute.xlu1 %4712 }
0x3c0f   :  { %v4715_v51 = vmul.f32 %v4713_v61, %v4710_v35  ;;  %v9737_v61 = vld [vmem:[#allocation13_spill] sm:$0xff] }
0x3c11   :  { %v9056_v55 = vadd.f32 %v4716_v0, %v4715_v51  ;;  %v9181_v0 = vld [vmem:[%s9571_s12 + $0x68] sm:$0xff]  ;;  %v9187_v51 = vld [vmem:[%s9571_s12 + $0x60] sm:$0xff] }
0x3c13   :  { %4719 = vrot.lane.b32.xlu0 %v9056_v55, %s7072_s9 }
0x3c85   :  { %v4720_v33 = vpop.permute.xlu0 %4719 }
0x3c86   :  { %6222 = vmatmul.mubr.msk.f32.vlgmr.msra.gmra.mxu1 %vm982_vm2, %v4720_v33 }
0x3c87   :  { %4819 = vmatpush1.msra.mxu1 %v9706_v5  ;;  %4858 = vmatprep.mubr.f32.mxu1 %v9686_v36 }
0x3c88   :  { %4820 = vmatprep.subr.mxu1 %v9707_v17 }
0x3c89   :  { %4821 = vmatpush1.msra.mxu1 %v9708_v59 }
0x3c8a   :  { %4822 = vmatprep.subr.mxu1 %v9709_v8 }
0x3c8b   :  { %4823 = vmatpush1.msra.mxu1 %v9710_v21 }
0x3c8c   :  { %4824 = vmatprep.subr.mxu1 %v9711_v28 }
0x3c8d   :  { %4825 = vmatpush1.msra.mxu1 %v9725_v63  ;;  %v9200_v63 = vld [vmem:[%s9571_s12 + $0x40] sm:$0xff] }
0x3c8e   :  { %6223 = vmatmul.mubr.msk.f32.vlgmr.msra.gmra.mxu1 %vm982_vm2, %v4720_v33  ;;  %6706 = vmatprep.subr.mxu1 %v9686_v36  ;;  %v9194_v33 = vld [vmem:[%s9571_s12 + $0x48] sm:$0xff] }
0x3c8f   :  { %6707 = vmatpush3.msra.mxu1 %v9726_v53  ;;  %6710 = vmatprep.mubr.msk.f32.mxu1 %vm7069_vm3, %v9686_v36 }
0x3c90   :  { %6708 = vmatprep.subr.mxu1 %v9686_v36 }
0x3c91   :  { %6709 = vmatpush3.msra.mxu1 %v9727_v30 }
0x3c92   :  { %6713 = vmatprep.subr.mxu1 %v9686_v36 }
0x3d46   :  { %v9077_v5 = vpop.f32.mrf.mxu1 }
0x3d48   :  { %v4791_v17 = vpop.f32.mrf.mxu1 }
0x3d49   :  { %v4865_v59 = vadd.f32 %v4791_v17, %v8807_v14  ;;  %v9212_v17 = vld [vmem:[%s9571_s12 + $0x20] sm:$0xff] }
0x3d4e   :  { %v4860_v8 = vpop.f32.mrf.mxu1 }
0x3d4f   :  { %v4866_v21 = vadd.f32 %v4860_v8, %v8802_v7  ;;  %v9224_v8 = vld [vmem:[%s9571_s12] sm:$0xff] }
0x3d50   :  { %v4862_v28 = vpop.f32.mrf.mxu1 }
0x3d51   :  { %6872 = vtanh.f32 %v4866_v21  ;;  %v4867_v22 = vadd.f32 %v4862_v28, %v8496_v29  ;;  %v9230_v21 = vld [vmem:[%s9571_s12 + $0x78] sm:$0xff] }
0x3d52   :  { %6874 = vtanh.f32 %v4865_v59  ;;  %v9218_v59 = vld [vmem:[%s9571_s12 + $0x8] sm:$0xff] }
0x3d53   :  { %6876 = vtanh.f32 %v4867_v22 }
0x3d5e   :  { %v6873_v42 = vpop.eup %6872 }
0x3d5f   :  { %v6875_v3 = vpop.eup %6874  ;;  %4938 = vmatprep.mubr.f32.mxu0 %v6873_v42 }
0x3d60   :  { %v6877_v13 = vpop.eup %6876  ;;  %4939 = vmatmul.mubr.f32.vlgmr.msra.gmra.mxu0 %v6875_v3 }
0x3d61   :  { %6711 = vmatmul.mubr.msk.f32.vlgmr.msra.gmra.mxu1 %vm3439_vm5, %v6877_v13  ;;  %6495 = vmatpush3.msra.mxu0 %v8594_v34  ;;  %v9728_v34 = vld [vmem:[#allocation35_spill] sm:$0xff] }
0x3d62   :  { %6714 = vmatpush3.msk.msra.mxu1 %vm1064_vm4, %v8817_v49  ;;  %6719 = vmatprep.mubr.msk.f32.mxu1 %vm7069_vm3, %v9686_v36 }
0x3d63   :  { %6715 = vmatprep.subr.mxu1 %v9686_v36  ;;  %6496 = vmatprep.subr.mxu0 %v8599_v40  ;;  %v9729_v40 = vld [vmem:[#allocation37_spill] sm:$0xff] }
0x3d64   :  { %6716 = vmatpush3.msra.mxu1 %v8823_v52  ;;  %6497 = vmatpush3.msra.mxu0 %v8606_v1  ;;  %v9730_v1 = vld [vmem:[#allocation38_spill] sm:$0xff] }
0x3d65   :  { %6717 = vmatprep.subr.mxu1 %v9686_v36  ;;  %6498 = vmatprep.subr.mxu0 %v8612_v47  ;;  %v9731_v47 = vld [vmem:[#allocation39_spill] sm:$0xff] }
0x3d66   :  { %6718 = vmatpush3.msra.mxu1 %v8833_v2  ;;  %6499 = vmatpush3.msra.mxu0 %v8620_v27  ;;  %v9732_v27 = vld [vmem:[#allocation33_spill] sm:$0xff] }
0x3d67   :  { %6722 = vmatprep.subr.mxu1 %v9686_v36  ;;  %6500 = vmatprep.subr.mxu0 %v8626_v11 }
0x3d68   :  { %6501 = vmatpush3.msra.mxu0 %v8632_v39 }
0x3d69   :  { %6502 = vmatprep.subr.mxu0 %v8638_v48 }
0x3d6a   :  { %6503 = vmatpush3.msra.mxu0 %v8644_v19  ;;  %v9733_v19 = vmax.f32 %v8893_v25, 0.0 }
0x3d6b   :  { %6504 = vmatprep.subr.mxu0 %v8650_v58 }
0x3d6c   :  { %6505 = vmatpush3.msra.mxu0 %v8656_v57  ;;  %v9127_v58 = vmax.f32 %v9733_v19, %v9020_v6 }
0x3d6d   :  { %6506 = vmatprep.subr.mxu0 %v8662_v26 }
0x3d6e   :  { %6507 = vmatpush3.msra.mxu0 %v8670_v50 }
0x3d6f   :  { %6508 = vmatprep.subr.mxu0 %v8675_v31 }
0x3d70   :  { %6509 = vmatpush3.msra.mxu0 %v8682_v9  ;;  %v5015_v9 = vmul.f32 10000000.0, %v9127_v58 }
0x3d71   :  { %6510 = vmatprep.subr.mxu0 %v8687_v56  ;;  %v5017_v56 = vld [vmem:[%s9575_s16 + $0x4] sm:$0x3] }
0x3d72   :  { %6511 = vmatpush3.msra.mxu0 %v8692_v60 }
0x3d73   :  { %6512 = vmatprep.subr.mxu0 %v8698_v37 }
0x3d74   :  { %6513 = vmatpush3.msra.mxu0 %v8704_v38 }
0x3d75   :  { %6514 = vmatprep.subr.mxu0 %v8710_v43 }
0x3d76   :  { %6515 = vmatpush3.msra.mxu0 %v8716_v44 }
0x3d77   :  { %6516 = vmatprep.subr.mxu0 %v8727_v45 }
0x3d78   :  { %6517 = vmatpush3.msra.mxu0 %v8734_v46  ;;  %v9142_v46 = vld [vmem:[%s9573_s14] ss:$0 sm:$0xff] }
0x3d79   :  { %6518 = vmatprep.subr.mxu0 %v8741_v23  ;;  %v5204_v23 = vadd.f32 %v9142_v46, %v9077_v5  ;;  %v9206_v5 = vld [vmem:[%s9571_s12 + $0x28] sm:$0xff] }
0x3d7a   :  { %6519 = vmatpush3.msra.mxu0 %v8747_v16 }
0x3d7b   :  { %6520 = vmatprep.subr.mxu0 %v8753_v20  ;;  %v6061_v20 = vsel %vm6060_vm6, %v8884_v18, %v9014_v32  ;;  %v9734_v18 = vld [vmem:[#allocation23_spill] sm:$0xff] }
0x3d7c   :  { %6521 = vmatpush3.msra.mxu0 %v8759_v41  ;;  %v9735_v32 = vld [vmem:[#allocation15_spill] sm:$0xff] }
0x3d7d   :  { %6522 = vmatprep.subr.mxu0 %v9728_v34 }
0x3d7e   :  { %6523 = vmatpush3.msra.mxu0 %v9729_v40 }
0x3d7f   :  { %6524 = vmatprep.subr.mxu0 %v9730_v1 }
0x3d80   :  { %6525 = vmatpush3.msra.mxu0 %v9731_v47 }
0x3d81   :  { %6540 = vmatprep.subr.mxu0 %v9732_v27 }
0x3e20   :  { %v6480_v11 = vpop.f32.mrf.mxu0 }
0x3e21   :  { %v5010_v39 = vpop.f32.mrf.mxu1 }
0x3e22   :  { %v6481_v48 = vpop.f32.mrf.mxu0 }
0x3e23   :  { %v6482_v57 = vadd.f32 %v6481_v48, %v6480_v11  ;;  %v6712_v26 = vpop.f32.mrf.mxu1 }
0x3e25   :  { %v5011_v50 = vadd.f32 %v6482_v57, %v5010_v39 }
0x3e27   :  { %v5014_v31 = vmax.f32 %v5011_v50, 0.0 }
0x3e29   :  { %v9133_v60 = vsub.f32 %v5014_v31, %v5015_v9 }
0x3e2b   :  { %v5018_v37 = vadd.f32 %v5017_v56, %v9133_v60 }
0x3e2d   :  { %v5019_v38 = vsel %vm3990_vm11, %v5018_v37, -inf }
0x3e2e   :  { %5020 = vmax.xlane.f32.xlu1 %v5019_v38 }
0x3eb7   :  { %v5021_v43 = vpop.xlane.xlu1 %5020 }
0x3eb8   :  { %vm5022_vm10 = vcmp.ge.f32.partialorder %v5018_v37, %v5021_v43  ;;  %v9245_v43 = vld [vmem:[%s9571_s12 + $0x70] sm:$0xff] }
0x3eb9   :  { %v5023_v44 = vsel %vm5022_vm10, %v8877_v24, 34.0  ;;  %vm6066_vm10 = vcmask 31744  }
0x3eba   :  { %v5024_v45 = vsel %vm3990_vm11, %v5023_v44, inf  ;;  %v9258_v44 = vld [vmem:[%s9571_s12 + $0x50] sm:$0xff] }
0x3ebb   :  { %5025 = vmin.xlane.f32.xlu0 %v5024_v45  ;;  %v9264_v45 = vld [vmem:[%s9571_s12 + $0x38] sm:$0xff] }
0x3ed1   :  { %5211 = vrot.lane.b32.xlu0 %v5204_v23, %s7070_s7 }
0x3f44   :  { %v5026_v16 = vpop.xlane.xlu0 %5025 }
0x3f45   :  { %v5028_v41 = vsel %vm5027_vm12, 0.0, %v5026_v16  ;;  %v9276_v16 = vld [vmem:[%s9571_s12 + $0x18] sm:$0xff] }
0x3f46   :  { %vm5029_vm14 = vcmp.eq.f32.partialorder %v8877_v24, %v5028_v41  ;;  %vm5051_vm15 = vcmp.eq.f32.partialorder %v5028_v41, 0.0  ;;  %v9153_v10 = vsel %vm6062_vm9, %v6061_v20, %v5028_v41  ;;  %v9282_v20 = vld [vmem:[%s9571_s12 + $0x10] sm:$0xff] }
0x3f47   :  { %v9156_v4 = vsel %vm5029_vm14, 1.0, %v9686_v36  ;;  %v9159_v15 = vsel %vm5051_vm15, 1.0, %v9686_v36  ;;  %vm6069_vm15 = vcmask 33792  }
0x3f48   :  { %6720 = vmatmul.mubr.msk.f32.vlgmr.msra.gmra.mxu1 %vm4025_vm13, %v9156_v4  ;;  %v5560_v12 = vsub.f32 1.0, %v9159_v15  ;;  %v5127_v35 = vrot.slane %v9156_v4, 1  ;;  %v5212_v39 = vpop.permute.xlu0 %5211  ;;  %vm5538_vm7 = vcmp.gt.f32.partialorder %v9159_v15, 0.5 }
0x3f49   :  { %6723 = vmatpush3.msk.msra.mxu1 %vm1064_vm4, %v9734_v18  ;;  %6728 = vmatprep.mubr.msk.f32.mxu1 %vm7069_vm3, %v9686_v36 }
0x3f4a   :  { %6724 = vmatprep.subr.mxu1 %v9686_v36  ;;  %v9171_v54 = vsel %vm6064_vm0, %v9735_v32, %v5560_v12 }
0x3f4b   :  { %6725 = vmatpush3.msra.mxu1 %v9736_v62 }
0x3f4c   :  { %6726 = vmatprep.subr.mxu1 %v9686_v36 }
0x3f4d   :  { %6727 = vmatpush3.msra.mxu1 %v9737_v61 }
0x3f4e   :  { %6729 = vmatmul.mubr.msk.f32.vlgmr.msra.gmra.mxu1 %vm4025_vm13, %v5127_v35  ;;  %5258 = vmatprep.subr.mxu1 %v9181_v0 }
0x3f4f   :  { %5259 = vmatpush1.msra.mxu1 %v9187_v51  ;;  %5298 = vmatprep.mubr.f32.mxu1 %v9686_v36 }
0x3f50   :  { %5260 = vmatprep.subr.mxu1 %v9194_v33 }
0x3f51   :  { %5261 = vmatpush1.msra.mxu1 %v9200_v63 }
0x3f52   :  { %5262 = vmatprep.subr.mxu1 %v9206_v5 }
0x3f53   :  { %5263 = vmatpush1.msra.mxu1 %v9212_v17 }
0x3f54   :  { %5264 = vmatprep.subr.mxu1 %v9218_v59 }
0x3f55   :  { %5265 = vmatpush1.msra.mxu1 %v9224_v8 }
0x3f56   :  { %5329 = vmatprep.subr.mxu1 %v9230_v21 }
0x4008   :  { %v5123_v28 = vpop.f32.mrf.mxu1 }
0x400a   :  { %v6721_v22 = vpop.f32.mrf.mxu1 }
0x400e   :  { %v5196_v42 = vpop.f32.mrf.mxu1 }
0x400f   :  { %v5201_v3 = vrot.slane %v5196_v42, 7 }
0x4010   :  { %v6730_v13 = vpop.f32.mrf.mxu1 }
0x4011   :  { %v5203_v34 = vsel %vm1064_vm4, %v5123_v28, %v5201_v3  ;;  %v6948_v13 = vld [vmem:[%s9574_s15 + $0x78] sm:$0xff] }
0x4012   :  { %v5205_v40 = vadd.f32 %v5204_v23, %v5203_v34  ;;  %v9270_v23 = vld [vmem:[%s9571_s12 + $0x30] sm:$0xff] }
0x4014   :  { %v5206_v1 = vmul.f32 0.5, %v5205_v40  ;;  %v6950_v40 = vld [vmem:[%s9574_s15 + $0x70] sm:$0xff] }
0x4016   :  { %6878 = vtanh.f32 %v5206_v1  ;;  %v6952_v1 = vld [vmem:[%s9574_s15 + $0x68] sm:$0xff] }
0x4023   :  { %v6879_v47 = vpop.eup %6878 }
0x4024   :  { %v5208_v27 = vmul.f32 0.5, %v6879_v47  ;;  %v6954_v47 = vld [vmem:[%s9574_s15 + $0x60] sm:$0xff] }
0x4026   :  { %v5209_v11 = vadd.f32 0.5, %v5208_v27  ;;  %v6956_v27 = vld [vmem:[%s9574_s15 + $0x58] sm:$0xff] }
0x4028   :  { %v5214_v48 = vmul.f32 %v5212_v39, %v5209_v11  ;;  %v5221_v50 = vsub.f32 1.0, %v5209_v11  ;;  %v5227_v9 = vmul.f32 %v5209_v11, %v9056_v55  ;;  %v9252_v55 = vld [vmem:[%s9571_s12 + $0x58] sm:$0xff]  ;;  %v6957_v11 = vld [vmem:[%s9574_s15 + $0xd0] sm:$0xff] }
0x4029   :  { %v6958_v39 = vld [vmem:[%s9574_s15 + $0x50] sm:$0xff] }
0x402a   :  { %5216 = vrot.lane.b32.xlu1 %v5214_v48, %s7070_s7  ;;  %v6959_v48 = vld [vmem:[%s9574_s15 + $0xc8] sm:$0xff] }
0x409c   :  { %v5217_v19 = vpop.permute.xlu1 %5216 }
0x409d   :  { %v5219_v57 = vadd.f32 %v5217_v19, %v5203_v34  ;;  %v6949_v34 = vld [vmem:[%s9574_s15 + $0xf0] sm:$0xff]  ;;  %v6960_v19 = vld [vmem:[%s9574_s15 + $0x48] sm:$0xff] }
0x409f   :  { %6880 = vtanh.f32 %v5219_v57  ;;  %v6961_v57 = vld [vmem:[%s9574_s15 + $0xc0] sm:$0xff] }
0x40ac   :  { %v6881_v26 = vpop.eup %6880 }
0x40ad   :  { %5223 = vrot.lane.b32.xlu1 %v6881_v26, %s7072_s9  ;;  %v6962_v26 = vld [vmem:[%s9574_s15 + $0x40] sm:$0xff] }
0x411f   :  { %v5224_v31 = vpop.permute.xlu1 %5223 }
0x4120   :  { %v5226_v56 = vmul.f32 %v5224_v31, %v5221_v50  ;;  %v6963_v50 = vld [vmem:[%s9574_s15 + $0xb8] sm:$0xff] }
0x4121   :  { %v6964_v31 = vld [vmem:[%s9574_s15 + $0x38] sm:$0xff] }
0x4122   :  { %v9237_v37 = vadd.f32 %v5227_v9, %v5226_v56  ;;  %v6965_v9 = vld [vmem:[%s9574_s15 + $0xb0] sm:$0xff] }
0x4123   :  { %v6966_v56 = vld [vmem:[%s9574_s15 + $0x30] sm:$0xff] }
0x4124   :  { %5230 = vrot.lane.b32.xlu0 %v9237_v37, %s7072_s9 }
0x4196   :  { %v5231_v38 = vpop.permute.xlu0 %5230 }
0x4197   :  { %6231 = vmatmul.mubr.msk.f32.vlgmr.msra.gmra.mxu1 %vm982_vm2, %v5231_v38 }
0x4198   :  { %5330 = vmatpush1.msra.mxu1 %v9245_v43  ;;  %5369 = vmatprep.mubr.f32.mxu1 %v9686_v36 }
0x4199   :  { %5331 = vmatprep.subr.mxu1 %v9252_v55 }
0x419a   :  { %5332 = vmatpush1.msra.mxu1 %v9258_v44 }
0x419b   :  { %5333 = vmatprep.subr.mxu1 %v9264_v45 }
0x419c   :  { %5334 = vmatpush1.msra.mxu1 %v9270_v23 }
0x419d   :  { %5335 = vmatprep.subr.mxu1 %v9276_v16 }
0x419e   :  { %5336 = vmatpush1.msra.mxu1 %v9282_v20 }
0x419f   :  { %6232 = vmatmul.mubr.msk.f32.vlgmr.msra.gmra.mxu1 %vm982_vm2, %v5231_v38  ;;  %6731 = vmatprep.subr.mxu1 %v9686_v36  ;;  %v6967_v38 = vld [vmem:[%s9574_s15 + $0xa8] sm:$0xff] }
0x41a0   :  { %6732 = vmatpush3.msra.mxu1 %v9726_v53  ;;  %6735 = vmatprep.mubr.msk.f32.mxu1 %vm7069_vm3, %v9686_v36 }
0x41a1   :  { %6733 = vmatprep.subr.mxu1 %v9686_v36 }
0x41a2   :  { %6734 = vmatpush3.msra.mxu1 %v9727_v30 }
0x41a3   :  { %6738 = vmatprep.subr.mxu1 %v9686_v36 }
0x4257   :  { %v9293_v41 = vpop.f32.mrf.mxu1 }
0x4259   :  { %v5302_v12 = vpop.f32.mrf.mxu1 }
0x425a   :  { %v5376_v32 = vadd.f32 %v5302_v12, %v8807_v14  ;;  %v6968_v12 = vld [vmem:[%s9574_s15 + $0x28] sm:$0xff] }
0x425f   :  { %v5371_v35 = vpop.f32.mrf.mxu1 }
0x4260   :  { %v5377_v28 = vadd.f32 %v5371_v35, %v8802_v7  ;;  %v6970_v35 = vld [vmem:[%s9574_s15 + $0x20] sm:$0xff] }
0x4261   :  { %v5373_v22 = vpop.f32.mrf.mxu1 }
0x4262   :  { %6882 = vtanh.f32 %v5377_v28  ;;  %v5378_v53 = vadd.f32 %v5373_v22, %v8496_v29  ;;  %v6971_v28 = vld [vmem:[%s9574_s15 + $0x98] sm:$0xff] }
0x4263   :  { %6884 = vtanh.f32 %v5376_v32  ;;  %v6969_v32 = vld [vmem:[%s9574_s15 + $0xa0] sm:$0xff]  ;;  %v6972_v22 = vld [vmem:[%s9574_s15 + $0x18] sm:$0xff] }
0x4264   :  { %6886 = vtanh.f32 %v5378_v53  ;;  %v6973_v53 = vld [vmem:[%s9574_s15 + $0x90] sm:$0xff] }
0x426f   :  { %v6883_v42 = vpop.eup %6882 }
0x4270   :  { %v6885_v3 = vpop.eup %6884  ;;  %5449 = vmatprep.mubr.f32.mxu0 %v6883_v42  ;;  %v6974_v42 = vld [vmem:[%s9574_s15 + $0x10] sm:$0xff] }
0x4271   :  { %v6887_v30 = vpop.eup %6886  ;;  %5450 = vmatmul.mubr.f32.vlgmr.msra.gmra.mxu0 %v6885_v3  ;;  %v6975_v3 = vld [vmem:[%s9574_s15 + $0x88] sm:$0xff] }
0x4272   :  { %6736 = vmatmul.mubr.msk.f32.vlgmr.msra.gmra.mxu1 %vm3439_vm5, %v6887_v30  ;;  %6541 = vmatpush3.msra.mxu0 %v6948_v13  ;;  %v6976_v30 = vld [vmem:[%s9574_s15 + $0x8] sm:$0xff]  ;;  %v6977_v13 = vld [vmem:[%s9574_s15 + $0x80] sm:$0xff] }
0x4273   :  { %6739 = vmatpush3.msk.msra.mxu1 %vm1064_vm4, %v8817_v49  ;;  %6744 = vmatprep.mubr.msk.f32.mxu1 %vm7069_vm3, %v9686_v36  ;;  %v6951_v49 = vld [vmem:[%s9574_s15 + $0xe8] sm:$0xff] }
0x4274   :  { %6740 = vmatprep.subr.mxu1 %v9686_v36  ;;  %6542 = vmatprep.subr.mxu0 %v6949_v34  ;;  %v6978_v34 = vld [vmem:[%s9574_s15] sm:$0xff] }
0x4275   :  { %6741 = vmatpush3.msra.mxu1 %v8823_v52  ;;  %6543 = vmatpush3.msra.mxu0 %v6950_v40  ;;  %v6953_v52 = vld [vmem:[%s9574_s15 + $0xe0] sm:$0xff] }
0x4276   :  { %6742 = vmatprep.subr.mxu1 %v9686_v36  ;;  %6544 = vmatprep.subr.mxu0 %v6951_v49 }
0x4277   :  { %6743 = vmatpush3.msra.mxu1 %v8833_v2  ;;  %6545 = vmatpush3.msra.mxu0 %v6952_v1  ;;  %v6955_v2 = vld [vmem:[%s9574_s15 + $0xd8] sm:$0xff] }
0x4278   :  { %6747 = vmatprep.subr.mxu1 %v9686_v36  ;;  %6546 = vmatprep.subr.mxu0 %v6953_v52  ;;  %v5050_v52 = vmax.f32 %v9127_v58, %v9156_v4 }
0x4279   :  { %6547 = vmatpush3.msra.mxu0 %v6954_v47 }
0x427a   :  { %6548 = vmatprep.subr.mxu0 %v6955_v2 }
0x427b   :  { %6549 = vmatpush3.msra.mxu0 %v6956_v27 }
0x427c   :  { %6550 = vmatprep.subr.mxu0 %v6957_v11 }
0x427d   :  { %6551 = vmatpush3.msra.mxu0 %v6958_v39  ;;  %v5526_v39 = vmul.f32 10000000.0, %v5050_v52 }
0x427e   :  { %6552 = vmatprep.subr.mxu0 %v6959_v48  ;;  %v5528_v48 = vld [vmem:[%s9575_s16 + $0x6] sm:$0x3] }
0x427f   :  { %6553 = vmatpush3.msra.mxu0 %v6960_v19 }
0x4280   :  { %6554 = vmatprep.subr.mxu0 %v6961_v57 }
0x4281   :  { %6555 = vmatpush3.msra.mxu0 %v6962_v26 }
0x4282   :  { %6556 = vmatprep.subr.mxu0 %v6963_v50 }
0x4283   :  { %6557 = vmatpush3.msra.mxu0 %v6964_v31 }
0x4284   :  { %6558 = vmatprep.subr.mxu0 %v6965_v9  ;;  %v5715_v9 = vadd.f32 %v9142_v46, %v9293_v41  ;;  %v9425_v41 = vsel %vm6038_vm8, 1.0, %v9686_v36 }
0x4285   :  { %6559 = vmatpush3.msra.mxu0 %v6966_v56 }
0x4286   :  { %6560 = vmatprep.subr.mxu0 %v6967_v38 }
0x4287   :  { %6561 = vmatpush3.msra.mxu0 %v6968_v12 }
0x4288   :  { %6562 = vmatprep.subr.mxu0 %v6969_v32 }
0x4289   :  { %6563 = vmatpush3.msra.mxu0 %v6970_v35 }
0x428a   :  { %6564 = vmatprep.subr.mxu0 %v6971_v28 }
0x428b   :  { %6565 = vmatpush3.msra.mxu0 %v6972_v22 }
0x428c   :  { %6566 = vmatprep.subr.mxu0 %v6973_v53 }
0x428d   :  { %6567 = vmatpush3.msra.mxu0 %v6974_v42 }
0x428e   :  { %6568 = vmatprep.subr.mxu0 %v6975_v3 }
0x428f   :  { %6569 = vmatpush3.msra.mxu0 %v6976_v30 }
0x4290   :  { %6570 = vmatprep.subr.mxu0 %v6977_v13 }
0x4291   :  { %6571 = vmatpush3.msra.mxu0 %v6978_v34  ;;  %v9738_v34 = vld [vmem:[#allocation40_spill] sm:$0xff] }
0x4331   :  { %v6526_v40 = vpop.f32.mrf.mxu0 }
0x4332   :  { %v5521_v49 = vpop.f32.mrf.mxu1 }
0x4333   :  { %v6527_v1 = vpop.f32.mrf.mxu0 }
0x4334   :  { %v6528_v47 = vadd.f32 %v6527_v1, %v6526_v40  ;;  %v6737_v2 = vpop.f32.mrf.mxu1  ;;  %v4004_v40 = vsel %vm3990_vm11, %v9738_v34, -inf }
0x4336   :  { %v5522_v27 = vadd.f32 %v6528_v47, %v5521_v49 }
0x4338   :  { %v5525_v11 = vmax.f32 %v5522_v27, 0.0 }
0x433a   :  { %v9406_v19 = vsub.f32 %v5525_v11, %v5526_v39  ;;  %v9739_v11 = vld [vmem:[#allocation12_spill] sm:$0xff] }
0x433b   :  { %v4521_v39 = vsel %vm3990_vm11, %v9739_v11, -inf }
0x433c   :  { %v5529_v57 = vadd.f32 %v5528_v48, %v9406_v19  ;;  %v5543_v49 = vsel %vm3990_vm11, %v9406_v19, -inf  ;;  %v5032_v48 = vsel %vm3990_vm11, %v9133_v60, -inf }
0x433e   :  { %v5530_v26 = vsel %vm3990_vm11, %v5529_v57, -inf }
0x433f   :  { %5531 = vmax.xlane.f32.xlu1 %v5530_v26 }
0x43c8   :  { %v5532_v50 = vpop.xlane.xlu1 %5531 }
0x43c9   :  { %vm5533_vm1 = vcmp.ge.f32.partialorder %v5529_v57, %v5532_v50 }
0x43ca   :  { %v5534_v58 = vsel %vm5533_vm1, %v8877_v24, 34.0 }
0x43cb   :  { %v5535_v31 = vsel %vm3990_vm11, %v5534_v58, inf }
0x43cc   :  { %5536 = vmin.xlane.f32.xlu0 %v5535_v31 }
0x43e2   :  { %5722 = vrot.lane.b32.xlu0 %v5715_v9, %s7070_s7 }
0x4455   :  { %v5537_v56 = vpop.xlane.xlu0 %5536 }
0x4456   :  { %v5539_v38 = vsel %vm5538_vm7, 0.0, %v5537_v56 }
0x4457   :  { %vm5540_vm12 = vcmp.eq.f32.partialorder %v8877_v24, %v5539_v38  ;;  %vm5562_vm14 = vcmp.eq.f32.partialorder %v5539_v38, 0.0  ;;  %v6065_v12 = vsel %vm6064_vm0, %v9153_v10, %v5539_v38 }
0x4458   :  { %v9421_v32 = vsel %vm5540_vm12, 1.0, %v9686_v36  ;;  %v6235_v46 = vsel %vm5562_vm14, 1.0, %v9686_v36  ;;  %v6067_v15 = vsel %vm6066_vm10, %v6065_v12, 0.0 }
0x4459   :  { %v9429_v35 = vmax.f32 %v5050_v52, %v9421_v32  ;;  %v6058_v28 = vsub.f32 1.0, %v6235_v46  ;;  %6745 = vmatmul.mubr.msk.f32.vlgmr.msra.gmra.mxu1 %vm4025_vm13, %v9421_v32  ;;  %v6763_v24 = vtrunc.f32 %v6067_v15  ;;  %v5638_v42 = vrot.slane %v9421_v32, 1 }
0x445a   :  { %6748 = vmatpush3.msk.msra.mxu1 %vm1064_vm4, %v9734_v18  ;;  %6753 = vmatprep.mubr.msk.f32.mxu1 %vm7069_vm3, %v9686_v36 }
0x445b   :  { %6749 = vmatprep.subr.mxu1 %v9686_v36  ;;  %v6079_v10 = vsel %vm6066_vm10, %v9171_v54, %v6058_v28  ;;  %v6059_v22 = vmax.f32 %v9429_v35, %v9425_v41  ;;  %v6764_v53 = vcvt.f32.s32 %v6763_v24 }
0x445c   :  { %6750 = vmatpush3.msra.mxu1 %v9736_v62  ;;  %6080 = vst.msk [vmem:[#allocation6] sm:$0x3] %vm6069_vm15, %v6079_v10 }
0x445d   :  { %6751 = vmatprep.subr.mxu1 %v9686_v36  ;;  %6081 = vst.msk [vmem:[#allocation7] sm:$0x3] %vm3990_vm11, %v6059_v22 }
0x445e   :  { %6752 = vmatpush3.msra.mxu1 %v9737_v61  ;;  %6070 = vst.msk [vmem:[#allocation2] sm:$0x3] %vm6069_vm15, %v6764_v53 }
0x445f   :  { %6754 = vmatmul.mubr.msk.f32.vlgmr.msra.gmra.mxu1 %vm4025_vm13, %v5638_v42  ;;  %5769 = vmatprep.subr.mxu1 %v9181_v0 }
0x4460   :  { %5770 = vmatpush1.msra.mxu1 %v9187_v51  ;;  %5809 = vmatprep.mubr.f32.mxu1 %v9686_v36 }
0x4461   :  { %5771 = vmatprep.subr.mxu1 %v9194_v33 }
0x4462   :  { %5772 = vmatpush1.msra.mxu1 %v9200_v63 }
0x4463   :  { %5773 = vmatprep.subr.mxu1 %v9206_v5 }
0x4464   :  { %5774 = vmatpush1.msra.mxu1 %v9212_v17  ;;  %v5723_v17 = vpop.permute.xlu0 %5722 }
0x4465   :  { %5775 = vmatprep.subr.mxu1 %v9218_v59 }
0x4466   :  { %5776 = vmatpush1.msra.mxu1 %v9224_v8 }
0x4467   :  { %5839 = vmatprep.subr.mxu1 %v9230_v21 }
0x4519   :  { %v5634_v18 = vpop.f32.mrf.mxu1 }
0x451b   :  { %v6746_v54 = vpop.f32.mrf.mxu1 }
0x451f   :  { %v5707_v62 = vpop.f32.mrf.mxu1 }
0x4520   :  { %v5712_v61 = vrot.slane %v5707_v62, 7 }
0x4521   :  { %v6755_v0 = vpop.f32.mrf.mxu1 }
0x4522   :  { %v5714_v51 = vsel %vm1064_vm4, %v5634_v18, %v5712_v61 }
0x4523   :  { %v5716_v33 = vadd.f32 %v5715_v9, %v5714_v51 }
0x4525   :  { %v5717_v3 = vmul.f32 0.5, %v5716_v33 }
0x4527   :  { %6888 = vtanh.f32 %v5717_v3  ;;  %v6036_v3 = vmul.f32 10000000.0, %v9429_v35  ;;  %v5044_v35 = vmul.f32 %v9156_v4, %v9133_v60 }
0x4534   :  { %v6889_v63 = vpop.eup %6888 }
0x4535   :  { %v5719_v5 = vmul.f32 0.5, %v6889_v63 }
0x4537   :  { %v5720_v30 = vadd.f32 0.5, %v5719_v5 }
0x4539   :  { %v5725_v13 = vmul.f32 %v5723_v17, %v5720_v30  ;;  %v5732_v1 = vsub.f32 1.0, %v5720_v30  ;;  %v5738_v47 = vmul.f32 %v5720_v30, %v9237_v37 }
0x453b   :  { %5727 = vrot.lane.b32.xlu1 %v5725_v13, %s7070_s7 }
0x45ad   :  { %v5728_v59 = vpop.permute.xlu1 %5727 }
0x45ae   :  { %v5730_v8 = vadd.f32 %v5728_v59, %v5714_v51 }
0x45b0   :  { %6890 = vtanh.f32 %v5730_v8  ;;  %v4016_v8 = vmul.f32 %v8893_v25, %v9738_v34 }
0x45bd   :  { %v6891_v21 = vpop.eup %6890 }
0x45be   :  { %5734 = vrot.lane.b32.xlu1 %v6891_v21, %s7072_s9  ;;  %v4017_v21 = vsel %vm3990_vm11, %v4016_v8, 0.0 }
0x45e2   :  { %4005 = vmax.xlane.f32.xlu1 %v4004_v40  ;;  %v5045_v40 = vsel %vm3990_vm11, %v5044_v35, 0.0 }
0x45e6   :  { %5544 = vmax.xlane.f32.xlu1 %v5543_v49 }
0x4630   :  { %v5735_v52 = vpop.permute.xlu1 %5734 }
0x4631   :  { %v5737_v2 = vmul.f32 %v5735_v52, %v5732_v1 }
0x4633   :  { %v5739_v27 = vadd.f32 %v5738_v47, %v5737_v2 }
0x4635   :  { %5741 = vrot.lane.b32.xlu0 %v5739_v27, %s7072_s9 }
0x4654   :  { %4522 = vmax.xlane.f32.xlu0 %v4521_v39 }
0x4658   :  { %5033 = vmax.xlane.f32.xlu0 %v5032_v48 }
0x466b   :  { %v9473_v57 = vpop.xlane.xlu1 %4005 }
0x466c   :  { %v4007_v26 = vsub.f32 %v9738_v34, %v9473_v57 }
0x466e   :  { %v4008_v50 = vmul.f32 1.442695, %v4007_v26 }
0x4670   :  { %6892 = vpow2.f32 %v4008_v50 }
0x467d   :  { %v6893_v37 = vpop.eup %6892 }
0x467e   :  { %v4010_v58 = vsel %vm3990_vm11, %v6893_v37, 0.0 }
0x467f   :  { %4011 = vadd.xlane.f32.xlu1 %v4010_v58 }
0x46a7   :  { %v5742_v31 = vpop.permute.xlu0 %5741 }
0x46a8   :  { %6240 = vmatmul.mubr.msk.f32.vlgmr.msra.gmra.mxu1 %vm982_vm2, %v5742_v31 }
0x46a9   :  { %5840 = vmatpush1.msra.mxu1 %v9245_v43  ;;  %5879 = vmatprep.mubr.f32.mxu1 %v9686_v36  ;;  %v6979_v43 = vld [vmem:[%s9574_s15 + $0x108] sm:$0xff] }
0x46aa   :  { %5841 = vmatprep.subr.mxu1 %v9252_v55  ;;  %v6980_v55 = vld [vmem:[%s9574_s15 + $0x100] sm:$0xff]  ;;  %s7077_s15 = smov [#allocation2]  }
0x46ab   :  { %5842 = vmatpush1.msra.mxu1 %v9258_v44  ;;  %s6088_s24 = sshll.u32 %s7077_s15, 4  ;;  %s6089_s24 = int_to_ptr.vmem [resolvable:$true] %s6088_s24 }
0x46ac   :  { %5843 = vmatprep.subr.mxu1 %v9264_v45  ;;  %s6981_s11 = scalar_lea.vmem %s6089_s24, 32  ;;  %p6986_p1 = scmp.lt.s32.totalorder %s6089_s24, %s6089_s24 }
0x46ad   :  { %5844 = vmatpush1.msra.mxu1 %v9270_v23  ;;  %p6982_p0 = scmp.ne.s32.totalorder %s6089_s24, %s6981_s11  ;;  %p6987_p2 = scmp.lt.s32.totalorder %s6981_s11, %s6981_s11 }
0x46ae   :  { %5845 = vmatprep.subr.mxu1 %v9276_v16 }
0x46af   :  { %5846 = vmatpush1.msra.mxu1 %v9282_v20  ;;  %p6988_p3 = por %p6987_p2, %p6986_p1 }
0x46b0   :  { %6241 = vmatmul.mubr.msk.f32.vlgmr.msra.gmra.mxu1 %vm982_vm2, %v5742_v31  ;;  %6756 = vmatprep.subr.mxu1 %v9686_v36 }
0x46b1   :  { %6757 = vmatpush3.msra.mxu1 %v6979_v43  ;;  %6760 = vmatprep.mubr.msk.f32.mxu1 %vm7069_vm3, %v9686_v36  ;;  %p6989_p4 = pnand %p6988_p3, %p6982_p0 }
0x46b2   :  { %6758 = vmatprep.subr.mxu1 %v9686_v36 }
0x46b3   :  { %6759 = vmatpush3.msra.mxu1 %v6980_v55 }
0x46dd   :  { %v9498_v44 = vpop.xlane.xlu0 %4522 }
0x46de   :  { %v4524_v53 = vsub.f32 %v9739_v11, %v9498_v44 }
0x46e0   :  { %v4525_v42 = vmul.f32 1.442695, %v4524_v53 }
0x46e1   :  { %v9500_v45 = vpop.xlane.xlu0 %5033 }
0x46e2   :  { %v5035_v23 = vsub.f32 %v9133_v60, %v9500_v45  ;;  %v4533_v60 = vmul.f32 %v9020_v6, %v9739_v11 }
0x46e4   :  { %v5036_v16 = vmul.f32 1.442695, %v5035_v23  ;;  %v4534_v4 = vsel %vm3990_vm11, %v4533_v60, 0.0 }
0x46e6   :  { %6894 = vpow2.f32 %v5036_v16 }
0x46f3   :  { %v6895_v20 = vpop.eup %6894 }
0x46f4   :  { %v5038_v9 = vsel %vm3990_vm11, %v6895_v20, 0.0 }
0x46f5   :  { %5039 = vadd.xlane.f32.xlu1 %v5038_v9 }
0x4768   :  { %v5811_v56 = vpop.f32.mrf.mxu1 }
0x476a   :  { %v5812_v36 = vpop.f32.mrf.mxu1 }
0x476b   :  { %v5886_v38 = vadd.f32 %v5812_v36, %v8807_v14  ;;  %v9511_v14 = vpop.xlane.xlu1 %5544 }
0x4770   :  { %v5881_v12 = vpop.f32.mrf.mxu1 }
0x4771   :  { %v5887_v46 = vadd.f32 %v5881_v12, %v8802_v7  ;;  %v5546_v7 = vsub.f32 %v9406_v19, %v9511_v14 }
0x4772   :  { %v5883_v15 = vpop.f32.mrf.mxu1 }
0x4773   :  { %6896 = vtanh.f32 %v5887_v46  ;;  %v5888_v28 = vadd.f32 %v5883_v15, %v8496_v29  ;;  %v5547_v18 = vmul.f32 1.442695, %v5546_v7 }
0x4774   :  { %6898 = vtanh.f32 %v5886_v38 }
0x4775   :  { %6900 = vtanh.f32 %v5888_v28 }
0x4776   :  { %6902 = vpow2.f32 %v4525_v42 }
0x4777   :  { %6904 = vpow2.f32 %v5547_v18 }
0x4780   :  { %v6897_v24 = vpop.eup %6896 }
0x4781   :  { %v6899_v10 = vpop.eup %6898  ;;  %5959 = vmatprep.mubr.f32.mxu0 %v6897_v24 }
0x4782   :  { %v6901_v22 = vpop.eup %6900  ;;  %5960 = vmatmul.mubr.f32.vlgmr.msra.gmra.mxu0 %v6899_v10 }
0x4783   :  { %6761 = vmatmul.mubr.msk.f32.vlgmr.msra.gmra.mxu1 %vm3439_vm5, %v6901_v22  ;;  %v6903_v30 = vpop.eup %6902 }
0x4784   :  { %v4527_v17 = vsel %vm3990_vm11, %v6903_v30, 0.0  ;;  %v6905_v13 = vpop.eup %6904 }
0x4785   :  { %v5549_v59 = vsel %vm3990_vm11, %v6905_v13, 0.0 }
0x4842   :  { %v6572_v29 = vpop.f32.mrf.mxu0 }
0x4843   :  { %v6031_v54 = vpop.f32.mrf.mxu1 }
0x4844   :  { %v6573_v62 = vpop.f32.mrf.mxu0 }
0x4845   :  { %v6574_v61 = vadd.f32 %v6573_v62, %v6572_v29  ;;  %v6762_v0 = vpop.f32.mrf.mxu1 }
0x4847   :  { %v6032_v51 = vadd.f32 %v6574_v61, %v6031_v54 }
0x4849   :  { %v6035_v33 = vmax.f32 %v6032_v51, 0.0 }
0x484b   :  { %v6037_v63 = vsub.f32 %v6035_v33, %v6036_v3 }
0x484d   :  { %v6041_v5 = vsel %vm3990_vm11, %v6037_v63, -inf  ;;  %v6053_v49 = vmul.f32 %v9425_v41, %v6037_v63  ;;  %v5555_v41 = vmul.f32 %v9421_v32, %v9406_v19 }
0x484e   :  { %6042 = vmax.xlane.f32.xlu0 %v6041_v5 }
0x484f   :  { %v6054_v1 = vsel %vm3990_vm11, %v6053_v49, 0.0  ;;  %v5556_v27 = vsel %vm3990_vm11, %v5555_v41, 0.0 }
0x4852   :  { %4528 = vadd.xlane.f32.xlu0 %v4527_v17 }
0x4856   :  { %5550 = vadd.xlane.f32.xlu0 %v5549_v59 }
0x485a   :  { %4018 = vadd.xlane.f32.xlu0 %v4017_v21 }
0x485e   :  { %5046 = vadd.xlane.f32.xlu0 %v5045_v40 }
0x4862   :  { %6055 = vadd.xlane.f32.xlu0 %v6054_v1 }
0x48d7   :  { %v9527_v52 = vpop.xlane.xlu0 %6042 }
0x48d8   :  { %v6044_v47 = vsub.f32 %v6037_v63, %v9527_v52 }
0x48da   :  { %v6045_v25 = vmul.f32 1.442695, %v6044_v47 }
0x48dc   :  { %6906 = vpow2.f32 %v6045_v25 }
0x48e9   :  { %v6907_v34 = vpop.eup %6906 }
0x48ea   :  { %v6047_v2 = vsel %vm3990_vm11, %v6907_v34, 0.0 }
0x48eb   :  { %6048 = vadd.xlane.f32.xlu1 %v6047_v2 }
0x48ef   :  { %4535 = vadd.xlane.f32.xlu1 %v4534_v4 }
0x48f3   :  { %5557 = vadd.xlane.f32.xlu1 %v5556_v27 }
0x48f4   :  { %6992 = shalt.err (!%p6989_p4)
}
0x48f5   :  { %6091 = dma.vmem_to_hbm [thread:$0]  %s6089_s24, 32, %s9576_s17, [#allocation3]  }
0x48f6   :  { %s7078_s12 = smov [#allocation7]  }
0x48f7   :  { %s6118_s3 = sshll.u32 %s7078_s12, 4  ;;  %s6119_s3 = int_to_ptr.vmem [resolvable:$true] %s6118_s3 }
0x48f8   :  { %s7001_s26 = scalar_lea.vmem %s6119_s3, 32  ;;  %p7006_p6 = scmp.lt.s32.totalorder %s6119_s3, %s6119_s3 }
0x48f9   :  { %p7002_p5 = scmp.ne.s32.totalorder %s6119_s3, %s7001_s26  ;;  %p7007_p7 = scmp.lt.s32.totalorder %s7001_s26, %s7001_s26 }
0x48fb   :  { %p7008_p8 = por %p7007_p7, %p7006_p6 }
0x48fd   :  { %p7009_p9 = pnand %p7008_p8, %p7002_p5 }
0x48ff   :  { %7012 = shalt.err (!%p7009_p9)
}
0x4900   :  { %6121 = dma.vmem_to_hbm [thread:$0]  %s6119_s3, 32, %s9579_s20, [#allocation8]   ;;  %v4529_v6 = vpop.xlane.xlu0 %4528  ;;  %v4012_v19 = vpop.xlane.xlu1 %4011 }
0x4901   :  { %6908 = vlog2.f32 %v4529_v6  ;;  %s7079_s17 = smov [#allocation4]   ;;  %s7080_s27 = smov [#allocation6]  }
0x4902   :  { %6910 = vlog2.f32 %v4012_v19  ;;  %s6098_s20 = sshll.u32 %s7079_s17, 4  ;;  %s6108_s8 = sshll.u32 %s7080_s27, 4  ;;  %s6099_s20 = int_to_ptr.vmem [resolvable:$true] %s6098_s20  ;;  %s6109_s8 = int_to_ptr.vmem [resolvable:$true] %s6108_s8 }
0x4903   :  { %s7021_s28 = scalar_lea.vmem %s6099_s20, 32  ;;  %p7026_p11 = scmp.lt.s32.totalorder %s6099_s20, %s6099_s20 }
0x4904   :  { %v5551_v32 = vpop.xlane.xlu0 %5550  ;;  %v5040_v11 = vpop.xlane.xlu1 %5039  ;;  %p7022_p10 = scmp.ne.s32.totalorder %s6099_s20, %s7021_s28  ;;  %p7027_p12 = scmp.lt.s32.totalorder %s7021_s28, %s7021_s28 }
0x4905   :  { %6912 = vlog2.f32 %v5551_v32 }
0x4906   :  { %6914 = vlog2.f32 %v5040_v11  ;;  %p7028_p13 = por %p7027_p12, %p7026_p11 }
0x4908   :  { %v4019_v37 = vpop.xlane.xlu0 %4018  ;;  %p7029_p0 = pnand %p7028_p13, %p7022_p10 }
0x490c   :  { %v5047_v56 = vpop.xlane.xlu0 %5046 }
0x490e   :  { %v6909_v48 = vpop.eup %6908 }
0x490f   :  { %v6911_v26 = vpop.eup %6910  ;;  %v4531_v50 = vmul.f32 0.6931472, %v6909_v48 }
0x4910   :  { %v4014_v55 = vmul.f32 0.6931472, %v6911_v26 }
0x4911   :  { %v4532_v16 = vadd.f32 %v4531_v50, %v9498_v44  ;;  %v6056_v44 = vpop.xlane.xlu0 %6055 }
0x4912   :  { %v6913_v58 = vpop.eup %6912  ;;  %v4015_v9 = vadd.f32 %v4014_v55, %v9473_v57 }
0x4913   :  { %v6915_v43 = vpop.eup %6914  ;;  %v5553_v23 = vmul.f32 0.6931472, %v6913_v58 }
0x4914   :  { %v5042_v20 = vmul.f32 0.6931472, %v6915_v43  ;;  %v4020_v46 = vsub.f32 %v4019_v37, %v4015_v9 }
0x4915   :  { %v5554_v15 = vadd.f32 %v5553_v23, %v9511_v14 }
0x4916   :  { %v5043_v28 = vadd.f32 %v5042_v20, %v9500_v45 }
0x4918   :  { %v5048_v53 = vsub.f32 %v5047_v56, %v5043_v28 }
0x4974   :  { %v6049_v39 = vpop.xlane.xlu1 %6048 }
0x4975   :  { %6916 = vlog2.f32 %v6049_v39 }
0x4978   :  { %v4536_v31 = vpop.xlane.xlu1 %4535 }
0x4979   :  { %v4537_v36 = vsub.f32 %v4536_v31, %v4532_v16 }
0x497b   :  { %v6071_v10 = vsel %vm6060_vm6, %v4020_v46, %v4537_v36 }
0x497c   :  { %v5558_v38 = vpop.xlane.xlu1 %5557  ;;  %v6072_v42 = vsel %vm6062_vm9, %v6071_v10, %v5048_v53 }
0x497d   :  { %v5559_v22 = vsub.f32 %v5558_v38, %v5554_v15 }
0x497f   :  { %v6073_v18 = vsel %vm6064_vm0, %v6072_v42, %v5559_v22 }
0x4982   :  { %v6917_v12 = vpop.eup %6916 }
0x4983   :  { %v6051_v24 = vmul.f32 0.6931472, %v6917_v12 }
0x4985   :  { %v6052_v7 = vadd.f32 %v6051_v24, %v9527_v52 }
0x4987   :  { %v6057_v57 = vsub.f32 %v6056_v44, %v6052_v7 }
0x4989   :  { %v6074_v45 = vsel %vm6066_vm10, %v6073_v18, %v6057_v57 }
0x498a   :  { %6075 = vst.msk [vmem:[#allocation4] sm:$0x3] %vm6069_vm15, %v6074_v45 }
0x498b   :  { %7032 = shalt.err (!%p7029_p0)
}
0x498c   :  { %6101 = dma.vmem_to_hbm [thread:$0]  %s6099_s20, 32, %s9577_s18, [#allocation5]  }
0x498d   :  { %s7041_s29 = scalar_lea.vmem %s6109_s8, 32  ;;  %p7046_p2 = scmp.lt.s32.totalorder %s6109_s8, %s6109_s8 }
0x498e   :  { %p7042_p1 = scmp.ne.s32.totalorder %s6109_s8, %s7041_s29  ;;  %p7047_p3 = scmp.lt.s32.totalorder %s7041_s29, %s7041_s29 }
0x4990   :  { %p7048_p4 = por %p7047_p3, %p7046_p2 }
0x4992   :  { %p7049_p5 = pnand %p7048_p4, %p7042_p1 }
0x4994   :  { %7052 = shalt.err (!%p7049_p5)
}
0x4995   :  { %6111 = dma.vmem_to_hbm [thread:$0]  %s6109_s8, 32, %s9578_s19, [#allocation5]  }
0x4996   :  { %7061 = dma.done.wait [#allocation3], 32  }
0x4997   :  { %7062 = vsyncadd [#allocation3], 4294967264 }
0x4998   :  { %7063 = dma.done.wait [#allocation5], 64  }
0x4999   :  { %7064 = vsyncadd [#allocation5], 4294967232 }
0x499a   :  { %7065 = dma.done.wait [#allocation8], 32  }
0x499b   :  { %7066 = vsyncadd [#allocation8], 4294967264 }
0x499c   :  { %6134 = vsyncpa [#allocation3], 1 }
0x499d   :  { %6135 = vsyncpa [#allocation5], 1 }
0x499e   :  { %6136 = vsyncpa [#allocation8], 1 }

</bundles_post_ra>
